<compile_context>
chip_gen: v5e
topology: v5e:2x2
jax: 0.10.0
libtpu: 0.0.40
codegen_flags: <defaults>
</compile_context>

<pallas_src>
import jax
import jax.numpy as jnp
from jax.experimental import pallas as pl
from jax.experimental.pallas import tpu as pltpu


# ============================================================================
# In-kernel helpers (all matmuls strictly 2-D; gate weights packed on lanes)
# ============================================================================
def _gru_in_proj(seq, w_ih_ref, b_i_ref):
    """Hoisted GRU input projection: (T, Bb, d) -> (T, Bb, 3H).

    One (T*Bb, d) x (d, 3H) matmul per layer/direction; gate order [r|z|n] on the
    lane axis; b_ih (plus folded b_hh for r/z) already included in b_i_ref.
    """
    T, Bb, d = seq.shape
    G = w_ih_ref.shape[-1]
    g = jnp.dot(seq.reshape(T * Bb, d), w_ih_ref[...],
                preferred_element_type=jnp.float32) + b_i_ref[...]
    return g.reshape(T, Bb, G)


def _gru_cell(h, gi_t, w_hh, b_hn_b, H):
    """One GRU step (PyTorch semantics), fused-gate layout.

    h: (Bb, H); gi_t: (Bb, 3H) hoisted input projection at this time step;
    w_hh: (H, 3H) value (hoisted out of the time loop); b_hn_b: (Bb, H) broadcast value.
    """
    gh = jnp.dot(h, w_hh, preferred_element_type=jnp.float32)   # one MXU op per step
    rz = jax.nn.sigmoid(gi_t[:, :2 * H] + gh[:, :2 * H])        # one 2H-wide EUP call
    r = rz[:, :H]
    z = rz[:, H:]
    n = jnp.tanh(gi_t[:, 2 * H:] + r * (gh[:, 2 * H:] + b_hn_b))
    return (1.0 - z) * n + z * h


def _bigru_layer(seq, p_fwd, p_bwd, need_seq):
    """Fused forward+backward GRU over the same (T, Bb, d) input sequence.

    The two independent chains share one fully-unrolled loop so they hide each
    other's MXU/EUP latency; the backward direction reads its hoisted projection at
    static index T-1-s (in-kernel time reversal, no activation copies).
    Returns (seq_f, seq_b, h_f_last, h_b_last); seq_* are (T, Bb, H), time order.
    """
    wf_ih, wf_hh, bf_i, bf_hn = p_fwd
    wb_ih, wb_hh, bb_i, bb_hn = p_bwd
    T, Bb, _ = seq.shape
    H = wf_hh.shape[0]

    gi_f = _gru_in_proj(seq, wf_ih, bf_i)           # (T, Bb, 3H)
    gi_b = _gru_in_proj(seq, wb_ih, bb_i)

    # Hoist loop-invariant weight loads / bias broadcasts out of the unrolled loop.
    whf = wf_hh[...]
    whb = wb_hh[...]
    bhnf = jnp.broadcast_to(bf_hn[...], (Bb, H))
    bhnb = jnp.broadcast_to(bb_hn[...], (Bb, H))

    h_f = jnp.zeros((Bb, H), jnp.float32)
    h_b = jnp.zeros((Bb, H), jnp.float32)
    outs_f, outs_b = [], []
    # TODO(synk): for long T or large batch blocks switch this trace-time unroll to
    # lax.fori_loop with a (T, Bb, H) VMEM scratch to bound per-step output live ranges.
    for s in range(T):
        tb = T - 1 - s
        h_f = _gru_cell(h_f, gi_f[s], whf, bhnf, H)
        h_b = _gru_cell(h_b, gi_b[tb], whb, bhnb, H)
        if need_seq:
            outs_f.append(h_f)
            outs_b.append(h_b)
    if not need_seq:
        return None, None, h_f, h_b
    seq_f = jnp.stack(outs_f, axis=0)               # (T, Bb, H), time order
    seq_b = jnp.stack(outs_b[::-1], axis=0)         # back in time order
    return seq_f, seq_b, h_f, h_b


def _decoder_2layer(input_seq, p0, p1):
    """Two stacked unidirectional GRU layers as a skewed pipeline.

    Layer-1 step t runs alongside layer-0 step t+1, so the two serial recurrence
    chains hide each other's latency.  Layer-1's per-step input projection is computed
    on the fly from layer-0's freshly produced hidden state (one extra small matmul,
    off the layer-0 critical path).  Returns layer-1 outputs as a list of T (Bb, H).
    """
    w0_ih, w0_hh, b0_i, b0_hn = p0
    w1_ih, w1_hh, b1_i, b1_hn = p1
    T, Bb, _ = input_seq.shape
    H = w0_hh.shape[0]

    gi0 = _gru_in_proj(input_seq, w0_ih, b0_i)      # (T, Bb, 3H), hoisted

    wh0 = w0_hh[...]
    wh1 = w1_hh[...]
    wi1 = w1_ih[...]                                # (H, 3H)
    bhn0 = jnp.broadcast_to(b0_hn[...], (Bb, H))
    bhn1 = jnp.broadcast_to(b1_hn[...], (Bb, H))
    bi1 = jnp.broadcast_to(b1_i[...], (Bb, wi1.shape[-1]))

    h0 = jnp.zeros((Bb, H), jnp.float32)
    h1 = jnp.zeros((Bb, H), jnp.float32)
    outs1 = []
    for s in range(T + 1):
        h0_prev = h0                                 # layer-0 output at time s-1
        if s < T:
            h0 = _gru_cell(h0_prev, gi0[s], wh0, bhn0, H)
        if s > 0:
            gi1_t = jnp.dot(h0_prev, wi1, preferred_element_type=jnp.float32) + bi1
            h1 = _gru_cell(h1, gi1_t, wh1, bhn1, H)
            outs1.append(h1)
    return outs1                                     # T entries, time order


def _take_gru(it):
    return (next(it), next(it), next(it), next(it))   # (w_ih, w_hh, b_i, b_hn)


# ============================================================================
# Fused kernel: whole GRUDeepSC forward for one batch block (time-major)
# ============================================================================
def _deepsc_kernel(x_ref, *refs):
    o_ref = refs[-1]
    it = iter(refs[:-1])
    enc = [[_take_gru(it) for _ in range(2)] for _ in range(2)]   # [layer][fwd, bwd]
    c0_w, c0_b, c1_w, c1_b = next(it), next(it), next(it), next(it)
    e0_w, e0_b, e1_w, e1_b = next(it), next(it), next(it), next(it)
    tw_ref = next(it)
    dec = [_take_gru(it) for _ in range(2)]
    ow_ref, ob_ref = next(it), next(it)

    T, Bb, D = x_ref.shape
    H = enc[0][0][1].shape[0]                        # w_hh is (H, 3H)

    x = x_ref[...].astype(jnp.float32)               # (T, Bb, D), time-major

    # ---------------- Encoder: 2-layer bidirectional GRU ----------------
    s0f, s0b, _, _ = _bigru_layer(x, enc[0][0], enc[0][1], need_seq=True)
    x1 = jnp.concatenate([s0f, s0b], axis=-1)        # (T, Bb, 2H) cheap lane concat
    # Only the final hidden states (PyTorch hidden[-2], hidden[-1]) are used downstream.
    _, _, h1f, h1b = _bigru_layer(x1, enc[1][0], enc[1][1], need_seq=False)

    # ---------------- compress MLP (dropouts identity in eval) ------------
    combined = jnp.concatenate([h1f, h1b], axis=-1)  # (Bb, 2H), single matmul below
    c = jnp.maximum(
        jnp.dot(combined, c0_w[...], preferred_element_type=jnp.float32) + c0_b[...],
        0.0)
    compressed = jnp.dot(c, c1_w[...], preferred_element_type=jnp.float32) + c1_b[...]

    # ---------------- expand MLP + time-weight broadcast ------------------
    e = jnp.maximum(
        jnp.dot(compressed, e0_w[...], preferred_element_type=jnp.float32) + e0_b[...],
        0.0)
    expanded = jnp.dot(e, e1_w[...], preferred_element_type=jnp.float32) + e1_b[...]
    input_seq = expanded[None, :, :] + tw_ref[...][:, None, :]      # (T, Bb, 2H)

    # ---------------- Decoder: 2 stacked GRU layers (skewed pipeline) -----
    d1 = _decoder_2layer(input_seq, dec[0], dec[1])  # list of T (Bb, H)

    # ---------------- output projection, lane-dense (Bb, T*D) store -------
    ow = ow_ref[...]
    ys = [jnp.dot(h, ow, preferred_element_type=jnp.float32) for h in d1]
    y = jnp.concatenate(ys, axis=-1) + jnp.tile(ob_ref[...], (1, T))  # (Bb, T*D)
    o_ref[...] = y.astype(o_ref.dtype)


# ============================================================================
# Wrapper
# ============================================================================
def _broadcast_spec(shape):
    nd = len(shape)
    return pl.BlockSpec(shape, lambda i: (0,) * nd)


def _flatten_params(p):
    flat = []
    for layer in range(2):
        for d in ("fwd", "bwd"):
            flat.extend(p["enc_gru"][layer][d])
    for w, b in p["compress"]:
        flat.extend([w, b])
    for w, b in p["expand"]:
        flat.extend([w, b])
    flat.append(p["time_weights"])
    for layer in range(2):
        flat.extend(p["dec_gru"][layer])
    flat.extend([p["out_w"], p["out_b"]])
    return flat


def _num_tensorcores():
    """Best-effort TensorCore count of device 0 (v7x: 2 TCs/chip; v5e/v6e: 1)."""
    try:
        d = jax.devices()[0]
        if d.platform != "tpu":
            return 1
        kind = str(getattr(d, "device_kind", "")).lower()
        if "v7" in kind:
            return 2
    except Exception:
        pass
    return 1


def _per_elem_bytes(T, D, H):
    # Rough f32 VMEM footprint per batch element of the fused forward
    # (hoisted gate projections + layer activations + in/out tiles).
    return 4 * T * (2 * D + 20 * H)


def _pick_batch_block(B, T, D, H):
    ncores = _num_tensorcores()
    bb = B
    # 1-TC chips (v5e/v6e): never split -- grid=(2,) would serialize the whole
    # latency-bound recurrence twice plus per-step grid overhead.  On v7x split
    # across the 2 TCs only when each half keeps an 8-aligned sublane count
    # (so the BlockSpec (8,128) rule holds for the batch dim).
    if ncores >= 2 and B % 2 == 0 and (B // 2) % 8 == 0:
        bb = B // 2
    # VMEM cap: keep the whole per-block forward resident with headroom
    # (target <= ~24 MiB/block; v7x has only 64 MiB physical VMEM per TC).
    max_bb = max(8, (24 << 20) // max(_per_elem_bytes(T, D, H), 1))
    while bb > max_bb and bb % 2 == 0 and (bb // 2) % 8 == 0:
        bb //= 2
    return bb


def _vmem_limit_bytes(flat, batch_block, T, D, H):
    weight_bytes = sum(int(w.size) * w.dtype.itemsize for w in flat)
    est = 2 * weight_bytes + batch_block * _per_elem_bytes(T, D, H) + (4 << 20)
    if est <= (16 << 20):
        return None                          # compiler default is plenty
    return int(min(est, 48 << 20))           # stay inside v7x's 64 MiB physical VMEM


def gru_deepsc_forward(params, x, *, batch_block=None):
    """x: (B, T, input_dim) -> (B, T, input_dim).  Single fused Pallas kernel."""
    B, T, D = x.shape
    H = params["dec_gru"][1][1].shape[0]             # w_hh is (H, 3H)
    if batch_block is None:
        batch_block = _pick_batch_block(B, T, D, H)
    assert B % batch_block == 0, (B, batch_block)
    grid = (B // batch_block,)

    # Time-major layout: per-step reads inside the kernel become free leading-axis
    # views (single transpose here, outside the kernel).
    x_tm = jnp.transpose(x, (1, 0, 2))               # (T, B, D)

    flat = _flatten_params(params)
    in_specs = ([pl.BlockSpec((T, batch_block, D), lambda i: (0, i, 0))]
                + [_broadcast_spec(tuple(w.shape)) for w in flat])
    # Lane-dense output slab: (B, T*D); reshaped back to (B, T, D) below.
    out_spec = pl.BlockSpec((batch_block, T * D), lambda i: (i, 0))

    ncores = _num_tensorcores()
    if grid[0] == 1:
        dims = ("arbitrary",)
    elif grid[0] == ncores:
        dims = (getattr(pltpu, "CORE_PARALLEL", "parallel"),)
    else:
        dims = ("parallel",)

    out = pl.pallas_call(
        _deepsc_kernel,
        grid=grid,
        in_specs=in_specs,
        out_specs=out_spec,
        out_shape=jax.ShapeDtypeStruct((B, T * D), x.dtype),
        compiler_params=pltpu.CompilerParams(
            dimension_semantics=dims,
            vmem_limit_bytes=_vmem_limit_bytes(flat, batch_block, T, D, H)),
    )(x_tm, *flat)
    return out.reshape(B, T, D)


# ============================================================================
# Parameters: synthetic PyTorch-layout init + conversion to the kernel layout
# ============================================================================
def _pack_gru_params(w_ih, w_hh, b_ih, b_hh):
    """PyTorch GRU layout -> fused-gate kernel layout.

    PyTorch: w_ih (3H, D_in), w_hh (3H, H), b_ih (3H,), b_hh (3H,), gates [r|z|n].
    Kernel:  w_ih (D_in, 3H), w_hh (H, 3H) (transposed; gates packed on lanes),
             b_i (1, 3H) with b_hh folded in for r/z (NOT n, it lives inside r*(.)),
             b_hn (1, H) = b_hh of gate n.
    """
    H = w_hh.shape[1]
    w_ih_p = jnp.transpose(w_ih)                             # (D_in, 3H)
    w_hh_p = jnp.transpose(w_hh)                             # (H, 3H)
    b_i = (b_ih + jnp.concatenate(
        [b_hh[:2 * H], jnp.zeros((H,), b_hh.dtype)])).reshape(1, 3 * H)
    b_hn = b_hh[2 * H:].reshape(1, H)
    return (w_ih_p, w_hh_p, b_i, b_hn)


def init_raw_params(key, input_dim, seq_len, hidden_dim):
    """Deterministic synthetic parameters in PyTorch layout (shapes match nn.GRU/Linear)."""
    H = hidden_dim
    keys = iter(jax.random.split(key, 64))
    s = 1.0 / float(H) ** 0.5

    def u(shape):
        return jax.random.uniform(next(keys), shape, jnp.float32, -s, s)

    def gru(d_in):
        return (u((3 * H, d_in)), u((3 * H, H)), u((3 * H,)), u((3 * H,)))

    enc_gru = []
    for layer in range(2):
        d_in = input_dim if layer == 0 else 2 * H
        enc_gru.append({"fwd": gru(d_in), "bwd": gru(d_in)})
    compress = [(u((2 * H, H)), u((H,))), (u((H, H)), u((H,)))]
    expand = [(u((H, H)), u((H,))), (u((H, 2 * H)), u((2 * H,)))]
    dec_gru = [gru(2 * H), gru(H)]
    out_w, out_b = u((H, input_dim)), u((input_dim,))
    time_weights = jax.random.normal(next(keys), (seq_len, 2 * H), jnp.float32)
    return dict(enc_gru=enc_gru, compress=compress, expand=expand, dec_gru=dec_gru,
                out_w=out_w, out_b=out_b, time_weights=time_weights)


def pack_params(raw):
    enc = [{d: _pack_gru_params(*raw["enc_gru"][layer][d]) for d in ("fwd", "bwd")}
           for layer in range(2)]
    dec = [_pack_gru_params(*raw["dec_gru"][layer]) for layer in range(2)]
    compress = [(w, b.reshape(1, -1)) for (w, b) in raw["compress"]]
    expand = [(w, b.reshape(1, -1)) for (w, b) in raw["expand"]]
    return dict(enc_gru=enc, compress=compress, expand=expand, dec_gru=dec,
                out_w=raw["out_w"], out_b=raw["out_b"].reshape(1, -1),
                time_weights=raw["time_weights"])


# ============================================================================
# Pure-JAX reference (mirrors the PyTorch module, eval mode) for correctness
# ============================================================================
def _ref_gru_dir(x, w_ih, w_hh, b_ih, b_hh, reverse=False):
    H = w_hh.shape[1]
    prec = jax.lax.Precision.HIGHEST

    def cell(h, x_t):
        gi = jnp.dot(x_t, w_ih.T, precision=prec) + b_ih
        gh = jnp.dot(h, w_hh.T, precision=prec) + b_hh
        r = jax.nn.sigmoid(gi[:, :H] + gh[:, :H])
        z = jax.nn.sigmoid(gi[:, H:2 * H] + gh[:, H:2 * H])
        n = jnp.tanh(gi[:, 2 * H:] + r * gh[:, 2 * H:])
        h_new = (1.0 - z) * n + z * h
        return h_new, h_new

    xs = jnp.swapaxes(x, 0, 1)
    if reverse:
        xs = xs[::-1]
    h0 = jnp.zeros((x.shape[0], H), jnp.float32)
    h_last, outs = jax.lax.scan(cell, h0, xs)
    if reverse:
        outs = outs[::-1]
    return jnp.swapaxes(outs, 0, 1), h_last


def ref_forward(raw, x):
    prec = jax.lax.Precision.HIGHEST
    dot = lambda a, b: jnp.dot(a, b, precision=prec)
    out = x
    h_f = h_b = None
    for layer in range(2):
        of, h_f = _ref_gru_dir(out, *raw["enc_gru"][layer]["fwd"])
        ob, h_b = _ref_gru_dir(out, *raw["enc_gru"][layer]["bwd"], reverse=True)
        out = jnp.concatenate([of, ob], axis=-1)
    combined = jnp.concatenate([h_f, h_b], axis=-1)
    c = jax.nn.relu(dot(combined, raw["compress"][0][0]) + raw["compress"][0][1])
    compressed = dot(c, raw["compress"][1][0]) + raw["compress"][1][1]
    e = jax.nn.relu(dot(compressed, raw["expand"][0][0]) + raw["expand"][0][1])
    expanded = dot(e, raw["expand"][1][0]) + raw["expand"][1][1]
    seq = expanded[:, None, :] + raw["time_weights"][None, :, :]
    for layer in range(2):
        seq, _ = _ref_gru_dir(seq, *raw["dec_gru"][layer])
    return dot(seq.reshape(-1, seq.shape[-1]), raw["out_w"]).reshape(
        seq.shape[0], seq.shape[1], -1) + raw["out_b"]


# ============================================================================
if __name__ == "__main__":
    B, T, D, H = 2, 8, 16, 32   # batch, seq_len, input_dim, hidden_dim

    raw = init_raw_params(jax.random.PRNGKey(42), D, T, H)
    params = pack_params(raw)
    x = jax.random.normal(jax.random.PRNGKey(0), (B, T, D), dtype=jnp.float32)

    y = jax.jit(gru_deepsc_forward)(params, x)
    jax.block_until_ready(y)

    assert y.shape == (B, T, D), y.shape
    assert bool(jnp.all(jnp.isfinite(y)))

    # Cross-check against the pure-JAX reference of the PyTorch module (eval mode).
    y_ref = ref_forward(raw, x)
    max_err = float(jnp.max(jnp.abs(y - y_ref)))
    assert bool(jnp.allclose(y, y_ref, atol=5e-3, rtol=5e-3)), max_err

    print("KERNEL_OK")
</pallas_src>

<mosaic_0001>
module attributes {stable_mosaic.version = 11 : i64} {
  func.func @_deepsc_kernel(%arg0: i32, %arg1: memref<8x2x16xf32, #tpu.memory_space<vmem>>, %arg2: memref<16x96xf32, #tpu.memory_space<vmem>>, %arg3: memref<32x96xf32, #tpu.memory_space<vmem>>, %arg4: memref<1x96xf32, #tpu.memory_space<vmem>>, %arg5: memref<1x32xf32, #tpu.memory_space<vmem>>, %arg6: memref<16x96xf32, #tpu.memory_space<vmem>>, %arg7: memref<32x96xf32, #tpu.memory_space<vmem>>, %arg8: memref<1x96xf32, #tpu.memory_space<vmem>>, %arg9: memref<1x32xf32, #tpu.memory_space<vmem>>, %arg10: memref<64x96xf32, #tpu.memory_space<vmem>>, %arg11: memref<32x96xf32, #tpu.memory_space<vmem>>, %arg12: memref<1x96xf32, #tpu.memory_space<vmem>>, %arg13: memref<1x32xf32, #tpu.memory_space<vmem>>, %arg14: memref<64x96xf32, #tpu.memory_space<vmem>>, %arg15: memref<32x96xf32, #tpu.memory_space<vmem>>, %arg16: memref<1x96xf32, #tpu.memory_space<vmem>>, %arg17: memref<1x32xf32, #tpu.memory_space<vmem>>, %arg18: memref<64x32xf32, #tpu.memory_space<vmem>>, %arg19: memref<1x32xf32, #tpu.memory_space<vmem>>, %arg20: memref<32x32xf32, #tpu.memory_space<vmem>>, %arg21: memref<1x32xf32, #tpu.memory_space<vmem>>, %arg22: memref<32x32xf32, #tpu.memory_space<vmem>>, %arg23: memref<1x32xf32, #tpu.memory_space<vmem>>, %arg24: memref<32x64xf32, #tpu.memory_space<vmem>>, %arg25: memref<1x64xf32, #tpu.memory_space<vmem>>, %arg26: memref<8x64xf32, #tpu.memory_space<vmem>>, %arg27: memref<64x96xf32, #tpu.memory_space<vmem>>, %arg28: memref<32x96xf32, #tpu.memory_space<vmem>>, %arg29: memref<1x96xf32, #tpu.memory_space<vmem>>, %arg30: memref<1x32xf32, #tpu.memory_space<vmem>>, %arg31: memref<32x96xf32, #tpu.memory_space<vmem>>, %arg32: memref<32x96xf32, #tpu.memory_space<vmem>>, %arg33: memref<1x96xf32, #tpu.memory_space<vmem>>, %arg34: memref<1x32xf32, #tpu.memory_space<vmem>>, %arg35: memref<32x16xf32, #tpu.memory_space<vmem>>, %arg36: memref<1x16xf32, #tpu.memory_space<vmem>>, %arg37: memref<2x128xf32, #tpu.memory_space<vmem>>) attributes {dimension_semantics = [#tpu.dimension_semantics<arbitrary>], iteration_bounds = array<i64: 1>, scalar_prefetch = 0 : i64, scratch_operands = 0 : i64, tpu.core_type = #tpu.core_type<tc>, window_params = [{transform_indices = @transform_0, window_bounds = array<i64: 8, 2, 16>}, {pipeline_mode = #tpu.pipeline_mode<synchronous>, transform_indices = @transform_1, window_bounds = array<i64: 16, 96>}, {pipeline_mode = #tpu.pipeline_mode<synchronous>, transform_indices = @transform_2, window_bounds = array<i64: 32, 96>}, {pipeline_mode = #tpu.pipeline_mode<synchronous>, transform_indices = @transform_3, window_bounds = array<i64: 1, 96>}, {pipeline_mode = #tpu.pipeline_mode<synchronous>, transform_indices = @transform_4, window_bounds = array<i64: 1, 32>}, {pipeline_mode = #tpu.pipeline_mode<synchronous>, transform_indices = @transform_5, window_bounds = array<i64: 16, 96>}, {pipeline_mode = #tpu.pipeline_mode<synchronous>, transform_indices = @transform_6, window_bounds = array<i64: 32, 96>}, {pipeline_mode = #tpu.pipeline_mode<synchronous>, transform_indices = @transform_7, window_bounds = array<i64: 1, 96>}, {pipeline_mode = #tpu.pipeline_mode<synchronous>, transform_indices = @transform_8, window_bounds = array<i64: 1, 32>}, {pipeline_mode = #tpu.pipeline_mode<synchronous>, transform_indices = @transform_9, window_bounds = array<i64: 64, 96>}, {pipeline_mode = #tpu.pipeline_mode<synchronous>, transform_indices = @transform_10, window_bounds = array<i64: 32, 96>}, {pipeline_mode = #tpu.pipeline_mode<synchronous>, transform_indices = @transform_11, window_bounds = array<i64: 1, 96>}, {pipeline_mode = #tpu.pipeline_mode<synchronous>, transform_indices = @transform_12, window_bounds = array<i64: 1, 32>}, {pipeline_mode = #tpu.pipeline_mode<synchronous>, transform_indices = @transform_13, window_bounds = array<i64: 64, 96>}, {pipeline_mode = #tpu.pipeline_mode<synchronous>, transform_indices = @transform_14, window_bounds = array<i64: 32, 96>}, {pipeline_mode = #tpu.pipeline_mode<synchronous>, transform_indices = @transform_15, window_bounds = array<i64: 1, 96>}, {pipeline_mode = #tpu.pipeline_mode<synchronous>, transform_indices = @transform_16, window_bounds = array<i64: 1, 32>}, {pipeline_mode = #tpu.pipeline_mode<synchronous>, transform_indices = @transform_17, window_bounds = array<i64: 64, 32>}, {pipeline_mode = #tpu.pipeline_mode<synchronous>, transform_indices = @transform_18, window_bounds = array<i64: 1, 32>}, {pipeline_mode = #tpu.pipeline_mode<synchronous>, transform_indices = @transform_19, window_bounds = array<i64: 32, 32>}, {pipeline_mode = #tpu.pipeline_mode<synchronous>, transform_indices = @transform_20, window_bounds = array<i64: 1, 32>}, {pipeline_mode = #tpu.pipeline_mode<synchronous>, transform_indices = @transform_21, window_bounds = array<i64: 32, 32>}, {pipeline_mode = #tpu.pipeline_mode<synchronous>, transform_indices = @transform_22, window_bounds = array<i64: 1, 32>}, {pipeline_mode = #tpu.pipeline_mode<synchronous>, transform_indices = @transform_23, window_bounds = array<i64: 32, 64>}, {pipeline_mode = #tpu.pipeline_mode<synchronous>, transform_indices = @transform_24, window_bounds = array<i64: 1, 64>}, {pipeline_mode = #tpu.pipeline_mode<synchronous>, transform_indices = @transform_25, window_bounds = array<i64: 8, 64>}, {pipeline_mode = #tpu.pipeline_mode<synchronous>, transform_indices = @transform_26, window_bounds = array<i64: 64, 96>}, {pipeline_mode = #tpu.pipeline_mode<synchronous>, transform_indices = @transform_27, window_bounds = array<i64: 32, 96>}, {pipeline_mode = #tpu.pipeline_mode<synchronous>, transform_indices = @transform_28, window_bounds = array<i64: 1, 96>}, {pipeline_mode = #tpu.pipeline_mode<synchronous>, transform_indices = @transform_29, window_bounds = array<i64: 1, 32>}, {pipeline_mode = #tpu.pipeline_mode<synchronous>, transform_indices = @transform_30, window_bounds = array<i64: 32, 96>}, {pipeline_mode = #tpu.pipeline_mode<synchronous>, transform_indices = @transform_31, window_bounds = array<i64: 32, 96>}, {pipeline_mode = #tpu.pipeline_mode<synchronous>, transform_indices = @transform_32, window_bounds = array<i64: 1, 96>}, {pipeline_mode = #tpu.pipeline_mode<synchronous>, transform_indices = @transform_33, window_bounds = array<i64: 1, 32>}, {pipeline_mode = #tpu.pipeline_mode<synchronous>, transform_indices = @transform_34, window_bounds = array<i64: 32, 16>}, {pipeline_mode = #tpu.pipeline_mode<synchronous>, transform_indices = @transform_35, window_bounds = array<i64: 1, 16>}, {transform_indices = @transform_36, window_bounds = array<i64: 2, 128>}]} {
    %c0 = arith.constant 0 : index
    %c0_0 = arith.constant 0 : index
    %c0_1 = arith.constant 0 : index
    %0 = vector.load %arg1[%c0, %c0_0, %c0_1] : memref<8x2x16xf32, #tpu.memory_space<vmem>>, vector<8x2x16xf32>
    %1 = vector.shape_cast %0 : vector<8x2x16xf32> to vector<16x16xf32>
    %c0_2 = arith.constant 0 : index
    %c0_3 = arith.constant 0 : index
    %2 = vector.load %arg2[%c0_2, %c0_3] : memref<16x96xf32, #tpu.memory_space<vmem>>, vector<16x96xf32>
    %cst = arith.constant dense<0.000000e+00> : vector<16x96xf32>
    %3 = tpu.matmul %1, %2, %cst {dimension_numbers = #tpu.dot_dimension_numbers<[1], [0], [0], [1], [0, 0, 1, 1], [], []>} : vector<16x16xf32>, vector<16x96xf32>, vector<16x96xf32> -> vector<16x96xf32>
    %c0_4 = arith.constant 0 : index
    %c0_5 = arith.constant 0 : index
    %4 = vector.load %arg4[%c0_4, %c0_5] : memref<1x96xf32, #tpu.memory_space<vmem>>, vector<1x96xf32>
    %5 = vector.broadcast %4 : vector<1x96xf32> to vector<16x96xf32>
    %6 = arith.addf %3, %5 : vector<16x96xf32>
    %7 = vector.shape_cast %6 : vector<16x96xf32> to vector<8x2x96xf32>
    %8 = vector.shape_cast %0 : vector<8x2x16xf32> to vector<16x16xf32>
    %c0_6 = arith.constant 0 : index
    %c0_7 = arith.constant 0 : index
    %9 = vector.load %arg6[%c0_6, %c0_7] : memref<16x96xf32, #tpu.memory_space<vmem>>, vector<16x96xf32>
    %cst_8 = arith.constant dense<0.000000e+00> : vector<16x96xf32>
    %10 = tpu.matmul %8, %9, %cst_8 {dimension_numbers = #tpu.dot_dimension_numbers<[1], [0], [0], [1], [0, 0, 1, 1], [], []>} : vector<16x16xf32>, vector<16x96xf32>, vector<16x96xf32> -> vector<16x96xf32>
    %c0_9 = arith.constant 0 : index
    %c0_10 = arith.constant 0 : index
    %11 = vector.load %arg8[%c0_9, %c0_10] : memref<1x96xf32, #tpu.memory_space<vmem>>, vector<1x96xf32>
    %12 = vector.broadcast %11 : vector<1x96xf32> to vector<16x96xf32>
    %13 = arith.addf %10, %12 : vector<16x96xf32>
    %14 = vector.shape_cast %13 : vector<16x96xf32> to vector<8x2x96xf32>
    %c0_11 = arith.constant 0 : index
    %c0_12 = arith.constant 0 : index
    %15 = vector.load %arg3[%c0_11, %c0_12] : memref<32x96xf32, #tpu.memory_space<vmem>>, vector<32x96xf32>
    %c0_13 = arith.constant 0 : index
    %c0_14 = arith.constant 0 : index
    %16 = vector.load %arg7[%c0_13, %c0_14] : memref<32x96xf32, #tpu.memory_space<vmem>>, vector<32x96xf32>
    %c0_15 = arith.constant 0 : index
    %c0_16 = arith.constant 0 : index
    %17 = vector.load %arg5[%c0_15, %c0_16] : memref<1x32xf32, #tpu.memory_space<vmem>>, vector<1x32xf32>
    %18 = vector.shape_cast %17 : vector<1x32xf32> to vector<1x32xf32>
    %19 = vector.broadcast %18 : vector<1x32xf32> to vector<2x32xf32>
    %c0_17 = arith.constant 0 : index
    %c0_18 = arith.constant 0 : index
    %20 = vector.load %arg9[%c0_17, %c0_18] : memref<1x32xf32, #tpu.memory_space<vmem>>, vector<1x32xf32>
    %21 = vector.shape_cast %20 : vector<1x32xf32> to vector<1x32xf32>
    %22 = vector.broadcast %21 : vector<1x32xf32> to vector<2x32xf32>
    %cst_19 = arith.constant 0.000000e+00 : f32
    %23 = vector.broadcast %cst_19 : f32 to vector<2x32xf32>
    %cst_20 = arith.constant 0.000000e+00 : f32
    %24 = vector.broadcast %cst_20 : f32 to vector<2x32xf32>
    %25 = vector.extract_strided_slice %7 {offsets = [0, 0, 0], sizes = [1, 2, 96], strides = [1, 1, 1]} : vector<8x2x96xf32> to vector<1x2x96xf32>
    %26 = vector.shape_cast %25 : vector<1x2x96xf32> to vector<2x96xf32>
    %cst_21 = arith.constant dense<0.000000e+00> : vector<2x96xf32>
    %27 = tpu.matmul %23, %15, %cst_21 {dimension_numbers = #tpu.dot_dimension_numbers<[1], [0], [0], [1], [0, 0, 1, 1], [], []>} : vector<2x32xf32>, vector<32x96xf32>, vector<2x96xf32> -> vector<2x96xf32>
    %28 = vector.extract_strided_slice %26 {offsets = [0, 0], sizes = [2, 64], strides = [1, 1]} : vector<2x96xf32> to vector<2x64xf32>
    %29 = vector.extract_strided_slice %27 {offsets = [0, 0], sizes = [2, 64], strides = [1, 1]} : vector<2x96xf32> to vector<2x64xf32>
    %30 = arith.addf %28, %29 : vector<2x64xf32>
    %31 = arith.negf %30 : vector<2x64xf32>
    %32 = math.exp %31 : vector<2x64xf32>
    %cst_22 = arith.constant 1.000000e+00 : f32
    %33 = vector.broadcast %cst_22 : f32 to vector<2x64xf32>
    %34 = arith.addf %33, %32 : vector<2x64xf32>
    %35 = arith.divf %33, %34 : vector<2x64xf32>
    %36 = vector.extract_strided_slice %35 {offsets = [0, 0], sizes = [2, 32], strides = [1, 1]} : vector<2x64xf32> to vector<2x32xf32>
    %37 = vector.extract_strided_slice %35 {offsets = [0, 32], sizes = [2, 32], strides = [1, 1]} : vector<2x64xf32> to vector<2x32xf32>
    %38 = vector.extract_strided_slice %26 {offsets = [0, 64], sizes = [2, 32], strides = [1, 1]} : vector<2x96xf32> to vector<2x32xf32>
    %39 = vector.extract_strided_slice %27 {offsets = [0, 64], sizes = [2, 32], strides = [1, 1]} : vector<2x96xf32> to vector<2x32xf32>
    %40 = arith.addf %39, %19 : vector<2x32xf32>
    %41 = arith.mulf %36, %40 : vector<2x32xf32>
    %42 = arith.addf %38, %41 : vector<2x32xf32>
    %43 = math.tanh %42 : vector<2x32xf32>
    %cst_23 = arith.constant 1.000000e+00 : f32
    %44 = vector.broadcast %cst_23 : f32 to vector<2x32xf32>
    %45 = arith.subf %44, %37 : vector<2x32xf32>
    %46 = arith.mulf %45, %43 : vector<2x32xf32>
    %47 = arith.mulf %37, %23 : vector<2x32xf32>
    %48 = arith.addf %46, %47 : vector<2x32xf32>
    %49 = vector.extract_strided_slice %14 {offsets = [7, 0, 0], sizes = [1, 2, 96], strides = [1, 1, 1]} : vector<8x2x96xf32> to vector<1x2x96xf32>
    %50 = vector.shape_cast %49 : vector<1x2x96xf32> to vector<2x96xf32>
    %cst_24 = arith.constant dense<0.000000e+00> : vector<2x96xf32>
    %51 = tpu.matmul %24, %16, %cst_24 {dimension_numbers = #tpu.dot_dimension_numbers<[1], [0], [0], [1], [0, 0, 1, 1], [], []>} : vector<2x32xf32>, vector<32x96xf32>, vector<2x96xf32> -> vector<2x96xf32>
    %52 = vector.extract_strided_slice %50 {offsets = [0, 0], sizes = [2, 64], strides = [1, 1]} : vector<2x96xf32> to vector<2x64xf32>
    %53 = vector.extract_strided_slice %51 {offsets = [0, 0], sizes = [2, 64], strides = [1, 1]} : vector<2x96xf32> to vector<2x64xf32>
    %54 = arith.addf %52, %53 : vector<2x64xf32>
    %55 = arith.negf %54 : vector<2x64xf32>
    %56 = math.exp %55 : vector<2x64xf32>
    %cst_25 = arith.constant 1.000000e+00 : f32
    %57 = vector.broadcast %cst_25 : f32 to vector<2x64xf32>
    %58 = arith.addf %57, %56 : vector<2x64xf32>
    %59 = arith.divf %57, %58 : vector<2x64xf32>
    %60 = vector.extract_strided_slice %59 {offsets = [0, 0], sizes = [2, 32], strides = [1, 1]} : vector<2x64xf32> to vector<2x32xf32>
    %61 = vector.extract_strided_slice %59 {offsets = [0, 32], sizes = [2, 32], strides = [1, 1]} : vector<2x64xf32> to vector<2x32xf32>
    %62 = vector.extract_strided_slice %50 {offsets = [0, 64], sizes = [2, 32], strides = [1, 1]} : vector<2x96xf32> to vector<2x32xf32>
    %63 = vector.extract_strided_slice %51 {offsets = [0, 64], sizes = [2, 32], strides = [1, 1]} : vector<2x96xf32> to vector<2x32xf32>
    %64 = arith.addf %63, %22 : vector<2x32xf32>
    %65 = arith.mulf %60, %64 : vector<2x32xf32>
    %66 = arith.addf %62, %65 : vector<2x32xf32>
    %67 = math.tanh %66 : vector<2x32xf32>
    %cst_26 = arith.constant 1.000000e+00 : f32
    %68 = vector.broadcast %cst_26 : f32 to vector<2x32xf32>
    %69 = arith.subf %68, %61 : vector<2x32xf32>
    %70 = arith.mulf %69, %67 : vector<2x32xf32>
    %71 = arith.mulf %61, %24 : vector<2x32xf32>
    %72 = arith.addf %70, %71 : vector<2x32xf32>
    %73 = vector.extract_strided_slice %7 {offsets = [1, 0, 0], sizes = [1, 2, 96], strides = [1, 1, 1]} : vector<8x2x96xf32> to vector<1x2x96xf32>
    %74 = vector.shape_cast %73 : vector<1x2x96xf32> to vector<2x96xf32>
    %cst_27 = arith.constant dense<0.000000e+00> : vector<2x96xf32>
    %75 = tpu.matmul %48, %15, %cst_27 {dimension_numbers = #tpu.dot_dimension_numbers<[1], [0], [0], [1], [0, 0, 1, 1], [], []>} : vector<2x32xf32>, vector<32x96xf32>, vector<2x96xf32> -> vector<2x96xf32>
    %76 = vector.extract_strided_slice %74 {offsets = [0, 0], sizes = [2, 64], strides = [1, 1]} : vector<2x96xf32> to vector<2x64xf32>
    %77 = vector.extract_strided_slice %75 {offsets = [0, 0], sizes = [2, 64], strides = [1, 1]} : vector<2x96xf32> to vector<2x64xf32>
    %78 = arith.addf %76, %77 : vector<2x64xf32>
    %79 = arith.negf %78 : vector<2x64xf32>
    %80 = math.exp %79 : vector<2x64xf32>
    %cst_28 = arith.constant 1.000000e+00 : f32
    %81 = vector.broadcast %cst_28 : f32 to vector<2x64xf32>
    %82 = arith.addf %81, %80 : vector<2x64xf32>
    %83 = arith.divf %81, %82 : vector<2x64xf32>
    %84 = vector.extract_strided_slice %83 {offsets = [0, 0], sizes = [2, 32], strides = [1, 1]} : vector<2x64xf32> to vector<2x32xf32>
    %85 = vector.extract_strided_slice %83 {offsets = [0, 32], sizes = [2, 32], strides = [1, 1]} : vector<2x64xf32> to vector<2x32xf32>
    %86 = vector.extract_strided_slice %74 {offsets = [0, 64], sizes = [2, 32], strides = [1, 1]} : vector<2x96xf32> to vector<2x32xf32>
    %87 = vector.extract_strided_slice %75 {offsets = [0, 64], sizes = [2, 32], strides = [1, 1]} : vector<2x96xf32> to vector<2x32xf32>
    %88 = arith.addf %87, %19 : vector<2x32xf32>
    %89 = arith.mulf %84, %88 : vector<2x32xf32>
    %90 = arith.addf %86, %89 : vector<2x32xf32>
    %91 = math.tanh %90 : vector<2x32xf32>
    %cst_29 = arith.constant 1.000000e+00 : f32
    %92 = vector.broadcast %cst_29 : f32 to vector<2x32xf32>
    %93 = arith.subf %92, %85 : vector<2x32xf32>
    %94 = arith.mulf %93, %91 : vector<2x32xf32>
    %95 = arith.mulf %85, %48 : vector<2x32xf32>
    %96 = arith.addf %94, %95 : vector<2x32xf32>
    %97 = vector.extract_strided_slice %14 {offsets = [6, 0, 0], sizes = [1, 2, 96], strides = [1, 1, 1]} : vector<8x2x96xf32> to vector<1x2x96xf32>
    %98 = vector.shape_cast %97 : vector<1x2x96xf32> to vector<2x96xf32>
    %cst_30 = arith.constant dense<0.000000e+00> : vector<2x96xf32>
    %99 = tpu.matmul %72, %16, %cst_30 {dimension_numbers = #tpu.dot_dimension_numbers<[1], [0], [0], [1], [0, 0, 1, 1], [], []>} : vector<2x32xf32>, vector<32x96xf32>, vector<2x96xf32> -> vector<2x96xf32>
    %100 = vector.extract_strided_slice %98 {offsets = [0, 0], sizes = [2, 64], strides = [1, 1]} : vector<2x96xf32> to vector<2x64xf32>
    %101 = vector.extract_strided_slice %99 {offsets = [0, 0], sizes = [2, 64], strides = [1, 1]} : vector<2x96xf32> to vector<2x64xf32>
    %102 = arith.addf %100, %101 : vector<2x64xf32>
    %103 = arith.negf %102 : vector<2x64xf32>
    %104 = math.exp %103 : vector<2x64xf32>
    %cst_31 = arith.constant 1.000000e+00 : f32
    %105 = vector.broadcast %cst_31 : f32 to vector<2x64xf32>
    %106 = arith.addf %105, %104 : vector<2x64xf32>
    %107 = arith.divf %105, %106 : vector<2x64xf32>
    %108 = vector.extract_strided_slice %107 {offsets = [0, 0], sizes = [2, 32], strides = [1, 1]} : vector<2x64xf32> to vector<2x32xf32>
    %109 = vector.extract_strided_slice %107 {offsets = [0, 32], sizes = [2, 32], strides = [1, 1]} : vector<2x64xf32> to vector<2x32xf32>
    %110 = vector.extract_strided_slice %98 {offsets = [0, 64], sizes = [2, 32], strides = [1, 1]} : vector<2x96xf32> to vector<2x32xf32>
    %111 = vector.extract_strided_slice %99 {offsets = [0, 64], sizes = [2, 32], strides = [1, 1]} : vector<2x96xf32> to vector<2x32xf32>
    %112 = arith.addf %111, %22 : vector<2x32xf32>
    %113 = arith.mulf %108, %112 : vector<2x32xf32>
    %114 = arith.addf %110, %113 : vector<2x32xf32>
    %115 = math.tanh %114 : vector<2x32xf32>
    %cst_32 = arith.constant 1.000000e+00 : f32
    %116 = vector.broadcast %cst_32 : f32 to vector<2x32xf32>
    %117 = arith.subf %116, %109 : vector<2x32xf32>
    %118 = arith.mulf %117, %115 : vector<2x32xf32>
    %119 = arith.mulf %109, %72 : vector<2x32xf32>
    %120 = arith.addf %118, %119 : vector<2x32xf32>
    %121 = vector.extract_strided_slice %7 {offsets = [2, 0, 0], sizes = [1, 2, 96], strides = [1, 1, 1]} : vector<8x2x96xf32> to vector<1x2x96xf32>
    %122 = vector.shape_cast %121 : vector<1x2x96xf32> to vector<2x96xf32>
    %cst_33 = arith.constant dense<0.000000e+00> : vector<2x96xf32>
    %123 = tpu.matmul %96, %15, %cst_33 {dimension_numbers = #tpu.dot_dimension_numbers<[1], [0], [0], [1], [0, 0, 1, 1], [], []>} : vector<2x32xf32>, vector<32x96xf32>, vector<2x96xf32> -> vector<2x96xf32>
    %124 = vector.extract_strided_slice %122 {offsets = [0, 0], sizes = [2, 64], strides = [1, 1]} : vector<2x96xf32> to vector<2x64xf32>
    %125 = vector.extract_strided_slice %123 {offsets = [0, 0], sizes = [2, 64], strides = [1, 1]} : vector<2x96xf32> to vector<2x64xf32>
    %126 = arith.addf %124, %125 : vector<2x64xf32>
    %127 = arith.negf %126 : vector<2x64xf32>
    %128 = math.exp %127 : vector<2x64xf32>
    %cst_34 = arith.constant 1.000000e+00 : f32
    %129 = vector.broadcast %cst_34 : f32 to vector<2x64xf32>
    %130 = arith.addf %129, %128 : vector<2x64xf32>
    %131 = arith.divf %129, %130 : vector<2x64xf32>
    %132 = vector.extract_strided_slice %131 {offsets = [0, 0], sizes = [2, 32], strides = [1, 1]} : vector<2x64xf32> to vector<2x32xf32>
    %133 = vector.extract_strided_slice %131 {offsets = [0, 32], sizes = [2, 32], strides = [1, 1]} : vector<2x64xf32> to vector<2x32xf32>
    %134 = vector.extract_strided_slice %122 {offsets = [0, 64], sizes = [2, 32], strides = [1, 1]} : vector<2x96xf32> to vector<2x32xf32>
    %135 = vector.extract_strided_slice %123 {offsets = [0, 64], sizes = [2, 32], strides = [1, 1]} : vector<2x96xf32> to vector<2x32xf32>
    %136 = arith.addf %135, %19 : vector<2x32xf32>
    %137 = arith.mulf %132, %136 : vector<2x32xf32>
    %138 = arith.addf %134, %137 : vector<2x32xf32>
    %139 = math.tanh %138 : vector<2x32xf32>
    %cst_35 = arith.constant 1.000000e+00 : f32
    %140 = vector.broadcast %cst_35 : f32 to vector<2x32xf32>
    %141 = arith.subf %140, %133 : vector<2x32xf32>
    %142 = arith.mulf %141, %139 : vector<2x32xf32>
    %143 = arith.mulf %133, %96 : vector<2x32xf32>
    %144 = arith.addf %142, %143 : vector<2x32xf32>
    %145 = vector.extract_strided_slice %14 {offsets = [5, 0, 0], sizes = [1, 2, 96], strides = [1, 1, 1]} : vector<8x2x96xf32> to vector<1x2x96xf32>
    %146 = vector.shape_cast %145 : vector<1x2x96xf32> to vector<2x96xf32>
    %cst_36 = arith.constant dense<0.000000e+00> : vector<2x96xf32>
    %147 = tpu.matmul %120, %16, %cst_36 {dimension_numbers = #tpu.dot_dimension_numbers<[1], [0], [0], [1], [0, 0, 1, 1], [], []>} : vector<2x32xf32>, vector<32x96xf32>, vector<2x96xf32> -> vector<2x96xf32>
    %148 = vector.extract_strided_slice %146 {offsets = [0, 0], sizes = [2, 64], strides = [1, 1]} : vector<2x96xf32> to vector<2x64xf32>
    %149 = vector.extract_strided_slice %147 {offsets = [0, 0], sizes = [2, 64], strides = [1, 1]} : vector<2x96xf32> to vector<2x64xf32>
    %150 = arith.addf %148, %149 : vector<2x64xf32>
    %151 = arith.negf %150 : vector<2x64xf32>
    %152 = math.exp %151 : vector<2x64xf32>
    %cst_37 = arith.constant 1.000000e+00 : f32
    %153 = vector.broadcast %cst_37 : f32 to vector<2x64xf32>
    %154 = arith.addf %153, %152 : vector<2x64xf32>
    %155 = arith.divf %153, %154 : vector<2x64xf32>
    %156 = vector.extract_strided_slice %155 {offsets = [0, 0], sizes = [2, 32], strides = [1, 1]} : vector<2x64xf32> to vector<2x32xf32>
    %157 = vector.extract_strided_slice %155 {offsets = [0, 32], sizes = [2, 32], strides = [1, 1]} : vector<2x64xf32> to vector<2x32xf32>
    %158 = vector.extract_strided_slice %146 {offsets = [0, 64], sizes = [2, 32], strides = [1, 1]} : vector<2x96xf32> to vector<2x32xf32>
    %159 = vector.extract_strided_slice %147 {offsets = [0, 64], sizes = [2, 32], strides = [1, 1]} : vector<2x96xf32> to vector<2x32xf32>
    %160 = arith.addf %159, %22 : vector<2x32xf32>
    %161 = arith.mulf %156, %160 : vector<2x32xf32>
    %162 = arith.addf %158, %161 : vector<2x32xf32>
    %163 = math.tanh %162 : vector<2x32xf32>
    %cst_38 = arith.constant 1.000000e+00 : f32
    %164 = vector.broadcast %cst_38 : f32 to vector<2x32xf32>
    %165 = arith.subf %164, %157 : vector<2x32xf32>
    %166 = arith.mulf %165, %163 : vector<2x32xf32>
    %167 = arith.mulf %157, %120 : vector<2x32xf32>
    %168 = arith.addf %166, %167 : vector<2x32xf32>
    %169 = vector.extract_strided_slice %7 {offsets = [3, 0, 0], sizes = [1, 2, 96], strides = [1, 1, 1]} : vector<8x2x96xf32> to vector<1x2x96xf32>
    %170 = vector.shape_cast %169 : vector<1x2x96xf32> to vector<2x96xf32>
    %cst_39 = arith.constant dense<0.000000e+00> : vector<2x96xf32>
    %171 = tpu.matmul %144, %15, %cst_39 {dimension_numbers = #tpu.dot_dimension_numbers<[1], [0], [0], [1], [0, 0, 1, 1], [], []>} : vector<2x32xf32>, vector<32x96xf32>, vector<2x96xf32> -> vector<2x96xf32>
    %172 = vector.extract_strided_slice %170 {offsets = [0, 0], sizes = [2, 64], strides = [1, 1]} : vector<2x96xf32> to vector<2x64xf32>
    %173 = vector.extract_strided_slice %171 {offsets = [0, 0], sizes = [2, 64], strides = [1, 1]} : vector<2x96xf32> to vector<2x64xf32>
    %174 = arith.addf %172, %173 : vector<2x64xf32>
    %175 = arith.negf %174 : vector<2x64xf32>
    %176 = math.exp %175 : vector<2x64xf32>
    %cst_40 = arith.constant 1.000000e+00 : f32
    %177 = vector.broadcast %cst_40 : f32 to vector<2x64xf32>
    %178 = arith.addf %177, %176 : vector<2x64xf32>
    %179 = arith.divf %177, %178 : vector<2x64xf32>
    %180 = vector.extract_strided_slice %179 {offsets = [0, 0], sizes = [2, 32], strides = [1, 1]} : vector<2x64xf32> to vector<2x32xf32>
    %181 = vector.extract_strided_slice %179 {offsets = [0, 32], sizes = [2, 32], strides = [1, 1]} : vector<2x64xf32> to vector<2x32xf32>
    %182 = vector.extract_strided_slice %170 {offsets = [0, 64], sizes = [2, 32], strides = [1, 1]} : vector<2x96xf32> to vector<2x32xf32>
    %183 = vector.extract_strided_slice %171 {offsets = [0, 64], sizes = [2, 32], strides = [1, 1]} : vector<2x96xf32> to vector<2x32xf32>
    %184 = arith.addf %183, %19 : vector<2x32xf32>
    %185 = arith.mulf %180, %184 : vector<2x32xf32>
    %186 = arith.addf %182, %185 : vector<2x32xf32>
    %187 = math.tanh %186 : vector<2x32xf32>
    %cst_41 = arith.constant 1.000000e+00 : f32
    %188 = vector.broadcast %cst_41 : f32 to vector<2x32xf32>
    %189 = arith.subf %188, %181 : vector<2x32xf32>
    %190 = arith.mulf %189, %187 : vector<2x32xf32>
    %191 = arith.mulf %181, %144 : vector<2x32xf32>
    %192 = arith.addf %190, %191 : vector<2x32xf32>
    %193 = vector.extract_strided_slice %14 {offsets = [4, 0, 0], sizes = [1, 2, 96], strides = [1, 1, 1]} : vector<8x2x96xf32> to vector<1x2x96xf32>
    %194 = vector.shape_cast %193 : vector<1x2x96xf32> to vector<2x96xf32>
    %cst_42 = arith.constant dense<0.000000e+00> : vector<2x96xf32>
    %195 = tpu.matmul %168, %16, %cst_42 {dimension_numbers = #tpu.dot_dimension_numbers<[1], [0], [0], [1], [0, 0, 1, 1], [], []>} : vector<2x32xf32>, vector<32x96xf32>, vector<2x96xf32> -> vector<2x96xf32>
    %196 = vector.extract_strided_slice %194 {offsets = [0, 0], sizes = [2, 64], strides = [1, 1]} : vector<2x96xf32> to vector<2x64xf32>
    %197 = vector.extract_strided_slice %195 {offsets = [0, 0], sizes = [2, 64], strides = [1, 1]} : vector<2x96xf32> to vector<2x64xf32>
    %198 = arith.addf %196, %197 : vector<2x64xf32>
    %199 = arith.negf %198 : vector<2x64xf32>
    %200 = math.exp %199 : vector<2x64xf32>
    %cst_43 = arith.constant 1.000000e+00 : f32
    %201 = vector.broadcast %cst_43 : f32 to vector<2x64xf32>
    %202 = arith.addf %201, %200 : vector<2x64xf32>
    %203 = arith.divf %201, %202 : vector<2x64xf32>
    %204 = vector.extract_strided_slice %203 {offsets = [0, 0], sizes = [2, 32], strides = [1, 1]} : vector<2x64xf32> to vector<2x32xf32>
    %205 = vector.extract_strided_slice %203 {offsets = [0, 32], sizes = [2, 32], strides = [1, 1]} : vector<2x64xf32> to vector<2x32xf32>
    %206 = vector.extract_strided_slice %194 {offsets = [0, 64], sizes = [2, 32], strides = [1, 1]} : vector<2x96xf32> to vector<2x32xf32>
    %207 = vector.extract_strided_slice %195 {offsets = [0, 64], sizes = [2, 32], strides = [1, 1]} : vector<2x96xf32> to vector<2x32xf32>
    %208 = arith.addf %207, %22 : vector<2x32xf32>
    %209 = arith.mulf %204, %208 : vector<2x32xf32>
    %210 = arith.addf %206, %209 : vector<2x32xf32>
    %211 = math.tanh %210 : vector<2x32xf32>
    %cst_44 = arith.constant 1.000000e+00 : f32
    %212 = vector.broadcast %cst_44 : f32 to vector<2x32xf32>
    %213 = arith.subf %212, %205 : vector<2x32xf32>
    %214 = arith.mulf %213, %211 : vector<2x32xf32>
    %215 = arith.mulf %205, %168 : vector<2x32xf32>
    %216 = arith.addf %214, %215 : vector<2x32xf32>
    %217 = vector.extract_strided_slice %7 {offsets = [4, 0, 0], sizes = [1, 2, 96], strides = [1, 1, 1]} : vector<8x2x96xf32> to vector<1x2x96xf32>
    %218 = vector.shape_cast %217 : vector<1x2x96xf32> to vector<2x96xf32>
    %cst_45 = arith.constant dense<0.000000e+00> : vector<2x96xf32>
    %219 = tpu.matmul %192, %15, %cst_45 {dimension_numbers = #tpu.dot_dimension_numbers<[1], [0], [0], [1], [0, 0, 1, 1], [], []>} : vector<2x32xf32>, vector<32x96xf32>, vector<2x96xf32> -> vector<2x96xf32>
    %220 = vector.extract_strided_slice %218 {offsets = [0, 0], sizes = [2, 64], strides = [1, 1]} : vector<2x96xf32> to vector<2x64xf32>
    %221 = vector.extract_strided_slice %219 {offsets = [0, 0], sizes = [2, 64], strides = [1, 1]} : vector<2x96xf32> to vector<2x64xf32>
    %222 = arith.addf %220, %221 : vector<2x64xf32>
    %223 = arith.negf %222 : vector<2x64xf32>
    %224 = math.exp %223 : vector<2x64xf32>
    %cst_46 = arith.constant 1.000000e+00 : f32
    %225 = vector.broadcast %cst_46 : f32 to vector<2x64xf32>
    %226 = arith.addf %225, %224 : vector<2x64xf32>
    %227 = arith.divf %225, %226 : vector<2x64xf32>
    %228 = vector.extract_strided_slice %227 {offsets = [0, 0], sizes = [2, 32], strides = [1, 1]} : vector<2x64xf32> to vector<2x32xf32>
    %229 = vector.extract_strided_slice %227 {offsets = [0, 32], sizes = [2, 32], strides = [1, 1]} : vector<2x64xf32> to vector<2x32xf32>
    %230 = vector.extract_strided_slice %218 {offsets = [0, 64], sizes = [2, 32], strides = [1, 1]} : vector<2x96xf32> to vector<2x32xf32>
    %231 = vector.extract_strided_slice %219 {offsets = [0, 64], sizes = [2, 32], strides = [1, 1]} : vector<2x96xf32> to vector<2x32xf32>
    %232 = arith.addf %231, %19 : vector<2x32xf32>
    %233 = arith.mulf %228, %232 : vector<2x32xf32>
    %234 = arith.addf %230, %233 : vector<2x32xf32>
    %235 = math.tanh %234 : vector<2x32xf32>
    %cst_47 = arith.constant 1.000000e+00 : f32
    %236 = vector.broadcast %cst_47 : f32 to vector<2x32xf32>
    %237 = arith.subf %236, %229 : vector<2x32xf32>
    %238 = arith.mulf %237, %235 : vector<2x32xf32>
    %239 = arith.mulf %229, %192 : vector<2x32xf32>
    %240 = arith.addf %238, %239 : vector<2x32xf32>
    %241 = vector.extract_strided_slice %14 {offsets = [3, 0, 0], sizes = [1, 2, 96], strides = [1, 1, 1]} : vector<8x2x96xf32> to vector<1x2x96xf32>
    %242 = vector.shape_cast %241 : vector<1x2x96xf32> to vector<2x96xf32>
    %cst_48 = arith.constant dense<0.000000e+00> : vector<2x96xf32>
    %243 = tpu.matmul %216, %16, %cst_48 {dimension_numbers = #tpu.dot_dimension_numbers<[1], [0], [0], [1], [0, 0, 1, 1], [], []>} : vector<2x32xf32>, vector<32x96xf32>, vector<2x96xf32> -> vector<2x96xf32>
    %244 = vector.extract_strided_slice %242 {offsets = [0, 0], sizes = [2, 64], strides = [1, 1]} : vector<2x96xf32> to vector<2x64xf32>
    %245 = vector.extract_strided_slice %243 {offsets = [0, 0], sizes = [2, 64], strides = [1, 1]} : vector<2x96xf32> to vector<2x64xf32>
    %246 = arith.addf %244, %245 : vector<2x64xf32>
    %247 = arith.negf %246 : vector<2x64xf32>
    %248 = math.exp %247 : vector<2x64xf32>
    %cst_49 = arith.constant 1.000000e+00 : f32
    %249 = vector.broadcast %cst_49 : f32 to vector<2x64xf32>
    %250 = arith.addf %249, %248 : vector<2x64xf32>
    %251 = arith.divf %249, %250 : vector<2x64xf32>
    %252 = vector.extract_strided_slice %251 {offsets = [0, 0], sizes = [2, 32], strides = [1, 1]} : vector<2x64xf32> to vector<2x32xf32>
    %253 = vector.extract_strided_slice %251 {offsets = [0, 32], sizes = [2, 32], strides = [1, 1]} : vector<2x64xf32> to vector<2x32xf32>
    %254 = vector.extract_strided_slice %242 {offsets = [0, 64], sizes = [2, 32], strides = [1, 1]} : vector<2x96xf32> to vector<2x32xf32>
    %255 = vector.extract_strided_slice %243 {offsets = [0, 64], sizes = [2, 32], strides = [1, 1]} : vector<2x96xf32> to vector<2x32xf32>
    %256 = arith.addf %255, %22 : vector<2x32xf32>
    %257 = arith.mulf %252, %256 : vector<2x32xf32>
    %258 = arith.addf %254, %257 : vector<2x32xf32>
    %259 = math.tanh %258 : vector<2x32xf32>
    %cst_50 = arith.constant 1.000000e+00 : f32
    %260 = vector.broadcast %cst_50 : f32 to vector<2x32xf32>
    %261 = arith.subf %260, %253 : vector<2x32xf32>
    %262 = arith.mulf %261, %259 : vector<2x32xf32>
    %263 = arith.mulf %253, %216 : vector<2x32xf32>
    %264 = arith.addf %262, %263 : vector<2x32xf32>
    %265 = vector.extract_strided_slice %7 {offsets = [5, 0, 0], sizes = [1, 2, 96], strides = [1, 1, 1]} : vector<8x2x96xf32> to vector<1x2x96xf32>
    %266 = vector.shape_cast %265 : vector<1x2x96xf32> to vector<2x96xf32>
    %cst_51 = arith.constant dense<0.000000e+00> : vector<2x96xf32>
    %267 = tpu.matmul %240, %15, %cst_51 {dimension_numbers = #tpu.dot_dimension_numbers<[1], [0], [0], [1], [0, 0, 1, 1], [], []>} : vector<2x32xf32>, vector<32x96xf32>, vector<2x96xf32> -> vector<2x96xf32>
    %268 = vector.extract_strided_slice %266 {offsets = [0, 0], sizes = [2, 64], strides = [1, 1]} : vector<2x96xf32> to vector<2x64xf32>
    %269 = vector.extract_strided_slice %267 {offsets = [0, 0], sizes = [2, 64], strides = [1, 1]} : vector<2x96xf32> to vector<2x64xf32>
    %270 = arith.addf %268, %269 : vector<2x64xf32>
    %271 = arith.negf %270 : vector<2x64xf32>
    %272 = math.exp %271 : vector<2x64xf32>
    %cst_52 = arith.constant 1.000000e+00 : f32
    %273 = vector.broadcast %cst_52 : f32 to vector<2x64xf32>
    %274 = arith.addf %273, %272 : vector<2x64xf32>
    %275 = arith.divf %273, %274 : vector<2x64xf32>
    %276 = vector.extract_strided_slice %275 {offsets = [0, 0], sizes = [2, 32], strides = [1, 1]} : vector<2x64xf32> to vector<2x32xf32>
    %277 = vector.extract_strided_slice %275 {offsets = [0, 32], sizes = [2, 32], strides = [1, 1]} : vector<2x64xf32> to vector<2x32xf32>
    %278 = vector.extract_strided_slice %266 {offsets = [0, 64], sizes = [2, 32], strides = [1, 1]} : vector<2x96xf32> to vector<2x32xf32>
    %279 = vector.extract_strided_slice %267 {offsets = [0, 64], sizes = [2, 32], strides = [1, 1]} : vector<2x96xf32> to vector<2x32xf32>
    %280 = arith.addf %279, %19 : vector<2x32xf32>
    %281 = arith.mulf %276, %280 : vector<2x32xf32>
    %282 = arith.addf %278, %281 : vector<2x32xf32>
    %283 = math.tanh %282 : vector<2x32xf32>
    %cst_53 = arith.constant 1.000000e+00 : f32
    %284 = vector.broadcast %cst_53 : f32 to vector<2x32xf32>
    %285 = arith.subf %284, %277 : vector<2x32xf32>
    %286 = arith.mulf %285, %283 : vector<2x32xf32>
    %287 = arith.mulf %277, %240 : vector<2x32xf32>
    %288 = arith.addf %286, %287 : vector<2x32xf32>
    %289 = vector.extract_strided_slice %14 {offsets = [2, 0, 0], sizes = [1, 2, 96], strides = [1, 1, 1]} : vector<8x2x96xf32> to vector<1x2x96xf32>
    %290 = vector.shape_cast %289 : vector<1x2x96xf32> to vector<2x96xf32>
    %cst_54 = arith.constant dense<0.000000e+00> : vector<2x96xf32>
    %291 = tpu.matmul %264, %16, %cst_54 {dimension_numbers = #tpu.dot_dimension_numbers<[1], [0], [0], [1], [0, 0, 1, 1], [], []>} : vector<2x32xf32>, vector<32x96xf32>, vector<2x96xf32> -> vector<2x96xf32>
    %292 = vector.extract_strided_slice %290 {offsets = [0, 0], sizes = [2, 64], strides = [1, 1]} : vector<2x96xf32> to vector<2x64xf32>
    %293 = vector.extract_strided_slice %291 {offsets = [0, 0], sizes = [2, 64], strides = [1, 1]} : vector<2x96xf32> to vector<2x64xf32>
    %294 = arith.addf %292, %293 : vector<2x64xf32>
    %295 = arith.negf %294 : vector<2x64xf32>
    %296 = math.exp %295 : vector<2x64xf32>
    %cst_55 = arith.constant 1.000000e+00 : f32
    %297 = vector.broadcast %cst_55 : f32 to vector<2x64xf32>
    %298 = arith.addf %297, %296 : vector<2x64xf32>
    %299 = arith.divf %297, %298 : vector<2x64xf32>
    %300 = vector.extract_strided_slice %299 {offsets = [0, 0], sizes = [2, 32], strides = [1, 1]} : vector<2x64xf32> to vector<2x32xf32>
    %301 = vector.extract_strided_slice %299 {offsets = [0, 32], sizes = [2, 32], strides = [1, 1]} : vector<2x64xf32> to vector<2x32xf32>
    %302 = vector.extract_strided_slice %290 {offsets = [0, 64], sizes = [2, 32], strides = [1, 1]} : vector<2x96xf32> to vector<2x32xf32>
    %303 = vector.extract_strided_slice %291 {offsets = [0, 64], sizes = [2, 32], strides = [1, 1]} : vector<2x96xf32> to vector<2x32xf32>
    %304 = arith.addf %303, %22 : vector<2x32xf32>
    %305 = arith.mulf %300, %304 : vector<2x32xf32>
    %306 = arith.addf %302, %305 : vector<2x32xf32>
    %307 = math.tanh %306 : vector<2x32xf32>
    %cst_56 = arith.constant 1.000000e+00 : f32
    %308 = vector.broadcast %cst_56 : f32 to vector<2x32xf32>
    %309 = arith.subf %308, %301 : vector<2x32xf32>
    %310 = arith.mulf %309, %307 : vector<2x32xf32>
    %311 = arith.mulf %301, %264 : vector<2x32xf32>
    %312 = arith.addf %310, %311 : vector<2x32xf32>
    %313 = vector.extract_strided_slice %7 {offsets = [6, 0, 0], sizes = [1, 2, 96], strides = [1, 1, 1]} : vector<8x2x96xf32> to vector<1x2x96xf32>
    %314 = vector.shape_cast %313 : vector<1x2x96xf32> to vector<2x96xf32>
    %cst_57 = arith.constant dense<0.000000e+00> : vector<2x96xf32>
    %315 = tpu.matmul %288, %15, %cst_57 {dimension_numbers = #tpu.dot_dimension_numbers<[1], [0], [0], [1], [0, 0, 1, 1], [], []>} : vector<2x32xf32>, vector<32x96xf32>, vector<2x96xf32> -> vector<2x96xf32>
    %316 = vector.extract_strided_slice %314 {offsets = [0, 0], sizes = [2, 64], strides = [1, 1]} : vector<2x96xf32> to vector<2x64xf32>
    %317 = vector.extract_strided_slice %315 {offsets = [0, 0], sizes = [2, 64], strides = [1, 1]} : vector<2x96xf32> to vector<2x64xf32>
    %318 = arith.addf %316, %317 : vector<2x64xf32>
    %319 = arith.negf %318 : vector<2x64xf32>
    %320 = math.exp %319 : vector<2x64xf32>
    %cst_58 = arith.constant 1.000000e+00 : f32
    %321 = vector.broadcast %cst_58 : f32 to vector<2x64xf32>
    %322 = arith.addf %321, %320 : vector<2x64xf32>
    %323 = arith.divf %321, %322 : vector<2x64xf32>
    %324 = vector.extract_strided_slice %323 {offsets = [0, 0], sizes = [2, 32], strides = [1, 1]} : vector<2x64xf32> to vector<2x32xf32>
    %325 = vector.extract_strided_slice %323 {offsets = [0, 32], sizes = [2, 32], strides = [1, 1]} : vector<2x64xf32> to vector<2x32xf32>
    %326 = vector.extract_strided_slice %314 {offsets = [0, 64], sizes = [2, 32], strides = [1, 1]} : vector<2x96xf32> to vector<2x32xf32>
    %327 = vector.extract_strided_slice %315 {offsets = [0, 64], sizes = [2, 32], strides = [1, 1]} : vector<2x96xf32> to vector<2x32xf32>
    %328 = arith.addf %327, %19 : vector<2x32xf32>
    %329 = arith.mulf %324, %328 : vector<2x32xf32>
    %330 = arith.addf %326, %329 : vector<2x32xf32>
    %331 = math.tanh %330 : vector<2x32xf32>
    %cst_59 = arith.constant 1.000000e+00 : f32
    %332 = vector.broadcast %cst_59 : f32 to vector<2x32xf32>
    %333 = arith.subf %332, %325 : vector<2x32xf32>
    %334 = arith.mulf %333, %331 : vector<2x32xf32>
    %335 = arith.mulf %325, %288 : vector<2x32xf32>
    %336 = arith.addf %334, %335 : vector<2x32xf32>
    %337 = vector.extract_strided_slice %14 {offsets = [1, 0, 0], sizes = [1, 2, 96], strides = [1, 1, 1]} : vector<8x2x96xf32> to vector<1x2x96xf32>
    %338 = vector.shape_cast %337 : vector<1x2x96xf32> to vector<2x96xf32>
    %cst_60 = arith.constant dense<0.000000e+00> : vector<2x96xf32>
    %339 = tpu.matmul %312, %16, %cst_60 {dimension_numbers = #tpu.dot_dimension_numbers<[1], [0], [0], [1], [0, 0, 1, 1], [], []>} : vector<2x32xf32>, vector<32x96xf32>, vector<2x96xf32> -> vector<2x96xf32>
    %340 = vector.extract_strided_slice %338 {offsets = [0, 0], sizes = [2, 64], strides = [1, 1]} : vector<2x96xf32> to vector<2x64xf32>
    %341 = vector.extract_strided_slice %339 {offsets = [0, 0], sizes = [2, 64], strides = [1, 1]} : vector<2x96xf32> to vector<2x64xf32>
    %342 = arith.addf %340, %341 : vector<2x64xf32>
    %343 = arith.negf %342 : vector<2x64xf32>
    %344 = math.exp %343 : vector<2x64xf32>
    %cst_61 = arith.constant 1.000000e+00 : f32
    %345 = vector.broadcast %cst_61 : f32 to vector<2x64xf32>
    %346 = arith.addf %345, %344 : vector<2x64xf32>
    %347 = arith.divf %345, %346 : vector<2x64xf32>
    %348 = vector.extract_strided_slice %347 {offsets = [0, 0], sizes = [2, 32], strides = [1, 1]} : vector<2x64xf32> to vector<2x32xf32>
    %349 = vector.extract_strided_slice %347 {offsets = [0, 32], sizes = [2, 32], strides = [1, 1]} : vector<2x64xf32> to vector<2x32xf32>
    %350 = vector.extract_strided_slice %338 {offsets = [0, 64], sizes = [2, 32], strides = [1, 1]} : vector<2x96xf32> to vector<2x32xf32>
    %351 = vector.extract_strided_slice %339 {offsets = [0, 64], sizes = [2, 32], strides = [1, 1]} : vector<2x96xf32> to vector<2x32xf32>
    %352 = arith.addf %351, %22 : vector<2x32xf32>
    %353 = arith.mulf %348, %352 : vector<2x32xf32>
    %354 = arith.addf %350, %353 : vector<2x32xf32>
    %355 = math.tanh %354 : vector<2x32xf32>
    %cst_62 = arith.constant 1.000000e+00 : f32
    %356 = vector.broadcast %cst_62 : f32 to vector<2x32xf32>
    %357 = arith.subf %356, %349 : vector<2x32xf32>
    %358 = arith.mulf %357, %355 : vector<2x32xf32>
    %359 = arith.mulf %349, %312 : vector<2x32xf32>
    %360 = arith.addf %358, %359 : vector<2x32xf32>
    %361 = vector.extract_strided_slice %7 {offsets = [7, 0, 0], sizes = [1, 2, 96], strides = [1, 1, 1]} : vector<8x2x96xf32> to vector<1x2x96xf32>
    %362 = vector.shape_cast %361 : vector<1x2x96xf32> to vector<2x96xf32>
    %cst_63 = arith.constant dense<0.000000e+00> : vector<2x96xf32>
    %363 = tpu.matmul %336, %15, %cst_63 {dimension_numbers = #tpu.dot_dimension_numbers<[1], [0], [0], [1], [0, 0, 1, 1], [], []>} : vector<2x32xf32>, vector<32x96xf32>, vector<2x96xf32> -> vector<2x96xf32>
    %364 = vector.extract_strided_slice %362 {offsets = [0, 0], sizes = [2, 64], strides = [1, 1]} : vector<2x96xf32> to vector<2x64xf32>
    %365 = vector.extract_strided_slice %363 {offsets = [0, 0], sizes = [2, 64], strides = [1, 1]} : vector<2x96xf32> to vector<2x64xf32>
    %366 = arith.addf %364, %365 : vector<2x64xf32>
    %367 = arith.negf %366 : vector<2x64xf32>
    %368 = math.exp %367 : vector<2x64xf32>
    %cst_64 = arith.constant 1.000000e+00 : f32
    %369 = vector.broadcast %cst_64 : f32 to vector<2x64xf32>
    %370 = arith.addf %369, %368 : vector<2x64xf32>
    %371 = arith.divf %369, %370 : vector<2x64xf32>
    %372 = vector.extract_strided_slice %371 {offsets = [0, 0], sizes = [2, 32], strides = [1, 1]} : vector<2x64xf32> to vector<2x32xf32>
    %373 = vector.extract_strided_slice %371 {offsets = [0, 32], sizes = [2, 32], strides = [1, 1]} : vector<2x64xf32> to vector<2x32xf32>
    %374 = vector.extract_strided_slice %362 {offsets = [0, 64], sizes = [2, 32], strides = [1, 1]} : vector<2x96xf32> to vector<2x32xf32>
    %375 = vector.extract_strided_slice %363 {offsets = [0, 64], sizes = [2, 32], strides = [1, 1]} : vector<2x96xf32> to vector<2x32xf32>
    %376 = arith.addf %375, %19 : vector<2x32xf32>
    %377 = arith.mulf %372, %376 : vector<2x32xf32>
    %378 = arith.addf %374, %377 : vector<2x32xf32>
    %379 = math.tanh %378 : vector<2x32xf32>
    %cst_65 = arith.constant 1.000000e+00 : f32
    %380 = vector.broadcast %cst_65 : f32 to vector<2x32xf32>
    %381 = arith.subf %380, %373 : vector<2x32xf32>
    %382 = arith.mulf %381, %379 : vector<2x32xf32>
    %383 = arith.mulf %373, %336 : vector<2x32xf32>
    %384 = arith.addf %382, %383 : vector<2x32xf32>
    %385 = vector.extract_strided_slice %14 {offsets = [0, 0, 0], sizes = [1, 2, 96], strides = [1, 1, 1]} : vector<8x2x96xf32> to vector<1x2x96xf32>
    %386 = vector.shape_cast %385 : vector<1x2x96xf32> to vector<2x96xf32>
    %cst_66 = arith.constant dense<0.000000e+00> : vector<2x96xf32>
    %387 = tpu.matmul %360, %16, %cst_66 {dimension_numbers = #tpu.dot_dimension_numbers<[1], [0], [0], [1], [0, 0, 1, 1], [], []>} : vector<2x32xf32>, vector<32x96xf32>, vector<2x96xf32> -> vector<2x96xf32>
    %388 = vector.extract_strided_slice %386 {offsets = [0, 0], sizes = [2, 64], strides = [1, 1]} : vector<2x96xf32> to vector<2x64xf32>
    %389 = vector.extract_strided_slice %387 {offsets = [0, 0], sizes = [2, 64], strides = [1, 1]} : vector<2x96xf32> to vector<2x64xf32>
    %390 = arith.addf %388, %389 : vector<2x64xf32>
    %391 = arith.negf %390 : vector<2x64xf32>
    %392 = math.exp %391 : vector<2x64xf32>
    %cst_67 = arith.constant 1.000000e+00 : f32
    %393 = vector.broadcast %cst_67 : f32 to vector<2x64xf32>
    %394 = arith.addf %393, %392 : vector<2x64xf32>
    %395 = arith.divf %393, %394 : vector<2x64xf32>
    %396 = vector.extract_strided_slice %395 {offsets = [0, 0], sizes = [2, 32], strides = [1, 1]} : vector<2x64xf32> to vector<2x32xf32>
    %397 = vector.extract_strided_slice %395 {offsets = [0, 32], sizes = [2, 32], strides = [1, 1]} : vector<2x64xf32> to vector<2x32xf32>
    %398 = vector.extract_strided_slice %386 {offsets = [0, 64], sizes = [2, 32], strides = [1, 1]} : vector<2x96xf32> to vector<2x32xf32>
    %399 = vector.extract_strided_slice %387 {offsets = [0, 64], sizes = [2, 32], strides = [1, 1]} : vector<2x96xf32> to vector<2x32xf32>
    %400 = arith.addf %399, %22 : vector<2x32xf32>
    %401 = arith.mulf %396, %400 : vector<2x32xf32>
    %402 = arith.addf %398, %401 : vector<2x32xf32>
    %403 = math.tanh %402 : vector<2x32xf32>
    %cst_68 = arith.constant 1.000000e+00 : f32
    %404 = vector.broadcast %cst_68 : f32 to vector<2x32xf32>
    %405 = arith.subf %404, %397 : vector<2x32xf32>
    %406 = arith.mulf %405, %403 : vector<2x32xf32>
    %407 = arith.mulf %397, %360 : vector<2x32xf32>
    %408 = arith.addf %406, %407 : vector<2x32xf32>
    %409 = vector.shape_cast %48 : vector<2x32xf32> to vector<1x2x32xf32>
    %410 = vector.shape_cast %96 : vector<2x32xf32> to vector<1x2x32xf32>
    %411 = vector.shape_cast %144 : vector<2x32xf32> to vector<1x2x32xf32>
    %412 = vector.shape_cast %192 : vector<2x32xf32> to vector<1x2x32xf32>
    %413 = vector.shape_cast %240 : vector<2x32xf32> to vector<1x2x32xf32>
    %414 = vector.shape_cast %288 : vector<2x32xf32> to vector<1x2x32xf32>
    %415 = vector.shape_cast %336 : vector<2x32xf32> to vector<1x2x32xf32>
    %416 = vector.shape_cast %384 : vector<2x32xf32> to vector<1x2x32xf32>
    %417 = tpu.concatenate %409, %410, %411, %412, %413, %414, %415, %416 in 0 : vector<1x2x32xf32>, vector<1x2x32xf32>, vector<1x2x32xf32>, vector<1x2x32xf32>, vector<1x2x32xf32>, vector<1x2x32xf32>, vector<1x2x32xf32>, vector<1x2x32xf32> -> vector<8x2x32xf32>
    %418 = vector.shape_cast %408 : vector<2x32xf32> to vector<1x2x32xf32>
    %419 = vector.shape_cast %360 : vector<2x32xf32> to vector<1x2x32xf32>
    %420 = vector.shape_cast %312 : vector<2x32xf32> to vector<1x2x32xf32>
    %421 = vector.shape_cast %264 : vector<2x32xf32> to vector<1x2x32xf32>
    %422 = vector.shape_cast %216 : vector<2x32xf32> to vector<1x2x32xf32>
    %423 = vector.shape_cast %168 : vector<2x32xf32> to vector<1x2x32xf32>
    %424 = vector.shape_cast %120 : vector<2x32xf32> to vector<1x2x32xf32>
    %425 = vector.shape_cast %72 : vector<2x32xf32> to vector<1x2x32xf32>
    %426 = tpu.concatenate %418, %419, %420, %421, %422, %423, %424, %425 in 0 : vector<1x2x32xf32>, vector<1x2x32xf32>, vector<1x2x32xf32>, vector<1x2x32xf32>, vector<1x2x32xf32>, vector<1x2x32xf32>, vector<1x2x32xf32>, vector<1x2x32xf32> -> vector<8x2x32xf32>
    %427 = tpu.concatenate %417, %426 in 2 : vector<8x2x32xf32>, vector<8x2x32xf32> -> vector<8x2x64xf32>
    %428 = vector.shape_cast %427 : vector<8x2x64xf32> to vector<16x64xf32>
    %c0_69 = arith.constant 0 : index
    %c0_70 = arith.constant 0 : index
    %429 = vector.load %arg10[%c0_69, %c0_70] : memref<64x96xf32, #tpu.memory_space<vmem>>, vector<64x96xf32>
    %cst_71 = arith.constant dense<0.000000e+00> : vector<16x96xf32>
    %430 = tpu.matmul %428, %429, %cst_71 {dimension_numbers = #tpu.dot_dimension_numbers<[1], [0], [0], [1], [0, 0, 1, 1], [], []>} : vector<16x64xf32>, vector<64x96xf32>, vector<16x96xf32> -> vector<16x96xf32>
    %c0_72 = arith.constant 0 : index
    %c0_73 = arith.constant 0 : index
    %431 = vector.load %arg12[%c0_72, %c0_73] : memref<1x96xf32, #tpu.memory_space<vmem>>, vector<1x96xf32>
    %432 = vector.broadcast %431 : vector<1x96xf32> to vector<16x96xf32>
    %433 = arith.addf %430, %432 : vector<16x96xf32>
    %434 = vector.shape_cast %433 : vector<16x96xf32> to vector<8x2x96xf32>
    %435 = vector.shape_cast %427 : vector<8x2x64xf32> to vector<16x64xf32>
    %c0_74 = arith.constant 0 : index
    %c0_75 = arith.constant 0 : index
    %436 = vector.load %arg14[%c0_74, %c0_75] : memref<64x96xf32, #tpu.memory_space<vmem>>, vector<64x96xf32>
    %cst_76 = arith.constant dense<0.000000e+00> : vector<16x96xf32>
    %437 = tpu.matmul %435, %436, %cst_76 {dimension_numbers = #tpu.dot_dimension_numbers<[1], [0], [0], [1], [0, 0, 1, 1], [], []>} : vector<16x64xf32>, vector<64x96xf32>, vector<16x96xf32> -> vector<16x96xf32>
    %c0_77 = arith.constant 0 : index
    %c0_78 = arith.constant 0 : index
    %438 = vector.load %arg16[%c0_77, %c0_78] : memref<1x96xf32, #tpu.memory_space<vmem>>, vector<1x96xf32>
    %439 = vector.broadcast %438 : vector<1x96xf32> to vector<16x96xf32>
    %440 = arith.addf %437, %439 : vector<16x96xf32>
    %441 = vector.shape_cast %440 : vector<16x96xf32> to vector<8x2x96xf32>
    %c0_79 = arith.constant 0 : index
    %c0_80 = arith.constant 0 : index
    %442 = vector.load %arg11[%c0_79, %c0_80] : memref<32x96xf32, #tpu.memory_space<vmem>>, vector<32x96xf32>
    %c0_81 = arith.constant 0 : index
    %c0_82 = arith.constant 0 : index
    %443 = vector.load %arg15[%c0_81, %c0_82] : memref<32x96xf32, #tpu.memory_space<vmem>>, vector<32x96xf32>
    %c0_83 = arith.constant 0 : index
    %c0_84 = arith.constant 0 : index
    %444 = vector.load %arg13[%c0_83, %c0_84] : memref<1x32xf32, #tpu.memory_space<vmem>>, vector<1x32xf32>
    %445 = vector.shape_cast %444 : vector<1x32xf32> to vector<1x32xf32>
    %446 = vector.broadcast %445 : vector<1x32xf32> to vector<2x32xf32>
    %c0_85 = arith.constant 0 : index
    %c0_86 = arith.constant 0 : index
    %447 = vector.load %arg17[%c0_85, %c0_86] : memref<1x32xf32, #tpu.memory_space<vmem>>, vector<1x32xf32>
    %448 = vector.shape_cast %447 : vector<1x32xf32> to vector<1x32xf32>
    %449 = vector.broadcast %448 : vector<1x32xf32> to vector<2x32xf32>
    %cst_87 = arith.constant 0.000000e+00 : f32
    %450 = vector.broadcast %cst_87 : f32 to vector<2x32xf32>
    %cst_88 = arith.constant 0.000000e+00 : f32
    %451 = vector.broadcast %cst_88 : f32 to vector<2x32xf32>
    %452 = vector.extract_strided_slice %434 {offsets = [0, 0, 0], sizes = [1, 2, 96], strides = [1, 1, 1]} : vector<8x2x96xf32> to vector<1x2x96xf32>
    %453 = vector.shape_cast %452 : vector<1x2x96xf32> to vector<2x96xf32>
    %cst_89 = arith.constant dense<0.000000e+00> : vector<2x96xf32>
    %454 = tpu.matmul %450, %442, %cst_89 {dimension_numbers = #tpu.dot_dimension_numbers<[1], [0], [0], [1], [0, 0, 1, 1], [], []>} : vector<2x32xf32>, vector<32x96xf32>, vector<2x96xf32> -> vector<2x96xf32>
    %455 = vector.extract_strided_slice %453 {offsets = [0, 0], sizes = [2, 64], strides = [1, 1]} : vector<2x96xf32> to vector<2x64xf32>
    %456 = vector.extract_strided_slice %454 {offsets = [0, 0], sizes = [2, 64], strides = [1, 1]} : vector<2x96xf32> to vector<2x64xf32>
    %457 = arith.addf %455, %456 : vector<2x64xf32>
    %458 = arith.negf %457 : vector<2x64xf32>
    %459 = math.exp %458 : vector<2x64xf32>
    %cst_90 = arith.constant 1.000000e+00 : f32
    %460 = vector.broadcast %cst_90 : f32 to vector<2x64xf32>
    %461 = arith.addf %460, %459 : vector<2x64xf32>
    %462 = arith.divf %460, %461 : vector<2x64xf32>
    %463 = vector.extract_strided_slice %462 {offsets = [0, 0], sizes = [2, 32], strides = [1, 1]} : vector<2x64xf32> to vector<2x32xf32>
    %464 = vector.extract_strided_slice %462 {offsets = [0, 32], sizes = [2, 32], strides = [1, 1]} : vector<2x64xf32> to vector<2x32xf32>
    %465 = vector.extract_strided_slice %453 {offsets = [0, 64], sizes = [2, 32], strides = [1, 1]} : vector<2x96xf32> to vector<2x32xf32>
    %466 = vector.extract_strided_slice %454 {offsets = [0, 64], sizes = [2, 32], strides = [1, 1]} : vector<2x96xf32> to vector<2x32xf32>
    %467 = arith.addf %466, %446 : vector<2x32xf32>
    %468 = arith.mulf %463, %467 : vector<2x32xf32>
    %469 = arith.addf %465, %468 : vector<2x32xf32>
    %470 = math.tanh %469 : vector<2x32xf32>
    %cst_91 = arith.constant 1.000000e+00 : f32
    %471 = vector.broadcast %cst_91 : f32 to vector<2x32xf32>
    %472 = arith.subf %471, %464 : vector<2x32xf32>
    %473 = arith.mulf %472, %470 : vector<2x32xf32>
    %474 = arith.mulf %464, %450 : vector<2x32xf32>
    %475 = arith.addf %473, %474 : vector<2x32xf32>
    %476 = vector.extract_strided_slice %441 {offsets = [7, 0, 0], sizes = [1, 2, 96], strides = [1, 1, 1]} : vector<8x2x96xf32> to vector<1x2x96xf32>
    %477 = vector.shape_cast %476 : vector<1x2x96xf32> to vector<2x96xf32>
    %cst_92 = arith.constant dense<0.000000e+00> : vector<2x96xf32>
    %478 = tpu.matmul %451, %443, %cst_92 {dimension_numbers = #tpu.dot_dimension_numbers<[1], [0], [0], [1], [0, 0, 1, 1], [], []>} : vector<2x32xf32>, vector<32x96xf32>, vector<2x96xf32> -> vector<2x96xf32>
    %479 = vector.extract_strided_slice %477 {offsets = [0, 0], sizes = [2, 64], strides = [1, 1]} : vector<2x96xf32> to vector<2x64xf32>
    %480 = vector.extract_strided_slice %478 {offsets = [0, 0], sizes = [2, 64], strides = [1, 1]} : vector<2x96xf32> to vector<2x64xf32>
    %481 = arith.addf %479, %480 : vector<2x64xf32>
    %482 = arith.negf %481 : vector<2x64xf32>
    %483 = math.exp %482 : vector<2x64xf32>
    %cst_93 = arith.constant 1.000000e+00 : f32
    %484 = vector.broadcast %cst_93 : f32 to vector<2x64xf32>
    %485 = arith.addf %484, %483 : vector<2x64xf32>
    %486 = arith.divf %484, %485 : vector<2x64xf32>
    %487 = vector.extract_strided_slice %486 {offsets = [0, 0], sizes = [2, 32], strides = [1, 1]} : vector<2x64xf32> to vector<2x32xf32>
    %488 = vector.extract_strided_slice %486 {offsets = [0, 32], sizes = [2, 32], strides = [1, 1]} : vector<2x64xf32> to vector<2x32xf32>
    %489 = vector.extract_strided_slice %477 {offsets = [0, 64], sizes = [2, 32], strides = [1, 1]} : vector<2x96xf32> to vector<2x32xf32>
    %490 = vector.extract_strided_slice %478 {offsets = [0, 64], sizes = [2, 32], strides = [1, 1]} : vector<2x96xf32> to vector<2x32xf32>
    %491 = arith.addf %490, %449 : vector<2x32xf32>
    %492 = arith.mulf %487, %491 : vector<2x32xf32>
    %493 = arith.addf %489, %492 : vector<2x32xf32>
    %494 = math.tanh %493 : vector<2x32xf32>
    %cst_94 = arith.constant 1.000000e+00 : f32
    %495 = vector.broadcast %cst_94 : f32 to vector<2x32xf32>
    %496 = arith.subf %495, %488 : vector<2x32xf32>
    %497 = arith.mulf %496, %494 : vector<2x32xf32>
    %498 = arith.mulf %488, %451 : vector<2x32xf32>
    %499 = arith.addf %497, %498 : vector<2x32xf32>
    %500 = vector.extract_strided_slice %434 {offsets = [1, 0, 0], sizes = [1, 2, 96], strides = [1, 1, 1]} : vector<8x2x96xf32> to vector<1x2x96xf32>
    %501 = vector.shape_cast %500 : vector<1x2x96xf32> to vector<2x96xf32>
    %cst_95 = arith.constant dense<0.000000e+00> : vector<2x96xf32>
    %502 = tpu.matmul %475, %442, %cst_95 {dimension_numbers = #tpu.dot_dimension_numbers<[1], [0], [0], [1], [0, 0, 1, 1], [], []>} : vector<2x32xf32>, vector<32x96xf32>, vector<2x96xf32> -> vector<2x96xf32>
    %503 = vector.extract_strided_slice %501 {offsets = [0, 0], sizes = [2, 64], strides = [1, 1]} : vector<2x96xf32> to vector<2x64xf32>
    %504 = vector.extract_strided_slice %502 {offsets = [0, 0], sizes = [2, 64], strides = [1, 1]} : vector<2x96xf32> to vector<2x64xf32>
    %505 = arith.addf %503, %504 : vector<2x64xf32>
    %506 = arith.negf %505 : vector<2x64xf32>
    %507 = math.exp %506 : vector<2x64xf32>
    %cst_96 = arith.constant 1.000000e+00 : f32
    %508 = vector.broadcast %cst_96 : f32 to vector<2x64xf32>
    %509 = arith.addf %508, %507 : vector<2x64xf32>
    %510 = arith.divf %508, %509 : vector<2x64xf32>
    %511 = vector.extract_strided_slice %510 {offsets = [0, 0], sizes = [2, 32], strides = [1, 1]} : vector<2x64xf32> to vector<2x32xf32>
    %512 = vector.extract_strided_slice %510 {offsets = [0, 32], sizes = [2, 32], strides = [1, 1]} : vector<2x64xf32> to vector<2x32xf32>
    %513 = vector.extract_strided_slice %501 {offsets = [0, 64], sizes = [2, 32], strides = [1, 1]} : vector<2x96xf32> to vector<2x32xf32>
    %514 = vector.extract_strided_slice %502 {offsets = [0, 64], sizes = [2, 32], strides = [1, 1]} : vector<2x96xf32> to vector<2x32xf32>
    %515 = arith.addf %514, %446 : vector<2x32xf32>
    %516 = arith.mulf %511, %515 : vector<2x32xf32>
    %517 = arith.addf %513, %516 : vector<2x32xf32>
    %518 = math.tanh %517 : vector<2x32xf32>
    %cst_97 = arith.constant 1.000000e+00 : f32
    %519 = vector.broadcast %cst_97 : f32 to vector<2x32xf32>
    %520 = arith.subf %519, %512 : vector<2x32xf32>
    %521 = arith.mulf %520, %518 : vector<2x32xf32>
    %522 = arith.mulf %512, %475 : vector<2x32xf32>
    %523 = arith.addf %521, %522 : vector<2x32xf32>
    %524 = vector.extract_strided_slice %441 {offsets = [6, 0, 0], sizes = [1, 2, 96], strides = [1, 1, 1]} : vector<8x2x96xf32> to vector<1x2x96xf32>
    %525 = vector.shape_cast %524 : vector<1x2x96xf32> to vector<2x96xf32>
    %cst_98 = arith.constant dense<0.000000e+00> : vector<2x96xf32>
    %526 = tpu.matmul %499, %443, %cst_98 {dimension_numbers = #tpu.dot_dimension_numbers<[1], [0], [0], [1], [0, 0, 1, 1], [], []>} : vector<2x32xf32>, vector<32x96xf32>, vector<2x96xf32> -> vector<2x96xf32>
    %527 = vector.extract_strided_slice %525 {offsets = [0, 0], sizes = [2, 64], strides = [1, 1]} : vector<2x96xf32> to vector<2x64xf32>
    %528 = vector.extract_strided_slice %526 {offsets = [0, 0], sizes = [2, 64], strides = [1, 1]} : vector<2x96xf32> to vector<2x64xf32>
    %529 = arith.addf %527, %528 : vector<2x64xf32>
    %530 = arith.negf %529 : vector<2x64xf32>
    %531 = math.exp %530 : vector<2x64xf32>
    %cst_99 = arith.constant 1.000000e+00 : f32
    %532 = vector.broadcast %cst_99 : f32 to vector<2x64xf32>
    %533 = arith.addf %532, %531 : vector<2x64xf32>
    %534 = arith.divf %532, %533 : vector<2x64xf32>
    %535 = vector.extract_strided_slice %534 {offsets = [0, 0], sizes = [2, 32], strides = [1, 1]} : vector<2x64xf32> to vector<2x32xf32>
    %536 = vector.extract_strided_slice %534 {offsets = [0, 32], sizes = [2, 32], strides = [1, 1]} : vector<2x64xf32> to vector<2x32xf32>
    %537 = vector.extract_strided_slice %525 {offsets = [0, 64], sizes = [2, 32], strides = [1, 1]} : vector<2x96xf32> to vector<2x32xf32>
    %538 = vector.extract_strided_slice %526 {offsets = [0, 64], sizes = [2, 32], strides = [1, 1]} : vector<2x96xf32> to vector<2x32xf32>
    %539 = arith.addf %538, %449 : vector<2x32xf32>
    %540 = arith.mulf %535, %539 : vector<2x32xf32>
    %541 = arith.addf %537, %540 : vector<2x32xf32>
    %542 = math.tanh %541 : vector<2x32xf32>
    %cst_100 = arith.constant 1.000000e+00 : f32
    %543 = vector.broadcast %cst_100 : f32 to vector<2x32xf32>
    %544 = arith.subf %543, %536 : vector<2x32xf32>
    %545 = arith.mulf %544, %542 : vector<2x32xf32>
    %546 = arith.mulf %536, %499 : vector<2x32xf32>
    %547 = arith.addf %545, %546 : vector<2x32xf32>
    %548 = vector.extract_strided_slice %434 {offsets = [2, 0, 0], sizes = [1, 2, 96], strides = [1, 1, 1]} : vector<8x2x96xf32> to vector<1x2x96xf32>
    %549 = vector.shape_cast %548 : vector<1x2x96xf32> to vector<2x96xf32>
    %cst_101 = arith.constant dense<0.000000e+00> : vector<2x96xf32>
    %550 = tpu.matmul %523, %442, %cst_101 {dimension_numbers = #tpu.dot_dimension_numbers<[1], [0], [0], [1], [0, 0, 1, 1], [], []>} : vector<2x32xf32>, vector<32x96xf32>, vector<2x96xf32> -> vector<2x96xf32>
    %551 = vector.extract_strided_slice %549 {offsets = [0, 0], sizes = [2, 64], strides = [1, 1]} : vector<2x96xf32> to vector<2x64xf32>
    %552 = vector.extract_strided_slice %550 {offsets = [0, 0], sizes = [2, 64], strides = [1, 1]} : vector<2x96xf32> to vector<2x64xf32>
    %553 = arith.addf %551, %552 : vector<2x64xf32>
    %554 = arith.negf %553 : vector<2x64xf32>
    %555 = math.exp %554 : vector<2x64xf32>
    %cst_102 = arith.constant 1.000000e+00 : f32
    %556 = vector.broadcast %cst_102 : f32 to vector<2x64xf32>
    %557 = arith.addf %556, %555 : vector<2x64xf32>
    %558 = arith.divf %556, %557 : vector<2x64xf32>
    %559 = vector.extract_strided_slice %558 {offsets = [0, 0], sizes = [2, 32], strides = [1, 1]} : vector<2x64xf32> to vector<2x32xf32>
    %560 = vector.extract_strided_slice %558 {offsets = [0, 32], sizes = [2, 32], strides = [1, 1]} : vector<2x64xf32> to vector<2x32xf32>
    %561 = vector.extract_strided_slice %549 {offsets = [0, 64], sizes = [2, 32], strides = [1, 1]} : vector<2x96xf32> to vector<2x32xf32>
    %562 = vector.extract_strided_slice %550 {offsets = [0, 64], sizes = [2, 32], strides = [1, 1]} : vector<2x96xf32> to vector<2x32xf32>
    %563 = arith.addf %562, %446 : vector<2x32xf32>
    %564 = arith.mulf %559, %563 : vector<2x32xf32>
    %565 = arith.addf %561, %564 : vector<2x32xf32>
    %566 = math.tanh %565 : vector<2x32xf32>
    %cst_103 = arith.constant 1.000000e+00 : f32
    %567 = vector.broadcast %cst_103 : f32 to vector<2x32xf32>
    %568 = arith.subf %567, %560 : vector<2x32xf32>
    %569 = arith.mulf %568, %566 : vector<2x32xf32>
    %570 = arith.mulf %560, %523 : vector<2x32xf32>
    %571 = arith.addf %569, %570 : vector<2x32xf32>
    %572 = vector.extract_strided_slice %441 {offsets = [5, 0, 0], sizes = [1, 2, 96], strides = [1, 1, 1]} : vector<8x2x96xf32> to vector<1x2x96xf32>
    %573 = vector.shape_cast %572 : vector<1x2x96xf32> to vector<2x96xf32>
    %cst_104 = arith.constant dense<0.000000e+00> : vector<2x96xf32>
    %574 = tpu.matmul %547, %443, %cst_104 {dimension_numbers = #tpu.dot_dimension_numbers<[1], [0], [0], [1], [0, 0, 1, 1], [], []>} : vector<2x32xf32>, vector<32x96xf32>, vector<2x96xf32> -> vector<2x96xf32>
    %575 = vector.extract_strided_slice %573 {offsets = [0, 0], sizes = [2, 64], strides = [1, 1]} : vector<2x96xf32> to vector<2x64xf32>
    %576 = vector.extract_strided_slice %574 {offsets = [0, 0], sizes = [2, 64], strides = [1, 1]} : vector<2x96xf32> to vector<2x64xf32>
    %577 = arith.addf %575, %576 : vector<2x64xf32>
    %578 = arith.negf %577 : vector<2x64xf32>
    %579 = math.exp %578 : vector<2x64xf32>
    %cst_105 = arith.constant 1.000000e+00 : f32
    %580 = vector.broadcast %cst_105 : f32 to vector<2x64xf32>
    %581 = arith.addf %580, %579 : vector<2x64xf32>
    %582 = arith.divf %580, %581 : vector<2x64xf32>
    %583 = vector.extract_strided_slice %582 {offsets = [0, 0], sizes = [2, 32], strides = [1, 1]} : vector<2x64xf32> to vector<2x32xf32>
    %584 = vector.extract_strided_slice %582 {offsets = [0, 32], sizes = [2, 32], strides = [1, 1]} : vector<2x64xf32> to vector<2x32xf32>
    %585 = vector.extract_strided_slice %573 {offsets = [0, 64], sizes = [2, 32], strides = [1, 1]} : vector<2x96xf32> to vector<2x32xf32>
    %586 = vector.extract_strided_slice %574 {offsets = [0, 64], sizes = [2, 32], strides = [1, 1]} : vector<2x96xf32> to vector<2x32xf32>
    %587 = arith.addf %586, %449 : vector<2x32xf32>
    %588 = arith.mulf %583, %587 : vector<2x32xf32>
    %589 = arith.addf %585, %588 : vector<2x32xf32>
    %590 = math.tanh %589 : vector<2x32xf32>
    %cst_106 = arith.constant 1.000000e+00 : f32
    %591 = vector.broadcast %cst_106 : f32 to vector<2x32xf32>
    %592 = arith.subf %591, %584 : vector<2x32xf32>
    %593 = arith.mulf %592, %590 : vector<2x32xf32>
    %594 = arith.mulf %584, %547 : vector<2x32xf32>
    %595 = arith.addf %593, %594 : vector<2x32xf32>
    %596 = vector.extract_strided_slice %434 {offsets = [3, 0, 0], sizes = [1, 2, 96], strides = [1, 1, 1]} : vector<8x2x96xf32> to vector<1x2x96xf32>
    %597 = vector.shape_cast %596 : vector<1x2x96xf32> to vector<2x96xf32>
    %cst_107 = arith.constant dense<0.000000e+00> : vector<2x96xf32>
    %598 = tpu.matmul %571, %442, %cst_107 {dimension_numbers = #tpu.dot_dimension_numbers<[1], [0], [0], [1], [0, 0, 1, 1], [], []>} : vector<2x32xf32>, vector<32x96xf32>, vector<2x96xf32> -> vector<2x96xf32>
    %599 = vector.extract_strided_slice %597 {offsets = [0, 0], sizes = [2, 64], strides = [1, 1]} : vector<2x96xf32> to vector<2x64xf32>
    %600 = vector.extract_strided_slice %598 {offsets = [0, 0], sizes = [2, 64], strides = [1, 1]} : vector<2x96xf32> to vector<2x64xf32>
    %601 = arith.addf %599, %600 : vector<2x64xf32>
    %602 = arith.negf %601 : vector<2x64xf32>
    %603 = math.exp %602 : vector<2x64xf32>
    %cst_108 = arith.constant 1.000000e+00 : f32
    %604 = vector.broadcast %cst_108 : f32 to vector<2x64xf32>
    %605 = arith.addf %604, %603 : vector<2x64xf32>
    %606 = arith.divf %604, %605 : vector<2x64xf32>
    %607 = vector.extract_strided_slice %606 {offsets = [0, 0], sizes = [2, 32], strides = [1, 1]} : vector<2x64xf32> to vector<2x32xf32>
    %608 = vector.extract_strided_slice %606 {offsets = [0, 32], sizes = [2, 32], strides = [1, 1]} : vector<2x64xf32> to vector<2x32xf32>
    %609 = vector.extract_strided_slice %597 {offsets = [0, 64], sizes = [2, 32], strides = [1, 1]} : vector<2x96xf32> to vector<2x32xf32>
    %610 = vector.extract_strided_slice %598 {offsets = [0, 64], sizes = [2, 32], strides = [1, 1]} : vector<2x96xf32> to vector<2x32xf32>
    %611 = arith.addf %610, %446 : vector<2x32xf32>
    %612 = arith.mulf %607, %611 : vector<2x32xf32>
    %613 = arith.addf %609, %612 : vector<2x32xf32>
    %614 = math.tanh %613 : vector<2x32xf32>
    %cst_109 = arith.constant 1.000000e+00 : f32
    %615 = vector.broadcast %cst_109 : f32 to vector<2x32xf32>
    %616 = arith.subf %615, %608 : vector<2x32xf32>
    %617 = arith.mulf %616, %614 : vector<2x32xf32>
    %618 = arith.mulf %608, %571 : vector<2x32xf32>
    %619 = arith.addf %617, %618 : vector<2x32xf32>
    %620 = vector.extract_strided_slice %441 {offsets = [4, 0, 0], sizes = [1, 2, 96], strides = [1, 1, 1]} : vector<8x2x96xf32> to vector<1x2x96xf32>
    %621 = vector.shape_cast %620 : vector<1x2x96xf32> to vector<2x96xf32>
    %cst_110 = arith.constant dense<0.000000e+00> : vector<2x96xf32>
    %622 = tpu.matmul %595, %443, %cst_110 {dimension_numbers = #tpu.dot_dimension_numbers<[1], [0], [0], [1], [0, 0, 1, 1], [], []>} : vector<2x32xf32>, vector<32x96xf32>, vector<2x96xf32> -> vector<2x96xf32>
    %623 = vector.extract_strided_slice %621 {offsets = [0, 0], sizes = [2, 64], strides = [1, 1]} : vector<2x96xf32> to vector<2x64xf32>
    %624 = vector.extract_strided_slice %622 {offsets = [0, 0], sizes = [2, 64], strides = [1, 1]} : vector<2x96xf32> to vector<2x64xf32>
    %625 = arith.addf %623, %624 : vector<2x64xf32>
    %626 = arith.negf %625 : vector<2x64xf32>
    %627 = math.exp %626 : vector<2x64xf32>
    %cst_111 = arith.constant 1.000000e+00 : f32
    %628 = vector.broadcast %cst_111 : f32 to vector<2x64xf32>
    %629 = arith.addf %628, %627 : vector<2x64xf32>
    %630 = arith.divf %628, %629 : vector<2x64xf32>
    %631 = vector.extract_strided_slice %630 {offsets = [0, 0], sizes = [2, 32], strides = [1, 1]} : vector<2x64xf32> to vector<2x32xf32>
    %632 = vector.extract_strided_slice %630 {offsets = [0, 32], sizes = [2, 32], strides = [1, 1]} : vector<2x64xf32> to vector<2x32xf32>
    %633 = vector.extract_strided_slice %621 {offsets = [0, 64], sizes = [2, 32], strides = [1, 1]} : vector<2x96xf32> to vector<2x32xf32>
    %634 = vector.extract_strided_slice %622 {offsets = [0, 64], sizes = [2, 32], strides = [1, 1]} : vector<2x96xf32> to vector<2x32xf32>
    %635 = arith.addf %634, %449 : vector<2x32xf32>
    %636 = arith.mulf %631, %635 : vector<2x32xf32>
    %637 = arith.addf %633, %636 : vector<2x32xf32>
    %638 = math.tanh %637 : vector<2x32xf32>
    %cst_112 = arith.constant 1.000000e+00 : f32
    %639 = vector.broadcast %cst_112 : f32 to vector<2x32xf32>
    %640 = arith.subf %639, %632 : vector<2x32xf32>
    %641 = arith.mulf %640, %638 : vector<2x32xf32>
    %642 = arith.mulf %632, %595 : vector<2x32xf32>
    %643 = arith.addf %641, %642 : vector<2x32xf32>
    %644 = vector.extract_strided_slice %434 {offsets = [4, 0, 0], sizes = [1, 2, 96], strides = [1, 1, 1]} : vector<8x2x96xf32> to vector<1x2x96xf32>
    %645 = vector.shape_cast %644 : vector<1x2x96xf32> to vector<2x96xf32>
    %cst_113 = arith.constant dense<0.000000e+00> : vector<2x96xf32>
    %646 = tpu.matmul %619, %442, %cst_113 {dimension_numbers = #tpu.dot_dimension_numbers<[1], [0], [0], [1], [0, 0, 1, 1], [], []>} : vector<2x32xf32>, vector<32x96xf32>, vector<2x96xf32> -> vector<2x96xf32>
    %647 = vector.extract_strided_slice %645 {offsets = [0, 0], sizes = [2, 64], strides = [1, 1]} : vector<2x96xf32> to vector<2x64xf32>
    %648 = vector.extract_strided_slice %646 {offsets = [0, 0], sizes = [2, 64], strides = [1, 1]} : vector<2x96xf32> to vector<2x64xf32>
    %649 = arith.addf %647, %648 : vector<2x64xf32>
    %650 = arith.negf %649 : vector<2x64xf32>
    %651 = math.exp %650 : vector<2x64xf32>
    %cst_114 = arith.constant 1.000000e+00 : f32
    %652 = vector.broadcast %cst_114 : f32 to vector<2x64xf32>
    %653 = arith.addf %652, %651 : vector<2x64xf32>
    %654 = arith.divf %652, %653 : vector<2x64xf32>
    %655 = vector.extract_strided_slice %654 {offsets = [0, 0], sizes = [2, 32], strides = [1, 1]} : vector<2x64xf32> to vector<2x32xf32>
    %656 = vector.extract_strided_slice %654 {offsets = [0, 32], sizes = [2, 32], strides = [1, 1]} : vector<2x64xf32> to vector<2x32xf32>
    %657 = vector.extract_strided_slice %645 {offsets = [0, 64], sizes = [2, 32], strides = [1, 1]} : vector<2x96xf32> to vector<2x32xf32>
    %658 = vector.extract_strided_slice %646 {offsets = [0, 64], sizes = [2, 32], strides = [1, 1]} : vector<2x96xf32> to vector<2x32xf32>
    %659 = arith.addf %658, %446 : vector<2x32xf32>
    %660 = arith.mulf %655, %659 : vector<2x32xf32>
    %661 = arith.addf %657, %660 : vector<2x32xf32>
    %662 = math.tanh %661 : vector<2x32xf32>
    %cst_115 = arith.constant 1.000000e+00 : f32
    %663 = vector.broadcast %cst_115 : f32 to vector<2x32xf32>
    %664 = arith.subf %663, %656 : vector<2x32xf32>
    %665 = arith.mulf %664, %662 : vector<2x32xf32>
    %666 = arith.mulf %656, %619 : vector<2x32xf32>
    %667 = arith.addf %665, %666 : vector<2x32xf32>
    %668 = vector.extract_strided_slice %441 {offsets = [3, 0, 0], sizes = [1, 2, 96], strides = [1, 1, 1]} : vector<8x2x96xf32> to vector<1x2x96xf32>
    %669 = vector.shape_cast %668 : vector<1x2x96xf32> to vector<2x96xf32>
    %cst_116 = arith.constant dense<0.000000e+00> : vector<2x96xf32>
    %670 = tpu.matmul %643, %443, %cst_116 {dimension_numbers = #tpu.dot_dimension_numbers<[1], [0], [0], [1], [0, 0, 1, 1], [], []>} : vector<2x32xf32>, vector<32x96xf32>, vector<2x96xf32> -> vector<2x96xf32>
    %671 = vector.extract_strided_slice %669 {offsets = [0, 0], sizes = [2, 64], strides = [1, 1]} : vector<2x96xf32> to vector<2x64xf32>
    %672 = vector.extract_strided_slice %670 {offsets = [0, 0], sizes = [2, 64], strides = [1, 1]} : vector<2x96xf32> to vector<2x64xf32>
    %673 = arith.addf %671, %672 : vector<2x64xf32>
    %674 = arith.negf %673 : vector<2x64xf32>
    %675 = math.exp %674 : vector<2x64xf32>
    %cst_117 = arith.constant 1.000000e+00 : f32
    %676 = vector.broadcast %cst_117 : f32 to vector<2x64xf32>
    %677 = arith.addf %676, %675 : vector<2x64xf32>
    %678 = arith.divf %676, %677 : vector<2x64xf32>
    %679 = vector.extract_strided_slice %678 {offsets = [0, 0], sizes = [2, 32], strides = [1, 1]} : vector<2x64xf32> to vector<2x32xf32>
    %680 = vector.extract_strided_slice %678 {offsets = [0, 32], sizes = [2, 32], strides = [1, 1]} : vector<2x64xf32> to vector<2x32xf32>
    %681 = vector.extract_strided_slice %669 {offsets = [0, 64], sizes = [2, 32], strides = [1, 1]} : vector<2x96xf32> to vector<2x32xf32>
    %682 = vector.extract_strided_slice %670 {offsets = [0, 64], sizes = [2, 32], strides = [1, 1]} : vector<2x96xf32> to vector<2x32xf32>
    %683 = arith.addf %682, %449 : vector<2x32xf32>
    %684 = arith.mulf %679, %683 : vector<2x32xf32>
    %685 = arith.addf %681, %684 : vector<2x32xf32>
    %686 = math.tanh %685 : vector<2x32xf32>
    %cst_118 = arith.constant 1.000000e+00 : f32
    %687 = vector.broadcast %cst_118 : f32 to vector<2x32xf32>
    %688 = arith.subf %687, %680 : vector<2x32xf32>
    %689 = arith.mulf %688, %686 : vector<2x32xf32>
    %690 = arith.mulf %680, %643 : vector<2x32xf32>
    %691 = arith.addf %689, %690 : vector<2x32xf32>
    %692 = vector.extract_strided_slice %434 {offsets = [5, 0, 0], sizes = [1, 2, 96], strides = [1, 1, 1]} : vector<8x2x96xf32> to vector<1x2x96xf32>
    %693 = vector.shape_cast %692 : vector<1x2x96xf32> to vector<2x96xf32>
    %cst_119 = arith.constant dense<0.000000e+00> : vector<2x96xf32>
    %694 = tpu.matmul %667, %442, %cst_119 {dimension_numbers = #tpu.dot_dimension_numbers<[1], [0], [0], [1], [0, 0, 1, 1], [], []>} : vector<2x32xf32>, vector<32x96xf32>, vector<2x96xf32> -> vector<2x96xf32>
    %695 = vector.extract_strided_slice %693 {offsets = [0, 0], sizes = [2, 64], strides = [1, 1]} : vector<2x96xf32> to vector<2x64xf32>
    %696 = vector.extract_strided_slice %694 {offsets = [0, 0], sizes = [2, 64], strides = [1, 1]} : vector<2x96xf32> to vector<2x64xf32>
    %697 = arith.addf %695, %696 : vector<2x64xf32>
    %698 = arith.negf %697 : vector<2x64xf32>
    %699 = math.exp %698 : vector<2x64xf32>
    %cst_120 = arith.constant 1.000000e+00 : f32
    %700 = vector.broadcast %cst_120 : f32 to vector<2x64xf32>
    %701 = arith.addf %700, %699 : vector<2x64xf32>
    %702 = arith.divf %700, %701 : vector<2x64xf32>
    %703 = vector.extract_strided_slice %702 {offsets = [0, 0], sizes = [2, 32], strides = [1, 1]} : vector<2x64xf32> to vector<2x32xf32>
    %704 = vector.extract_strided_slice %702 {offsets = [0, 32], sizes = [2, 32], strides = [1, 1]} : vector<2x64xf32> to vector<2x32xf32>
    %705 = vector.extract_strided_slice %693 {offsets = [0, 64], sizes = [2, 32], strides = [1, 1]} : vector<2x96xf32> to vector<2x32xf32>
    %706 = vector.extract_strided_slice %694 {offsets = [0, 64], sizes = [2, 32], strides = [1, 1]} : vector<2x96xf32> to vector<2x32xf32>
    %707 = arith.addf %706, %446 : vector<2x32xf32>
    %708 = arith.mulf %703, %707 : vector<2x32xf32>
    %709 = arith.addf %705, %708 : vector<2x32xf32>
    %710 = math.tanh %709 : vector<2x32xf32>
    %cst_121 = arith.constant 1.000000e+00 : f32
    %711 = vector.broadcast %cst_121 : f32 to vector<2x32xf32>
    %712 = arith.subf %711, %704 : vector<2x32xf32>
    %713 = arith.mulf %712, %710 : vector<2x32xf32>
    %714 = arith.mulf %704, %667 : vector<2x32xf32>
    %715 = arith.addf %713, %714 : vector<2x32xf32>
    %716 = vector.extract_strided_slice %441 {offsets = [2, 0, 0], sizes = [1, 2, 96], strides = [1, 1, 1]} : vector<8x2x96xf32> to vector<1x2x96xf32>
    %717 = vector.shape_cast %716 : vector<1x2x96xf32> to vector<2x96xf32>
    %cst_122 = arith.constant dense<0.000000e+00> : vector<2x96xf32>
    %718 = tpu.matmul %691, %443, %cst_122 {dimension_numbers = #tpu.dot_dimension_numbers<[1], [0], [0], [1], [0, 0, 1, 1], [], []>} : vector<2x32xf32>, vector<32x96xf32>, vector<2x96xf32> -> vector<2x96xf32>
    %719 = vector.extract_strided_slice %717 {offsets = [0, 0], sizes = [2, 64], strides = [1, 1]} : vector<2x96xf32> to vector<2x64xf32>
    %720 = vector.extract_strided_slice %718 {offsets = [0, 0], sizes = [2, 64], strides = [1, 1]} : vector<2x96xf32> to vector<2x64xf32>
    %721 = arith.addf %719, %720 : vector<2x64xf32>
    %722 = arith.negf %721 : vector<2x64xf32>
    %723 = math.exp %722 : vector<2x64xf32>
    %cst_123 = arith.constant 1.000000e+00 : f32
    %724 = vector.broadcast %cst_123 : f32 to vector<2x64xf32>
    %725 = arith.addf %724, %723 : vector<2x64xf32>
    %726 = arith.divf %724, %725 : vector<2x64xf32>
    %727 = vector.extract_strided_slice %726 {offsets = [0, 0], sizes = [2, 32], strides = [1, 1]} : vector<2x64xf32> to vector<2x32xf32>
    %728 = vector.extract_strided_slice %726 {offsets = [0, 32], sizes = [2, 32], strides = [1, 1]} : vector<2x64xf32> to vector<2x32xf32>
    %729 = vector.extract_strided_slice %717 {offsets = [0, 64], sizes = [2, 32], strides = [1, 1]} : vector<2x96xf32> to vector<2x32xf32>
    %730 = vector.extract_strided_slice %718 {offsets = [0, 64], sizes = [2, 32], strides = [1, 1]} : vector<2x96xf32> to vector<2x32xf32>
    %731 = arith.addf %730, %449 : vector<2x32xf32>
    %732 = arith.mulf %727, %731 : vector<2x32xf32>
    %733 = arith.addf %729, %732 : vector<2x32xf32>
    %734 = math.tanh %733 : vector<2x32xf32>
    %cst_124 = arith.constant 1.000000e+00 : f32
    %735 = vector.broadcast %cst_124 : f32 to vector<2x32xf32>
    %736 = arith.subf %735, %728 : vector<2x32xf32>
    %737 = arith.mulf %736, %734 : vector<2x32xf32>
    %738 = arith.mulf %728, %691 : vector<2x32xf32>
    %739 = arith.addf %737, %738 : vector<2x32xf32>
    %740 = vector.extract_strided_slice %434 {offsets = [6, 0, 0], sizes = [1, 2, 96], strides = [1, 1, 1]} : vector<8x2x96xf32> to vector<1x2x96xf32>
    %741 = vector.shape_cast %740 : vector<1x2x96xf32> to vector<2x96xf32>
    %cst_125 = arith.constant dense<0.000000e+00> : vector<2x96xf32>
    %742 = tpu.matmul %715, %442, %cst_125 {dimension_numbers = #tpu.dot_dimension_numbers<[1], [0], [0], [1], [0, 0, 1, 1], [], []>} : vector<2x32xf32>, vector<32x96xf32>, vector<2x96xf32> -> vector<2x96xf32>
    %743 = vector.extract_strided_slice %741 {offsets = [0, 0], sizes = [2, 64], strides = [1, 1]} : vector<2x96xf32> to vector<2x64xf32>
    %744 = vector.extract_strided_slice %742 {offsets = [0, 0], sizes = [2, 64], strides = [1, 1]} : vector<2x96xf32> to vector<2x64xf32>
    %745 = arith.addf %743, %744 : vector<2x64xf32>
    %746 = arith.negf %745 : vector<2x64xf32>
    %747 = math.exp %746 : vector<2x64xf32>
    %cst_126 = arith.constant 1.000000e+00 : f32
    %748 = vector.broadcast %cst_126 : f32 to vector<2x64xf32>
    %749 = arith.addf %748, %747 : vector<2x64xf32>
    %750 = arith.divf %748, %749 : vector<2x64xf32>
    %751 = vector.extract_strided_slice %750 {offsets = [0, 0], sizes = [2, 32], strides = [1, 1]} : vector<2x64xf32> to vector<2x32xf32>
    %752 = vector.extract_strided_slice %750 {offsets = [0, 32], sizes = [2, 32], strides = [1, 1]} : vector<2x64xf32> to vector<2x32xf32>
    %753 = vector.extract_strided_slice %741 {offsets = [0, 64], sizes = [2, 32], strides = [1, 1]} : vector<2x96xf32> to vector<2x32xf32>
    %754 = vector.extract_strided_slice %742 {offsets = [0, 64], sizes = [2, 32], strides = [1, 1]} : vector<2x96xf32> to vector<2x32xf32>
    %755 = arith.addf %754, %446 : vector<2x32xf32>
    %756 = arith.mulf %751, %755 : vector<2x32xf32>
    %757 = arith.addf %753, %756 : vector<2x32xf32>
    %758 = math.tanh %757 : vector<2x32xf32>
    %cst_127 = arith.constant 1.000000e+00 : f32
    %759 = vector.broadcast %cst_127 : f32 to vector<2x32xf32>
    %760 = arith.subf %759, %752 : vector<2x32xf32>
    %761 = arith.mulf %760, %758 : vector<2x32xf32>
    %762 = arith.mulf %752, %715 : vector<2x32xf32>
    %763 = arith.addf %761, %762 : vector<2x32xf32>
    %764 = vector.extract_strided_slice %441 {offsets = [1, 0, 0], sizes = [1, 2, 96], strides = [1, 1, 1]} : vector<8x2x96xf32> to vector<1x2x96xf32>
    %765 = vector.shape_cast %764 : vector<1x2x96xf32> to vector<2x96xf32>
    %cst_128 = arith.constant dense<0.000000e+00> : vector<2x96xf32>
    %766 = tpu.matmul %739, %443, %cst_128 {dimension_numbers = #tpu.dot_dimension_numbers<[1], [0], [0], [1], [0, 0, 1, 1], [], []>} : vector<2x32xf32>, vector<32x96xf32>, vector<2x96xf32> -> vector<2x96xf32>
    %767 = vector.extract_strided_slice %765 {offsets = [0, 0], sizes = [2, 64], strides = [1, 1]} : vector<2x96xf32> to vector<2x64xf32>
    %768 = vector.extract_strided_slice %766 {offsets = [0, 0], sizes = [2, 64], strides = [1, 1]} : vector<2x96xf32> to vector<2x64xf32>
    %769 = arith.addf %767, %768 : vector<2x64xf32>
    %770 = arith.negf %769 : vector<2x64xf32>
    %771 = math.exp %770 : vector<2x64xf32>
    %cst_129 = arith.constant 1.000000e+00 : f32
    %772 = vector.broadcast %cst_129 : f32 to vector<2x64xf32>
    %773 = arith.addf %772, %771 : vector<2x64xf32>
    %774 = arith.divf %772, %773 : vector<2x64xf32>
    %775 = vector.extract_strided_slice %774 {offsets = [0, 0], sizes = [2, 32], strides = [1, 1]} : vector<2x64xf32> to vector<2x32xf32>
    %776 = vector.extract_strided_slice %774 {offsets = [0, 32], sizes = [2, 32], strides = [1, 1]} : vector<2x64xf32> to vector<2x32xf32>
    %777 = vector.extract_strided_slice %765 {offsets = [0, 64], sizes = [2, 32], strides = [1, 1]} : vector<2x96xf32> to vector<2x32xf32>
    %778 = vector.extract_strided_slice %766 {offsets = [0, 64], sizes = [2, 32], strides = [1, 1]} : vector<2x96xf32> to vector<2x32xf32>
    %779 = arith.addf %778, %449 : vector<2x32xf32>
    %780 = arith.mulf %775, %779 : vector<2x32xf32>
    %781 = arith.addf %777, %780 : vector<2x32xf32>
    %782 = math.tanh %781 : vector<2x32xf32>
    %cst_130 = arith.constant 1.000000e+00 : f32
    %783 = vector.broadcast %cst_130 : f32 to vector<2x32xf32>
    %784 = arith.subf %783, %776 : vector<2x32xf32>
    %785 = arith.mulf %784, %782 : vector<2x32xf32>
    %786 = arith.mulf %776, %739 : vector<2x32xf32>
    %787 = arith.addf %785, %786 : vector<2x32xf32>
    %788 = vector.extract_strided_slice %434 {offsets = [7, 0, 0], sizes = [1, 2, 96], strides = [1, 1, 1]} : vector<8x2x96xf32> to vector<1x2x96xf32>
    %789 = vector.shape_cast %788 : vector<1x2x96xf32> to vector<2x96xf32>
    %cst_131 = arith.constant dense<0.000000e+00> : vector<2x96xf32>
    %790 = tpu.matmul %763, %442, %cst_131 {dimension_numbers = #tpu.dot_dimension_numbers<[1], [0], [0], [1], [0, 0, 1, 1], [], []>} : vector<2x32xf32>, vector<32x96xf32>, vector<2x96xf32> -> vector<2x96xf32>
    %791 = vector.extract_strided_slice %789 {offsets = [0, 0], sizes = [2, 64], strides = [1, 1]} : vector<2x96xf32> to vector<2x64xf32>
    %792 = vector.extract_strided_slice %790 {offsets = [0, 0], sizes = [2, 64], strides = [1, 1]} : vector<2x96xf32> to vector<2x64xf32>
    %793 = arith.addf %791, %792 : vector<2x64xf32>
    %794 = arith.negf %793 : vector<2x64xf32>
    %795 = math.exp %794 : vector<2x64xf32>
    %cst_132 = arith.constant 1.000000e+00 : f32
    %796 = vector.broadcast %cst_132 : f32 to vector<2x64xf32>
    %797 = arith.addf %796, %795 : vector<2x64xf32>
    %798 = arith.divf %796, %797 : vector<2x64xf32>
    %799 = vector.extract_strided_slice %798 {offsets = [0, 0], sizes = [2, 32], strides = [1, 1]} : vector<2x64xf32> to vector<2x32xf32>
    %800 = vector.extract_strided_slice %798 {offsets = [0, 32], sizes = [2, 32], strides = [1, 1]} : vector<2x64xf32> to vector<2x32xf32>
    %801 = vector.extract_strided_slice %789 {offsets = [0, 64], sizes = [2, 32], strides = [1, 1]} : vector<2x96xf32> to vector<2x32xf32>
    %802 = vector.extract_strided_slice %790 {offsets = [0, 64], sizes = [2, 32], strides = [1, 1]} : vector<2x96xf32> to vector<2x32xf32>
    %803 = arith.addf %802, %446 : vector<2x32xf32>
    %804 = arith.mulf %799, %803 : vector<2x32xf32>
    %805 = arith.addf %801, %804 : vector<2x32xf32>
    %806 = math.tanh %805 : vector<2x32xf32>
    %cst_133 = arith.constant 1.000000e+00 : f32
    %807 = vector.broadcast %cst_133 : f32 to vector<2x32xf32>
    %808 = arith.subf %807, %800 : vector<2x32xf32>
    %809 = arith.mulf %808, %806 : vector<2x32xf32>
    %810 = arith.mulf %800, %763 : vector<2x32xf32>
    %811 = arith.addf %809, %810 : vector<2x32xf32>
    %812 = vector.extract_strided_slice %441 {offsets = [0, 0, 0], sizes = [1, 2, 96], strides = [1, 1, 1]} : vector<8x2x96xf32> to vector<1x2x96xf32>
    %813 = vector.shape_cast %812 : vector<1x2x96xf32> to vector<2x96xf32>
    %cst_134 = arith.constant dense<0.000000e+00> : vector<2x96xf32>
    %814 = tpu.matmul %787, %443, %cst_134 {dimension_numbers = #tpu.dot_dimension_numbers<[1], [0], [0], [1], [0, 0, 1, 1], [], []>} : vector<2x32xf32>, vector<32x96xf32>, vector<2x96xf32> -> vector<2x96xf32>
    %815 = vector.extract_strided_slice %813 {offsets = [0, 0], sizes = [2, 64], strides = [1, 1]} : vector<2x96xf32> to vector<2x64xf32>
    %816 = vector.extract_strided_slice %814 {offsets = [0, 0], sizes = [2, 64], strides = [1, 1]} : vector<2x96xf32> to vector<2x64xf32>
    %817 = arith.addf %815, %816 : vector<2x64xf32>
    %818 = arith.negf %817 : vector<2x64xf32>
    %819 = math.exp %818 : vector<2x64xf32>
    %cst_135 = arith.constant 1.000000e+00 : f32
    %820 = vector.broadcast %cst_135 : f32 to vector<2x64xf32>
    %821 = arith.addf %820, %819 : vector<2x64xf32>
    %822 = arith.divf %820, %821 : vector<2x64xf32>
    %823 = vector.extract_strided_slice %822 {offsets = [0, 0], sizes = [2, 32], strides = [1, 1]} : vector<2x64xf32> to vector<2x32xf32>
    %824 = vector.extract_strided_slice %822 {offsets = [0, 32], sizes = [2, 32], strides = [1, 1]} : vector<2x64xf32> to vector<2x32xf32>
    %825 = vector.extract_strided_slice %813 {offsets = [0, 64], sizes = [2, 32], strides = [1, 1]} : vector<2x96xf32> to vector<2x32xf32>
    %826 = vector.extract_strided_slice %814 {offsets = [0, 64], sizes = [2, 32], strides = [1, 1]} : vector<2x96xf32> to vector<2x32xf32>
    %827 = arith.addf %826, %449 : vector<2x32xf32>
    %828 = arith.mulf %823, %827 : vector<2x32xf32>
    %829 = arith.addf %825, %828 : vector<2x32xf32>
    %830 = math.tanh %829 : vector<2x32xf32>
    %cst_136 = arith.constant 1.000000e+00 : f32
    %831 = vector.broadcast %cst_136 : f32 to vector<2x32xf32>
    %832 = arith.subf %831, %824 : vector<2x32xf32>
    %833 = arith.mulf %832, %830 : vector<2x32xf32>
    %834 = arith.mulf %824, %787 : vector<2x32xf32>
    %835 = arith.addf %833, %834 : vector<2x32xf32>
    %836 = tpu.concatenate %811, %835 in 1 : vector<2x32xf32>, vector<2x32xf32> -> vector<2x64xf32>
    %c0_137 = arith.constant 0 : index
    %c0_138 = arith.constant 0 : index
    %837 = vector.load %arg18[%c0_137, %c0_138] : memref<64x32xf32, #tpu.memory_space<vmem>>, vector<64x32xf32>
    %cst_139 = arith.constant dense<0.000000e+00> : vector<2x32xf32>
    %838 = tpu.matmul %836, %837, %cst_139 {dimension_numbers = #tpu.dot_dimension_numbers<[1], [0], [0], [1], [0, 0, 1, 1], [], []>} : vector<2x64xf32>, vector<64x32xf32>, vector<2x32xf32> -> vector<2x32xf32>
    %c0_140 = arith.constant 0 : index
    %c0_141 = arith.constant 0 : index
    %839 = vector.load %arg19[%c0_140, %c0_141] : memref<1x32xf32, #tpu.memory_space<vmem>>, vector<1x32xf32>
    %840 = vector.broadcast %839 : vector<1x32xf32> to vector<2x32xf32>
    %841 = arith.addf %838, %840 : vector<2x32xf32>
    %cst_142 = arith.constant 0.000000e+00 : f32
    %842 = vector.broadcast %cst_142 : f32 to vector<2x32xf32>
    %843 = arith.maximumf %841, %842 : vector<2x32xf32>
    %c0_143 = arith.constant 0 : index
    %c0_144 = arith.constant 0 : index
    %844 = vector.load %arg20[%c0_143, %c0_144] : memref<32x32xf32, #tpu.memory_space<vmem>>, vector<32x32xf32>
    %cst_145 = arith.constant dense<0.000000e+00> : vector<2x32xf32>
    %845 = tpu.matmul %843, %844, %cst_145 {dimension_numbers = #tpu.dot_dimension_numbers<[1], [0], [0], [1], [0, 0, 1, 1], [], []>} : vector<2x32xf32>, vector<32x32xf32>, vector<2x32xf32> -> vector<2x32xf32>
    %c0_146 = arith.constant 0 : index
    %c0_147 = arith.constant 0 : index
    %846 = vector.load %arg21[%c0_146, %c0_147] : memref<1x32xf32, #tpu.memory_space<vmem>>, vector<1x32xf32>
    %847 = vector.broadcast %846 : vector<1x32xf32> to vector<2x32xf32>
    %848 = arith.addf %845, %847 : vector<2x32xf32>
    %c0_148 = arith.constant 0 : index
    %c0_149 = arith.constant 0 : index
    %849 = vector.load %arg22[%c0_148, %c0_149] : memref<32x32xf32, #tpu.memory_space<vmem>>, vector<32x32xf32>
    %cst_150 = arith.constant dense<0.000000e+00> : vector<2x32xf32>
    %850 = tpu.matmul %848, %849, %cst_150 {dimension_numbers = #tpu.dot_dimension_numbers<[1], [0], [0], [1], [0, 0, 1, 1], [], []>} : vector<2x32xf32>, vector<32x32xf32>, vector<2x32xf32> -> vector<2x32xf32>
    %c0_151 = arith.constant 0 : index
    %c0_152 = arith.constant 0 : index
    %851 = vector.load %arg23[%c0_151, %c0_152] : memref<1x32xf32, #tpu.memory_space<vmem>>, vector<1x32xf32>
    %852 = vector.broadcast %851 : vector<1x32xf32> to vector<2x32xf32>
    %853 = arith.addf %850, %852 : vector<2x32xf32>
    %cst_153 = arith.constant 0.000000e+00 : f32
    %854 = vector.broadcast %cst_153 : f32 to vector<2x32xf32>
    %855 = arith.maximumf %853, %854 : vector<2x32xf32>
    %c0_154 = arith.constant 0 : index
    %c0_155 = arith.constant 0 : index
    %856 = vector.load %arg24[%c0_154, %c0_155] : memref<32x64xf32, #tpu.memory_space<vmem>>, vector<32x64xf32>
    %cst_156 = arith.constant dense<0.000000e+00> : vector<2x64xf32>
    %857 = tpu.matmul %855, %856, %cst_156 {dimension_numbers = #tpu.dot_dimension_numbers<[1], [0], [0], [1], [0, 0, 1, 1], [], []>} : vector<2x32xf32>, vector<32x64xf32>, vector<2x64xf32> -> vector<2x64xf32>
    %c0_157 = arith.constant 0 : index
    %c0_158 = arith.constant 0 : index
    %858 = vector.load %arg25[%c0_157, %c0_158] : memref<1x64xf32, #tpu.memory_space<vmem>>, vector<1x64xf32>
    %859 = vector.broadcast %858 : vector<1x64xf32> to vector<2x64xf32>
    %860 = arith.addf %857, %859 : vector<2x64xf32>
    %861 = vector.shape_cast %860 : vector<2x64xf32> to vector<1x2x64xf32>
    %c0_159 = arith.constant 0 : index
    %c0_160 = arith.constant 0 : index
    %862 = vector.load %arg26[%c0_159, %c0_160] : memref<8x64xf32, #tpu.memory_space<vmem>>, vector<8x64xf32>
    %863 = vector.shape_cast %862 : vector<8x64xf32> to vector<8x1x64xf32>
    %864 = vector.broadcast %861 : vector<1x2x64xf32> to vector<8x2x64xf32>
    %865 = vector.broadcast %863 : vector<8x1x64xf32> to vector<8x2x64xf32>
    %866 = arith.addf %864, %865 : vector<8x2x64xf32>
    %867 = vector.shape_cast %866 : vector<8x2x64xf32> to vector<16x64xf32>
    %c0_161 = arith.constant 0 : index
    %c0_162 = arith.constant 0 : index
    %868 = vector.load %arg27[%c0_161, %c0_162] : memref<64x96xf32, #tpu.memory_space<vmem>>, vector<64x96xf32>
    %cst_163 = arith.constant dense<0.000000e+00> : vector<16x96xf32>
    %869 = tpu.matmul %867, %868, %cst_163 {dimension_numbers = #tpu.dot_dimension_numbers<[1], [0], [0], [1], [0, 0, 1, 1], [], []>} : vector<16x64xf32>, vector<64x96xf32>, vector<16x96xf32> -> vector<16x96xf32>
    %c0_164 = arith.constant 0 : index
    %c0_165 = arith.constant 0 : index
    %870 = vector.load %arg29[%c0_164, %c0_165] : memref<1x96xf32, #tpu.memory_space<vmem>>, vector<1x96xf32>
    %871 = vector.broadcast %870 : vector<1x96xf32> to vector<16x96xf32>
    %872 = arith.addf %869, %871 : vector<16x96xf32>
    %873 = vector.shape_cast %872 : vector<16x96xf32> to vector<8x2x96xf32>
    %c0_166 = arith.constant 0 : index
    %c0_167 = arith.constant 0 : index
    %874 = vector.load %arg28[%c0_166, %c0_167] : memref<32x96xf32, #tpu.memory_space<vmem>>, vector<32x96xf32>
    %c0_168 = arith.constant 0 : index
    %c0_169 = arith.constant 0 : index
    %875 = vector.load %arg32[%c0_168, %c0_169] : memref<32x96xf32, #tpu.memory_space<vmem>>, vector<32x96xf32>
    %c0_170 = arith.constant 0 : index
    %c0_171 = arith.constant 0 : index
    %876 = vector.load %arg31[%c0_170, %c0_171] : memref<32x96xf32, #tpu.memory_space<vmem>>, vector<32x96xf32>
    %c0_172 = arith.constant 0 : index
    %c0_173 = arith.constant 0 : index
    %877 = vector.load %arg30[%c0_172, %c0_173] : memref<1x32xf32, #tpu.memory_space<vmem>>, vector<1x32xf32>
    %878 = vector.shape_cast %877 : vector<1x32xf32> to vector<1x32xf32>
    %879 = vector.broadcast %878 : vector<1x32xf32> to vector<2x32xf32>
    %c0_174 = arith.constant 0 : index
    %c0_175 = arith.constant 0 : index
    %880 = vector.load %arg34[%c0_174, %c0_175] : memref<1x32xf32, #tpu.memory_space<vmem>>, vector<1x32xf32>
    %881 = vector.shape_cast %880 : vector<1x32xf32> to vector<1x32xf32>
    %882 = vector.broadcast %881 : vector<1x32xf32> to vector<2x32xf32>
    %c0_176 = arith.constant 0 : index
    %c0_177 = arith.constant 0 : index
    %883 = vector.load %arg33[%c0_176, %c0_177] : memref<1x96xf32, #tpu.memory_space<vmem>>, vector<1x96xf32>
    %884 = vector.shape_cast %883 : vector<1x96xf32> to vector<1x96xf32>
    %885 = vector.broadcast %884 : vector<1x96xf32> to vector<2x96xf32>
    %cst_178 = arith.constant 0.000000e+00 : f32
    %886 = vector.broadcast %cst_178 : f32 to vector<2x32xf32>
    %cst_179 = arith.constant 0.000000e+00 : f32
    %887 = vector.broadcast %cst_179 : f32 to vector<2x32xf32>
    %888 = vector.extract_strided_slice %873 {offsets = [0, 0, 0], sizes = [1, 2, 96], strides = [1, 1, 1]} : vector<8x2x96xf32> to vector<1x2x96xf32>
    %889 = vector.shape_cast %888 : vector<1x2x96xf32> to vector<2x96xf32>
    %cst_180 = arith.constant dense<0.000000e+00> : vector<2x96xf32>
    %890 = tpu.matmul %886, %874, %cst_180 {dimension_numbers = #tpu.dot_dimension_numbers<[1], [0], [0], [1], [0, 0, 1, 1], [], []>} : vector<2x32xf32>, vector<32x96xf32>, vector<2x96xf32> -> vector<2x96xf32>
    %891 = vector.extract_strided_slice %889 {offsets = [0, 0], sizes = [2, 64], strides = [1, 1]} : vector<2x96xf32> to vector<2x64xf32>
    %892 = vector.extract_strided_slice %890 {offsets = [0, 0], sizes = [2, 64], strides = [1, 1]} : vector<2x96xf32> to vector<2x64xf32>
    %893 = arith.addf %891, %892 : vector<2x64xf32>
    %894 = arith.negf %893 : vector<2x64xf32>
    %895 = math.exp %894 : vector<2x64xf32>
    %cst_181 = arith.constant 1.000000e+00 : f32
    %896 = vector.broadcast %cst_181 : f32 to vector<2x64xf32>
    %897 = arith.addf %896, %895 : vector<2x64xf32>
    %898 = arith.divf %896, %897 : vector<2x64xf32>
    %899 = vector.extract_strided_slice %898 {offsets = [0, 0], sizes = [2, 32], strides = [1, 1]} : vector<2x64xf32> to vector<2x32xf32>
    %900 = vector.extract_strided_slice %898 {offsets = [0, 32], sizes = [2, 32], strides = [1, 1]} : vector<2x64xf32> to vector<2x32xf32>
    %901 = vector.extract_strided_slice %889 {offsets = [0, 64], sizes = [2, 32], strides = [1, 1]} : vector<2x96xf32> to vector<2x32xf32>
    %902 = vector.extract_strided_slice %890 {offsets = [0, 64], sizes = [2, 32], strides = [1, 1]} : vector<2x96xf32> to vector<2x32xf32>
    %903 = arith.addf %902, %879 : vector<2x32xf32>
    %904 = arith.mulf %899, %903 : vector<2x32xf32>
    %905 = arith.addf %901, %904 : vector<2x32xf32>
    %906 = math.tanh %905 : vector<2x32xf32>
    %cst_182 = arith.constant 1.000000e+00 : f32
    %907 = vector.broadcast %cst_182 : f32 to vector<2x32xf32>
    %908 = arith.subf %907, %900 : vector<2x32xf32>
    %909 = arith.mulf %908, %906 : vector<2x32xf32>
    %910 = arith.mulf %900, %886 : vector<2x32xf32>
    %911 = arith.addf %909, %910 : vector<2x32xf32>
    %912 = vector.extract_strided_slice %873 {offsets = [1, 0, 0], sizes = [1, 2, 96], strides = [1, 1, 1]} : vector<8x2x96xf32> to vector<1x2x96xf32>
    %913 = vector.shape_cast %912 : vector<1x2x96xf32> to vector<2x96xf32>
    %cst_183 = arith.constant dense<0.000000e+00> : vector<2x96xf32>
    %914 = tpu.matmul %911, %874, %cst_183 {dimension_numbers = #tpu.dot_dimension_numbers<[1], [0], [0], [1], [0, 0, 1, 1], [], []>} : vector<2x32xf32>, vector<32x96xf32>, vector<2x96xf32> -> vector<2x96xf32>
    %915 = vector.extract_strided_slice %913 {offsets = [0, 0], sizes = [2, 64], strides = [1, 1]} : vector<2x96xf32> to vector<2x64xf32>
    %916 = vector.extract_strided_slice %914 {offsets = [0, 0], sizes = [2, 64], strides = [1, 1]} : vector<2x96xf32> to vector<2x64xf32>
    %917 = arith.addf %915, %916 : vector<2x64xf32>
    %918 = arith.negf %917 : vector<2x64xf32>
    %919 = math.exp %918 : vector<2x64xf32>
    %cst_184 = arith.constant 1.000000e+00 : f32
    %920 = vector.broadcast %cst_184 : f32 to vector<2x64xf32>
    %921 = arith.addf %920, %919 : vector<2x64xf32>
    %922 = arith.divf %920, %921 : vector<2x64xf32>
    %923 = vector.extract_strided_slice %922 {offsets = [0, 0], sizes = [2, 32], strides = [1, 1]} : vector<2x64xf32> to vector<2x32xf32>
    %924 = vector.extract_strided_slice %922 {offsets = [0, 32], sizes = [2, 32], strides = [1, 1]} : vector<2x64xf32> to vector<2x32xf32>
    %925 = vector.extract_strided_slice %913 {offsets = [0, 64], sizes = [2, 32], strides = [1, 1]} : vector<2x96xf32> to vector<2x32xf32>
    %926 = vector.extract_strided_slice %914 {offsets = [0, 64], sizes = [2, 32], strides = [1, 1]} : vector<2x96xf32> to vector<2x32xf32>
    %927 = arith.addf %926, %879 : vector<2x32xf32>
    %928 = arith.mulf %923, %927 : vector<2x32xf32>
    %929 = arith.addf %925, %928 : vector<2x32xf32>
    %930 = math.tanh %929 : vector<2x32xf32>
    %cst_185 = arith.constant 1.000000e+00 : f32
    %931 = vector.broadcast %cst_185 : f32 to vector<2x32xf32>
    %932 = arith.subf %931, %924 : vector<2x32xf32>
    %933 = arith.mulf %932, %930 : vector<2x32xf32>
    %934 = arith.mulf %924, %911 : vector<2x32xf32>
    %935 = arith.addf %933, %934 : vector<2x32xf32>
    %cst_186 = arith.constant dense<0.000000e+00> : vector<2x96xf32>
    %936 = tpu.matmul %911, %876, %cst_186 {dimension_numbers = #tpu.dot_dimension_numbers<[1], [0], [0], [1], [0, 0, 1, 1], [], []>} : vector<2x32xf32>, vector<32x96xf32>, vector<2x96xf32> -> vector<2x96xf32>
    %937 = arith.addf %936, %885 : vector<2x96xf32>
    %cst_187 = arith.constant dense<0.000000e+00> : vector<2x96xf32>
    %938 = tpu.matmul %887, %875, %cst_187 {dimension_numbers = #tpu.dot_dimension_numbers<[1], [0], [0], [1], [0, 0, 1, 1], [], []>} : vector<2x32xf32>, vector<32x96xf32>, vector<2x96xf32> -> vector<2x96xf32>
    %939 = vector.extract_strided_slice %937 {offsets = [0, 0], sizes = [2, 64], strides = [1, 1]} : vector<2x96xf32> to vector<2x64xf32>
    %940 = vector.extract_strided_slice %938 {offsets = [0, 0], sizes = [2, 64], strides = [1, 1]} : vector<2x96xf32> to vector<2x64xf32>
    %941 = arith.addf %939, %940 : vector<2x64xf32>
    %942 = arith.negf %941 : vector<2x64xf32>
    %943 = math.exp %942 : vector<2x64xf32>
    %cst_188 = arith.constant 1.000000e+00 : f32
    %944 = vector.broadcast %cst_188 : f32 to vector<2x64xf32>
    %945 = arith.addf %944, %943 : vector<2x64xf32>
    %946 = arith.divf %944, %945 : vector<2x64xf32>
    %947 = vector.extract_strided_slice %946 {offsets = [0, 0], sizes = [2, 32], strides = [1, 1]} : vector<2x64xf32> to vector<2x32xf32>
    %948 = vector.extract_strided_slice %946 {offsets = [0, 32], sizes = [2, 32], strides = [1, 1]} : vector<2x64xf32> to vector<2x32xf32>
    %949 = vector.extract_strided_slice %937 {offsets = [0, 64], sizes = [2, 32], strides = [1, 1]} : vector<2x96xf32> to vector<2x32xf32>
    %950 = vector.extract_strided_slice %938 {offsets = [0, 64], sizes = [2, 32], strides = [1, 1]} : vector<2x96xf32> to vector<2x32xf32>
    %951 = arith.addf %950, %882 : vector<2x32xf32>
    %952 = arith.mulf %947, %951 : vector<2x32xf32>
    %953 = arith.addf %949, %952 : vector<2x32xf32>
    %954 = math.tanh %953 : vector<2x32xf32>
    %cst_189 = arith.constant 1.000000e+00 : f32
    %955 = vector.broadcast %cst_189 : f32 to vector<2x32xf32>
    %956 = arith.subf %955, %948 : vector<2x32xf32>
    %957 = arith.mulf %956, %954 : vector<2x32xf32>
    %958 = arith.mulf %948, %887 : vector<2x32xf32>
    %959 = arith.addf %957, %958 : vector<2x32xf32>
    %960 = vector.extract_strided_slice %873 {offsets = [2, 0, 0], sizes = [1, 2, 96], strides = [1, 1, 1]} : vector<8x2x96xf32> to vector<1x2x96xf32>
    %961 = vector.shape_cast %960 : vector<1x2x96xf32> to vector<2x96xf32>
    %cst_190 = arith.constant dense<0.000000e+00> : vector<2x96xf32>
    %962 = tpu.matmul %935, %874, %cst_190 {dimension_numbers = #tpu.dot_dimension_numbers<[1], [0], [0], [1], [0, 0, 1, 1], [], []>} : vector<2x32xf32>, vector<32x96xf32>, vector<2x96xf32> -> vector<2x96xf32>
    %963 = vector.extract_strided_slice %961 {offsets = [0, 0], sizes = [2, 64], strides = [1, 1]} : vector<2x96xf32> to vector<2x64xf32>
    %964 = vector.extract_strided_slice %962 {offsets = [0, 0], sizes = [2, 64], strides = [1, 1]} : vector<2x96xf32> to vector<2x64xf32>
    %965 = arith.addf %963, %964 : vector<2x64xf32>
    %966 = arith.negf %965 : vector<2x64xf32>
    %967 = math.exp %966 : vector<2x64xf32>
    %cst_191 = arith.constant 1.000000e+00 : f32
    %968 = vector.broadcast %cst_191 : f32 to vector<2x64xf32>
    %969 = arith.addf %968, %967 : vector<2x64xf32>
    %970 = arith.divf %968, %969 : vector<2x64xf32>
    %971 = vector.extract_strided_slice %970 {offsets = [0, 0], sizes = [2, 32], strides = [1, 1]} : vector<2x64xf32> to vector<2x32xf32>
    %972 = vector.extract_strided_slice %970 {offsets = [0, 32], sizes = [2, 32], strides = [1, 1]} : vector<2x64xf32> to vector<2x32xf32>
    %973 = vector.extract_strided_slice %961 {offsets = [0, 64], sizes = [2, 32], strides = [1, 1]} : vector<2x96xf32> to vector<2x32xf32>
    %974 = vector.extract_strided_slice %962 {offsets = [0, 64], sizes = [2, 32], strides = [1, 1]} : vector<2x96xf32> to vector<2x32xf32>
    %975 = arith.addf %974, %879 : vector<2x32xf32>
    %976 = arith.mulf %971, %975 : vector<2x32xf32>
    %977 = arith.addf %973, %976 : vector<2x32xf32>
    %978 = math.tanh %977 : vector<2x32xf32>
    %cst_192 = arith.constant 1.000000e+00 : f32
    %979 = vector.broadcast %cst_192 : f32 to vector<2x32xf32>
    %980 = arith.subf %979, %972 : vector<2x32xf32>
    %981 = arith.mulf %980, %978 : vector<2x32xf32>
    %982 = arith.mulf %972, %935 : vector<2x32xf32>
    %983 = arith.addf %981, %982 : vector<2x32xf32>
    %cst_193 = arith.constant dense<0.000000e+00> : vector<2x96xf32>
    %984 = tpu.matmul %935, %876, %cst_193 {dimension_numbers = #tpu.dot_dimension_numbers<[1], [0], [0], [1], [0, 0, 1, 1], [], []>} : vector<2x32xf32>, vector<32x96xf32>, vector<2x96xf32> -> vector<2x96xf32>
    %985 = arith.addf %984, %885 : vector<2x96xf32>
    %cst_194 = arith.constant dense<0.000000e+00> : vector<2x96xf32>
    %986 = tpu.matmul %959, %875, %cst_194 {dimension_numbers = #tpu.dot_dimension_numbers<[1], [0], [0], [1], [0, 0, 1, 1], [], []>} : vector<2x32xf32>, vector<32x96xf32>, vector<2x96xf32> -> vector<2x96xf32>
    %987 = vector.extract_strided_slice %985 {offsets = [0, 0], sizes = [2, 64], strides = [1, 1]} : vector<2x96xf32> to vector<2x64xf32>
    %988 = vector.extract_strided_slice %986 {offsets = [0, 0], sizes = [2, 64], strides = [1, 1]} : vector<2x96xf32> to vector<2x64xf32>
    %989 = arith.addf %987, %988 : vector<2x64xf32>
    %990 = arith.negf %989 : vector<2x64xf32>
    %991 = math.exp %990 : vector<2x64xf32>
    %cst_195 = arith.constant 1.000000e+00 : f32
    %992 = vector.broadcast %cst_195 : f32 to vector<2x64xf32>
    %993 = arith.addf %992, %991 : vector<2x64xf32>
    %994 = arith.divf %992, %993 : vector<2x64xf32>
    %995 = vector.extract_strided_slice %994 {offsets = [0, 0], sizes = [2, 32], strides = [1, 1]} : vector<2x64xf32> to vector<2x32xf32>
    %996 = vector.extract_strided_slice %994 {offsets = [0, 32], sizes = [2, 32], strides = [1, 1]} : vector<2x64xf32> to vector<2x32xf32>
    %997 = vector.extract_strided_slice %985 {offsets = [0, 64], sizes = [2, 32], strides = [1, 1]} : vector<2x96xf32> to vector<2x32xf32>
    %998 = vector.extract_strided_slice %986 {offsets = [0, 64], sizes = [2, 32], strides = [1, 1]} : vector<2x96xf32> to vector<2x32xf32>
    %999 = arith.addf %998, %882 : vector<2x32xf32>
    %1000 = arith.mulf %995, %999 : vector<2x32xf32>
    %1001 = arith.addf %997, %1000 : vector<2x32xf32>
    %1002 = math.tanh %1001 : vector<2x32xf32>
    %cst_196 = arith.constant 1.000000e+00 : f32
    %1003 = vector.broadcast %cst_196 : f32 to vector<2x32xf32>
    %1004 = arith.subf %1003, %996 : vector<2x32xf32>
    %1005 = arith.mulf %1004, %1002 : vector<2x32xf32>
    %1006 = arith.mulf %996, %959 : vector<2x32xf32>
    %1007 = arith.addf %1005, %1006 : vector<2x32xf32>
    %1008 = vector.extract_strided_slice %873 {offsets = [3, 0, 0], sizes = [1, 2, 96], strides = [1, 1, 1]} : vector<8x2x96xf32> to vector<1x2x96xf32>
    %1009 = vector.shape_cast %1008 : vector<1x2x96xf32> to vector<2x96xf32>
    %cst_197 = arith.constant dense<0.000000e+00> : vector<2x96xf32>
    %1010 = tpu.matmul %983, %874, %cst_197 {dimension_numbers = #tpu.dot_dimension_numbers<[1], [0], [0], [1], [0, 0, 1, 1], [], []>} : vector<2x32xf32>, vector<32x96xf32>, vector<2x96xf32> -> vector<2x96xf32>
    %1011 = vector.extract_strided_slice %1009 {offsets = [0, 0], sizes = [2, 64], strides = [1, 1]} : vector<2x96xf32> to vector<2x64xf32>
    %1012 = vector.extract_strided_slice %1010 {offsets = [0, 0], sizes = [2, 64], strides = [1, 1]} : vector<2x96xf32> to vector<2x64xf32>
    %1013 = arith.addf %1011, %1012 : vector<2x64xf32>
    %1014 = arith.negf %1013 : vector<2x64xf32>
    %1015 = math.exp %1014 : vector<2x64xf32>
    %cst_198 = arith.constant 1.000000e+00 : f32
    %1016 = vector.broadcast %cst_198 : f32 to vector<2x64xf32>
    %1017 = arith.addf %1016, %1015 : vector<2x64xf32>
    %1018 = arith.divf %1016, %1017 : vector<2x64xf32>
    %1019 = vector.extract_strided_slice %1018 {offsets = [0, 0], sizes = [2, 32], strides = [1, 1]} : vector<2x64xf32> to vector<2x32xf32>
    %1020 = vector.extract_strided_slice %1018 {offsets = [0, 32], sizes = [2, 32], strides = [1, 1]} : vector<2x64xf32> to vector<2x32xf32>
    %1021 = vector.extract_strided_slice %1009 {offsets = [0, 64], sizes = [2, 32], strides = [1, 1]} : vector<2x96xf32> to vector<2x32xf32>
    %1022 = vector.extract_strided_slice %1010 {offsets = [0, 64], sizes = [2, 32], strides = [1, 1]} : vector<2x96xf32> to vector<2x32xf32>
    %1023 = arith.addf %1022, %879 : vector<2x32xf32>
    %1024 = arith.mulf %1019, %1023 : vector<2x32xf32>
    %1025 = arith.addf %1021, %1024 : vector<2x32xf32>
    %1026 = math.tanh %1025 : vector<2x32xf32>
    %cst_199 = arith.constant 1.000000e+00 : f32
    %1027 = vector.broadcast %cst_199 : f32 to vector<2x32xf32>
    %1028 = arith.subf %1027, %1020 : vector<2x32xf32>
    %1029 = arith.mulf %1028, %1026 : vector<2x32xf32>
    %1030 = arith.mulf %1020, %983 : vector<2x32xf32>
    %1031 = arith.addf %1029, %1030 : vector<2x32xf32>
    %cst_200 = arith.constant dense<0.000000e+00> : vector<2x96xf32>
    %1032 = tpu.matmul %983, %876, %cst_200 {dimension_numbers = #tpu.dot_dimension_numbers<[1], [0], [0], [1], [0, 0, 1, 1], [], []>} : vector<2x32xf32>, vector<32x96xf32>, vector<2x96xf32> -> vector<2x96xf32>
    %1033 = arith.addf %1032, %885 : vector<2x96xf32>
    %cst_201 = arith.constant dense<0.000000e+00> : vector<2x96xf32>
    %1034 = tpu.matmul %1007, %875, %cst_201 {dimension_numbers = #tpu.dot_dimension_numbers<[1], [0], [0], [1], [0, 0, 1, 1], [], []>} : vector<2x32xf32>, vector<32x96xf32>, vector<2x96xf32> -> vector<2x96xf32>
    %1035 = vector.extract_strided_slice %1033 {offsets = [0, 0], sizes = [2, 64], strides = [1, 1]} : vector<2x96xf32> to vector<2x64xf32>
    %1036 = vector.extract_strided_slice %1034 {offsets = [0, 0], sizes = [2, 64], strides = [1, 1]} : vector<2x96xf32> to vector<2x64xf32>
    %1037 = arith.addf %1035, %1036 : vector<2x64xf32>
    %1038 = arith.negf %1037 : vector<2x64xf32>
    %1039 = math.exp %1038 : vector<2x64xf32>
    %cst_202 = arith.constant 1.000000e+00 : f32
    %1040 = vector.broadcast %cst_202 : f32 to vector<2x64xf32>
    %1041 = arith.addf %1040, %1039 : vector<2x64xf32>
    %1042 = arith.divf %1040, %1041 : vector<2x64xf32>
    %1043 = vector.extract_strided_slice %1042 {offsets = [0, 0], sizes = [2, 32], strides = [1, 1]} : vector<2x64xf32> to vector<2x32xf32>
    %1044 = vector.extract_strided_slice %1042 {offsets = [0, 32], sizes = [2, 32], strides = [1, 1]} : vector<2x64xf32> to vector<2x32xf32>
    %1045 = vector.extract_strided_slice %1033 {offsets = [0, 64], sizes = [2, 32], strides = [1, 1]} : vector<2x96xf32> to vector<2x32xf32>
    %1046 = vector.extract_strided_slice %1034 {offsets = [0, 64], sizes = [2, 32], strides = [1, 1]} : vector<2x96xf32> to vector<2x32xf32>
    %1047 = arith.addf %1046, %882 : vector<2x32xf32>
    %1048 = arith.mulf %1043, %1047 : vector<2x32xf32>
    %1049 = arith.addf %1045, %1048 : vector<2x32xf32>
    %1050 = math.tanh %1049 : vector<2x32xf32>
    %cst_203 = arith.constant 1.000000e+00 : f32
    %1051 = vector.broadcast %cst_203 : f32 to vector<2x32xf32>
    %1052 = arith.subf %1051, %1044 : vector<2x32xf32>
    %1053 = arith.mulf %1052, %1050 : vector<2x32xf32>
    %1054 = arith.mulf %1044, %1007 : vector<2x32xf32>
    %1055 = arith.addf %1053, %1054 : vector<2x32xf32>
    %1056 = vector.extract_strided_slice %873 {offsets = [4, 0, 0], sizes = [1, 2, 96], strides = [1, 1, 1]} : vector<8x2x96xf32> to vector<1x2x96xf32>
    %1057 = vector.shape_cast %1056 : vector<1x2x96xf32> to vector<2x96xf32>
    %cst_204 = arith.constant dense<0.000000e+00> : vector<2x96xf32>
    %1058 = tpu.matmul %1031, %874, %cst_204 {dimension_numbers = #tpu.dot_dimension_numbers<[1], [0], [0], [1], [0, 0, 1, 1], [], []>} : vector<2x32xf32>, vector<32x96xf32>, vector<2x96xf32> -> vector<2x96xf32>
    %1059 = vector.extract_strided_slice %1057 {offsets = [0, 0], sizes = [2, 64], strides = [1, 1]} : vector<2x96xf32> to vector<2x64xf32>
    %1060 = vector.extract_strided_slice %1058 {offsets = [0, 0], sizes = [2, 64], strides = [1, 1]} : vector<2x96xf32> to vector<2x64xf32>
    %1061 = arith.addf %1059, %1060 : vector<2x64xf32>
    %1062 = arith.negf %1061 : vector<2x64xf32>
    %1063 = math.exp %1062 : vector<2x64xf32>
    %cst_205 = arith.constant 1.000000e+00 : f32
    %1064 = vector.broadcast %cst_205 : f32 to vector<2x64xf32>
    %1065 = arith.addf %1064, %1063 : vector<2x64xf32>
    %1066 = arith.divf %1064, %1065 : vector<2x64xf32>
    %1067 = vector.extract_strided_slice %1066 {offsets = [0, 0], sizes = [2, 32], strides = [1, 1]} : vector<2x64xf32> to vector<2x32xf32>
    %1068 = vector.extract_strided_slice %1066 {offsets = [0, 32], sizes = [2, 32], strides = [1, 1]} : vector<2x64xf32> to vector<2x32xf32>
    %1069 = vector.extract_strided_slice %1057 {offsets = [0, 64], sizes = [2, 32], strides = [1, 1]} : vector<2x96xf32> to vector<2x32xf32>
    %1070 = vector.extract_strided_slice %1058 {offsets = [0, 64], sizes = [2, 32], strides = [1, 1]} : vector<2x96xf32> to vector<2x32xf32>
    %1071 = arith.addf %1070, %879 : vector<2x32xf32>
    %1072 = arith.mulf %1067, %1071 : vector<2x32xf32>
    %1073 = arith.addf %1069, %1072 : vector<2x32xf32>
    %1074 = math.tanh %1073 : vector<2x32xf32>
    %cst_206 = arith.constant 1.000000e+00 : f32
    %1075 = vector.broadcast %cst_206 : f32 to vector<2x32xf32>
    %1076 = arith.subf %1075, %1068 : vector<2x32xf32>
    %1077 = arith.mulf %1076, %1074 : vector<2x32xf32>
    %1078 = arith.mulf %1068, %1031 : vector<2x32xf32>
    %1079 = arith.addf %1077, %1078 : vector<2x32xf32>
    %cst_207 = arith.constant dense<0.000000e+00> : vector<2x96xf32>
    %1080 = tpu.matmul %1031, %876, %cst_207 {dimension_numbers = #tpu.dot_dimension_numbers<[1], [0], [0], [1], [0, 0, 1, 1], [], []>} : vector<2x32xf32>, vector<32x96xf32>, vector<2x96xf32> -> vector<2x96xf32>
    %1081 = arith.addf %1080, %885 : vector<2x96xf32>
    %cst_208 = arith.constant dense<0.000000e+00> : vector<2x96xf32>
    %1082 = tpu.matmul %1055, %875, %cst_208 {dimension_numbers = #tpu.dot_dimension_numbers<[1], [0], [0], [1], [0, 0, 1, 1], [], []>} : vector<2x32xf32>, vector<32x96xf32>, vector<2x96xf32> -> vector<2x96xf32>
    %1083 = vector.extract_strided_slice %1081 {offsets = [0, 0], sizes = [2, 64], strides = [1, 1]} : vector<2x96xf32> to vector<2x64xf32>
    %1084 = vector.extract_strided_slice %1082 {offsets = [0, 0], sizes = [2, 64], strides = [1, 1]} : vector<2x96xf32> to vector<2x64xf32>
    %1085 = arith.addf %1083, %1084 : vector<2x64xf32>
    %1086 = arith.negf %1085 : vector<2x64xf32>
    %1087 = math.exp %1086 : vector<2x64xf32>
    %cst_209 = arith.constant 1.000000e+00 : f32
    %1088 = vector.broadcast %cst_209 : f32 to vector<2x64xf32>
    %1089 = arith.addf %1088, %1087 : vector<2x64xf32>
    %1090 = arith.divf %1088, %1089 : vector<2x64xf32>
    %1091 = vector.extract_strided_slice %1090 {offsets = [0, 0], sizes = [2, 32], strides = [1, 1]} : vector<2x64xf32> to vector<2x32xf32>
    %1092 = vector.extract_strided_slice %1090 {offsets = [0, 32], sizes = [2, 32], strides = [1, 1]} : vector<2x64xf32> to vector<2x32xf32>
    %1093 = vector.extract_strided_slice %1081 {offsets = [0, 64], sizes = [2, 32], strides = [1, 1]} : vector<2x96xf32> to vector<2x32xf32>
    %1094 = vector.extract_strided_slice %1082 {offsets = [0, 64], sizes = [2, 32], strides = [1, 1]} : vector<2x96xf32> to vector<2x32xf32>
    %1095 = arith.addf %1094, %882 : vector<2x32xf32>
    %1096 = arith.mulf %1091, %1095 : vector<2x32xf32>
    %1097 = arith.addf %1093, %1096 : vector<2x32xf32>
    %1098 = math.tanh %1097 : vector<2x32xf32>
    %cst_210 = arith.constant 1.000000e+00 : f32
    %1099 = vector.broadcast %cst_210 : f32 to vector<2x32xf32>
    %1100 = arith.subf %1099, %1092 : vector<2x32xf32>
    %1101 = arith.mulf %1100, %1098 : vector<2x32xf32>
    %1102 = arith.mulf %1092, %1055 : vector<2x32xf32>
    %1103 = arith.addf %1101, %1102 : vector<2x32xf32>
    %1104 = vector.extract_strided_slice %873 {offsets = [5, 0, 0], sizes = [1, 2, 96], strides = [1, 1, 1]} : vector<8x2x96xf32> to vector<1x2x96xf32>
    %1105 = vector.shape_cast %1104 : vector<1x2x96xf32> to vector<2x96xf32>
    %cst_211 = arith.constant dense<0.000000e+00> : vector<2x96xf32>
    %1106 = tpu.matmul %1079, %874, %cst_211 {dimension_numbers = #tpu.dot_dimension_numbers<[1], [0], [0], [1], [0, 0, 1, 1], [], []>} : vector<2x32xf32>, vector<32x96xf32>, vector<2x96xf32> -> vector<2x96xf32>
    %1107 = vector.extract_strided_slice %1105 {offsets = [0, 0], sizes = [2, 64], strides = [1, 1]} : vector<2x96xf32> to vector<2x64xf32>
    %1108 = vector.extract_strided_slice %1106 {offsets = [0, 0], sizes = [2, 64], strides = [1, 1]} : vector<2x96xf32> to vector<2x64xf32>
    %1109 = arith.addf %1107, %1108 : vector<2x64xf32>
    %1110 = arith.negf %1109 : vector<2x64xf32>
    %1111 = math.exp %1110 : vector<2x64xf32>
    %cst_212 = arith.constant 1.000000e+00 : f32
    %1112 = vector.broadcast %cst_212 : f32 to vector<2x64xf32>
    %1113 = arith.addf %1112, %1111 : vector<2x64xf32>
    %1114 = arith.divf %1112, %1113 : vector<2x64xf32>
    %1115 = vector.extract_strided_slice %1114 {offsets = [0, 0], sizes = [2, 32], strides = [1, 1]} : vector<2x64xf32> to vector<2x32xf32>
    %1116 = vector.extract_strided_slice %1114 {offsets = [0, 32], sizes = [2, 32], strides = [1, 1]} : vector<2x64xf32> to vector<2x32xf32>
    %1117 = vector.extract_strided_slice %1105 {offsets = [0, 64], sizes = [2, 32], strides = [1, 1]} : vector<2x96xf32> to vector<2x32xf32>
    %1118 = vector.extract_strided_slice %1106 {offsets = [0, 64], sizes = [2, 32], strides = [1, 1]} : vector<2x96xf32> to vector<2x32xf32>
    %1119 = arith.addf %1118, %879 : vector<2x32xf32>
    %1120 = arith.mulf %1115, %1119 : vector<2x32xf32>
    %1121 = arith.addf %1117, %1120 : vector<2x32xf32>
    %1122 = math.tanh %1121 : vector<2x32xf32>
    %cst_213 = arith.constant 1.000000e+00 : f32
    %1123 = vector.broadcast %cst_213 : f32 to vector<2x32xf32>
    %1124 = arith.subf %1123, %1116 : vector<2x32xf32>
    %1125 = arith.mulf %1124, %1122 : vector<2x32xf32>
    %1126 = arith.mulf %1116, %1079 : vector<2x32xf32>
    %1127 = arith.addf %1125, %1126 : vector<2x32xf32>
    %cst_214 = arith.constant dense<0.000000e+00> : vector<2x96xf32>
    %1128 = tpu.matmul %1079, %876, %cst_214 {dimension_numbers = #tpu.dot_dimension_numbers<[1], [0], [0], [1], [0, 0, 1, 1], [], []>} : vector<2x32xf32>, vector<32x96xf32>, vector<2x96xf32> -> vector<2x96xf32>
    %1129 = arith.addf %1128, %885 : vector<2x96xf32>
    %cst_215 = arith.constant dense<0.000000e+00> : vector<2x96xf32>
    %1130 = tpu.matmul %1103, %875, %cst_215 {dimension_numbers = #tpu.dot_dimension_numbers<[1], [0], [0], [1], [0, 0, 1, 1], [], []>} : vector<2x32xf32>, vector<32x96xf32>, vector<2x96xf32> -> vector<2x96xf32>
    %1131 = vector.extract_strided_slice %1129 {offsets = [0, 0], sizes = [2, 64], strides = [1, 1]} : vector<2x96xf32> to vector<2x64xf32>
    %1132 = vector.extract_strided_slice %1130 {offsets = [0, 0], sizes = [2, 64], strides = [1, 1]} : vector<2x96xf32> to vector<2x64xf32>
    %1133 = arith.addf %1131, %1132 : vector<2x64xf32>
    %1134 = arith.negf %1133 : vector<2x64xf32>
    %1135 = math.exp %1134 : vector<2x64xf32>
    %cst_216 = arith.constant 1.000000e+00 : f32
    %1136 = vector.broadcast %cst_216 : f32 to vector<2x64xf32>
    %1137 = arith.addf %1136, %1135 : vector<2x64xf32>
    %1138 = arith.divf %1136, %1137 : vector<2x64xf32>
    %1139 = vector.extract_strided_slice %1138 {offsets = [0, 0], sizes = [2, 32], strides = [1, 1]} : vector<2x64xf32> to vector<2x32xf32>
    %1140 = vector.extract_strided_slice %1138 {offsets = [0, 32], sizes = [2, 32], strides = [1, 1]} : vector<2x64xf32> to vector<2x32xf32>
    %1141 = vector.extract_strided_slice %1129 {offsets = [0, 64], sizes = [2, 32], strides = [1, 1]} : vector<2x96xf32> to vector<2x32xf32>
    %1142 = vector.extract_strided_slice %1130 {offsets = [0, 64], sizes = [2, 32], strides = [1, 1]} : vector<2x96xf32> to vector<2x32xf32>
    %1143 = arith.addf %1142, %882 : vector<2x32xf32>
    %1144 = arith.mulf %1139, %1143 : vector<2x32xf32>
    %1145 = arith.addf %1141, %1144 : vector<2x32xf32>
    %1146 = math.tanh %1145 : vector<2x32xf32>
    %cst_217 = arith.constant 1.000000e+00 : f32
    %1147 = vector.broadcast %cst_217 : f32 to vector<2x32xf32>
    %1148 = arith.subf %1147, %1140 : vector<2x32xf32>
    %1149 = arith.mulf %1148, %1146 : vector<2x32xf32>
    %1150 = arith.mulf %1140, %1103 : vector<2x32xf32>
    %1151 = arith.addf %1149, %1150 : vector<2x32xf32>
    %1152 = vector.extract_strided_slice %873 {offsets = [6, 0, 0], sizes = [1, 2, 96], strides = [1, 1, 1]} : vector<8x2x96xf32> to vector<1x2x96xf32>
    %1153 = vector.shape_cast %1152 : vector<1x2x96xf32> to vector<2x96xf32>
    %cst_218 = arith.constant dense<0.000000e+00> : vector<2x96xf32>
    %1154 = tpu.matmul %1127, %874, %cst_218 {dimension_numbers = #tpu.dot_dimension_numbers<[1], [0], [0], [1], [0, 0, 1, 1], [], []>} : vector<2x32xf32>, vector<32x96xf32>, vector<2x96xf32> -> vector<2x96xf32>
    %1155 = vector.extract_strided_slice %1153 {offsets = [0, 0], sizes = [2, 64], strides = [1, 1]} : vector<2x96xf32> to vector<2x64xf32>
    %1156 = vector.extract_strided_slice %1154 {offsets = [0, 0], sizes = [2, 64], strides = [1, 1]} : vector<2x96xf32> to vector<2x64xf32>
    %1157 = arith.addf %1155, %1156 : vector<2x64xf32>
    %1158 = arith.negf %1157 : vector<2x64xf32>
    %1159 = math.exp %1158 : vector<2x64xf32>
    %cst_219 = arith.constant 1.000000e+00 : f32
    %1160 = vector.broadcast %cst_219 : f32 to vector<2x64xf32>
    %1161 = arith.addf %1160, %1159 : vector<2x64xf32>
    %1162 = arith.divf %1160, %1161 : vector<2x64xf32>
    %1163 = vector.extract_strided_slice %1162 {offsets = [0, 0], sizes = [2, 32], strides = [1, 1]} : vector<2x64xf32> to vector<2x32xf32>
    %1164 = vector.extract_strided_slice %1162 {offsets = [0, 32], sizes = [2, 32], strides = [1, 1]} : vector<2x64xf32> to vector<2x32xf32>
    %1165 = vector.extract_strided_slice %1153 {offsets = [0, 64], sizes = [2, 32], strides = [1, 1]} : vector<2x96xf32> to vector<2x32xf32>
    %1166 = vector.extract_strided_slice %1154 {offsets = [0, 64], sizes = [2, 32], strides = [1, 1]} : vector<2x96xf32> to vector<2x32xf32>
    %1167 = arith.addf %1166, %879 : vector<2x32xf32>
    %1168 = arith.mulf %1163, %1167 : vector<2x32xf32>
    %1169 = arith.addf %1165, %1168 : vector<2x32xf32>
    %1170 = math.tanh %1169 : vector<2x32xf32>
    %cst_220 = arith.constant 1.000000e+00 : f32
    %1171 = vector.broadcast %cst_220 : f32 to vector<2x32xf32>
    %1172 = arith.subf %1171, %1164 : vector<2x32xf32>
    %1173 = arith.mulf %1172, %1170 : vector<2x32xf32>
    %1174 = arith.mulf %1164, %1127 : vector<2x32xf32>
    %1175 = arith.addf %1173, %1174 : vector<2x32xf32>
    %cst_221 = arith.constant dense<0.000000e+00> : vector<2x96xf32>
    %1176 = tpu.matmul %1127, %876, %cst_221 {dimension_numbers = #tpu.dot_dimension_numbers<[1], [0], [0], [1], [0, 0, 1, 1], [], []>} : vector<2x32xf32>, vector<32x96xf32>, vector<2x96xf32> -> vector<2x96xf32>
    %1177 = arith.addf %1176, %885 : vector<2x96xf32>
    %cst_222 = arith.constant dense<0.000000e+00> : vector<2x96xf32>
    %1178 = tpu.matmul %1151, %875, %cst_222 {dimension_numbers = #tpu.dot_dimension_numbers<[1], [0], [0], [1], [0, 0, 1, 1], [], []>} : vector<2x32xf32>, vector<32x96xf32>, vector<2x96xf32> -> vector<2x96xf32>
    %1179 = vector.extract_strided_slice %1177 {offsets = [0, 0], sizes = [2, 64], strides = [1, 1]} : vector<2x96xf32> to vector<2x64xf32>
    %1180 = vector.extract_strided_slice %1178 {offsets = [0, 0], sizes = [2, 64], strides = [1, 1]} : vector<2x96xf32> to vector<2x64xf32>
    %1181 = arith.addf %1179, %1180 : vector<2x64xf32>
    %1182 = arith.negf %1181 : vector<2x64xf32>
    %1183 = math.exp %1182 : vector<2x64xf32>
    %cst_223 = arith.constant 1.000000e+00 : f32
    %1184 = vector.broadcast %cst_223 : f32 to vector<2x64xf32>
    %1185 = arith.addf %1184, %1183 : vector<2x64xf32>
    %1186 = arith.divf %1184, %1185 : vector<2x64xf32>
    %1187 = vector.extract_strided_slice %1186 {offsets = [0, 0], sizes = [2, 32], strides = [1, 1]} : vector<2x64xf32> to vector<2x32xf32>
    %1188 = vector.extract_strided_slice %1186 {offsets = [0, 32], sizes = [2, 32], strides = [1, 1]} : vector<2x64xf32> to vector<2x32xf32>
    %1189 = vector.extract_strided_slice %1177 {offsets = [0, 64], sizes = [2, 32], strides = [1, 1]} : vector<2x96xf32> to vector<2x32xf32>
    %1190 = vector.extract_strided_slice %1178 {offsets = [0, 64], sizes = [2, 32], strides = [1, 1]} : vector<2x96xf32> to vector<2x32xf32>
    %1191 = arith.addf %1190, %882 : vector<2x32xf32>
    %1192 = arith.mulf %1187, %1191 : vector<2x32xf32>
    %1193 = arith.addf %1189, %1192 : vector<2x32xf32>
    %1194 = math.tanh %1193 : vector<2x32xf32>
    %cst_224 = arith.constant 1.000000e+00 : f32
    %1195 = vector.broadcast %cst_224 : f32 to vector<2x32xf32>
    %1196 = arith.subf %1195, %1188 : vector<2x32xf32>
    %1197 = arith.mulf %1196, %1194 : vector<2x32xf32>
    %1198 = arith.mulf %1188, %1151 : vector<2x32xf32>
    %1199 = arith.addf %1197, %1198 : vector<2x32xf32>
    %1200 = vector.extract_strided_slice %873 {offsets = [7, 0, 0], sizes = [1, 2, 96], strides = [1, 1, 1]} : vector<8x2x96xf32> to vector<1x2x96xf32>
    %1201 = vector.shape_cast %1200 : vector<1x2x96xf32> to vector<2x96xf32>
    %cst_225 = arith.constant dense<0.000000e+00> : vector<2x96xf32>
    %1202 = tpu.matmul %1175, %874, %cst_225 {dimension_numbers = #tpu.dot_dimension_numbers<[1], [0], [0], [1], [0, 0, 1, 1], [], []>} : vector<2x32xf32>, vector<32x96xf32>, vector<2x96xf32> -> vector<2x96xf32>
    %1203 = vector.extract_strided_slice %1201 {offsets = [0, 0], sizes = [2, 64], strides = [1, 1]} : vector<2x96xf32> to vector<2x64xf32>
    %1204 = vector.extract_strided_slice %1202 {offsets = [0, 0], sizes = [2, 64], strides = [1, 1]} : vector<2x96xf32> to vector<2x64xf32>
    %1205 = arith.addf %1203, %1204 : vector<2x64xf32>
    %1206 = arith.negf %1205 : vector<2x64xf32>
    %1207 = math.exp %1206 : vector<2x64xf32>
    %cst_226 = arith.constant 1.000000e+00 : f32
    %1208 = vector.broadcast %cst_226 : f32 to vector<2x64xf32>
    %1209 = arith.addf %1208, %1207 : vector<2x64xf32>
    %1210 = arith.divf %1208, %1209 : vector<2x64xf32>
    %1211 = vector.extract_strided_slice %1210 {offsets = [0, 0], sizes = [2, 32], strides = [1, 1]} : vector<2x64xf32> to vector<2x32xf32>
    %1212 = vector.extract_strided_slice %1210 {offsets = [0, 32], sizes = [2, 32], strides = [1, 1]} : vector<2x64xf32> to vector<2x32xf32>
    %1213 = vector.extract_strided_slice %1201 {offsets = [0, 64], sizes = [2, 32], strides = [1, 1]} : vector<2x96xf32> to vector<2x32xf32>
    %1214 = vector.extract_strided_slice %1202 {offsets = [0, 64], sizes = [2, 32], strides = [1, 1]} : vector<2x96xf32> to vector<2x32xf32>
    %1215 = arith.addf %1214, %879 : vector<2x32xf32>
    %1216 = arith.mulf %1211, %1215 : vector<2x32xf32>
    %1217 = arith.addf %1213, %1216 : vector<2x32xf32>
    %1218 = math.tanh %1217 : vector<2x32xf32>
    %cst_227 = arith.constant 1.000000e+00 : f32
    %1219 = vector.broadcast %cst_227 : f32 to vector<2x32xf32>
    %1220 = arith.subf %1219, %1212 : vector<2x32xf32>
    %1221 = arith.mulf %1220, %1218 : vector<2x32xf32>
    %1222 = arith.mulf %1212, %1175 : vector<2x32xf32>
    %1223 = arith.addf %1221, %1222 : vector<2x32xf32>
    %cst_228 = arith.constant dense<0.000000e+00> : vector<2x96xf32>
    %1224 = tpu.matmul %1175, %876, %cst_228 {dimension_numbers = #tpu.dot_dimension_numbers<[1], [0], [0], [1], [0, 0, 1, 1], [], []>} : vector<2x32xf32>, vector<32x96xf32>, vector<2x96xf32> -> vector<2x96xf32>
    %1225 = arith.addf %1224, %885 : vector<2x96xf32>
    %cst_229 = arith.constant dense<0.000000e+00> : vector<2x96xf32>
    %1226 = tpu.matmul %1199, %875, %cst_229 {dimension_numbers = #tpu.dot_dimension_numbers<[1], [0], [0], [1], [0, 0, 1, 1], [], []>} : vector<2x32xf32>, vector<32x96xf32>, vector<2x96xf32> -> vector<2x96xf32>
    %1227 = vector.extract_strided_slice %1225 {offsets = [0, 0], sizes = [2, 64], strides = [1, 1]} : vector<2x96xf32> to vector<2x64xf32>
    %1228 = vector.extract_strided_slice %1226 {offsets = [0, 0], sizes = [2, 64], strides = [1, 1]} : vector<2x96xf32> to vector<2x64xf32>
    %1229 = arith.addf %1227, %1228 : vector<2x64xf32>
    %1230 = arith.negf %1229 : vector<2x64xf32>
    %1231 = math.exp %1230 : vector<2x64xf32>
    %cst_230 = arith.constant 1.000000e+00 : f32
    %1232 = vector.broadcast %cst_230 : f32 to vector<2x64xf32>
    %1233 = arith.addf %1232, %1231 : vector<2x64xf32>
    %1234 = arith.divf %1232, %1233 : vector<2x64xf32>
    %1235 = vector.extract_strided_slice %1234 {offsets = [0, 0], sizes = [2, 32], strides = [1, 1]} : vector<2x64xf32> to vector<2x32xf32>
    %1236 = vector.extract_strided_slice %1234 {offsets = [0, 32], sizes = [2, 32], strides = [1, 1]} : vector<2x64xf32> to vector<2x32xf32>
    %1237 = vector.extract_strided_slice %1225 {offsets = [0, 64], sizes = [2, 32], strides = [1, 1]} : vector<2x96xf32> to vector<2x32xf32>
    %1238 = vector.extract_strided_slice %1226 {offsets = [0, 64], sizes = [2, 32], strides = [1, 1]} : vector<2x96xf32> to vector<2x32xf32>
    %1239 = arith.addf %1238, %882 : vector<2x32xf32>
    %1240 = arith.mulf %1235, %1239 : vector<2x32xf32>
    %1241 = arith.addf %1237, %1240 : vector<2x32xf32>
    %1242 = math.tanh %1241 : vector<2x32xf32>
    %cst_231 = arith.constant 1.000000e+00 : f32
    %1243 = vector.broadcast %cst_231 : f32 to vector<2x32xf32>
    %1244 = arith.subf %1243, %1236 : vector<2x32xf32>
    %1245 = arith.mulf %1244, %1242 : vector<2x32xf32>
    %1246 = arith.mulf %1236, %1199 : vector<2x32xf32>
    %1247 = arith.addf %1245, %1246 : vector<2x32xf32>
    %cst_232 = arith.constant dense<0.000000e+00> : vector<2x96xf32>
    %1248 = tpu.matmul %1223, %876, %cst_232 {dimension_numbers = #tpu.dot_dimension_numbers<[1], [0], [0], [1], [0, 0, 1, 1], [], []>} : vector<2x32xf32>, vector<32x96xf32>, vector<2x96xf32> -> vector<2x96xf32>
    %1249 = arith.addf %1248, %885 : vector<2x96xf32>
    %cst_233 = arith.constant dense<0.000000e+00> : vector<2x96xf32>
    %1250 = tpu.matmul %1247, %875, %cst_233 {dimension_numbers = #tpu.dot_dimension_numbers<[1], [0], [0], [1], [0, 0, 1, 1], [], []>} : vector<2x32xf32>, vector<32x96xf32>, vector<2x96xf32> -> vector<2x96xf32>
    %1251 = vector.extract_strided_slice %1249 {offsets = [0, 0], sizes = [2, 64], strides = [1, 1]} : vector<2x96xf32> to vector<2x64xf32>
    %1252 = vector.extract_strided_slice %1250 {offsets = [0, 0], sizes = [2, 64], strides = [1, 1]} : vector<2x96xf32> to vector<2x64xf32>
    %1253 = arith.addf %1251, %1252 : vector<2x64xf32>
    %1254 = arith.negf %1253 : vector<2x64xf32>
    %1255 = math.exp %1254 : vector<2x64xf32>
    %cst_234 = arith.constant 1.000000e+00 : f32
    %1256 = vector.broadcast %cst_234 : f32 to vector<2x64xf32>
    %1257 = arith.addf %1256, %1255 : vector<2x64xf32>
    %1258 = arith.divf %1256, %1257 : vector<2x64xf32>
    %1259 = vector.extract_strided_slice %1258 {offsets = [0, 0], sizes = [2, 32], strides = [1, 1]} : vector<2x64xf32> to vector<2x32xf32>
    %1260 = vector.extract_strided_slice %1258 {offsets = [0, 32], sizes = [2, 32], strides = [1, 1]} : vector<2x64xf32> to vector<2x32xf32>
    %1261 = vector.extract_strided_slice %1249 {offsets = [0, 64], sizes = [2, 32], strides = [1, 1]} : vector<2x96xf32> to vector<2x32xf32>
    %1262 = vector.extract_strided_slice %1250 {offsets = [0, 64], sizes = [2, 32], strides = [1, 1]} : vector<2x96xf32> to vector<2x32xf32>
    %1263 = arith.addf %1262, %882 : vector<2x32xf32>
    %1264 = arith.mulf %1259, %1263 : vector<2x32xf32>
    %1265 = arith.addf %1261, %1264 : vector<2x32xf32>
    %1266 = math.tanh %1265 : vector<2x32xf32>
    %cst_235 = arith.constant 1.000000e+00 : f32
    %1267 = vector.broadcast %cst_235 : f32 to vector<2x32xf32>
    %1268 = arith.subf %1267, %1260 : vector<2x32xf32>
    %1269 = arith.mulf %1268, %1266 : vector<2x32xf32>
    %1270 = arith.mulf %1260, %1247 : vector<2x32xf32>
    %1271 = arith.addf %1269, %1270 : vector<2x32xf32>
    %c0_236 = arith.constant 0 : index
    %c0_237 = arith.constant 0 : index
    %1272 = vector.load %arg35[%c0_236, %c0_237] : memref<32x16xf32, #tpu.memory_space<vmem>>, vector<32x16xf32>
    %cst_238 = arith.constant dense<0.000000e+00> : vector<2x16xf32>
    %1273 = tpu.matmul %959, %1272, %cst_238 {dimension_numbers = #tpu.dot_dimension_numbers<[1], [0], [0], [1], [0, 0, 1, 1], [], []>} : vector<2x32xf32>, vector<32x16xf32>, vector<2x16xf32> -> vector<2x16xf32>
    %cst_239 = arith.constant dense<0.000000e+00> : vector<2x16xf32>
    %1274 = tpu.matmul %1007, %1272, %cst_239 {dimension_numbers = #tpu.dot_dimension_numbers<[1], [0], [0], [1], [0, 0, 1, 1], [], []>} : vector<2x32xf32>, vector<32x16xf32>, vector<2x16xf32> -> vector<2x16xf32>
    %cst_240 = arith.constant dense<0.000000e+00> : vector<2x16xf32>
    %1275 = tpu.matmul %1055, %1272, %cst_240 {dimension_numbers = #tpu.dot_dimension_numbers<[1], [0], [0], [1], [0, 0, 1, 1], [], []>} : vector<2x32xf32>, vector<32x16xf32>, vector<2x16xf32> -> vector<2x16xf32>
    %cst_241 = arith.constant dense<0.000000e+00> : vector<2x16xf32>
    %1276 = tpu.matmul %1103, %1272, %cst_241 {dimension_numbers = #tpu.dot_dimension_numbers<[1], [0], [0], [1], [0, 0, 1, 1], [], []>} : vector<2x32xf32>, vector<32x16xf32>, vector<2x16xf32> -> vector<2x16xf32>
    %cst_242 = arith.constant dense<0.000000e+00> : vector<2x16xf32>
    %1277 = tpu.matmul %1151, %1272, %cst_242 {dimension_numbers = #tpu.dot_dimension_numbers<[1], [0], [0], [1], [0, 0, 1, 1], [], []>} : vector<2x32xf32>, vector<32x16xf32>, vector<2x16xf32> -> vector<2x16xf32>
    %cst_243 = arith.constant dense<0.000000e+00> : vector<2x16xf32>
    %1278 = tpu.matmul %1199, %1272, %cst_243 {dimension_numbers = #tpu.dot_dimension_numbers<[1], [0], [0], [1], [0, 0, 1, 1], [], []>} : vector<2x32xf32>, vector<32x16xf32>, vector<2x16xf32> -> vector<2x16xf32>
    %cst_244 = arith.constant dense<0.000000e+00> : vector<2x16xf32>
    %1279 = tpu.matmul %1247, %1272, %cst_244 {dimension_numbers = #tpu.dot_dimension_numbers<[1], [0], [0], [1], [0, 0, 1, 1], [], []>} : vector<2x32xf32>, vector<32x16xf32>, vector<2x16xf32> -> vector<2x16xf32>
    %cst_245 = arith.constant dense<0.000000e+00> : vector<2x16xf32>
    %1280 = tpu.matmul %1271, %1272, %cst_245 {dimension_numbers = #tpu.dot_dimension_numbers<[1], [0], [0], [1], [0, 0, 1, 1], [], []>} : vector<2x32xf32>, vector<32x16xf32>, vector<2x16xf32> -> vector<2x16xf32>
    %1281 = tpu.concatenate %1273, %1274, %1275, %1276, %1277, %1278, %1279, %1280 in 1 : vector<2x16xf32>, vector<2x16xf32>, vector<2x16xf32>, vector<2x16xf32>, vector<2x16xf32>, vector<2x16xf32>, vector<2x16xf32>, vector<2x16xf32> -> vector<2x128xf32>
    %c0_246 = arith.constant 0 : index
    %c0_247 = arith.constant 0 : index
    %1282 = vector.load %arg36[%c0_246, %c0_247] : memref<1x16xf32, #tpu.memory_space<vmem>>, vector<1x16xf32>
    %1283 = tpu.concatenate %1282, %1282, %1282, %1282, %1282, %1282, %1282, %1282 in 1 : vector<1x16xf32>, vector<1x16xf32>, vector<1x16xf32>, vector<1x16xf32>, vector<1x16xf32>, vector<1x16xf32>, vector<1x16xf32>, vector<1x16xf32> -> vector<1x128xf32>
    %1284 = vector.broadcast %1283 : vector<1x128xf32> to vector<2x128xf32>
    %1285 = arith.addf %1281, %1284 : vector<2x128xf32>
    %c0_248 = arith.constant 0 : index
    %c0_249 = arith.constant 0 : index
    %1286 = vector.load %arg37[%c0_248, %c0_249] : memref<2x128xf32, #tpu.memory_space<vmem>>, vector<2x128xf32>
    tpu.vector_store %arg37[%c0_248, %c0_249], %1285 {strides = array<i32>} : memref<2x128xf32, #tpu.memory_space<vmem>>, vector<2x128xf32>,
    return
  }
  func.func @transform_0(%arg0: i32) -> (i32, i32, i32) {
    %c0_i32 = arith.constant 0 : i32
    %c0_i32_0 = arith.constant 0 : i32
    %c0_i32_1 = arith.constant 0 : i32
    return %c0_i32, %arg0, %c0_i32_0 : i32, i32, i32
  }
  func.func @transform_1(%arg0: i32) -> (i32, i32) {
    %c0_i32 = arith.constant 0 : i32
    %c0_i32_0 = arith.constant 0 : i32
    %c0_i32_1 = arith.constant 0 : i32
    return %c0_i32, %c0_i32_0 : i32, i32
  }
  func.func @transform_2(%arg0: i32) -> (i32, i32) {
    %c0_i32 = arith.constant 0 : i32
    %c0_i32_0 = arith.constant 0 : i32
    %c0_i32_1 = arith.constant 0 : i32
    return %c0_i32, %c0_i32_0 : i32, i32
  }
  func.func @transform_3(%arg0: i32) -> (i32, i32) {
    %c0_i32 = arith.constant 0 : i32
    %c0_i32_0 = arith.constant 0 : i32
    %c0_i32_1 = arith.constant 0 : i32
    return %c0_i32, %c0_i32_0 : i32, i32
  }
  func.func @transform_4(%arg0: i32) -> (i32, i32) {
    %c0_i32 = arith.constant 0 : i32
    %c0_i32_0 = arith.constant 0 : i32
    %c0_i32_1 = arith.constant 0 : i32
    return %c0_i32, %c0_i32_0 : i32, i32
  }
  func.func @transform_5(%arg0: i32) -> (i32, i32) {
    %c0_i32 = arith.constant 0 : i32
    %c0_i32_0 = arith.constant 0 : i32
    %c0_i32_1 = arith.constant 0 : i32
    return %c0_i32, %c0_i32_0 : i32, i32
  }
  func.func @transform_6(%arg0: i32) -> (i32, i32) {
    %c0_i32 = arith.constant 0 : i32
    %c0_i32_0 = arith.constant 0 : i32
    %c0_i32_1 = arith.constant 0 : i32
    return %c0_i32, %c0_i32_0 : i32, i32
  }
  func.func @transform_7(%arg0: i32) -> (i32, i32) {
    %c0_i32 = arith.constant 0 : i32
    %c0_i32_0 = arith.constant 0 : i32
    %c0_i32_1 = arith.constant 0 : i32
    return %c0_i32, %c0_i32_0 : i32, i32
  }
  func.func @transform_8(%arg0: i32) -> (i32, i32) {
    %c0_i32 = arith.constant 0 : i32
    %c0_i32_0 = arith.constant 0 : i32
    %c0_i32_1 = arith.constant 0 : i32
    return %c0_i32, %c0_i32_0 : i32, i32
  }
  func.func @transform_9(%arg0: i32) -> (i32, i32) {
    %c0_i32 = arith.constant 0 : i32
    %c0_i32_0 = arith.constant 0 : i32
    %c0_i32_1 = arith.constant 0 : i32
    return %c0_i32, %c0_i32_0 : i32, i32
  }
  func.func @transform_10(%arg0: i32) -> (i32, i32) {
    %c0_i32 = arith.constant 0 : i32
    %c0_i32_0 = arith.constant 0 : i32
    %c0_i32_1 = arith.constant 0 : i32
    return %c0_i32, %c0_i32_0 : i32, i32
  }
  func.func @transform_11(%arg0: i32) -> (i32, i32) {
    %c0_i32 = arith.constant 0 : i32
    %c0_i32_0 = arith.constant 0 : i32
    %c0_i32_1 = arith.constant 0 : i32
    return %c0_i32, %c0_i32_0 : i32, i32
  }
  func.func @transform_12(%arg0: i32) -> (i32, i32) {
    %c0_i32 = arith.constant 0 : i32
    %c0_i32_0 = arith.constant 0 : i32
    %c0_i32_1 = arith.constant 0 : i32
    return %c0_i32, %c0_i32_0 : i32, i32
  }
  func.func @transform_13(%arg0: i32) -> (i32, i32) {
    %c0_i32 = arith.constant 0 : i32
    %c0_i32_0 = arith.constant 0 : i32
    %c0_i32_1 = arith.constant 0 : i32
    return %c0_i32, %c0_i32_0 : i32, i32
  }
  func.func @transform_14(%arg0: i32) -> (i32, i32) {
    %c0_i32 = arith.constant 0 : i32
    %c0_i32_0 = arith.constant 0 : i32
    %c0_i32_1 = arith.constant 0 : i32
    return %c0_i32, %c0_i32_0 : i32, i32
  }
  func.func @transform_15(%arg0: i32) -> (i32, i32) {
    %c0_i32 = arith.constant 0 : i32
    %c0_i32_0 = arith.constant 0 : i32
    %c0_i32_1 = arith.constant 0 : i32
    return %c0_i32, %c0_i32_0 : i32, i32
  }
  func.func @transform_16(%arg0: i32) -> (i32, i32) {
    %c0_i32 = arith.constant 0 : i32
    %c0_i32_0 = arith.constant 0 : i32
    %c0_i32_1 = arith.constant 0 : i32
    return %c0_i32, %c0_i32_0 : i32, i32
  }
  func.func @transform_17(%arg0: i32) -> (i32, i32) {
    %c0_i32 = arith.constant 0 : i32
    %c0_i32_0 = arith.constant 0 : i32
    %c0_i32_1 = arith.constant 0 : i32
    return %c0_i32, %c0_i32_0 : i32, i32
  }
  func.func @transform_18(%arg0: i32) -> (i32, i32) {
    %c0_i32 = arith.constant 0 : i32
    %c0_i32_0 = arith.constant 0 : i32
    %c0_i32_1 = arith.constant 0 : i32
    return %c0_i32, %c0_i32_0 : i32, i32
  }
  func.func @transform_19(%arg0: i32) -> (i32, i32) {
    %c0_i32 = arith.constant 0 : i32
    %c0_i32_0 = arith.constant 0 : i32
    %c0_i32_1 = arith.constant 0 : i32
    return %c0_i32, %c0_i32_0 : i32, i32
  }
  func.func @transform_20(%arg0: i32) -> (i32, i32) {
    %c0_i32 = arith.constant 0 : i32
    %c0_i32_0 = arith.constant 0 : i32
    %c0_i32_1 = arith.constant 0 : i32
    return %c0_i32, %c0_i32_0 : i32, i32
  }
  func.func @transform_21(%arg0: i32) -> (i32, i32) {
    %c0_i32 = arith.constant 0 : i32
    %c0_i32_0 = arith.constant 0 : i32
    %c0_i32_1 = arith.constant 0 : i32
    return %c0_i32, %c0_i32_0 : i32, i32
  }
  func.func @transform_22(%arg0: i32) -> (i32, i32) {
    %c0_i32 = arith.constant 0 : i32
    %c0_i32_0 = arith.constant 0 : i32
    %c0_i32_1 = arith.constant 0 : i32
    return %c0_i32, %c0_i32_0 : i32, i32
  }
  func.func @transform_23(%arg0: i32) -> (i32, i32) {
    %c0_i32 = arith.constant 0 : i32
    %c0_i32_0 = arith.constant 0 : i32
    %c0_i32_1 = arith.constant 0 : i32
    return %c0_i32, %c0_i32_0 : i32, i32
  }
  func.func @transform_24(%arg0: i32) -> (i32, i32) {
    %c0_i32 = arith.constant 0 : i32
    %c0_i32_0 = arith.constant 0 : i32
    %c0_i32_1 = arith.constant 0 : i32
    return %c0_i32, %c0_i32_0 : i32, i32
  }
  func.func @transform_25(%arg0: i32) -> (i32, i32) {
    %c0_i32 = arith.constant 0 : i32
    %c0_i32_0 = arith.constant 0 : i32
    %c0_i32_1 = arith.constant 0 : i32
    return %c0_i32, %c0_i32_0 : i32, i32
  }
  func.func @transform_26(%arg0: i32) -> (i32, i32) {
    %c0_i32 = arith.constant 0 : i32
    %c0_i32_0 = arith.constant 0 : i32
    %c0_i32_1 = arith.constant 0 : i32
    return %c0_i32, %c0_i32_0 : i32, i32
  }
  func.func @transform_27(%arg0: i32) -> (i32, i32) {
    %c0_i32 = arith.constant 0 : i32
    %c0_i32_0 = arith.constant 0 : i32
    %c0_i32_1 = arith.constant 0 : i32
    return %c0_i32, %c0_i32_0 : i32, i32
  }
  func.func @transform_28(%arg0: i32) -> (i32, i32) {
    %c0_i32 = arith.constant 0 : i32
    %c0_i32_0 = arith.constant 0 : i32
    %c0_i32_1 = arith.constant 0 : i32
    return %c0_i32, %c0_i32_0 : i32, i32
  }
  func.func @transform_29(%arg0: i32) -> (i32, i32) {
    %c0_i32 = arith.constant 0 : i32
    %c0_i32_0 = arith.constant 0 : i32
    %c0_i32_1 = arith.constant 0 : i32
    return %c0_i32, %c0_i32_0 : i32, i32
  }
  func.func @transform_30(%arg0: i32) -> (i32, i32) {
    %c0_i32 = arith.constant 0 : i32
    %c0_i32_0 = arith.constant 0 : i32
    %c0_i32_1 = arith.constant 0 : i32
    return %c0_i32, %c0_i32_0 : i32, i32
  }
  func.func @transform_31(%arg0: i32) -> (i32, i32) {
    %c0_i32 = arith.constant 0 : i32
    %c0_i32_0 = arith.constant 0 : i32
    %c0_i32_1 = arith.constant 0 : i32
    return %c0_i32, %c0_i32_0 : i32, i32
  }
  func.func @transform_32(%arg0: i32) -> (i32, i32) {
    %c0_i32 = arith.constant 0 : i32
    %c0_i32_0 = arith.constant 0 : i32
    %c0_i32_1 = arith.constant 0 : i32
    return %c0_i32, %c0_i32_0 : i32, i32
  }
  func.func @transform_33(%arg0: i32) -> (i32, i32) {
    %c0_i32 = arith.constant 0 : i32
    %c0_i32_0 = arith.constant 0 : i32
    %c0_i32_1 = arith.constant 0 : i32
    return %c0_i32, %c0_i32_0 : i32, i32
  }
  func.func @transform_34(%arg0: i32) -> (i32, i32) {
    %c0_i32 = arith.constant 0 : i32
    %c0_i32_0 = arith.constant 0 : i32
    %c0_i32_1 = arith.constant 0 : i32
    return %c0_i32, %c0_i32_0 : i32, i32
  }
  func.func @transform_35(%arg0: i32) -> (i32, i32) {
    %c0_i32 = arith.constant 0 : i32
    %c0_i32_0 = arith.constant 0 : i32
    %c0_i32_1 = arith.constant 0 : i32
    return %c0_i32, %c0_i32_0 : i32, i32
  }
  func.func @transform_36(%arg0: i32) -> (i32, i32) {
    %c0_i32 = arith.constant 0 : i32
    %c0_i32_0 = arith.constant 0 : i32
    return %arg0, %c0_i32 : i32, i32
  }
}

</mosaic_0001>

<bundles_post_ra>
// kernel: gru_deepsc_forward.1
= control target key start
LH: loop header
LB: loop body
LE: loop exit
PB: predicated region body
PF: predicated region fallthrough
CT: control target
= control target key end

     0   :  { %s5885_s6 = smov 1   ;;  %s5886_s10 = smov 2   ;;  %s7377_s0 = inlined_call_operand.smem [shape: u32[37], index: -1, kind: input, shape index: {}] }
   0x1   :  { %s5962_s5 = sld [smem:[%s7377_s0]]   ;;  %s5887_s14 = smov 3  }
   0x2   :  { %s5967_s9 = sld [smem:[%s7377_s0 + %s5885_s6]]   ;;  %s5888_s18 = smov 4  }
   0x3   :  { %s5972_s13 = sld [smem:[%s7377_s0 + %s5886_s10]]   ;;  %s5889_s22 = smov 5  }
   0x4   :  { %s5977_s17 = sld [smem:[%s7377_s0 + %s5887_s14]]   ;;  %s5890_s26 = smov 6  }
   0x5   :  { %s5982_s21 = sld [smem:[%s7377_s0 + %s5888_s18]]   ;;  %s5891_s30 = smov 7  }
   0x6   :  { %s5987_s25 = sld [smem:[%s7377_s0 + %s5889_s22]]   ;;  %s5892_s4 = smov 8  }
   0x7   :  { %7389 = sst [smem:[#allocation49_spill]] %s5962_s5  ;;  %s5893_s10 = smov 9  }
   0x8   :  { %s5992_s29 = sld [smem:[%s7377_s0 + %s5890_s26]]   ;;  %s5894_s15 = smov 10  }
   0x9   :  { %s5997_s3 = sld [smem:[%s7377_s0 + %s5891_s30]]   ;;  %s5895_s20 = smov 11  }
   0xa   :  { %7390 = sst [smem:[#allocation50_spill]] %s5977_s17  ;;  %s5896_s26 = smov 12  }
   0xb   :  { %7391 = sst [smem:[#allocation51_spill]] %s5982_s21  ;;  %s5897_s1 = smov 13  }
   0xc   :  { %s6002_s8 = sld [smem:[%s7377_s0 + %s5892_s4]]   ;;  %s5898_s7 = smov 14  }
   0xd   :  { %s6007_s14 = sld [smem:[%s7377_s0 + %s5893_s10]]   ;;  %s5900_s22 = smov 16  }
   0xe   :  { %s6012_s19 = sld [smem:[%s7377_s0 + %s5894_s15]]   ;;  %s5899_s15 = smov 15  }
   0xf   :  { %7392 = sst [smem:[#allocation52_spill]] %s5997_s3  ;;  %s5901_s28 = smov 17  }
  0x10   :  { %s6017_s24 = sld [smem:[%s7377_s0 + %s5895_s20]]  }
  0x11   :  { %s6022_s30 = sld [smem:[%s7377_s0 + %s5896_s26]]  }
  0x12   :  { %7393 = sst [smem:[#allocation53_spill]] %s6002_s8 }
  0x13   :  { %7394 = sst [smem:[#allocation54_spill]] %s6007_s14 }
  0x14   :  { %s6027_s6 = sld [smem:[%s7377_s0 + %s5897_s1]]  }
  0x15   :  { %s6032_s12 = sld [smem:[%s7377_s0 + %s5898_s7]]   ;;  %s5902_s7 = smov 18  }
  0x16   :  { %7395 = sst [smem:[#allocation55_spill]] %s6017_s24 }
  0x17   :  { %7396 = sst [smem:[#allocation56_spill]] %s6022_s30 }
  0x18   :  { %s6037_s20 = sld [smem:[%s7377_s0 + %s5899_s15]]   ;;  %s5903_s15 = smov 19  }
  0x19   :  { %s6042_s27 = sld [smem:[%s7377_s0 + %s5900_s22]]   ;;  %s5904_s22 = smov 20  }
  0x1a   :  { %7397 = sst [smem:[#allocation57_spill]] %s6027_s6 }
  0x1b   :  { %s6047_s4 = sld [smem:[%s7377_s0 + %s5901_s28]]   ;;  %s5905_s28 = smov 21  }
  0x1c   :  { %s6052_s24 = sld [smem:[%s7377_s0 + %s5902_s7]]   ;;  %s5906_s7 = smov 22  }
  0x1d   :  { %s6062_s6 = sld [smem:[%s7377_s0 + %s5904_s22]]   ;;  %s5908_s22 = smov 24  }
  0x1e   :  { %7398 = sst [smem:[#allocation58_spill]] %s6037_s20 }
  0x1f   :  { %s6057_s20 = sld [smem:[%s7377_s0 + %s5903_s15]]   ;;  %s5907_s15 = smov 23  }
  0x20   :  { %s6072_s14 = sld [smem:[%s7377_s0 + %s5906_s7]]   ;;  %s5910_s7 = smov 26  }
  0x21   :  { %7399 = sst [smem:[#allocation59_spill]] %s6047_s4 }
  0x22   :  { %s6067_s4 = sld [smem:[%s7377_s0 + %s5905_s28]]   ;;  %s5909_s28 = smov 25  }
  0x23   :  { %s6077_s30 = sld [smem:[%s7377_s0 + %s5907_s15]]   ;;  %s5911_s15 = smov 27  }
  0x24   :  { %s6082_s17 = sld [smem:[%s7377_s0 + %s5908_s22]]   ;;  %s5912_s22 = smov 28  }
  0x25   :  { %7400 = sst [smem:[#allocation60_spill]] %s6057_s20 }
  0x26   :  { %s6087_s3 = sld [smem:[%s7377_s0 + %s5909_s28]]   ;;  %s5913_s28 = smov 29  }
  0x27   :  { %s6092_s8 = sld [smem:[%s7377_s0 + %s5910_s7]]   ;;  %s5914_s7 = smov 30  }
  0x28   :  { %7401 = sst [smem:[#allocation61_spill]] %s6067_s4 }
  0x29   :  { %7402 = sst [smem:[#allocation62_spill]] %s6077_s30 }
  0x2a   :  { %s6097_s21 = sld [smem:[%s7377_s0 + %s5911_s15]]   ;;  %s5915_s15 = smov 31  }
  0x2b   :  { %s6102_s5 = sld [smem:[%s7377_s0 + %s5912_s22]]   ;;  %s5916_s22 = smov 32  }
  0x2c   :  { %7403 = sst [smem:[#allocation63_spill]] %s6087_s3 }
  0x2d   :  { %7404 = sst [smem:[#allocation64_spill]] %s6092_s8 }
  0x2e   :  { %s6107_s3 = sld [smem:[%s7377_s0 + %s5913_s28]]   ;;  %s5917_s28 = smov 33  }
  0x2f   :  { %s6112_s8 = sld [smem:[%s7377_s0 + %s5914_s7]]   ;;  %s5918_s7 = smov 34  }
  0x30   :  { %s6117_s30 = sld [smem:[%s7377_s0 + %s5915_s15]]   ;;  %s5919_s15 = smov 35  }
  0x31   :  { %7405 = sst [smem:[#allocation65_spill]] %s6102_s5 }
  0x32   :  { %s6122_s5 = sld [smem:[%s7377_s0 + %s5916_s22]]   ;;  %s5920_s22 = smov 36  }
  0x33   :  { %s6127_s4 = sld [smem:[%s7377_s0 + %s5917_s28]]  }
  0x34   :  { %s6137_s20 = sld [smem:[%s7377_s0 + %s5919_s15]]  }
  0x35   :  { %7406 = sst [smem:[#allocation66_spill]] %s6112_s8 }
  0x36   :  { %s6132_s8 = sld [smem:[%s7377_s0 + %s5918_s7]]  }
  0x38   :  { %7407 = sst [smem:[#allocation67_spill]] %s6122_s5 }
  0x39   :  { %s6142_s5 = sld [smem:[%s7377_s0 + %s5920_s22]]  }
  0x3a   :  { %78 = vsyncpa [#allocation3], 0 }
  0x3b   :  { %79 = vsyncpa [#allocation5], 0 }
  0x3c   :  { %80 = vsyncpa [#allocation8], 0 }
  0x3d   :  { %81 = vsyncpa [#allocation11], 0 }
  0x3e   :  { %82 = vsyncpa [#allocation14], 0 }
  0x3f   :  { %83 = vsyncpa [#allocation17], 0 }
  0x40   :  { %84 = vsyncpa [#allocation20], 0 }
  0x41   :  { %85 = vsyncpa [#allocation23], 0 }
  0x42   :  { %86 = vsyncpa [#allocation26], 0 }
  0x43   :  { %87 = vsyncpa [#allocation29], 0 }
  0x44   :  { %88 = vsyncpa [#allocation32], 0 }
  0x45   :  { %89 = vsyncpa [#allocation35], 0  ;;  %s109_s28 = sshll.u32 %s5972_s13, 4  ;;  %s5921_s0 = smov [#allocation4]   ;;  %s110_s28 = int_to_ptr.hbm [resolvable:$true] %s109_s28 }
  0x46   :  { %s111_s1 = sshll.u32 %s5921_s0, 4  ;;  %s139_s2 = sshll.u32 %s5992_s29, 4  ;;  %s112_s1 = int_to_ptr.vmem [resolvable:$true] %s111_s1  ;;  %s140_s2 = int_to_ptr.hbm [resolvable:$true] %s139_s2 }
  0x47   :  { %s5309_s7 = sshra.s32 %s110_s28, 4  ;;  %s5313_s11 = scalar_lea.hbm %s5972_s13, 32  ;;  %s5310_s7 = int_to_ptr.hbm [resolvable:$true] %s5309_s7 }
  0x48   :  { %s5311_s10 = scalar_lea.hbm %s5310_s7, 32  ;;  %p5314_p1 = scmp.lt.s32.totalorder %s5310_s7, %s5972_s13 }
  0x49   :  { %p5312_p0 = scmp.ne.s32.totalorder %s5310_s7, %s5311_s10  ;;  %p5315_p2 = scmp.lt.s32.totalorder %s5313_s11, %s5311_s10 }
  0x4b   :  { %p5316_p3 = por %p5315_p2, %p5314_p1 }
  0x4d   :  { %p5317_p4 = pnand %p5316_p3, %p5312_p0 }
  0x4f   :  { %5320 = shalt.err (!%p5317_p4)
}
  0x50   :  { %s5922_s15 = smov 128   ;;  %s5923_s16 = smov 8  }
  0x51   :  { %117 = dma.hbm_to_vmem [thread:$0]  %s110_s28, 512, %s112_s1, [#allocation5], %s5922_s15, %s5922_s15, %s5923_s16  }
  0x52   :  { %s5924_s18 = smov [#allocation7]   ;;  %s177_s23 = sshll.u32 %s6032_s12, 4  ;;  %s6152_s23 = int_to_ptr.hbm [resolvable:$true] %s177_s23 }
  0x53   :  { %s141_s22 = sshll.u32 %s5924_s18, 4  ;;  %s5333_s13 = sshra.s32 %s140_s2, 4  ;;  %s142_s22 = int_to_ptr.vmem [resolvable:$true] %s141_s22  ;;  %s5334_s13 = int_to_ptr.hbm [resolvable:$true] %s5333_s13 }
  0x54   :  { %s5335_s26 = scalar_lea.hbm %s5334_s13, 32  ;;  %s5337_s0 = scalar_lea.hbm %s5992_s29, 32 }
  0x55   :  { %p5336_p5 = scmp.ne.s32.totalorder %s5334_s13, %s5335_s26  ;;  %p5338_p6 = scmp.lt.s32.totalorder %s5334_s13, %s5992_s29 }
  0x56   :  { %p5339_p7 = scmp.lt.s32.totalorder %s5337_s0, %s5335_s26 }
  0x58   :  { %p5340_p8 = por %p5339_p7, %p5338_p6 }
  0x5a   :  { %p5341_p9 = pnand %p5340_p8, %p5336_p5 }
  0x5c   :  { %5344 = shalt.err (!%p5341_p9)
}
  0x5d   :  { %147 = dma.hbm_to_vmem [thread:$0]  %s140_s2, 512, %s142_s22, [#allocation8], %s5922_s15, %s5922_s15, %s5923_s16  }
  0x5e   :  { %s206_s28 = sshll.u32 %s6052_s24, 4  ;;  %s5925_s1 = smov [#allocation10]   ;;  %s207_s28 = int_to_ptr.hbm [resolvable:$true] %s206_s28 }
  0x5f   :  { %s179_s7 = sshll.u32 %s5925_s1, 4  ;;  %s5357_s10 = sshra.s32 %s6152_s23, 4  ;;  %s180_s7 = int_to_ptr.vmem [resolvable:$true] %s179_s7  ;;  %s5358_s10 = int_to_ptr.hbm [resolvable:$true] %s5357_s10 }
  0x60   :  { %s5359_s29 = scalar_lea.hbm %s5358_s10, 32  ;;  %s5361_s11 = scalar_lea.hbm %s6032_s12, 32 }
  0x61   :  { %p5360_p10 = scmp.ne.s32.totalorder %s5358_s10, %s5359_s29  ;;  %p5362_p11 = scmp.lt.s32.totalorder %s5358_s10, %s6032_s12 }
  0x62   :  { %p5363_p12 = scmp.lt.s32.totalorder %s5361_s11, %s5359_s29 }
  0x64   :  { %p5364_p13 = por %p5363_p12, %p5362_p11 }
  0x66   :  { %p5365_p0 = pnand %p5364_p13, %p5360_p10 }
  0x68   :  { %5368 = shalt.err (!%p5365_p0)
}
  0x69   :  { %185 = dma.hbm_to_vmem [thread:$0]  %s6152_s23, 512, %s180_s7, [#allocation11], %s5922_s15, %s5922_s15, %s5923_s16  }
  0x6a   :  { %s5926_s2 = smov [#allocation13]   ;;  %s230_s22 = sshll.u32 %s6062_s6, 4  ;;  %s231_s22 = int_to_ptr.hbm [resolvable:$true] %s230_s22 }
  0x6b   :  { %s208_s18 = sshll.u32 %s5926_s2, 4  ;;  %s5381_s13 = sshra.s32 %s207_s28, 4  ;;  %s209_s18 = int_to_ptr.vmem [resolvable:$true] %s208_s18  ;;  %s5382_s13 = int_to_ptr.hbm [resolvable:$true] %s5381_s13 }
  0x6c   :  { %s5383_s12 = scalar_lea.hbm %s5382_s13, 1  ;;  %s5385_s26 = scalar_lea.hbm %s6052_s24, 1 }
  0x6d   :  { %p5384_p1 = scmp.ne.s32.totalorder %s5382_s13, %s5383_s12  ;;  %p5386_p2 = scmp.lt.s32.totalorder %s5382_s13, %s6052_s24 }
  0x6e   :  { %p5387_p3 = scmp.lt.s32.totalorder %s5385_s26, %s5383_s12 }
  0x70   :  { %p5388_p4 = por %p5387_p3, %p5386_p2 }
  0x72   :  { %p5389_p5 = pnand %p5388_p4, %p5384_p1 }
  0x74   :  { %5392 = shalt.err (!%p5389_p5)
}
  0x75   :  { %211 = dma.hbm_to_vmem [thread:$0]  %s207_s28, 16, %s209_s18, [#allocation14]  }
  0x76   :  { %s254_s23 = sshll.u32 %s6072_s14, 4  ;;  %s5927_s0 = smov [#allocation16]   ;;  %s255_s23 = int_to_ptr.hbm [resolvable:$true] %s254_s23 }
  0x77   :  { %s232_s1 = sshll.u32 %s5927_s0, 4  ;;  %s5405_s7 = sshra.s32 %s231_s22, 4  ;;  %s233_s1 = int_to_ptr.vmem [resolvable:$true] %s232_s1  ;;  %s5406_s7 = int_to_ptr.hbm [resolvable:$true] %s5405_s7 }
  0x78   :  { %s5407_s10 = scalar_lea.hbm %s5406_s7, 1  ;;  %s5409_s29 = scalar_lea.hbm %s6062_s6, 1 }
  0x79   :  { %p5408_p6 = scmp.ne.s32.totalorder %s5406_s7, %s5407_s10  ;;  %p5410_p7 = scmp.lt.s32.totalorder %s5406_s7, %s6062_s6 }
  0x7a   :  { %p5411_p8 = scmp.lt.s32.totalorder %s5409_s29, %s5407_s10 }
  0x7c   :  { %p5412_p9 = por %p5411_p8, %p5410_p7 }
  0x7e   :  { %p5413_p10 = pnand %p5412_p9, %p5408_p6 }
  0x80   :  { %5416 = shalt.err (!%p5413_p10)
}
  0x81   :  { %235 = dma.hbm_to_vmem [thread:$0]  %s231_s22, 16, %s233_s1, [#allocation17]  }
  0x82   :  { %s5928_s24 = smov [#allocation19]   ;;  %s278_s11 = sshll.u32 %s6082_s17, 4  ;;  %s279_s11 = int_to_ptr.hbm [resolvable:$true] %s278_s11 }
  0x83   :  { %s256_s28 = sshll.u32 %s5928_s24, 4  ;;  %s5429_s2 = sshra.s32 %s255_s23, 4  ;;  %s257_s28 = int_to_ptr.vmem [resolvable:$true] %s256_s28  ;;  %s5430_s2 = int_to_ptr.hbm [resolvable:$true] %s5429_s2 }
  0x84   :  { %s5431_s18 = scalar_lea.hbm %s5430_s2, 1  ;;  %s5433_s13 = scalar_lea.hbm %s6072_s14, 1 }
  0x85   :  { %p5432_p11 = scmp.ne.s32.totalorder %s5430_s2, %s5431_s18  ;;  %p5434_p12 = scmp.lt.s32.totalorder %s5430_s2, %s6072_s14 }
  0x86   :  { %p5435_p13 = scmp.lt.s32.totalorder %s5433_s13, %s5431_s18 }
  0x88   :  { %p5436_p0 = por %p5435_p13, %p5434_p12 }
  0x8a   :  { %p5437_p1 = pnand %p5436_p0, %p5432_p11 }
  0x8c   :  { %5440 = shalt.err (!%p5437_p1)
}
  0x8d   :  { %259 = dma.hbm_to_vmem [thread:$0]  %s255_s23, 16, %s257_s28, [#allocation20]  }
  0x8e   :  { %s303_s6 = sshll.u32 %s6097_s21, 4  ;;  %s5929_s22 = smov [#allocation22]   ;;  %s6177_s6 = int_to_ptr.hbm [resolvable:$true] %s303_s6 }
  0x8f   :  { %s280_s12 = sshll.u32 %s5929_s22, 4  ;;  %s5453_s26 = sshra.s32 %s279_s11, 4  ;;  %s281_s12 = int_to_ptr.vmem [resolvable:$true] %s280_s12  ;;  %s5454_s26 = int_to_ptr.hbm [resolvable:$true] %s5453_s26 }
  0x90   :  { %s5455_s0 = scalar_lea.hbm %s5454_s26, 1  ;;  %s5457_s1 = scalar_lea.hbm %s6082_s17, 1 }
  0x91   :  { %p5456_p2 = scmp.ne.s32.totalorder %s5454_s26, %s5455_s0  ;;  %p5458_p3 = scmp.lt.s32.totalorder %s5454_s26, %s6082_s17 }
  0x92   :  { %p5459_p4 = scmp.lt.s32.totalorder %s5457_s1, %s5455_s0 }
  0x94   :  { %p5460_p5 = por %p5459_p4, %p5458_p3 }
  0x96   :  { %p5461_p6 = pnand %p5460_p5, %p5456_p2 }
  0x98   :  { %5464 = shalt.err (!%p5461_p6)
}
  0x99   :  { %283 = dma.hbm_to_vmem [thread:$0]  %s279_s11, 16, %s281_s12, [#allocation23]  }
  0x9a   :  { %s5930_s14 = smov [#allocation25]   ;;  %s328_s7 = sshll.u32 %s6107_s3, 4  ;;  %s329_s7 = int_to_ptr.hbm [resolvable:$true] %s328_s7 }
  0x9b   :  { %s305_s23 = sshll.u32 %s5930_s14, 4  ;;  %s5477_s10 = sshra.s32 %s6177_s6, 4  ;;  %s306_s23 = int_to_ptr.vmem [resolvable:$true] %s305_s23  ;;  %s5478_s10 = int_to_ptr.hbm [resolvable:$true] %s5477_s10 }
  0x9c   :  { %s5479_s29 = scalar_lea.hbm %s5478_s10, 32  ;;  %s5481_s24 = scalar_lea.hbm %s6097_s21, 32 }
  0x9d   :  { %p5480_p7 = scmp.ne.s32.totalorder %s5478_s10, %s5479_s29  ;;  %p5482_p8 = scmp.lt.s32.totalorder %s5478_s10, %s6097_s21 }
  0x9e   :  { %p5483_p9 = scmp.lt.s32.totalorder %s5481_s24, %s5479_s29 }
  0xa0   :  { %p5484_p10 = por %p5483_p9, %p5482_p8 }
  0xa2   :  { %p5485_p11 = pnand %p5484_p10, %p5480_p7 }
  0xa4   :  { %5488 = shalt.err (!%p5485_p11)
}
  0xa5   :  { %311 = dma.hbm_to_vmem [thread:$0]  %s6177_s6, 512, %s306_s23, [#allocation26], %s5922_s15, %s5922_s15, %s5923_s16  }
  0xa6   :  { %s351_s17 = sshll.u32 %s6117_s30, 4  ;;  %s5931_s28 = smov [#allocation28]   ;;  %s6190_s17 = int_to_ptr.hbm [resolvable:$true] %s351_s17 }
  0xa7   :  { %s330_s11 = sshll.u32 %s5931_s28, 4  ;;  %s5501_s2 = sshra.s32 %s329_s7, 4  ;;  %s331_s11 = int_to_ptr.vmem [resolvable:$true] %s330_s11  ;;  %s5502_s2 = int_to_ptr.hbm [resolvable:$true] %s5501_s2 }
  0xa8   :  { %s5503_s21 = scalar_lea.hbm %s5502_s2, 1  ;;  %s5505_s18 = scalar_lea.hbm %s6107_s3, 1 }
  0xa9   :  { %p5504_p12 = scmp.ne.s32.totalorder %s5502_s2, %s5503_s21  ;;  %p5506_p13 = scmp.lt.s32.totalorder %s5502_s2, %s6107_s3 }
  0xaa   :  { %p5507_p0 = scmp.lt.s32.totalorder %s5505_s18, %s5503_s21 }
  0xac   :  { %p5508_p1 = por %p5507_p0, %p5506_p13 }
  0xae   :  { %p5509_p2 = pnand %p5508_p1, %p5504_p12 }
  0xb0   :  { %5512 = shalt.err (!%p5509_p2)
}
  0xb1   :  { %333 = dma.hbm_to_vmem [thread:$0]  %s329_s7, 16, %s331_s11, [#allocation29]  }
  0xb2   :  { %s5932_s13 = smov [#allocation31]   ;;  %s376_s22 = sshll.u32 %s6127_s4, 4  ;;  %s377_s22 = int_to_ptr.hbm [resolvable:$true] %s376_s22 }
  0xb3   :  { %s353_s6 = sshll.u32 %s5932_s13, 4  ;;  %s5525_s12 = sshra.s32 %s6190_s17, 4  ;;  %s354_s6 = int_to_ptr.vmem [resolvable:$true] %s353_s6  ;;  %s5526_s12 = int_to_ptr.hbm [resolvable:$true] %s5525_s12 }
  0xb4   :  { %s5527_s26 = scalar_lea.hbm %s5526_s12, 32  ;;  %s5529_s0 = scalar_lea.hbm %s6117_s30, 32 }
  0xb5   :  { %p5528_p3 = scmp.ne.s32.totalorder %s5526_s12, %s5527_s26  ;;  %p5530_p4 = scmp.lt.s32.totalorder %s5526_s12, %s6117_s30 }
  0xb6   :  { %p5531_p5 = scmp.lt.s32.totalorder %s5529_s0, %s5527_s26 }
  0xb8   :  { %p5532_p6 = por %p5531_p5, %p5530_p4 }
  0xba   :  { %p5533_p7 = pnand %p5532_p6, %p5528_p3 }
  0xbc   :  { %5536 = shalt.err (!%p5533_p7)
}
  0xbd   :  { %359 = dma.hbm_to_vmem [thread:$0]  %s6190_s17, 512, %s354_s6, [#allocation32], %s5922_s15, %s5922_s15, %s5923_s16  }
  0xbe   :  { %s96_s3 = sshll.u32 %s5967_s9, 4  ;;  %s5933_s1 = smov [#allocation34]   ;;  %s6203_s3 = int_to_ptr.hbm [resolvable:$true] %s96_s3 }
  0xbf   :  { %s378_s14 = sshll.u32 %s5933_s1, 4  ;;  %s5549_s23 = sshra.s32 %s377_s22, 4  ;;  %s379_s14 = int_to_ptr.vmem [resolvable:$true] %s378_s14  ;;  %s5550_s23 = int_to_ptr.hbm [resolvable:$true] %s5549_s23 }
  0xc0   :  { %s5551_s30 = scalar_lea.hbm %s5550_s23, 1  ;;  %s5553_s7 = scalar_lea.hbm %s6127_s4, 1 }
  0xc1   :  { %p5552_p8 = scmp.ne.s32.totalorder %s5550_s23, %s5551_s30  ;;  %p5554_p9 = scmp.lt.s32.totalorder %s5550_s23, %s6127_s4 }
  0xc2   :  { %p5555_p10 = scmp.lt.s32.totalorder %s5553_s7, %s5551_s30 }
  0xc4   :  { %p5556_p11 = por %p5555_p10, %p5554_p9 }
  0xc6   :  { %p5557_p12 = pnand %p5556_p11, %p5552_p8 }
  0xc8   :  { %5560 = shalt.err (!%p5557_p12)
}
  0xc9   :  { %381 = dma.hbm_to_vmem [thread:$0]  %s377_s22, 16, %s379_s14, [#allocation35]  }
  0xca   :  { %s5934_s10 = smov [#allocation2]   ;;  %s126_s24 = sshll.u32 %s5987_s25, 4  ;;  %s6208_s24 = int_to_ptr.hbm [resolvable:$true] %s126_s24 }
  0xcb   :  { %s98_s29 = sshll.u32 %s5934_s10, 4  ;;  %s5573_s17 = sshra.s32 %s6203_s3, 4  ;;  %s99_s29 = int_to_ptr.vmem [resolvable:$true] %s98_s29  ;;  %s5574_s17 = int_to_ptr.hbm [resolvable:$true] %s5573_s17 }
  0xcc   :  { %s5575_s28 = scalar_lea.hbm %s5574_s17, 16  ;;  %s5577_s4 = scalar_lea.hbm %s5967_s9, 16 }
  0xcd   :  { %p5576_p13 = scmp.ne.s32.totalorder %s5574_s17, %s5575_s28  ;;  %p5578_p0 = scmp.lt.s32.totalorder %s5574_s17, %s5967_s9 }
  0xce   :  { %p5579_p1 = scmp.lt.s32.totalorder %s5577_s4, %s5575_s28 }
  0xd0   :  { %p5580_p2 = por %p5579_p1, %p5578_p0 }
  0xd2   :  { %p5581_p3 = pnand %p5580_p2, %p5576_p13 }
  0xd4   :  { %5584 = shalt.err (!%p5581_p3)
}
  0xd5   :  { %104 = dma.hbm_to_vmem [thread:$0]  %s6203_s3, 256, %s99_s29, [#allocation3], %s5922_s15, %s5922_s15, %s5923_s16  }
  0xd6   :  { %s158_s11 = sshll.u32 %s6012_s19, 4  ;;  %s5935_s2 = smov [#allocation6]   ;;  %s6218_s11 = int_to_ptr.hbm [resolvable:$true] %s158_s11 }
  0xd7   :  { %s128_s21 = sshll.u32 %s5935_s2, 4  ;;  %s5597_s9 = sshra.s32 %s6208_s24, 4  ;;  %s129_s21 = int_to_ptr.vmem [resolvable:$true] %s128_s21  ;;  %s5598_s9 = int_to_ptr.hbm [resolvable:$true] %s5597_s9 }
  0xd8   :  { %s5599_s18 = scalar_lea.hbm %s5598_s9, 16  ;;  %s5601_s13 = scalar_lea.hbm %s5987_s25, 16 }
  0xd9   :  { %p5600_p4 = scmp.ne.s32.totalorder %s5598_s9, %s5599_s18  ;;  %p5602_p5 = scmp.lt.s32.totalorder %s5598_s9, %s5987_s25 }
  0xda   :  { %p5603_p6 = scmp.lt.s32.totalorder %s5601_s13, %s5599_s18 }
  0xdc   :  { %p5604_p7 = por %p5603_p6, %p5602_p5 }
  0xde   :  { %p5605_p8 = pnand %p5604_p7, %p5600_p4 }
  0xe0   :  { %5608 = shalt.err (!%p5605_p8)
}
  0xe1   :  { %134 = dma.hbm_to_vmem [thread:$0]  %s6208_s24, 256, %s129_s21, [#allocation5], %s5922_s15, %s5922_s15, %s5923_s16  }
  0xe2   :  { %s5936_s6 = smov [#allocation9]   ;;  %s193_s12 = sshll.u32 %s6042_s27, 4  ;;  %s194_s12 = int_to_ptr.hbm [resolvable:$true] %s193_s12 }
  0xe3   :  { %s160_s22 = sshll.u32 %s5936_s6, 4  ;;  %s5621_s26 = sshra.s32 %s6218_s11, 4  ;;  %s161_s22 = int_to_ptr.vmem [resolvable:$true] %s160_s22  ;;  %s5622_s26 = int_to_ptr.hbm [resolvable:$true] %s5621_s26 }
  0xe4   :  { %s5623_s25 = scalar_lea.hbm %s5622_s26, 32  ;;  %s5625_s0 = scalar_lea.hbm %s6012_s19, 32 }
  0xe5   :  { %p5624_p9 = scmp.ne.s32.totalorder %s5622_s26, %s5623_s25  ;;  %p5626_p10 = scmp.lt.s32.totalorder %s5622_s26, %s6012_s19 }
  0xe6   :  { %p5627_p11 = scmp.lt.s32.totalorder %s5625_s0, %s5623_s25 }
  0xe8   :  { %p5628_p12 = por %p5627_p11, %p5626_p10 }
  0xea   :  { %p5629_p13 = pnand %p5628_p12, %p5624_p9 }
  0xec   :  { %5632 = shalt.err (!%p5629_p13)
}
  0xed   :  { %s7408_s3 = sld [smem:[#allocation60_spill]]  ;;  %s5937_s14 = smov [#allocation12]  }
  0xee   :  { %166 = dma.hbm_to_vmem [thread:$0]  %s6218_s11, 512, %s161_s22, [#allocation8], %s5922_s15, %s5922_s15, %s5923_s16  }
  0xef   :  { %s195_s23 = sshll.u32 %s5937_s14, 4  ;;  %s5645_s30 = sshra.s32 %s194_s12, 4  ;;  %s196_s23 = int_to_ptr.vmem [resolvable:$true] %s195_s23  ;;  %s5646_s30 = int_to_ptr.hbm [resolvable:$true] %s5645_s30 }
  0xf0   :  { %s5647_s19 = scalar_lea.hbm %s5646_s30, 1  ;;  %s5649_s7 = scalar_lea.hbm %s6042_s27, 1 }
  0xf1   :  { %p5648_p0 = scmp.ne.s32.totalorder %s5646_s30, %s5647_s19  ;;  %p5650_p1 = scmp.lt.s32.totalorder %s5646_s30, %s6042_s27 }
  0xf2   :  { %p5651_p2 = scmp.lt.s32.totalorder %s5649_s7, %s5647_s19 }
  0xf3   :  { %s216_s1 = sshll.u32 %s7408_s3, 4  ;;  %s6236_s1 = int_to_ptr.hbm [resolvable:$true] %s216_s1 }
  0xf4   :  { %p5652_p3 = por %p5651_p2, %p5650_p1 }
  0xf6   :  { %p5653_p4 = pnand %p5652_p3, %p5648_p0 }
  0xf8   :  { %5656 = shalt.err (!%p5653_p4)
}
  0xf9   :  { %198 = dma.hbm_to_vmem [thread:$0]  %s194_s12, 16, %s196_s23, [#allocation11]  }
  0xfa   :  { %s7409_s10 = sld [smem:[#allocation61_spill]]  ;;  %s5938_s29 = smov [#allocation15]  }
  0xfb   :  { %s218_s24 = sshll.u32 %s5938_s29, 4  ;;  %s5669_s28 = sshra.s32 %s6236_s1, 4  ;;  %s219_s24 = int_to_ptr.vmem [resolvable:$true] %s218_s24  ;;  %s5670_s28 = int_to_ptr.hbm [resolvable:$true] %s5669_s28 }
  0xfc   :  { %s5671_s4 = scalar_lea.hbm %s5670_s28, 32  ;;  %s5673_s27 = scalar_lea.hbm %s7408_s3, 32 }
  0xfd   :  { %p5672_p5 = scmp.ne.s32.totalorder %s5670_s28, %s5671_s4  ;;  %p5674_p6 = scmp.lt.s32.totalorder %s5670_s28, %s7408_s3 }
  0xfe   :  { %p5675_p7 = scmp.lt.s32.totalorder %s5673_s27, %s5671_s4 }
 0x100   :  { %s240_s17 = sshll.u32 %s7409_s10, 4  ;;  %p5676_p8 = por %p5675_p7, %p5674_p6  ;;  %s6241_s17 = int_to_ptr.hbm [resolvable:$true] %s240_s17 }
 0x102   :  { %p5677_p9 = pnand %p5676_p8, %p5672_p5 }
 0x104   :  { %5680 = shalt.err (!%p5677_p9)
}
 0x105   :  { %s7410_s11 = sld [smem:[#allocation62_spill]]  ;;  %s5939_s21 = smov [#allocation18]  }
 0x106   :  { %224 = dma.hbm_to_vmem [thread:$0]  %s6236_s1, 512, %s219_s24, [#allocation14], %s5922_s15, %s5922_s15, %s5923_s16  }
 0x107   :  { %s242_s9 = sshll.u32 %s5939_s21, 4  ;;  %s5693_s18 = sshra.s32 %s6241_s17, 4  ;;  %s243_s9 = int_to_ptr.vmem [resolvable:$true] %s242_s9  ;;  %s5694_s18 = int_to_ptr.hbm [resolvable:$true] %s5693_s18 }
 0x108   :  { %s5695_s13 = scalar_lea.hbm %s5694_s18, 32  ;;  %s5697_s6 = scalar_lea.hbm %s7409_s10, 32 }
 0x109   :  { %p5696_p10 = scmp.ne.s32.totalorder %s5694_s18, %s5695_s13  ;;  %p5698_p11 = scmp.lt.s32.totalorder %s5694_s18, %s7409_s10 }
 0x10a   :  { %p5699_p12 = scmp.lt.s32.totalorder %s5697_s6, %s5695_s13 }
 0x10b   :  { %s264_s2 = sshll.u32 %s7410_s11, 4  ;;  %s6251_s2 = int_to_ptr.hbm [resolvable:$true] %s264_s2 }
 0x10c   :  { %p5700_p13 = por %p5699_p12, %p5698_p11 }
 0x10e   :  { %p5701_p0 = pnand %p5700_p13, %p5696_p10 }
 0x110   :  { %5704 = shalt.err (!%p5701_p0)
}
 0x111   :  { %s7411_s22 = sld [smem:[#allocation64_spill]]  ;;  %s5940_s12 = smov [#allocation21]  }
 0x112   :  { %248 = dma.hbm_to_vmem [thread:$0]  %s6241_s17, 512, %s243_s9, [#allocation17], %s5922_s15, %s5922_s15, %s5923_s16  }
 0x113   :  { %s266_s26 = sshll.u32 %s5940_s12, 4  ;;  %s5717_s0 = sshra.s32 %s6251_s2, 4  ;;  %s267_s26 = int_to_ptr.vmem [resolvable:$true] %s266_s26  ;;  %s5718_s0 = int_to_ptr.hbm [resolvable:$true] %s5717_s0 }
 0x114   :  { %s5719_s3 = scalar_lea.hbm %s5718_s0, 32  ;;  %s5721_s1 = scalar_lea.hbm %s7410_s11, 32 }
 0x115   :  { %p5720_p1 = scmp.ne.s32.totalorder %s5718_s0, %s5719_s3  ;;  %p5722_p2 = scmp.lt.s32.totalorder %s5718_s0, %s7410_s11 }
 0x116   :  { %p5723_p3 = scmp.lt.s32.totalorder %s5721_s1, %s5719_s3 }
 0x117   :  { %s290_s25 = sshll.u32 %s7411_s22, 4  ;;  %s6261_s25 = int_to_ptr.hbm [resolvable:$true] %s290_s25 }
 0x118   :  { %p5724_p4 = por %p5723_p3, %p5722_p2 }
 0x11a   :  { %p5725_p5 = pnand %p5724_p4, %p5720_p1 }
 0x11c   :  { %5728 = shalt.err (!%p5725_p5)
}
 0x11d   :  { %s7412_s14 = sld [smem:[#allocation65_spill]]  ;;  %s5941_s30 = smov [#allocation24]  }
 0x11e   :  { %272 = dma.hbm_to_vmem [thread:$0]  %s6251_s2, 512, %s267_s26, [#allocation20], %s5922_s15, %s5922_s15, %s5923_s16  }
 0x11f   :  { %s292_s19 = sshll.u32 %s5941_s30, 4  ;;  %s5741_s7 = sshra.s32 %s6261_s25, 4  ;;  %s293_s19 = int_to_ptr.vmem [resolvable:$true] %s292_s19  ;;  %s5742_s7 = int_to_ptr.hbm [resolvable:$true] %s5741_s7 }
 0x120   :  { %s5743_s10 = scalar_lea.hbm %s5742_s7, 64  ;;  %s5745_s29 = scalar_lea.hbm %s7411_s22, 64 }
 0x121   :  { %p5744_p6 = scmp.ne.s32.totalorder %s5742_s7, %s5743_s10  ;;  %p5746_p7 = scmp.lt.s32.totalorder %s5742_s7, %s7411_s22 }
 0x122   :  { %p5747_p8 = scmp.lt.s32.totalorder %s5745_s29, %s5743_s10 }
 0x123   :  { %s317_s23 = sshll.u32 %s7412_s14, 4  ;;  %s318_s23 = int_to_ptr.hbm [resolvable:$true] %s317_s23 }
 0x124   :  { %p5748_p9 = por %p5747_p8, %p5746_p7 }
 0x126   :  { %p5749_p10 = pnand %p5748_p9, %p5744_p6 }
 0x128   :  { %5752 = shalt.err (!%p5749_p10)
}
 0x129   :  { %s7413_s24 = sld [smem:[#allocation66_spill]]  ;;  %s5942_s17 = smov [#allocation27]  }
 0x12a   :  { %298 = dma.hbm_to_vmem [thread:$0]  %s6261_s25, 1024, %s293_s19, [#allocation23], %s5922_s15, %s5922_s15, %s5923_s16  }
 0x12b   :  { %s319_s28 = sshll.u32 %s5942_s17, 4  ;;  %s5765_s27 = sshra.s32 %s318_s23, 4  ;;  %s320_s28 = int_to_ptr.vmem [resolvable:$true] %s319_s28  ;;  %s5766_s27 = int_to_ptr.hbm [resolvable:$true] %s5765_s27 }
 0x12c   :  { %s5767_s11 = scalar_lea.hbm %s5766_s27, 1  ;;  %s5769_s2 = scalar_lea.hbm %s7412_s14, 1 }
 0x12d   :  { %p5768_p11 = scmp.ne.s32.totalorder %s5766_s27, %s5767_s11  ;;  %p5770_p12 = scmp.lt.s32.totalorder %s5766_s27, %s7412_s14 }
 0x12e   :  { %p5771_p13 = scmp.lt.s32.totalorder %s5769_s2, %s5767_s11 }
 0x12f   :  { %s338_s4 = sshll.u32 %s7413_s24, 4  ;;  %s6279_s4 = int_to_ptr.hbm [resolvable:$true] %s338_s4 }
 0x130   :  { %p5772_p0 = por %p5771_p13, %p5770_p12 }
 0x132   :  { %p5773_p1 = pnand %p5772_p0, %p5768_p11 }
 0x134   :  { %5776 = shalt.err (!%p5773_p1)
}
 0x135   :  { %322 = dma.hbm_to_vmem [thread:$0]  %s318_s23, 16, %s320_s28, [#allocation26]  }
 0x136   :  { %s7414_s21 = sld [smem:[#allocation67_spill]]  ;;  %s5943_s18 = smov [#allocation30]  }
 0x137   :  { %s340_s13 = sshll.u32 %s5943_s18, 4  ;;  %s5789_s6 = sshra.s32 %s6279_s4, 4  ;;  %s341_s13 = int_to_ptr.vmem [resolvable:$true] %s340_s13  ;;  %s5790_s6 = int_to_ptr.hbm [resolvable:$true] %s5789_s6 }
 0x138   :  { %s5791_s22 = scalar_lea.hbm %s5790_s6, 32  ;;  %s5793_s12 = scalar_lea.hbm %s7413_s24, 32 }
 0x139   :  { %p5792_p2 = scmp.ne.s32.totalorder %s5790_s6, %s5791_s22  ;;  %p5794_p3 = scmp.lt.s32.totalorder %s5790_s6, %s7413_s24 }
 0x13a   :  { %p5795_p4 = scmp.lt.s32.totalorder %s5793_s12, %s5791_s22 }
 0x13c   :  { %s365_s9 = sshll.u32 %s7414_s21, 4  ;;  %p5796_p5 = por %p5795_p4, %p5794_p3  ;;  %s366_s9 = int_to_ptr.hbm [resolvable:$true] %s365_s9 }
 0x13e   :  { %p5797_p6 = pnand %p5796_p5, %p5792_p2 }
 0x140   :  { %5800 = shalt.err (!%p5797_p6)
}
 0x141   :  { %346 = dma.hbm_to_vmem [thread:$0]  %s6279_s4, 512, %s341_s13, [#allocation29], %s5922_s15, %s5922_s15, %s5923_s16  }
 0x142   :  { %s5944_s26 = smov [#allocation33]   ;;  %s389_s0 = sshll.u32 %s6137_s20, 4  ;;  %s390_s0 = int_to_ptr.hbm [resolvable:$true] %s389_s0 }
 0x143   :  { %s367_s25 = sshll.u32 %s5944_s26, 4  ;;  %s5813_s3 = sshra.s32 %s366_s9, 4  ;;  %s368_s25 = int_to_ptr.vmem [resolvable:$true] %s367_s25  ;;  %s5814_s3 = int_to_ptr.hbm [resolvable:$true] %s5813_s3 }
 0x144   :  { %s5815_s1 = scalar_lea.hbm %s5814_s3, 1  ;;  %s5817_s14 = scalar_lea.hbm %s7414_s21, 1 }
 0x145   :  { %p5816_p7 = scmp.ne.s32.totalorder %s5814_s3, %s5815_s1  ;;  %p5818_p8 = scmp.lt.s32.totalorder %s5814_s3, %s7414_s21 }
 0x146   :  { %p5819_p9 = scmp.lt.s32.totalorder %s5817_s14, %s5815_s1 }
 0x148   :  { %p5820_p10 = por %p5819_p9, %p5818_p8 }
 0x14a   :  { %p5821_p11 = pnand %p5820_p10, %p5816_p7 }
 0x14c   :  { %5824 = shalt.err (!%p5821_p11)
}
 0x14d   :  { %370 = dma.hbm_to_vmem [thread:$0]  %s366_s9, 16, %s368_s25, [#allocation32]  }
 0x14e   :  { %s5945_s23 = smov [#allocation36]   ;;  %s5837_s16 = sshra.s32 %s390_s0, 4  ;;  %s5838_s16 = int_to_ptr.hbm [resolvable:$true] %s5837_s16 }
 0x14f   :  { %s391_s15 = sshll.u32 %s5945_s23, 4  ;;  %s5839_s30 = scalar_lea.hbm %s5838_s16, 1  ;;  %s392_s15 = int_to_ptr.vmem [resolvable:$true] %s391_s15 }
 0x150   :  { %p5840_p12 = scmp.ne.s32.totalorder %s5838_s16, %s5839_s30  ;;  %s5841_s19 = scalar_lea.hbm %s6137_s20, 1 }
 0x151   :  { %p5842_p13 = scmp.lt.s32.totalorder %s5838_s16, %s6137_s20  ;;  %p5843_p0 = scmp.lt.s32.totalorder %s5841_s19, %s5839_s30 }
 0x153   :  { %p5844_p1 = por %p5843_p0, %p5842_p13 }
 0x155   :  { %p5845_p2 = pnand %p5844_p1, %p5840_p12 }
 0x157   :  { %5848 = shalt.err (!%p5845_p2)
}
 0x158   :  { %394 = dma.hbm_to_vmem [thread:$0]  %s390_s0, 16, %s392_s15, [#allocation35]  }
 0x159   :  { %5861 = dma.done.wait [#allocation3], 256  }
 0x15a   :  { %5862 = vsyncadd [#allocation3], 4294967040 }
 0x15b   :  { %5863 = dma.done.wait [#allocation5], 768  }
 0x15c   :  { %5864 = vsyncadd [#allocation5], 4294966528 }
 0x15d   :  { %5865 = dma.done.wait [#allocation8], 1024  }
 0x15e   :  { %5866 = vsyncadd [#allocation8], 4294966272 }
 0x15f   :  { %5867 = dma.done.wait [#allocation11], 528  }
 0x160   :  { %5868 = vsyncadd [#allocation11], 4294966768 }
 0x161   :  { %5869 = dma.done.wait [#allocation14], 528  }
 0x162   :  { %5870 = vsyncadd [#allocation14], 4294966768 }
 0x163   :  { %5871 = dma.done.wait [#allocation17], 528  }
 0x164   :  { %5872 = vsyncadd [#allocation17], 4294966768 }
 0x165   :  { %5873 = dma.done.wait [#allocation20], 528  }
 0x166   :  { %5874 = vsyncadd [#allocation20], 4294966768 }
 0x167   :  { %5875 = dma.done.wait [#allocation23], 1040  }
 0x168   :  { %5876 = vsyncadd [#allocation23], 4294966256 }
 0x169   :  { %5877 = dma.done.wait [#allocation26], 528  }
 0x16a   :  { %5878 = vsyncadd [#allocation26], 4294966768 }
 0x16b   :  { %5879 = dma.done.wait [#allocation29], 528  }
 0x16c   :  { %5880 = vsyncadd [#allocation29], 4294966768 }
 0x16d   :  { %5881 = dma.done.wait [#allocation32], 528  }
 0x16e   :  { %5882 = vsyncadd [#allocation32], 4294966768 }
 0x16f   :  { %5883 = dma.done.wait [#allocation35], 32  }
 0x170   :  { %5884 = vsyncadd [#allocation35], 4294967264  ;;  %s7415_s20 = sld [smem:[#allocation49_spill]]  ;;  %v6296_v0 = vld [vmem:[#allocation4 + $0x18] sm:$0xff]  ;;  %v6298_v1 = vld [vmem:[#allocation4 + $0x10] sm:$0xff]  ;;  %v5946_v20 = vmov 0.0  }
 0x171   :  { %662 = vmatpush.msra.mxu2 %v6296_v0  ;;  %v6301_v2 = vld [vmem:[#allocation4 + $0x8] sm:$0xff]  ;;  %v496_v3 = vld [vmem:[#allocation2 + $0x8] sm:$0xff]  ;;  %v495_v5 = vld [vmem:[#allocation2] sm:$0xff]  ;;  %s7416_s7 = sld [smem:[#allocation51_spill]]  ;;  %s5947_s29 = smov 64   ;;  %vm526_vm0 = vcmask 130048  }
 0x172   :  { %v6303_v4 = vld [vmem:[#allocation7 + $0x18] sm:$0xff]  ;;  %545 = vmatpush.msra.mxu0 %v496_v3  ;;  %v6306_v6 = vld [vmem:[#allocation7 + $0x10] sm:$0xff]  ;;  %v6316_v12 = vld [vmem:[#allocation7 + $0x8] sm:$0xff]  ;;  %s7417_s10 = sld [smem:[#allocation53_spill]]  ;;  %s5948_s28 = smov 96   ;;  %vm646_vm9 = vcmask 261120  }
 0x173   :  { %725 = vmatpush.msra.mxu3 %v6303_v4  ;;  %663 = vmatpush.msra.mxu2 %v6298_v1  ;;  %v6310_v8 = vld [vmem:[#allocation4] sm:$0xff]  ;;  %v569_v13 = vld [vmem:[#allocation6 + $0x8] sm:$0xff]  ;;  %v6319_v14 = vld [vmem:[#allocation7] sm:$0xff]  ;;  %s7418_s24 = sld [smem:[#allocation52_spill]]  ;;  %s5950_s13 = smov 48  }
 0x174   :  { %546 = vmatpush.msra.mxu0 %v495_v5  ;;  %609 = vmatpush.msra.mxu1 %v569_v13  ;;  %v568_v15 = vld [vmem:[#allocation6] sm:$0xff]  ;;  %s7419_s17 = sld [smem:[#allocation50_spill]]  ;;  %s5951_s6 = smov 32  }
 0x175   :  { %726 = vmatpush.msra.mxu3 %v6306_v6  ;;  %664 = vmatpush.msra.mxu2 %v6301_v2  ;;  %s7420_s4 = sld [smem:[#allocation56_spill]]  ;;  %s5952_s22 = smov 80  }
 0x176   :  { %v487_v7 = vld [vmem:[%s7415_s20] sm:$0x3]  ;;  %v488_v9 = vld [vmem:[%s7415_s20 + $0x2] sm:$0x3]  ;;  %v489_v10 = vld [vmem:[%s7415_s20 + $0x4] sm:$0x3]  ;;  %929 = vmatpush.msrb.mxu0 %v6296_v0  ;;  %610 = vmatpush.msra.mxu1 %v568_v15 }
 0x177   :  { %v490_v11 = vld [vmem:[%s7415_s20 + $0x6] sm:$0x3]  ;;  %509 = vst [vmem:[#allocation1] ss:$4 sm:$0xff] %v487_v7  ;;  %727 = vmatpush.msra.mxu3 %v6316_v12  ;;  %v5003_v16 = vld [vmem:[%s7416_s7] ss:$0 sm:$0xff]  ;;  %665 = vmatpush.msra.mxu2 %v6310_v8 }
 0x178   :  { %511 = vst [vmem:[#allocation1 + $0x1] ss:$4 sm:$0xff] %v488_v9  ;;  %v491_v17 = vld [vmem:[%s7415_s20 + $0x8] sm:$0x3]  ;;  %v492_v18 = vld [vmem:[%s7415_s20 + $0xa] sm:$0x3]  ;;  %666 = vmatmul.f32.vlgmr.msra.gmra.mxu2 %v5946_v20  ;;  %690 = vrot.lane.b32.xlu0 %v5003_v16, %s5947_s29 }
 0x179   :  { %513 = vst [vmem:[#allocation1 + $0x2] ss:$4 sm:$0xff] %v489_v10  ;;  %v493_v19 = vld [vmem:[%s7415_s20 + $0xc] sm:$0x3]  ;;  %728 = vmatpush.msra.mxu3 %v6319_v14  ;;  %v494_v21 = vld [vmem:[%s7415_s20 + $0xe] sm:$0x3]  ;;  %795 = vmatpush.msrb.mxu2 %v6296_v0 }
 0x17a   :  { %515 = vst [vmem:[#allocation1 + $0x3] ss:$4 sm:$0xff] %v490_v11  ;;  %729 = vmatmul.f32.vlgmr.msra.gmra.mxu3 %v5946_v20  ;;  %v5004_v22 = vld [vmem:[%s7417_s10] ss:$0 sm:$0xff]  ;;  %930 = vmatpush.msrb.mxu0 %v6298_v1  ;;  %s7421_s27 = sld [smem:[#allocation54_spill]]  ;;  %s5953_s12 = smov 112  }
 0x17b   :  { %517 = vst [vmem:[#allocation1 + $0x20] ss:$4 sm:$0xff] %v491_v17  ;;  %862 = vmatpush.msrb.mxu3 %v6303_v4  ;;  %996 = vmatpush.msrb.mxu1 %v6303_v4  ;;  %v5006_v33 = vld [vmem:[%s7418_s24] ss:$0 sm:$0xff]  ;;  %s7422_s11 = sld [smem:[#allocation57_spill]] }
 0x17c   :  { %519 = vst [vmem:[#allocation1 + $0x21] ss:$4 sm:$0xff] %v492_v18  ;;  %796 = vmatpush.msrb.mxu2 %v6298_v1  ;;  %931 = vmatpush.msrb.mxu0 %v6301_v2  ;;  %v6382_v36 = vld [vmem:[%s7419_s17] ss:$0 sm:$0xff]  ;;  %s7423_s2 = sld [smem:[#allocation55_spill]] }
 0x17d   :  { %521 = vst [vmem:[#allocation1 + $0x22] ss:$4 sm:$0xff] %v493_v19  ;;  %863 = vmatpush.msrb.mxu3 %v6306_v6  ;;  %997 = vmatpush.msrb.mxu1 %v6306_v6  ;;  %s7424_s21 = sld [smem:[#allocation58_spill]] }
 0x17e   :  { %523 = vst [vmem:[#allocation1 + $0x23] ss:$4 sm:$0xff] %v494_v21  ;;  %797 = vmatpush.msrb.mxu2 %v6301_v2  ;;  %932 = vmatpush.msrb.mxu0 %v6310_v8  ;;  %s7425_s9 = sld [smem:[#allocation59_spill]] }
 0x17f   :  { %864 = vmatpush.msrb.mxu3 %v6316_v12  ;;  %998 = vmatpush.msrb.mxu1 %v6316_v12  ;;  %s7426_s18 = sld [smem:[#allocation63_spill]] }
 0x180   :  { %798 = vmatpush.msrb.mxu2 %v6310_v8  ;;  %753 = vrot.lane.b32.xlu0 %v5004_v22, %s5947_s29 }
 0x181   :  { %v524_v23 = vld.sshfl [vmem:[#allocation1] sm:$0xff pattern:$0x73625140]  ;;  %865 = vmatpush.msrb.mxu3 %v6319_v14  ;;  %999 = vmatpush.msrb.mxu1 %v6319_v14 }
 0x182   :  { %4814 = vmatmul.msk.f32.vlgmr.msra.gmra.mxu0 %vm526_vm0, %v524_v23  ;;  %574 = vst [vmem:[#allocation1] ss:$4 sm:$0xff] %v487_v7  ;;  %1063 = vmatpush.msra.mxu2 %v6296_v0 }
 0x183   :  { %576 = vst [vmem:[#allocation1 + $0x1] ss:$4 sm:$0xff] %v488_v9  ;;  %1130 = vmatpush.msra.mxu3 %v6303_v4  ;;  %1197 = vmatpush.msra.mxu0 %v6296_v0 }
 0x184   :  { %578 = vst [vmem:[#allocation1 + $0x2] ss:$4 sm:$0xff] %v489_v10  ;;  %1064 = vmatpush.msra.mxu2 %v6298_v1 }
 0x185   :  { %580 = vst [vmem:[#allocation1 + $0x3] ss:$4 sm:$0xff] %v490_v11  ;;  %v525_v24 = vld.sshfl [vmem:[#allocation1 + $0x20] sm:$0xff pattern:$0x73625140]  ;;  %1131 = vmatpush.msra.mxu3 %v6306_v6  ;;  %1198 = vmatpush.msra.mxu0 %v6298_v1 }
 0x186   :  { %582 = vst [vmem:[#allocation1 + $0x20] ss:$4 sm:$0xff] %v491_v17  ;;  %1065 = vmatpush.msra.mxu2 %v6301_v2 }
 0x187   :  { %584 = vst [vmem:[#allocation1 + $0x21] ss:$4 sm:$0xff] %v492_v18  ;;  %1132 = vmatpush.msra.mxu3 %v6316_v12  ;;  %1199 = vmatpush.msra.mxu0 %v6301_v2 }
 0x188   :  { %586 = vst [vmem:[#allocation1 + $0x22] ss:$4 sm:$0xff] %v493_v19  ;;  %1066 = vmatpush.msra.mxu2 %v6310_v8 }
 0x189   :  { %588 = vst [vmem:[#allocation1 + $0x23] ss:$4 sm:$0xff] %v494_v21  ;;  %1133 = vmatpush.msra.mxu3 %v6319_v14  ;;  %1200 = vmatpush.msra.mxu0 %v6310_v8 }
 0x18a   :  { %4815 = vmatmul.msk.f32.gmra.mxu0 %vm526_vm0, %v525_v24 }
 0x18c   :  { %v589_v25 = vld.sshfl [vmem:[#allocation1] sm:$0xff pattern:$0x73625140] }
 0x18d   :  { %4816 = vmatmul.msk.f32.vlgmr.msra.gmra.mxu1 %vm526_vm0, %v589_v25 }
 0x18e   :  { %1264 = vmatpush.msra.mxu1 %v6303_v4 }
 0x190   :  { %1265 = vmatpush.msra.mxu1 %v6306_v6  ;;  %v590_v26 = vld.sshfl [vmem:[#allocation1 + $0x20] sm:$0xff pattern:$0x73625140] }
 0x192   :  { %1266 = vmatpush.msra.mxu1 %v6316_v12 }
 0x194   :  { %1267 = vmatpush.msra.mxu1 %v6319_v14 }
 0x195   :  { %4817 = vmatmul.msk.f32.gmra.mxu1 %vm526_vm0, %v590_v26 }
 0x1ea   :  { %v6370_v27 = vpop.permute.xlu0 %690 }
 0x1f2   :  { %v6374_v30 = vpop.permute.xlu0 %753 }
 0x1fb   :  { %v667_v28 = vpop.f32.mrf.mxu2 }
 0x1fc   :  { %v693_v29 = vadd.f32 %v6370_v27, %v667_v28 }
 0x1fd   :  { %v730_v31 = vpop.f32.mrf.mxu3 }
 0x1fe   :  { %695 = vrot.lane.b32.xlu1 %v693_v29, %s5947_s29  ;;  %v756_v32 = vadd.f32 %v6374_v30, %v730_v31 }
 0x1ff   :  { %v548_v37 = vpop.f32.mrf.mxu0 }
 0x200   :  { %v6385_v38 = vadd.f32 %v6382_v36, %v548_v37 }
 0x202   :  { %v670_v40 = vadd.f32 %v667_v28, %v6385_v38 }
 0x204   :  { %v4818_v42 = vmul.f32 -1.442695, %v670_v40 }
 0x206   :  { %758 = vrot.lane.b32.xlu1 %v756_v32, %s5947_s29  ;;  %5020 = vpow2.f32 %v4818_v42 }
 0x20a   :  { %v612_v34 = vpop.f32.mrf.mxu1 }
 0x20b   :  { %v6379_v35 = vadd.f32 %v5006_v33, %v612_v34 }
 0x20c   :  { %v5021_v46 = vpop.eup %5020 }
 0x20d   :  { %v674_v47 = vadd.f32 1.0, %v5021_v46 }
 0x20f   :  { %v686_v58 = vand.u32 2147483648, %v674_v47  ;;  %vm680_vm2 = vweird.f32 %v674_v47  ;;  %v684_v59 = vand.u32 2147483647, %v674_v47 }
 0x211   :  { %v687_v62 = vor.u32 1.1754944e-38, %v686_v58  ;;  %vm685_vm4 = vcmp.eq.f32.partialorder %v684_v59, 8.507059e+37 }
 0x212   :  { %v615_v39 = vpop.f32.mrf.mxu1 }
 0x213   :  { %v6388_v41 = vadd.f32 %v5006_v33, %v615_v39 }
 0x215   :  { %v625_v43 = vrot.slane %v6388_v41, 6 }
 0x217   :  { %v733_v44 = vadd.f32 %v730_v31, %v625_v43 }
 0x219   :  { %v4819_v45 = vmul.f32 -1.442695, %v733_v44 }
 0x21b   :  { %5022 = vpow2.f32 %v4819_v45 }
 0x21c   :  { %5024 = vrcp.f32 %v674_v47 }
 0x221   :  { %v5023_v48 = vpop.eup %5022 }
 0x222   :  { %v737_v49 = vadd.f32 1.0, %v5023_v48  ;;  %v5025_v50 = vpop.eup %5024 }
 0x223   :  { %v676_v51 = vmul.f32 %v5025_v50, %v674_v47  ;;  %vm681_vm1 = vweird.f32 %v5025_v50 }
 0x224   :  { %5026 = vrcp.f32 %v737_v49  ;;  %vm682_vm3 = vmor %vm680_vm2, %vm681_vm1  ;;  %v749_v9 = vand.u32 2147483648, %v737_v49  ;;  %vm743_vm6 = vweird.f32 %v737_v49  ;;  %v747_v10 = vand.u32 2147483647, %v737_v49 }
 0x225   :  { %v677_v52 = vsub.f32 1.0, %v676_v51 }
 0x226   :  { %v750_v13 = vor.u32 1.1754944e-38, %v749_v9  ;;  %vm748_vm8 = vcmp.eq.f32.partialorder %v747_v10, 8.507059e+37 }
 0x227   :  { %v678_v54 = vmul.f32 %v5025_v50, %v677_v52  ;;  %v624_v52 = vrot.slane %v6388_v41, 4 }
 0x229   :  { %v679_v56 = vadd.f32 %v5025_v50, %v678_v54 }
 0x22a   :  { %v5027_v53 = vpop.eup %5026 }
 0x22b   :  { %v739_v55 = vmul.f32 %v5027_v53, %v737_v49  ;;  %v683_v60 = vsel %vm682_vm3, %v5025_v50, %v679_v56  ;;  %vm744_vm5 = vweird.f32 %v5027_v53  ;;  %v556_v49 = vrot.slane %v6385_v38, 2 }
 0x22c   :  { %v688_v3 = vsel %vm685_vm4, %v687_v62, %v683_v60  ;;  %vm745_vm7 = vmor %vm743_vm6, %vm744_vm5 }
 0x22d   :  { %v740_v57 = vsub.f32 1.0, %v739_v55  ;;  %v705_v25 = vsub.f32 1.0, %v688_v3  ;;  %v711_v28 = vmul.f32 0.0, %v688_v3 }
 0x22f   :  { %v741_v61 = vmul.f32 %v5027_v53, %v740_v57 }
 0x231   :  { %v742_v7 = vadd.f32 %v5027_v53, %v741_v61 }
 0x233   :  { %v746_v11 = vsel %vm745_vm7, %v5027_v53, %v742_v7 }
 0x234   :  { %v751_v16 = vsel %vm748_vm8, %v750_v13, %v746_v11 }
 0x235   :  { %v768_v32 = vsub.f32 1.0, %v751_v16  ;;  %v774_v34 = vmul.f32 0.0, %v751_v16 }
 0x270   :  { %v696_v63 = vpop.permute.xlu1 %695 }
 0x271   :  { %v698_v5 = vmul.f32 %v696_v63, %v688_v3 }
 0x273   :  { %700 = vrot.lane.b32.xlu2 %v698_v5, %s5947_s29 }
 0x278   :  { %v759_v15 = vpop.permute.xlu1 %758 }
 0x279   :  { %v761_v17 = vmul.f32 %v759_v15, %v751_v16 }
 0x27b   :  { %763 = vrot.lane.b32.xlu2 %v761_v17, %s5947_s29 }
 0x2cd   :  { %v701_v18 = vpop.permute.xlu2 %700 }
 0x2ce   :  { %v703_v19 = vadd.f32 %v701_v18, %v6385_v38 }
 0x2d0   :  { %5028 = vtanh.f32 %v703_v19 }
 0x2d5   :  { %v764_v21 = vpop.permute.xlu2 %763 }
 0x2d6   :  { %v5029_v22 = vpop.eup %5028  ;;  %v766_v23 = vadd.f32 %v764_v21, %v625_v43 }
 0x2d7   :  { %707 = vrot.lane.b32.xlu0 %v5029_v22, %s5948_s28 }
 0x2d8   :  { %5030 = vtanh.f32 %v766_v23 }
 0x2de   :  { %v5031_v24 = vpop.eup %5030 }
 0x2df   :  { %770 = vrot.lane.b32.xlu1 %v5031_v24, %s5948_s28 }
 0x349   :  { %v708_v26 = vpop.permute.xlu0 %707 }
 0x34a   :  { %v710_v29 = vmul.f32 %v708_v26, %v705_v25 }
 0x34c   :  { %v6396_v31 = vadd.f32 %v711_v28, %v710_v29 }
 0x34e   :  { %777 = vst [vmem:[#allocation1] ss:$4 sm:$0xff] %v6396_v31 }
 0x351   :  { %v771_v33 = vpop.permute.xlu1 %770 }
 0x352   :  { %v773_v37 = vmul.f32 %v771_v33, %v768_v32 }
 0x354   :  { %v6399_v39 = vadd.f32 %v774_v34, %v773_v37 }
 0x355   :  { %v778_v40 = vld.sshfl [vmem:[#allocation1] sm:$0xff pattern:$0x73625140] }
 0x356   :  { %844 = vst [vmem:[#allocation1] ss:$4 sm:$0xff] %v6399_v39  ;;  %779 = vrot.lane.b32.xlu2 %v778_v40, %s5948_s28 }
 0x35d   :  { %v845_v42 = vld.sshfl [vmem:[#allocation1] sm:$0xff pattern:$0x73625140] }
 0x35e   :  { %846 = vrot.lane.b32.xlu0 %v845_v42, %s5948_s28 }
 0x3b0   :  { %v780_v43 = vpop.permute.xlu2 %779 }
 0x3b1   :  { %4820 = vmatmul.msk.f32.vlgmr.msrb.gmra.mxu2 %vm646_vm9, %v780_v43 }
 0x3b2   :  { %1331 = vmatpush.msrb.mxu2 %v6296_v0 }
 0x3b4   :  { %1332 = vmatpush.msrb.mxu2 %v6298_v1 }
 0x3b6   :  { %1333 = vmatpush.msrb.mxu2 %v6301_v2 }
 0x3b8   :  { %1334 = vmatpush.msrb.mxu2 %v6310_v8 }
 0x3d0   :  { %v847_v44 = vpop.permute.xlu0 %846 }
 0x3d1   :  { %4822 = vmatmul.msk.f32.vlgmr.msrb.gmra.mxu3 %vm646_vm9, %v847_v44 }
 0x3d2   :  { %1398 = vmatpush.msrb.mxu3 %v6303_v4 }
 0x3d4   :  { %1399 = vmatpush.msrb.mxu3 %v6306_v6 }
 0x3d6   :  { %1400 = vmatpush.msrb.mxu3 %v6316_v12 }
 0x3d8   :  { %1401 = vmatpush.msrb.mxu3 %v6319_v14 }
 0x434   :  { %v800_v45 = vpop.f32.mrf.mxu2 }
 0x435   :  { %v823_v46 = vadd.f32 %v800_v45, %v6370_v27  ;;  %v803_v50 = vadd.f32 %v800_v45, %v556_v49 }
 0x437   :  { %825 = vrot.lane.b32.xlu1 %v823_v46, %s5947_s29  ;;  %v4821_v51 = vmul.f32 -1.442695, %v803_v50 }
 0x439   :  { %5032 = vpow2.f32 %v4821_v51 }
 0x43f   :  { %v5033_v55 = vpop.eup %5032 }
 0x440   :  { %v807_v56 = vadd.f32 1.0, %v5033_v55 }
 0x442   :  { %v819_v9 = vand.u32 2147483648, %v807_v56  ;;  %vm813_vm11 = vweird.f32 %v807_v56  ;;  %v817_v10 = vand.u32 2147483647, %v807_v56 }
 0x444   :  { %v820_v15 = vor.u32 1.1754944e-38, %v819_v9  ;;  %vm818_vm13 = vcmp.eq.f32.partialorder %v817_v10, 8.507059e+37 }
 0x454   :  { %v867_v47 = vpop.f32.mrf.mxu3 }
 0x455   :  { %v890_v48 = vadd.f32 %v867_v47, %v6374_v30  ;;  %v870_v53 = vadd.f32 %v867_v47, %v624_v52 }
 0x457   :  { %892 = vrot.lane.b32.xlu2 %v890_v48, %s5947_s29  ;;  %v4823_v54 = vmul.f32 -1.442695, %v870_v53 }
 0x459   :  { %5034 = vpow2.f32 %v4823_v54 }
 0x45a   :  { %5036 = vrcp.f32 %v807_v56 }
 0x45f   :  { %v5035_v57 = vpop.eup %5034 }
 0x460   :  { %v874_v58 = vadd.f32 1.0, %v5035_v57  ;;  %v5037_v59 = vpop.eup %5036 }
 0x461   :  { %v809_v60 = vmul.f32 %v5037_v59, %v807_v56  ;;  %vm814_vm10 = vweird.f32 %v5037_v59  ;;  %v6445_v56 = vpop.f32.mrf.mxu0 }
 0x462   :  { %5038 = vrcp.f32 %v874_v58  ;;  %vm815_vm12 = vmor %vm813_vm11, %vm814_vm10  ;;  %v886_v21 = vand.u32 2147483648, %v874_v58  ;;  %vm880_vm15 = vweird.f32 %v874_v58  ;;  %v884_v22 = vand.u32 2147483647, %v874_v58 }
 0x463   :  { %v810_v61 = vsub.f32 1.0, %v809_v60 }
 0x464   :  { %v887_v24 = vor.u32 1.1754944e-38, %v886_v21  ;;  %vm885_vm2 = vcmp.eq.f32.partialorder %v884_v22, 8.507059e+37 }
 0x465   :  { %v811_v63 = vmul.f32 %v5037_v59, %v810_v61  ;;  %v557_v61 = vrot.slane %v6385_v38, 4 }
 0x467   :  { %v812_v5 = vadd.f32 %v5037_v59, %v811_v63 }
 0x468   :  { %v5039_v62 = vpop.eup %5038 }
 0x469   :  { %v876_v3 = vmul.f32 %v5039_v62, %v874_v58  ;;  %v816_v11 = vsel %vm815_vm12, %v5037_v59, %v812_v5  ;;  %vm881_vm14 = vweird.f32 %v5039_v62 }
 0x46a   :  { %v821_v17 = vsel %vm818_vm13, %v820_v15, %v816_v11  ;;  %vm882_vm1 = vmor %vm880_vm15, %vm881_vm14 }
 0x46b   :  { %v877_v7 = vsub.f32 1.0, %v876_v3  ;;  %v835_v42 = vsub.f32 1.0, %v821_v17  ;;  %v841_v44 = vmul.f32 %v821_v17, %v6396_v31  ;;  %v623_v3 = vrot.slane %v6388_v41, 2 }
 0x46d   :  { %v878_v13 = vmul.f32 %v5039_v62, %v877_v7 }
 0x46f   :  { %v879_v19 = vadd.f32 %v5039_v62, %v878_v13 }
 0x471   :  { %v883_v23 = vsel %vm882_vm1, %v5039_v62, %v879_v19 }
 0x472   :  { %v888_v25 = vsel %vm885_vm2, %v887_v24, %v883_v23 }
 0x473   :  { %v902_v48 = vsub.f32 1.0, %v888_v25  ;;  %v908_v50 = vmul.f32 %v888_v25, %v6399_v39 }
 0x4a9   :  { %v826_v16 = vpop.permute.xlu1 %825 }
 0x4aa   :  { %v828_v18 = vmul.f32 %v826_v16, %v821_v17 }
 0x4ac   :  { %830 = vrot.lane.b32.xlu0 %v828_v18, %s5947_s29 }
 0x4b1   :  { %v893_v26 = vpop.permute.xlu2 %892 }
 0x4b2   :  { %v895_v28 = vmul.f32 %v893_v26, %v888_v25 }
 0x4b4   :  { %897 = vrot.lane.b32.xlu1 %v895_v28, %s5947_s29 }
 0x51e   :  { %v831_v29 = vpop.permute.xlu0 %830 }
 0x51f   :  { %v833_v32 = vadd.f32 %v831_v29, %v556_v49 }
 0x521   :  { %5040 = vtanh.f32 %v833_v32 }
 0x526   :  { %v898_v33 = vpop.permute.xlu1 %897 }
 0x527   :  { %v5041_v34 = vpop.eup %5040  ;;  %v900_v37 = vadd.f32 %v898_v33, %v624_v52 }
 0x528   :  { %837 = vrot.lane.b32.xlu2 %v5041_v34, %s5948_s28 }
 0x529   :  { %5042 = vtanh.f32 %v900_v37 }
 0x52f   :  { %v5043_v40 = vpop.eup %5042 }
 0x530   :  { %904 = vrot.lane.b32.xlu0 %v5043_v40, %s5948_s28 }
 0x582   :  { %v838_v43 = vpop.permute.xlu2 %837 }
 0x583   :  { %v840_v45 = vmul.f32 %v838_v43, %v835_v42 }
 0x585   :  { %v6425_v46 = vadd.f32 %v841_v44, %v840_v45 }
 0x587   :  { %911 = vst [vmem:[#allocation1] ss:$4 sm:$0xff] %v6425_v46 }
 0x588   :  { %1718 = vst [vmem:[#allocation1 + $0x20] ss:$4 sm:$0xff] %v6425_v46 }
 0x58e   :  { %v912_v47 = vld.sshfl [vmem:[#allocation1] sm:$0xff pattern:$0x73625140] }
 0x58f   :  { %913 = vrot.lane.b32.xlu1 %v912_v47, %s5948_s28 }
 0x5a2   :  { %v905_v49 = vpop.permute.xlu0 %904 }
 0x5a3   :  { %v907_v51 = vmul.f32 %v905_v49, %v902_v48 }
 0x5a5   :  { %v6431_v52 = vadd.f32 %v908_v50, %v907_v51 }
 0x5a7   :  { %978 = vst [vmem:[#allocation1] ss:$4 sm:$0xff] %v6431_v52 }
 0x5ae   :  { %v979_v53 = vld.sshfl [vmem:[#allocation1] sm:$0xff pattern:$0x73625140] }
 0x5af   :  { %980 = vrot.lane.b32.xlu2 %v979_v53, %s5948_s28 }
 0x601   :  { %v914_v54 = vpop.permute.xlu1 %913 }
 0x602   :  { %4824 = vmatmul.msk.f32.vlgmr.msrb.gmra.mxu0 %vm646_vm9, %v914_v54 }
 0x603   :  { %1465 = vmatpush.msrb.mxu0 %v6296_v0 }
 0x605   :  { %1466 = vmatpush.msrb.mxu0 %v6298_v1 }
 0x607   :  { %1467 = vmatpush.msrb.mxu0 %v6301_v2 }
 0x609   :  { %v981_v55 = vpop.permute.xlu2 %980  ;;  %1468 = vmatpush.msrb.mxu0 %v6310_v8 }
 0x60a   :  { %4826 = vmatmul.msk.f32.vlgmr.msrb.gmra.mxu1 %vm646_vm9, %v981_v55 }
 0x60b   :  { %1532 = vmatpush.msrb.mxu1 %v6303_v4 }
 0x60d   :  { %1533 = vmatpush.msrb.mxu1 %v6306_v6 }
 0x60f   :  { %1534 = vmatpush.msrb.mxu1 %v6316_v12 }
 0x611   :  { %1535 = vmatpush.msrb.mxu1 %v6319_v14 }
 0x67f   :  { %v934_v57 = vpop.f32.mrf.mxu0 }
 0x680   :  { %v957_v58 = vadd.f32 %v934_v57, %v6370_v27  ;;  %v937_v62 = vadd.f32 %v934_v57, %v557_v61 }
 0x682   :  { %959 = vrot.lane.b32.xlu0 %v957_v58, %s5947_s29  ;;  %v4825_v63 = vmul.f32 -1.442695, %v937_v62 }
 0x684   :  { %5044 = vpow2.f32 %v4825_v63 }
 0x687   :  { %v1001_v59 = vpop.f32.mrf.mxu1 }
 0x688   :  { %v1024_v60 = vadd.f32 %v1001_v59, %v6374_v30  ;;  %v1004_v5 = vadd.f32 %v1001_v59, %v623_v3 }
 0x68a   :  { %1026 = vrot.lane.b32.xlu1 %v1024_v60, %s5947_s29  ;;  %v4827_v7 = vmul.f32 -1.442695, %v1004_v5  ;;  %v5045_v9 = vpop.eup %5044 }
 0x68b   :  { %v941_v10 = vadd.f32 1.0, %v5045_v9 }
 0x68c   :  { %5046 = vpow2.f32 %v4827_v7 }
 0x68d   :  { %5048 = vrcp.f32 %v941_v10  ;;  %v953_v24 = vand.u32 2147483648, %v941_v10  ;;  %vm947_vm4 = vweird.f32 %v941_v10  ;;  %v951_v25 = vand.u32 2147483647, %v941_v10 }
 0x68f   :  { %v954_v29 = vor.u32 1.1754944e-38, %v953_v24  ;;  %vm952_vm6 = vcmp.eq.f32.partialorder %v951_v25, 8.507059e+37 }
 0x692   :  { %v5047_v11 = vpop.eup %5046 }
 0x693   :  { %v1008_v13 = vadd.f32 1.0, %v5047_v11  ;;  %v5049_v15 = vpop.eup %5048 }
 0x694   :  { %v943_v16 = vmul.f32 %v5049_v15, %v941_v10  ;;  %vm948_vm3 = vweird.f32 %v5049_v15 }
 0x695   :  { %5050 = vrcp.f32 %v1008_v13  ;;  %vm949_vm5 = vmor %vm947_vm4, %vm948_vm3  ;;  %v1020_v40 = vand.u32 2147483648, %v1008_v13  ;;  %vm1014_vm8 = vweird.f32 %v1008_v13  ;;  %v1018_v42 = vand.u32 2147483647, %v1008_v13 }
 0x696   :  { %v944_v17 = vsub.f32 1.0, %v943_v16 }
 0x697   :  { %v1021_v44 = vor.u32 1.1754944e-38, %v1020_v40  ;;  %vm1019_vm11 = vcmp.eq.f32.partialorder %v1018_v42, 8.507059e+37 }
 0x698   :  { %v945_v19 = vmul.f32 %v5049_v15, %v944_v17 }
 0x69a   :  { %v946_v22 = vadd.f32 %v5049_v15, %v945_v19 }
 0x69b   :  { %v5051_v18 = vpop.eup %5050 }
 0x69c   :  { %v1010_v21 = vmul.f32 %v5051_v18, %v1008_v13  ;;  %v950_v26 = vsel %vm949_vm5, %v5049_v15, %v946_v22  ;;  %vm1015_vm7 = vweird.f32 %v5051_v18 }
 0x69d   :  { %v955_v32 = vsel %vm952_vm6, %v954_v29, %v950_v26  ;;  %vm1016_vm10 = vmor %vm1014_vm8, %vm1015_vm7 }
 0x69e   :  { %v1011_v23 = vsub.f32 1.0, %v1010_v21  ;;  %v969_v57 = vsub.f32 1.0, %v955_v32  ;;  %v975_v59 = vmul.f32 %v955_v32, %v6425_v46 }
 0x6a0   :  { %v1012_v28 = vmul.f32 %v5051_v18, %v1011_v23 }
 0x6a2   :  { %v1013_v37 = vadd.f32 %v5051_v18, %v1012_v28 }
 0x6a4   :  { %v1017_v43 = vsel %vm1016_vm10, %v5051_v18, %v1013_v37 }
 0x6a5   :  { %v1022_v47 = vsel %vm1019_vm11, %v1021_v44, %v1017_v43 }
 0x6a6   :  { %v1042_v5 = vmul.f32 %v1022_v47, %v6431_v52 }
 0x6f4   :  { %v960_v33 = vpop.permute.xlu0 %959 }
 0x6f5   :  { %v962_v34 = vmul.f32 %v960_v33, %v955_v32 }
 0x6f7   :  { %964 = vrot.lane.b32.xlu2 %v962_v34, %s5947_s29 }
 0x6fc   :  { %v1027_v45 = vpop.permute.xlu1 %1026 }
 0x6fd   :  { %v1029_v48 = vmul.f32 %v1027_v45, %v1022_v47 }
 0x6ff   :  { %1031 = vrot.lane.b32.xlu0 %v1029_v48, %s5947_s29 }
 0x751   :  { %v965_v49 = vpop.permute.xlu2 %964 }
 0x752   :  { %v967_v50 = vadd.f32 %v965_v49, %v557_v61  ;;  %v1036_v61 = vsub.f32 1.0, %v1022_v47 }
 0x754   :  { %5052 = vtanh.f32 %v967_v50 }
 0x75a   :  { %v5053_v51 = vpop.eup %5052 }
 0x75b   :  { %971 = vrot.lane.b32.xlu1 %v5053_v51, %s5948_s28 }
 0x771   :  { %v1032_v53 = vpop.permute.xlu0 %1031 }
 0x772   :  { %v1034_v54 = vadd.f32 %v1032_v53, %v623_v3 }
 0x774   :  { %5054 = vtanh.f32 %v1034_v54 }
 0x77a   :  { %v5055_v55 = vpop.eup %5054 }
 0x77b   :  { %1038 = vrot.lane.b32.xlu2 %v5055_v55, %s5948_s28 }
 0x7cd   :  { %v972_v58 = vpop.permute.xlu1 %971 }
 0x7ce   :  { %v974_v60 = vmul.f32 %v972_v58, %v969_v57 }
 0x7d0   :  { %v6458_v62 = vadd.f32 %v975_v59, %v974_v60 }
 0x7d2   :  { %1045 = vst [vmem:[#allocation1] ss:$4 sm:$0xff] %v6458_v62 }
 0x7d5   :  { %v1039_v63 = vpop.permute.xlu2 %1038 }
 0x7d6   :  { %v1041_v7 = vmul.f32 %v1039_v63, %v1036_v61 }
 0x7d8   :  { %v6462_v9 = vadd.f32 %v1042_v5, %v1041_v7 }
 0x7d9   :  { %v1046_v3 = vld.sshfl [vmem:[#allocation1] sm:$0xff pattern:$0x73625140] }
 0x7da   :  { %1112 = vst [vmem:[#allocation1] ss:$4 sm:$0xff] %v6462_v9  ;;  %1047 = vrot.lane.b32.xlu0 %v1046_v3, %s5948_s28  ;;  %v6491_v3 = vld.sshfl [vmem:[#allocation1 + $0x20] sm:$0xff pattern:$0x73625140] }
 0x7e1   :  { %v1113_v10 = vld.sshfl [vmem:[#allocation1] sm:$0xff pattern:$0x73625140] }
 0x7e2   :  { %1114 = vrot.lane.b32.xlu1 %v1113_v10, %s5948_s28 }
 0x84c   :  { %v1048_v46 = vpop.permute.xlu0 %1047 }
 0x84d   :  { %4828 = vmatmul.msk.f32.vlgmr.msra.gmra.mxu2 %vm646_vm9, %v1048_v46 }
 0x84e   :  { %1599 = vmatpush.msra.mxu2 %v6296_v0 }
 0x850   :  { %1600 = vmatpush.msra.mxu2 %v6298_v1 }
 0x852   :  { %1601 = vmatpush.msra.mxu2 %v6301_v2 }
 0x854   :  { %v1115_v11 = vpop.permute.xlu1 %1114  ;;  %1602 = vmatpush.msra.mxu2 %v6310_v8  ;;  %v558_v8 = vrot.slane %v6385_v38, 6 }
 0x855   :  { %4830 = vmatmul.msk.f32.vlgmr.msra.gmra.mxu3 %vm646_vm9, %v1115_v11 }
 0x856   :  { %1666 = vmatpush.msra.mxu3 %v6303_v4 }
 0x858   :  { %1667 = vmatpush.msra.mxu3 %v6306_v6 }
 0x85a   :  { %1668 = vmatpush.msra.mxu3 %v6316_v12 }
 0x85c   :  { %1669 = vmatpush.msra.mxu3 %v6319_v14 }
 0x8d0   :  { %v1068_v13 = vpop.f32.mrf.mxu2 }
 0x8d1   :  { %v1091_v0 = vadd.f32 %v1068_v13, %v6370_v27  ;;  %v1071_v15 = vadd.f32 %v1068_v13, %v558_v8 }
 0x8d3   :  { %1093 = vrot.lane.b32.xlu2 %v1091_v0, %s5947_s29  ;;  %v4829_v4 = vmul.f32 -1.442695, %v1071_v15 }
 0x8d5   :  { %5056 = vpow2.f32 %v4829_v4 }
 0x8d8   :  { %v1135_v1 = vpop.f32.mrf.mxu3 }
 0x8d9   :  { %v1158_v2 = vadd.f32 %v1135_v1, %v6374_v30  ;;  %v1138_v17 = vadd.f32 %v1135_v1, %v6388_v41 }
 0x8db   :  { %1160 = vrot.lane.b32.xlu0 %v1158_v2, %s5947_s29  ;;  %v5057_v6 = vpop.eup %5056  ;;  %v4831_v19 = vmul.f32 -1.442695, %v1138_v17 }
 0x8dc   :  { %v1075_v16 = vadd.f32 1.0, %v5057_v6 }
 0x8de   :  { %5058 = vrcp.f32 %v1075_v16  ;;  %v1087_v23 = vand.u32 2147483648, %v1075_v16  ;;  %vm1081_vm13 = vweird.f32 %v1075_v16  ;;  %v1085_v24 = vand.u32 2147483647, %v1075_v16 }
 0x8df   :  { %5060 = vpow2.f32 %v4831_v19 }
 0x8e0   :  { %v1088_v26 = vor.u32 1.1754944e-38, %v1087_v23  ;;  %vm1086_vm15 = vcmp.eq.f32.partialorder %v1085_v24, 8.507059e+37 }
 0x8e4   :  { %v5059_v12 = vpop.eup %5058 }
 0x8e5   :  { %v1077_v14 = vmul.f32 %v5059_v12, %v1075_v16  ;;  %vm1082_vm12 = vweird.f32 %v5059_v12  ;;  %v5061_v38 = vpop.eup %5060 }
 0x8e6   :  { %vm1083_vm14 = vmor %vm1081_vm13, %vm1082_vm12  ;;  %v1142_v28 = vadd.f32 1.0, %v5061_v38 }
 0x8e7   :  { %v1078_v18 = vsub.f32 1.0, %v1077_v14 }
 0x8e8   :  { %5062 = vrcp.f32 %v1142_v28  ;;  %v1154_v44 = vand.u32 2147483648, %v1142_v28  ;;  %vm1148_vm2 = vweird.f32 %v1142_v28  ;;  %v1152_v45 = vand.u32 2147483647, %v1142_v28 }
 0x8e9   :  { %v1079_v21 = vmul.f32 %v5059_v12, %v1078_v18  ;;  %v622_v18 = vrot.slane %v6379_v35, 6 }
 0x8ea   :  { %v1155_v48 = vor.u32 1.1754944e-38, %v1154_v44  ;;  %vm1153_vm4 = vcmp.eq.f32.partialorder %v1152_v45, 8.507059e+37 }
 0x8eb   :  { %v1080_v22 = vadd.f32 %v5059_v12, %v1079_v21 }
 0x8ed   :  { %v1084_v25 = vsel %vm1083_vm14, %v5059_v12, %v1080_v22  ;;  %v6509_v12 = vadd.f32 %v6382_v36, %v6445_v56 }
 0x8ee   :  { %v1089_v32 = vsel %vm1086_vm15, %v1088_v26, %v1084_v25  ;;  %v5063_v34 = vpop.eup %5062 }
 0x8ef   :  { %v1144_v37 = vmul.f32 %v5063_v34, %v1142_v28  ;;  %vm1149_vm1 = vweird.f32 %v5063_v34  ;;  %v1103_v60 = vsub.f32 1.0, %v1089_v32  ;;  %v1109_v63 = vmul.f32 %v1089_v32, %v6458_v62 }
 0x8f0   :  { %vm1150_vm3 = vmor %vm1148_vm2, %vm1149_vm1 }
 0x8f1   :  { %v1145_v40 = vsub.f32 1.0, %v1144_v37 }
 0x8f3   :  { %v1146_v42 = vmul.f32 %v5063_v34, %v1145_v40 }
 0x8f5   :  { %v1147_v43 = vadd.f32 %v5063_v34, %v1146_v42 }
 0x8f7   :  { %v1151_v47 = vsel %vm1150_vm3, %v5063_v34, %v1147_v43 }
 0x8f8   :  { %v1156_v49 = vsel %vm1153_vm4, %v1155_v48, %v1151_v47 }
 0x8f9   :  { %v1176_v46 = vmul.f32 %v1156_v49, %v6462_v9 }
 0x92d   :  { %v1094_v29 = vpop.permute.xlu2 %1093 }
 0x92e   :  { %v1096_v33 = vmul.f32 %v1094_v29, %v1089_v32 }
 0x930   :  { %1098 = vrot.lane.b32.xlu1 %v1096_v33, %s5947_s29 }
 0x94d   :  { %v1161_v50 = vpop.permute.xlu0 %1160 }
 0x94e   :  { %v1163_v51 = vmul.f32 %v1161_v50, %v1156_v49 }
 0x950   :  { %1165 = vrot.lane.b32.xlu2 %v1163_v51, %s5947_s29 }
 0x9a2   :  { %v1099_v53 = vpop.permute.xlu1 %1098 }
 0x9a3   :  { %v1101_v54 = vadd.f32 %v1099_v53, %v558_v8 }
 0x9a5   :  { %5064 = vtanh.f32 %v1101_v54 }
 0x9aa   :  { %v1166_v55 = vpop.permute.xlu2 %1165 }
 0x9ab   :  { %v5065_v57 = vpop.eup %5064  ;;  %v1168_v58 = vadd.f32 %v1166_v55, %v6388_v41  ;;  %v1170_v41 = vsub.f32 1.0, %v1156_v49 }
 0x9ac   :  { %1105 = vrot.lane.b32.xlu0 %v5065_v57, %s5948_s28 }
 0x9ad   :  { %5066 = vtanh.f32 %v1168_v58 }
 0x9b3   :  { %v5067_v59 = vpop.eup %5066 }
 0x9b4   :  { %1172 = vrot.lane.b32.xlu1 %v5067_v59, %s5948_s28 }
 0xa1e   :  { %v1106_v61 = vpop.permute.xlu0 %1105 }
 0xa1f   :  { %v1108_v5 = vmul.f32 %v1106_v61, %v1103_v60 }
 0xa21   :  { %v6489_v7 = vadd.f32 %v1109_v63, %v1108_v5 }
 0xa23   :  { %1179 = vst [vmem:[#allocation1] ss:$4 sm:$0xff] %v6489_v7 }
 0xa24   :  { %1722 = vst [vmem:[#allocation1 + $0x20] ss:$4 sm:$0xff] %v6489_v7 }
 0xa26   :  { %v1173_v10 = vpop.permute.xlu1 %1172 }
 0xa27   :  { %v1175_v11 = vmul.f32 %v1173_v10, %v1170_v41 }
 0xa29   :  { %v6496_v13 = vadd.f32 %v1176_v46, %v1175_v11 }
 0xa2a   :  { %v1180_v0 = vld.sshfl [vmem:[#allocation1] sm:$0xff pattern:$0x73625140] }
 0xa2b   :  { %1246 = vst [vmem:[#allocation1] ss:$4 sm:$0xff] %v6496_v13  ;;  %1181 = vrot.lane.b32.xlu2 %v1180_v0, %s5948_s28 }
 0xa32   :  { %v1247_v1 = vld.sshfl [vmem:[#allocation1] sm:$0xff pattern:$0x73625140] }
 0xa33   :  { %1248 = vrot.lane.b32.xlu0 %v1247_v1, %s5948_s28 }
 0xa85   :  { %v1182_v2 = vpop.permute.xlu2 %1181 }
 0xa86   :  { %4832 = vmatmul.msk.f32.vlgmr.msra.gmra.mxu0 %vm646_vm9, %v1182_v2 }
 0xaa5   :  { %v1249_v8 = vpop.permute.xlu0 %1248 }
 0xaa6   :  { %4834 = vmatmul.msk.f32.vlgmr.msra.gmra.mxu1 %vm646_vm9, %v1249_v8 }
 0xb03   :  { %v1202_v15 = vpop.f32.mrf.mxu0 }
 0xb04   :  { %v1225_v4 = vadd.f32 %v1202_v15, %v6370_v27  ;;  %v1205_v14 = vadd.f32 %v1202_v15, %v6509_v12 }
 0xb06   :  { %1227 = vrot.lane.b32.xlu1 %v1225_v4, %s5947_s29  ;;  %v4833_v17 = vmul.f32 -1.442695, %v1205_v14 }
 0xb08   :  { %5068 = vpow2.f32 %v4833_v17 }
 0xb0e   :  { %v5069_v22 = vpop.eup %5068 }
 0xb0f   :  { %v1209_v23 = vadd.f32 1.0, %v5069_v22  ;;  %v559_v22 = vrot.slane %v6509_v12, 2 }
 0xb11   :  { %v1221_v34 = vand.u32 2147483648, %v1209_v23  ;;  %vm1215_vm6 = vweird.f32 %v1209_v23  ;;  %v1219_v37 = vand.u32 2147483647, %v1209_v23 }
 0xb13   :  { %v1222_v43 = vor.u32 1.1754944e-38, %v1221_v34  ;;  %vm1220_vm8 = vcmp.eq.f32.partialorder %v1219_v37, 8.507059e+37 }
 0xb23   :  { %v1269_v6 = vpop.f32.mrf.mxu1 }
 0xb24   :  { %v1292_v16 = vadd.f32 %v1269_v6, %v6374_v30  ;;  %v1272_v19 = vadd.f32 %v1269_v6, %v622_v18 }
 0xb26   :  { %1294 = vrot.lane.b32.xlu2 %v1292_v16, %s5947_s29  ;;  %v4835_v21 = vmul.f32 -1.442695, %v1272_v19 }
 0xb28   :  { %5070 = vpow2.f32 %v4835_v21 }
 0xb29   :  { %5072 = vrcp.f32 %v1209_v23 }
 0xb2e   :  { %v5071_v24 = vpop.eup %5070 }
 0xb2f   :  { %v1276_v38 = vadd.f32 1.0, %v5071_v24  ;;  %v5073_v25 = vpop.eup %5072 }
 0xb30   :  { %v1211_v26 = vmul.f32 %v5073_v25, %v1209_v23  ;;  %vm1216_vm5 = vweird.f32 %v5073_v25 }
 0xb31   :  { %5074 = vrcp.f32 %v1276_v38  ;;  %vm1217_vm7 = vmor %vm1215_vm6, %vm1216_vm5  ;;  %v1288_v49 = vand.u32 2147483648, %v1276_v38  ;;  %vm1282_vm11 = vweird.f32 %v1276_v38  ;;  %v1286_v50 = vand.u32 2147483647, %v1276_v38 }
 0xb32   :  { %v1212_v28 = vsub.f32 1.0, %v1211_v26 }
 0xb33   :  { %v1289_v53 = vor.u32 1.1754944e-38, %v1288_v49  ;;  %vm1287_vm13 = vcmp.eq.f32.partialorder %v1286_v50, 8.507059e+37 }
 0xb34   :  { %v1213_v56 = vmul.f32 %v5073_v25, %v1212_v28 }
 0xb36   :  { %v1214_v32 = vadd.f32 %v5073_v25, %v1213_v56 }
 0xb37   :  { %v5075_v36 = vpop.eup %5074 }
 0xb38   :  { %v1278_v29 = vmul.f32 %v5075_v36, %v1276_v38  ;;  %v1218_v40 = vsel %vm1217_vm7, %v5073_v25, %v1214_v32  ;;  %vm1283_vm10 = vweird.f32 %v5075_v36  ;;  %v621_v38 = vrot.slane %v6379_v35, 4 }
 0xb39   :  { %v1223_v45 = vsel %vm1220_vm8, %v1222_v43, %v1218_v40  ;;  %vm1284_vm12 = vmor %vm1282_vm11, %vm1283_vm10 }
 0xb3a   :  { %v1279_v33 = vsub.f32 1.0, %v1278_v29  ;;  %v1237_v41 = vsub.f32 1.0, %v1223_v45  ;;  %v1243_v46 = vmul.f32 %v1223_v45, %v6489_v7 }
 0xb3c   :  { %v1280_v42 = vmul.f32 %v5075_v36, %v1279_v33 }
 0xb3e   :  { %v1281_v48 = vadd.f32 %v5075_v36, %v1280_v42 }
 0xb40   :  { %v1285_v51 = vsel %vm1284_vm12, %v5075_v36, %v1281_v48 }
 0xb41   :  { %v1290_v55 = vsel %vm1287_vm13, %v1289_v53, %v1285_v51 }
 0xb42   :  { %v1304_v2 = vsub.f32 1.0, %v1290_v55  ;;  %v1310_v15 = vmul.f32 %v1290_v55, %v6496_v13 }
 0xb78   :  { %v1228_v44 = vpop.permute.xlu1 %1227 }
 0xb79   :  { %v1230_v47 = vmul.f32 %v1228_v44, %v1223_v45 }
 0xb7b   :  { %1232 = vrot.lane.b32.xlu0 %v1230_v47, %s5947_s29 }
 0xb80   :  { %v1295_v54 = vpop.permute.xlu2 %1294 }
 0xb81   :  { %v1297_v57 = vmul.f32 %v1295_v54, %v1290_v55 }
 0xb83   :  { %1299 = vrot.lane.b32.xlu1 %v1297_v57, %s5947_s29 }
 0xbed   :  { %v1233_v58 = vpop.permute.xlu0 %1232 }
 0xbee   :  { %v1235_v59 = vadd.f32 %v1233_v58, %v6509_v12 }
 0xbf0   :  { %5076 = vtanh.f32 %v1235_v59 }
 0xbf5   :  { %v1300_v60 = vpop.permute.xlu1 %1299 }
 0xbf6   :  { %v5077_v61 = vpop.eup %5076  ;;  %v1302_v63 = vadd.f32 %v1300_v60, %v622_v18 }
 0xbf7   :  { %1239 = vrot.lane.b32.xlu2 %v5077_v61, %s5948_s28 }
 0xbf8   :  { %5078 = vtanh.f32 %v1302_v63 }
 0xbfe   :  { %v5079_v5 = vpop.eup %5078 }
 0xbff   :  { %1306 = vrot.lane.b32.xlu0 %v5079_v5, %s5948_s28 }
 0xc51   :  { %v1240_v10 = vpop.permute.xlu2 %1239 }
 0xc52   :  { %v1242_v11 = vmul.f32 %v1240_v10, %v1237_v41 }
 0xc54   :  { %v6519_v0 = vadd.f32 %v1243_v46, %v1242_v11 }
 0xc56   :  { %1313 = vst [vmem:[#allocation1] ss:$4 sm:$0xff] %v6519_v0 }
 0xc5d   :  { %v1314_v1 = vld.sshfl [vmem:[#allocation1] sm:$0xff pattern:$0x73625140] }
 0xc5e   :  { %1315 = vrot.lane.b32.xlu1 %v1314_v1, %s5948_s28 }
 0xc71   :  { %v1307_v8 = vpop.permute.xlu0 %1306 }
 0xc72   :  { %v1309_v4 = vmul.f32 %v1307_v8, %v1304_v2 }
 0xc74   :  { %v6524_v6 = vadd.f32 %v1310_v15, %v1309_v4 }
 0xc76   :  { %1380 = vst [vmem:[#allocation1] ss:$4 sm:$0xff] %v6524_v6 }
 0xc7d   :  { %v1381_v16 = vld.sshfl [vmem:[#allocation1] sm:$0xff pattern:$0x73625140] }
 0xc7e   :  { %1382 = vrot.lane.b32.xlu2 %v1381_v16, %s5948_s28 }
 0xcd0   :  { %v1316_v7 = vpop.permute.xlu1 %1315 }
 0xcd1   :  { %4836 = vmatmul.msk.f32.vlgmr.msrb.gmra.mxu2 %vm646_vm9, %v1316_v7 }
 0xcd8   :  { %v1383_v14 = vpop.permute.xlu2 %1382 }
 0xcd9   :  { %4838 = vmatmul.msk.f32.vlgmr.msrb.gmra.mxu3 %vm646_vm9, %v1383_v14  ;;  %v6543_v14 = vld.sshfl [vmem:[#allocation1 + $0x20] sm:$0xff pattern:$0x73625140] }
 0xd54   :  { %v1336_v17 = vpop.f32.mrf.mxu2 }
 0xd55   :  { %v1359_v18 = vadd.f32 %v1336_v17, %v6370_v27  ;;  %v1339_v23 = vadd.f32 %v1336_v17, %v559_v22 }
 0xd57   :  { %1361 = vrot.lane.b32.xlu0 %v1359_v18, %s5947_s29  ;;  %v4837_v24 = vmul.f32 -1.442695, %v1339_v23 }
 0xd59   :  { %5080 = vpow2.f32 %v4837_v24 }
 0xd5c   :  { %v1403_v19 = vpop.f32.mrf.mxu3 }
 0xd5d   :  { %v1426_v21 = vadd.f32 %v1403_v19, %v6374_v30  ;;  %v1406_v25 = vadd.f32 %v1403_v19, %v621_v38 }
 0xd5f   :  { %1428 = vrot.lane.b32.xlu1 %v1426_v21, %s5947_s29  ;;  %v4839_v26 = vmul.f32 -1.442695, %v1406_v25  ;;  %v5081_v28 = vpop.eup %5080 }
 0xd60   :  { %v1343_v36 = vadd.f32 1.0, %v5081_v28 }
 0xd61   :  { %5082 = vpow2.f32 %v4839_v26 }
 0xd62   :  { %5084 = vrcp.f32 %v1343_v36  ;;  %v1355_v45 = vand.u32 2147483648, %v1343_v36  ;;  %vm1349_vm15 = vweird.f32 %v1343_v36  ;;  %v1353_v47 = vand.u32 2147483647, %v1343_v36 }
 0xd64   :  { %v1356_v50 = vor.u32 1.1754944e-38, %v1355_v45  ;;  %vm1354_vm2 = vcmp.eq.f32.partialorder %v1353_v47, 8.507059e+37 }
 0xd67   :  { %v5083_v56 = vpop.eup %5082 }
 0xd68   :  { %v1410_v29 = vadd.f32 1.0, %v5083_v56  ;;  %v5085_v32 = vpop.eup %5084 }
 0xd69   :  { %v1345_v33 = vmul.f32 %v5085_v32, %v1343_v36  ;;  %vm1350_vm14 = vweird.f32 %v5085_v32 }
 0xd6a   :  { %5086 = vrcp.f32 %v1410_v29  ;;  %vm1351_vm1 = vmor %vm1349_vm15, %vm1350_vm14  ;;  %v1422_v57 = vand.u32 2147483648, %v1410_v29  ;;  %vm1416_vm4 = vweird.f32 %v1410_v29  ;;  %v1420_v58 = vand.u32 2147483647, %v1410_v29 }
 0xd6b   :  { %v1346_v34 = vsub.f32 1.0, %v1345_v33 }
 0xd6c   :  { %v1423_v60 = vor.u32 1.1754944e-38, %v1422_v57  ;;  %vm1421_vm6 = vcmp.eq.f32.partialorder %v1420_v58, 8.507059e+37 }
 0xd6d   :  { %v1347_v40 = vmul.f32 %v5085_v32, %v1346_v34 }
 0xd6f   :  { %v1348_v43 = vadd.f32 %v5085_v32, %v1347_v40 }
 0xd70   :  { %v5087_v37 = vpop.eup %5086 }
 0xd71   :  { %v1412_v42 = vmul.f32 %v5087_v37, %v1410_v29  ;;  %v1352_v48 = vsel %vm1351_vm1, %v5085_v32, %v1348_v43  ;;  %vm1417_vm3 = vweird.f32 %v5087_v37  ;;  %v560_v29 = vrot.slane %v6509_v12, 4 }
 0xd72   :  { %v1357_v51 = vsel %vm1354_vm2, %v1356_v50, %v1352_v48  ;;  %vm1418_vm5 = vmor %vm1416_vm4, %vm1417_vm3 }
 0xd73   :  { %v1413_v44 = vsub.f32 1.0, %v1412_v42  ;;  %v1371_v8 = vsub.f32 1.0, %v1357_v51  ;;  %v1377_v4 = vmul.f32 %v1357_v51, %v6519_v0  ;;  %v620_v42 = vrot.slane %v6379_v35, 2 }
 0xd75   :  { %v1414_v49 = vmul.f32 %v5087_v37, %v1413_v44 }
 0xd77   :  { %v1415_v55 = vadd.f32 %v5087_v37, %v1414_v49 }
 0xd79   :  { %v1419_v59 = vsel %vm1418_vm5, %v5087_v37, %v1415_v55 }
 0xd7a   :  { %v1424_v63 = vsel %vm1421_vm6, %v1423_v60, %v1419_v59 }
 0xd7b   :  { %v1438_v17 = vsub.f32 1.0, %v1424_v63  ;;  %v1444_v19 = vmul.f32 %v1424_v63, %v6524_v6 }
 0xdc9   :  { %v1362_v53 = vpop.permute.xlu0 %1361 }
 0xdca   :  { %v1364_v54 = vmul.f32 %v1362_v53, %v1357_v51 }
 0xdcc   :  { %1366 = vrot.lane.b32.xlu2 %v1364_v54, %s5947_s29 }
 0xdd1   :  { %v1429_v61 = vpop.permute.xlu1 %1428 }
 0xdd2   :  { %v1431_v5 = vmul.f32 %v1429_v61, %v1424_v63 }
 0xdd4   :  { %1433 = vrot.lane.b32.xlu0 %v1431_v5, %s5947_s29 }
 0xe26   :  { %v1367_v41 = vpop.permute.xlu2 %1366 }
 0xe27   :  { %v1369_v10 = vadd.f32 %v1367_v41, %v559_v22 }
 0xe29   :  { %5088 = vtanh.f32 %v1369_v10 }
 0xe2f   :  { %v5089_v46 = vpop.eup %5088 }
 0xe30   :  { %1373 = vrot.lane.b32.xlu1 %v5089_v46, %s5948_s28 }
 0xe46   :  { %v1434_v11 = vpop.permute.xlu0 %1433 }
 0xe47   :  { %v1436_v1 = vadd.f32 %v1434_v11, %v621_v38 }
 0xe49   :  { %5090 = vtanh.f32 %v1436_v1 }
 0xe4f   :  { %v5091_v2 = vpop.eup %5090 }
 0xe50   :  { %1440 = vrot.lane.b32.xlu2 %v5091_v2, %s5948_s28 }
 0xea2   :  { %v1374_v15 = vpop.permute.xlu1 %1373 }
 0xea3   :  { %v1376_v16 = vmul.f32 %v1374_v15, %v1371_v8 }
 0xea5   :  { %v6541_v7 = vadd.f32 %v1377_v4, %v1376_v16 }
 0xea7   :  { %1447 = vst [vmem:[#allocation1] ss:$4 sm:$0xff] %v6541_v7 }
 0xea8   :  { %1726 = vst [vmem:[#allocation1 + $0x20] ss:$4 sm:$0xff] %v6541_v7 }
 0xeaa   :  { %v1441_v18 = vpop.permute.xlu2 %1440 }
 0xeab   :  { %v1443_v21 = vmul.f32 %v1441_v18, %v1438_v17 }
 0xead   :  { %v6548_v22 = vadd.f32 %v1444_v19, %v1443_v21 }
 0xeae   :  { %v1448_v23 = vld.sshfl [vmem:[#allocation1] sm:$0xff pattern:$0x73625140] }
 0xeaf   :  { %1514 = vst [vmem:[#allocation1] ss:$4 sm:$0xff] %v6548_v22  ;;  %1449 = vrot.lane.b32.xlu0 %v1448_v23, %s5948_s28 }
 0xeb6   :  { %v1515_v24 = vld.sshfl [vmem:[#allocation1] sm:$0xff pattern:$0x73625140] }
 0xeb7   :  { %1516 = vrot.lane.b32.xlu1 %v1515_v24, %s5948_s28 }
 0xf21   :  { %v1450_v38 = vpop.permute.xlu0 %1449 }
 0xf22   :  { %4840 = vmatmul.msk.f32.vlgmr.msrb.gmra.mxu0 %vm646_vm9, %v1450_v38 }
 0xf29   :  { %v1517_v25 = vpop.permute.xlu1 %1516 }
 0xf2a   :  { %4842 = vmatmul.msk.f32.vlgmr.msrb.gmra.mxu1 %vm646_vm9, %v1517_v25 }
 0xf9f   :  { %v1470_v26 = vpop.f32.mrf.mxu0 }
 0xfa0   :  { %v1493_v28 = vadd.f32 %v1470_v26, %v6370_v27  ;;  %v1473_v32 = vadd.f32 %v1470_v26, %v560_v29 }
 0xfa2   :  { %1495 = vrot.lane.b32.xlu2 %v1493_v28, %s5947_s29  ;;  %v4841_v33 = vmul.f32 -1.442695, %v1473_v32 }
 0xfa4   :  { %5092 = vpow2.f32 %v4841_v33 }
 0xfa7   :  { %v1537_v36 = vpop.f32.mrf.mxu1 }
 0xfa8   :  { %v1560_v56 = vadd.f32 %v1537_v36, %v6374_v30  ;;  %v1540_v44 = vadd.f32 %v1537_v36, %v620_v42 }
 0xfaa   :  { %1562 = vrot.lane.b32.xlu0 %v1560_v56, %s5947_s29  ;;  %v5093_v34 = vpop.eup %5092  ;;  %v4843_v47 = vmul.f32 -1.442695, %v1540_v44 }
 0xfab   :  { %v1477_v37 = vadd.f32 1.0, %v5093_v34 }
 0xfad   :  { %5094 = vrcp.f32 %v1477_v37  ;;  %v1489_v50 = vand.u32 2147483648, %v1477_v37  ;;  %vm1483_vm8 = vweird.f32 %v1477_v37  ;;  %v1487_v51 = vand.u32 2147483647, %v1477_v37 }
 0xfae   :  { %5096 = vpow2.f32 %v4843_v47 }
 0xfaf   :  { %v1490_v55 = vor.u32 1.1754944e-38, %v1489_v50  ;;  %vm1488_vm11 = vcmp.eq.f32.partialorder %v1487_v51, 8.507059e+37 }
 0xfb3   :  { %v5095_v40 = vpop.eup %5094 }
 0xfb4   :  { %v1479_v43 = vmul.f32 %v5095_v40, %v1477_v37  ;;  %vm1484_vm7 = vweird.f32 %v5095_v40  ;;  %v5097_v53 = vpop.eup %5096 }
 0xfb5   :  { %vm1485_vm10 = vmor %vm1483_vm8, %vm1484_vm7  ;;  %v1544_v57 = vadd.f32 1.0, %v5097_v53 }
 0xfb6   :  { %v1480_v45 = vsub.f32 1.0, %v1479_v43 }
 0xfb7   :  { %5098 = vrcp.f32 %v1544_v57  ;;  %v1556_v46 = vand.u32 2147483648, %v1544_v57  ;;  %vm1550_vm13 = vweird.f32 %v1544_v57  ;;  %v1554_v11 = vand.u32 2147483647, %v1544_v57 }
 0xfb8   :  { %v1481_v48 = vmul.f32 %v5095_v40, %v1480_v45 }
 0xfb9   :  { %v1557_v2 = vor.u32 1.1754944e-38, %v1556_v46  ;;  %vm1555_vm15 = vcmp.eq.f32.partialorder %v1554_v11, 8.507059e+37 }
 0xfba   :  { %v1482_v49 = vadd.f32 %v5095_v40, %v1481_v48 }
 0xfbc   :  { %v1486_v54 = vsel %vm1485_vm10, %v5095_v40, %v1482_v49  ;;  %vm1801_vm10 = vcmask 523264  }
 0xfbd   :  { %v1491_v59 = vsel %vm1488_vm11, %v1490_v55, %v1486_v54  ;;  %v5099_v61 = vpop.eup %5098 }
 0xfbe   :  { %v1546_v63 = vmul.f32 %v5099_v61, %v1544_v57  ;;  %vm1551_vm12 = vweird.f32 %v5099_v61  ;;  %v1505_v24 = vsub.f32 1.0, %v1491_v59  ;;  %v1511_v25 = vmul.f32 %v1491_v59, %v6541_v7 }
 0xfbf   :  { %vm1552_vm14 = vmor %vm1550_vm13, %vm1551_vm12 }
 0xfc0   :  { %v1547_v5 = vsub.f32 1.0, %v1546_v63 }
 0xfc2   :  { %v1548_v41 = vmul.f32 %v5099_v61, %v1547_v5 }
 0xfc4   :  { %v1549_v10 = vadd.f32 %v5099_v61, %v1548_v41 }
 0xfc6   :  { %v1553_v1 = vsel %vm1552_vm14, %v5099_v61, %v1549_v10 }
 0xfc7   :  { %v1558_v8 = vsel %vm1555_vm15, %v1557_v2, %v1553_v1 }
 0xfc8   :  { %v1572_v36 = vsub.f32 1.0, %v1558_v8 }
 0xffc   :  { %v1496_v58 = vpop.permute.xlu2 %1495 }
 0xffd   :  { %v1498_v60 = vmul.f32 %v1496_v58, %v1491_v59 }
 0xfff   :  { %1500 = vrot.lane.b32.xlu1 %v1498_v60, %s5947_s29 }
0x101c   :  { %v1563_v15 = vpop.permute.xlu0 %1562 }
0x101d   :  { %v1565_v4 = vmul.f32 %v1563_v15, %v1558_v8 }
0x101f   :  { %1567 = vrot.lane.b32.xlu2 %v1565_v4, %s5947_s29 }
0x1071   :  { %v1501_v16 = vpop.permute.xlu1 %1500 }
0x1072   :  { %v1503_v17 = vadd.f32 %v1501_v16, %v560_v29  ;;  %v1578_v29 = vmul.f32 %v1558_v8, %v6548_v22 }
0x1074   :  { %5100 = vtanh.f32 %v1503_v17 }
0x1079   :  { %v1568_v18 = vpop.permute.xlu2 %1567 }
0x107a   :  { %v5101_v19 = vpop.eup %5100  ;;  %v1570_v21 = vadd.f32 %v1568_v18, %v620_v42 }
0x107b   :  { %1507 = vrot.lane.b32.xlu0 %v5101_v19, %s5948_s28 }
0x107c   :  { %5102 = vtanh.f32 %v1570_v21 }
0x1082   :  { %v5103_v23 = vpop.eup %5102 }
0x1083   :  { %1574 = vrot.lane.b32.xlu1 %v5103_v23, %s5948_s28 }
0x10ed   :  { %v1508_v38 = vpop.permute.xlu0 %1507 }
0x10ee   :  { %v1510_v26 = vmul.f32 %v1508_v38, %v1505_v24 }
0x10f0   :  { %v6566_v28 = vadd.f32 %v1511_v25, %v1510_v26  ;;  %v6603_v26 = vld [vmem:[#allocation9 + $0x18] sm:$0xff] }
0x10f1   :  { %1939 = vmatpush.msrb.mxu2 %v6603_v26 }
0x10f2   :  { %1581 = vst [vmem:[#allocation1] ss:$4 sm:$0xff] %v6566_v28 }
0x10f5   :  { %v1575_v56 = vpop.permute.xlu1 %1574 }
0x10f6   :  { %v1577_v32 = vmul.f32 %v1575_v56, %v1572_v36  ;;  %v6605_v36 = vld [vmem:[#allocation9 + $0x10] sm:$0xff]  ;;  %v6608_v56 = vld [vmem:[#allocation9 + $0x8] sm:$0xff] }
0x10f7   :  { %1940 = vmatpush.msrb.mxu2 %v6605_v36 }
0x10f8   :  { %v6570_v33 = vadd.f32 %v1578_v29, %v1577_v32  ;;  %v6611_v29 = vld [vmem:[#allocation9] sm:$0xff] }
0x10f9   :  { %v1582_v34 = vld.sshfl [vmem:[#allocation1] sm:$0xff pattern:$0x73625140]  ;;  %1941 = vmatpush.msrb.mxu2 %v6608_v56 }
0x10fa   :  { %1648 = vst [vmem:[#allocation1] ss:$4 sm:$0xff] %v6570_v33  ;;  %1583 = vrot.lane.b32.xlu2 %v1582_v34, %s5948_s28 }
0x10fb   :  { %1942 = vmatpush.msrb.mxu2 %v6611_v29 }
0x1101   :  { %v1649_v37 = vld.sshfl [vmem:[#allocation1] sm:$0xff pattern:$0x73625140] }
0x1102   :  { %1715 = vst [vmem:[#allocation1] ss:$4 sm:$0xff] %v6396_v31  ;;  %1650 = vrot.lane.b32.xlu0 %v1649_v37, %s5948_s28 }
0x1109   :  { %v1716_v7 = vld.sshfl [vmem:[#allocation1] sm:$0xff pattern:$0x73625140] }
0x110a   :  { %1720 = vst [vmem:[#allocation1] ss:$4 sm:$0xff] %v6458_v62 }
0x1111   :  { %v6577_v40 = vld.sshfl [vmem:[#allocation1] sm:$0xff pattern:$0x73625140] }
0x1112   :  { %1724 = vst [vmem:[#allocation1] ss:$4 sm:$0xff] %v6519_v0  ;;  %v561_v0 = vrot.slane %v6509_v12, 6 }
0x1119   :  { %v6580_v42 = vld.sshfl [vmem:[#allocation1] sm:$0xff pattern:$0x73625140] }
0x111a   :  { %1728 = vst [vmem:[#allocation1] ss:$4 sm:$0xff] %v6566_v28 }
0x1121   :  { %v1729_v24 = vld.sshfl [vmem:[#allocation1] sm:$0xff pattern:$0x73625140] }
0x1154   :  { %v1584_v43 = vpop.permute.xlu2 %1583 }
0x1155   :  { %4844 = vmatmul.msk.f32.vlgmr.msra.gmra.mxu2 %vm646_vm9, %v1584_v43 }
0x1156   :  { %2072 = vmatpush.msra.mxu2 %v6603_v26 }
0x1158   :  { %2073 = vmatpush.msra.mxu2 %v6605_v36 }
0x115a   :  { %2074 = vmatpush.msra.mxu2 %v6608_v56 }
0x115c   :  { %2075 = vmatpush.msra.mxu2 %v6611_v29 }
0x115d   :  { %1943 = vmatmul.f32.vlgmr.msrb.gmra.mxu2 %v5946_v20 }
0x115e   :  { %2206 = vmatpush.msrb.mxu2 %v6603_v26 }
0x1160   :  { %2207 = vmatpush.msrb.mxu2 %v6605_v36 }
0x1162   :  { %2208 = vmatpush.msrb.mxu2 %v6608_v56 }
0x1164   :  { %2209 = vmatpush.msrb.mxu2 %v6611_v29 }
0x1174   :  { %v1651_v44 = vpop.permute.xlu0 %1650 }
0x1175   :  { %4846 = vmatmul.msk.f32.vlgmr.msra.gmra.mxu3 %vm646_vm9, %v1651_v44  ;;  %v5007_v44 = vld [vmem:[%s7420_s4] ss:$0 sm:$0xff] }
0x11d8   :  { %v1604_v31 = vpop.f32.mrf.mxu2 }
0x11d9   :  { %v1627_v45 = vadd.f32 %v1604_v31, %v6370_v27  ;;  %v1607_v48 = vadd.f32 %v1604_v31, %v561_v0  ;;  %v6643_v31 = vld [vmem:[#allocation10 + $0x18] sm:$0xff] }
0x11da   :  { %2002 = vmatpush.msrb.mxu3 %v6643_v31 }
0x11db   :  { %1629 = vrot.lane.b32.xlu1 %v1627_v45, %s5947_s29  ;;  %v4845_v49 = vmul.f32 -1.442695, %v1607_v48  ;;  %v6648_v45 = vld [vmem:[#allocation10 + $0x8] sm:$0xff] }
0x11dd   :  { %5104 = vpow2.f32 %v4845_v49  ;;  %v1771_v49 = vld [vmem:[%s7421_s27 + $0x38] sm:$0xff] }
0x11de   :  { %1814 = vmatpush.msra.mxu0 %v1771_v49 }
0x11e3   :  { %v5105_v53 = vpop.eup %5104 }
0x11e4   :  { %v1611_v54 = vadd.f32 1.0, %v5105_v53  ;;  %v1769_v53 = vld [vmem:[%s7421_s27 + $0x28] sm:$0xff] }
0x11e6   :  { %v1623_v5 = vand.u32 2147483648, %v1611_v54  ;;  %vm1617_vm2 = vweird.f32 %v1611_v54  ;;  %v1621_v41 = vand.u32 2147483647, %v1611_v54 }
0x11e8   :  { %v1624_v11 = vor.u32 1.1754944e-38, %v1623_v5  ;;  %vm1622_vm4 = vcmp.eq.f32.partialorder %v1621_v41, 8.507059e+37  ;;  %v1847_v5 = vld [vmem:[%s7422_s11 + $0x20] sm:$0xff]  ;;  %v1846_v41 = vld [vmem:[%s7422_s11 + $0x18] sm:$0xff] }
0x11f8   :  { %v1671_v62 = vpop.f32.mrf.mxu3 }
0x11f9   :  { %v1694_v47 = vadd.f32 %v1671_v62, %v6374_v30  ;;  %v1674_v50 = vadd.f32 %v1671_v62, %v6379_v35 }
0x11fb   :  { %1696 = vrot.lane.b32.xlu2 %v1694_v47, %s5947_s29  ;;  %v4847_v51 = vmul.f32 -1.442695, %v1674_v50  ;;  %v1770_v50 = vld [vmem:[%s7421_s27 + $0x30] sm:$0xff] }
0x11fc   :  { %1815 = vmatpush.msra.mxu0 %v1770_v50 }
0x11fd   :  { %5106 = vpow2.f32 %v4847_v51 }
0x11fe   :  { %5108 = vrcp.f32 %v1611_v54  ;;  %1816 = vmatpush.msra.mxu0 %v1769_v53 }
0x1203   :  { %v5107_v27 = vpop.eup %5106 }
0x1204   :  { %v1678_v55 = vadd.f32 1.0, %v5107_v27  ;;  %v5109_v57 = vpop.eup %5108 }
0x1205   :  { %v1613_v58 = vmul.f32 %v5109_v57, %v1611_v54  ;;  %vm1618_vm1 = vweird.f32 %v5109_v57 }
0x1206   :  { %5110 = vrcp.f32 %v1678_v55  ;;  %vm1619_vm3 = vmor %vm1617_vm2, %vm1618_vm1  ;;  %v1690_v4 = vand.u32 2147483648, %v1678_v55  ;;  %vm1684_vm6 = vweird.f32 %v1678_v55  ;;  %v1688_v16 = vand.u32 2147483647, %v1678_v55 }
0x1207   :  { %v1614_v30 = vsub.f32 1.0, %v1613_v58 }
0x1208   :  { %v1691_v18 = vor.u32 1.1754944e-38, %v1690_v4  ;;  %vm1689_vm8 = vcmp.eq.f32.partialorder %v1688_v16, 8.507059e+37 }
0x1209   :  { %v1615_v60 = vmul.f32 %v5109_v57, %v1614_v30  ;;  %v1768_v30 = vld [vmem:[%s7421_s27 + $0x20] sm:$0xff] }
0x120a   :  { %1817 = vmatpush.msra.mxu0 %v1768_v30 }
0x120b   :  { %v1616_v12 = vadd.f32 %v5109_v57, %v1615_v60  ;;  %v1766_v60 = vld [vmem:[%s7421_s27 + $0x10] sm:$0xff] }
0x120c   :  { %v5111_v59 = vpop.eup %5110 }
0x120d   :  { %v1680_v61 = vmul.f32 %v5111_v59, %v1678_v55  ;;  %v1620_v10 = vsel %vm1619_vm3, %v5109_v57, %v1616_v12  ;;  %vm1685_vm5 = vweird.f32 %v5111_v59  ;;  %v1765_v12 = vld [vmem:[%s7421_s27 + $0x8] sm:$0xff] }
0x120e   :  { %v6591_v2 = vsel %vm1622_vm4, %v1624_v11, %v1620_v10  ;;  %vm1686_vm7 = vmor %vm1684_vm6, %vm1685_vm5  ;;  %v1845_v10 = vld [vmem:[%s7422_s11 + $0x10] sm:$0xff]  ;;  %v5008_v11 = vld [vmem:[#allocation12] ss:$0 sm:$0xff] }
0x120f   :  { %v1681_v63 = vsub.f32 1.0, %v1680_v61  ;;  %v1645_v47 = vmul.f32 %v6591_v2, %v6566_v28  ;;  %v1849_v61 = vld [vmem:[%s7422_s11 + $0x30] sm:$0xff] }
0x1211   :  { %v1682_v46 = vmul.f32 %v5111_v59, %v1681_v63  ;;  %v1764_v63 = vld [vmem:[%s7421_s27] sm:$0xff] }
0x1213   :  { %v1683_v15 = vadd.f32 %v5111_v59, %v1682_v46  ;;  %v1844_v46 = vld [vmem:[%s7422_s11 + $0x8] sm:$0xff] }
0x1215   :  { %v1687_v17 = vsel %vm1686_vm7, %v5111_v59, %v1683_v15  ;;  %v1850_v59 = vld [vmem:[%s7422_s11 + $0x38] sm:$0xff] }
0x1216   :  { %v6595_v21 = vsel %vm1689_vm8, %v1691_v18, %v1687_v17  ;;  %1884 = vmatpush.msra.mxu1 %v1850_v59 }
0x1217   :  { %v1712_v15 = vmul.f32 %v6595_v21, %v6570_v33 }
0x1218   :  { %1885 = vmatpush.msra.mxu1 %v1849_v61 }
0x124d   :  { %v1630_v1 = vpop.permute.xlu1 %1629 }
0x124e   :  { %v1632_v8 = vmul.f32 %v1630_v1, %v6591_v2  ;;  %v1706_v1 = vsub.f32 1.0, %v6595_v21 }
0x1250   :  { %1634 = vrot.lane.b32.xlu0 %v1632_v8, %s5947_s29 }
0x1255   :  { %v1697_v19 = vpop.permute.xlu2 %1696 }
0x1256   :  { %v1699_v23 = vmul.f32 %v1697_v19, %v6595_v21 }
0x1258   :  { %1701 = vrot.lane.b32.xlu1 %v1699_v23, %s5947_s29 }
0x1260   :  { %1732 = vrot.lane.b32.xlu1 %v1716_v7, %s5948_s28 }
0x1268   :  { %1738 = vrot.lane.b32.xlu1 %v6543_v14, %s5948_s28 }
0x1270   :  { %1744 = vrot.lane.b32.xlu1 %v1729_v24, %s5948_s28 }
0x12c2   :  { %v1635_v38 = vpop.permute.xlu0 %1634 }
0x12c3   :  { %v1637_v25 = vadd.f32 %v1635_v38, %v561_v0 }
0x12c5   :  { %5112 = vtanh.f32 %v1637_v25 }
0x12ca   :  { %v1702_v14 = vpop.permute.xlu1 %1701 }
0x12cb   :  { %v5113_v32 = vpop.eup %5112  ;;  %v1704_v34 = vadd.f32 %v1702_v14, %v6379_v35 }
0x12cc   :  { %1641 = vrot.lane.b32.xlu2 %v5113_v32, %s5948_s28 }
0x12cd   :  { %5114 = vtanh.f32 %v1704_v34 }
0x12d2   :  { %v6621_v37 = vpop.permute.xlu1 %1732 }
0x12d3   :  { %v5115_v7 = vpop.eup %5114 }
0x12d4   :  { %1708 = vrot.lane.b32.xlu0 %v5115_v7, %s5948_s28  ;;  %1734 = vrot.lane.b32.xlu2 %v6491_v3, %s5948_s28  ;;  %v1727_v3 = vld.sshfl [vmem:[#allocation1 + $0x20] sm:$0xff pattern:$0x73625140] }
0x12da   :  { %v1739_v35 = vpop.permute.xlu1 %1738 }
0x12db   :  { %v6632_v43 = vsel %vm646_vm9, %v1739_v35, %v6524_v6  ;;  %v6645_v6 = vld [vmem:[#allocation10 + $0x10] sm:$0xff] }
0x12dc   :  { %1790 = vst [vmem:[#allocation1 + $0x3] ss:$4 sm:$0xff] %v6632_v43  ;;  %1736 = vrot.lane.b32.xlu0 %v6577_v40, %s5948_s28  ;;  %1740 = vrot.lane.b32.xlu2 %v6580_v42, %s5948_s28  ;;  %v6651_v40 = vld [vmem:[#allocation10] sm:$0xff]  ;;  %v1639_v42 = vsub.f32 1.0, %v6591_v2  ;;  %v1843_v2 = vld [vmem:[%s7422_s11] sm:$0xff] }
0x12dd   :  { %2003 = vmatpush.msrb.mxu3 %v6645_v6 }
0x12df   :  { %2004 = vmatpush.msrb.mxu3 %v6648_v45 }
0x12e1   :  { %2005 = vmatpush.msrb.mxu3 %v6651_v40 }
0x12e2   :  { %2006 = vmatmul.f32.vlgmr.msrb.gmra.mxu3 %v5946_v20  ;;  %v1745_v28 = vpop.permute.xlu1 %1744 }
0x12e3   :  { %2139 = vmatpush.msra.mxu3 %v6643_v31  ;;  %v6674_v27 = vsel %vm646_vm9, %v1745_v28, %v6431_v52  ;;  %v1767_v52 = vld [vmem:[%s7421_s27 + $0x18] sm:$0xff] }
0x12e4   :  { %1742 = vrot.lane.b32.xlu0 %v1727_v3, %s5948_s28  ;;  %1818 = vmatpush.msra.mxu0 %v1767_v52 }
0x12e5   :  { %2140 = vmatpush.msra.mxu3 %v6645_v6 }
0x12e6   :  { %1819 = vmatpush.msra.mxu0 %v1766_v60 }
0x12e7   :  { %2141 = vmatpush.msra.mxu3 %v6648_v45 }
0x12e8   :  { %1820 = vmatpush.msra.mxu0 %v1765_v12 }
0x12e9   :  { %2142 = vmatpush.msra.mxu3 %v6651_v40 }
0x12ea   :  { %1821 = vmatpush.msra.mxu0 %v1764_v63 }
0x12eb   :  { %2273 = vmatpush.msrb.mxu3 %v6643_v31 }
0x12ec   :  { %1967 = vrot.lane.b32.xlu0 %v5007_v44, %s5947_s29  ;;  %2340 = vmatpush.msrb.mxu0 %v6603_v26 }
0x12ed   :  { %2274 = vmatpush.msrb.mxu3 %v6645_v6 }
0x12ee   :  { %2341 = vmatpush.msrb.mxu0 %v6605_v36 }
0x12ef   :  { %2275 = vmatpush.msrb.mxu3 %v6648_v45 }
0x12f0   :  { %2342 = vmatpush.msrb.mxu0 %v6608_v56 }
0x12f1   :  { %2276 = vmatpush.msrb.mxu3 %v6651_v40 }
0x12f2   :  { %2343 = vmatpush.msrb.mxu0 %v6611_v29 }
0x1326   :  { %v1642_v62 = vpop.permute.xlu2 %1641 }
0x1327   :  { %v1644_v0 = vmul.f32 %v1642_v62, %v1639_v42  ;;  %v5010_v62 = vld [vmem:[%s7424_s21] ss:$0 sm:$0xff] }
0x1329   :  { %v1646_v48 = vadd.f32 %v1645_v47, %v1644_v0 }
0x132b   :  { %1730 = vst [vmem:[#allocation1 + $0x20] ss:$4 sm:$0xff] %v1646_v48 }
0x132e   :  { %v1735_v51 = vpop.permute.xlu2 %1734 }
0x132f   :  { %v1757_v54 = vsel %vm646_vm9, %v1735_v51, %v6570_v33 }
0x1330   :  { %1786 = vst [vmem:[#allocation1 + $0x1] ss:$4 sm:$0xff] %v1757_v54 }
0x1332   :  { %v1731_v55 = vld.sshfl [vmem:[#allocation1 + $0x20] sm:$0xff pattern:$0x73625140] }
0x1333   :  { %1746 = vrot.lane.b32.xlu2 %v1731_v55, %s5948_s28  ;;  %1796 = vst [vmem:[#allocation1 + $0x22] ss:$4 sm:$0xff] %v6674_v27 }
0x1336   :  { %v1741_v57 = vpop.permute.xlu2 %1740 }
0x1337   :  { %v6680_v58 = vsel %vm646_vm9, %v1741_v57, %v6496_v13  ;;  %v1848_v13 = vld [vmem:[%s7422_s11 + $0x28] sm:$0xff] }
0x1338   :  { %1792 = vst [vmem:[#allocation1 + $0x20] ss:$4 sm:$0xff] %v6680_v58  ;;  %1886 = vmatpush.msra.mxu1 %v1848_v13 }
0x133a   :  { %1887 = vmatpush.msra.mxu1 %v1847_v5 }
0x133b   :  { %2030 = vrot.lane.b32.xlu2 %v5008_v11, %s5947_s29 }
0x133c   :  { %1888 = vmatpush.msra.mxu1 %v1846_v41 }
0x133e   :  { %1889 = vmatpush.msra.mxu1 %v1845_v10 }
0x1340   :  { %1890 = vmatpush.msra.mxu1 %v1844_v46 }
0x1342   :  { %1891 = vmatpush.msra.mxu1 %v1843_v2 }
0x1344   :  { %2407 = vmatpush.msrb.mxu1 %v6643_v31 }
0x1346   :  { %v1709_v8 = vpop.permute.xlu0 %1708  ;;  %2408 = vmatpush.msrb.mxu1 %v6645_v6 }
0x1347   :  { %v1711_v4 = vmul.f32 %v1709_v8, %v1706_v1 }
0x1348   :  { %2409 = vmatpush.msrb.mxu1 %v6648_v45 }
0x1349   :  { %v1713_v16 = vadd.f32 %v1712_v15, %v1711_v4 }
0x134a   :  { %2410 = vmatpush.msrb.mxu1 %v6651_v40 }
0x134b   :  { %v1756_v17 = vsel %vm646_vm9, %v6621_v37, %v1713_v16 }
0x134c   :  { %1784 = vst [vmem:[#allocation1] ss:$4 sm:$0xff] %v1756_v17 }
0x134e   :  { %v1737_v18 = vpop.permute.xlu0 %1736 }
0x134f   :  { %v1758_v19 = vsel %vm646_vm9, %v1737_v18, %v6548_v22  ;;  %v1944_v22 = vpop.f32.mrf.mxu2 }
0x1350   :  { %1788 = vst [vmem:[#allocation1 + $0x2] ss:$4 sm:$0xff] %v1758_v19 }
0x1356   :  { %v1743_v33 = vpop.permute.xlu0 %1742 }
0x1357   :  { %v1799_v21 = vld.sshfl [vmem:[#allocation1] sm:$0xff pattern:$0x73625140]  ;;  %v1761_v23 = vsel %vm646_vm9, %v1743_v33, %v6462_v9 }
0x1358   :  { %1855 = vst [vmem:[#allocation1] ss:$4 sm:$0xff] %v1756_v17  ;;  %4848 = vmatmul.msk.f32.vlgmr.msra.gmra.mxu0 %vm1801_vm10, %v1799_v21 }
0x1359   :  { %1857 = vst [vmem:[#allocation1 + $0x1] ss:$4 sm:$0xff] %v1757_v54  ;;  %2608 = vmatpush.msra.mxu0 %v6603_v26 }
0x135a   :  { %1859 = vst [vmem:[#allocation1 + $0x2] ss:$4 sm:$0xff] %v1758_v19 }
0x135b   :  { %1861 = vst [vmem:[#allocation1 + $0x3] ss:$4 sm:$0xff] %v6632_v43  ;;  %2609 = vmatpush.msra.mxu0 %v6605_v36 }
0x135c   :  { %1794 = vst [vmem:[#allocation1 + $0x21] ss:$4 sm:$0xff] %v1761_v23 }
0x135d   :  { %2610 = vmatpush.msra.mxu0 %v6608_v56 }
0x135e   :  { %v6719_v24 = vpop.permute.xlu0 %1967 }
0x135f   :  { %v1970_v38 = vadd.f32 %v6719_v24, %v1944_v22  ;;  %2611 = vmatpush.msra.mxu0 %v6611_v29 }
0x1361   :  { %1972 = vrot.lane.b32.xlu1 %v1970_v38, %s5947_s29 }
0x1362   :  { %v1870_v9 = vld.sshfl [vmem:[#allocation1] sm:$0xff pattern:$0x73625140] }
0x1363   :  { %4850 = vmatmul.msk.f32.vlgmr.msra.gmra.mxu1 %vm1801_vm10, %v1870_v9 }
0x1364   :  { %2675 = vmatpush.msra.mxu1 %v6643_v31 }
0x1365   :  { %v2007_v7 = vpop.f32.mrf.mxu3 }
0x1366   :  { %2676 = vmatpush.msra.mxu1 %v6645_v6 }
0x1368   :  { %2677 = vmatpush.msra.mxu1 %v6648_v45 }
0x136a   :  { %2678 = vmatpush.msra.mxu1 %v6651_v40 }
0x138d   :  { %v1747_v25 = vpop.permute.xlu2 %1746 }
0x138e   :  { %v1763_v14 = vsel %vm646_vm9, %v1747_v25, %v6399_v39  ;;  %v6740_v39 = vld [vmem:[%s7423_s2] ss:$0 sm:$0xff] }
0x138f   :  { %1798 = vst [vmem:[#allocation1 + $0x23] ss:$4 sm:$0xff] %v1763_v14 }
0x1395   :  { %v6734_v37 = vpop.permute.xlu2 %2030 }
0x1396   :  { %v1800_v32 = vld.sshfl [vmem:[#allocation1 + $0x20] sm:$0xff pattern:$0x73625140]  ;;  %v2033_v35 = vadd.f32 %v6734_v37, %v2007_v7 }
0x1397   :  { %4849 = vmatmul.msk.f32.gmra.mxu0 %vm1801_vm10, %v1800_v32  ;;  %1863 = vst [vmem:[#allocation1 + $0x20] ss:$4 sm:$0xff] %v6680_v58 }
0x1398   :  { %1865 = vst [vmem:[#allocation1 + $0x21] ss:$4 sm:$0xff] %v1761_v23  ;;  %2035 = vrot.lane.b32.xlu1 %v2033_v35, %s5947_s29 }
0x1399   :  { %1867 = vst [vmem:[#allocation1 + $0x22] ss:$4 sm:$0xff] %v6674_v27 }
0x139a   :  { %1869 = vst [vmem:[#allocation1 + $0x23] ss:$4 sm:$0xff] %v1763_v14 }
0x13a1   :  { %v1871_v34 = vld.sshfl [vmem:[#allocation1 + $0x20] sm:$0xff pattern:$0x73625140] }
0x13a2   :  { %4851 = vmatmul.msk.f32.gmra.mxu1 %vm1801_vm10, %v1871_v34 }
0x13d3   :  { %v1973_v57 = vpop.permute.xlu1 %1972 }
0x13d5   :  { %v1823_v43 = vpop.f32.mrf.mxu0 }
0x13d6   :  { %v6743_v3 = vadd.f32 %v6740_v39, %v1823_v43 }
0x13d8   :  { %v1947_v44 = vadd.f32 %v1944_v22, %v6743_v3 }
0x13da   :  { %v4852_v42 = vmul.f32 -1.442695, %v1947_v44 }
0x13dc   :  { %5116 = vpow2.f32 %v4852_v42 }
0x13e0   :  { %v1893_v47 = vpop.f32.mrf.mxu1 }
0x13e1   :  { %v6747_v0 = vadd.f32 %v5010_v62, %v1893_v47 }
0x13e2   :  { %v5117_v48 = vpop.eup %5116 }
0x13e3   :  { %v1951_v49 = vadd.f32 1.0, %v5117_v48 }
0x13e5   :  { %5118 = vrcp.f32 %v1951_v49  ;;  %v1963_v28 = vand.u32 2147483648, %v1951_v49  ;;  %v1961_v27 = vand.u32 2147483647, %v1951_v49  ;;  %vm1957_vm12 = vweird.f32 %v1951_v49 }
0x13e7   :  { %v1964_v58 = vor.u32 1.1754944e-38, %v1963_v28  ;;  %vm1962_vm14 = vcmp.eq.f32.partialorder %v1961_v27, 8.507059e+37  ;;  %v1831_v28 = vrot.slane %v6743_v3, 2 }
0x13eb   :  { %v5119_v50 = vpop.eup %5118 }
0x13ec   :  { %v1953_v51 = vmul.f32 %v5119_v50, %v1951_v49  ;;  %vm1958_vm11 = vweird.f32 %v5119_v50 }
0x13ed   :  { %vm1959_vm13 = vmor %vm1957_vm12, %vm1958_vm11 }
0x13ee   :  { %v1954_v53 = vsub.f32 1.0, %v1953_v51 }
0x13f0   :  { %v1955_v54 = vmul.f32 %v5119_v50, %v1954_v53 }
0x13f2   :  { %v1956_v55 = vadd.f32 %v5119_v50, %v1955_v54 }
0x13f4   :  { %v1960_v30 = vsel %vm1959_vm13, %v5119_v50, %v1956_v55 }
0x13f5   :  { %v1965_v52 = vsel %vm1962_vm14, %v1964_v58, %v1960_v30 }
0x13f6   :  { %v1975_v59 = vmul.f32 %v1973_v57, %v1965_v52  ;;  %v1982_v25 = vsub.f32 1.0, %v1965_v52  ;;  %v1988_v32 = vmul.f32 0.0, %v1965_v52 }
0x13f8   :  { %1977 = vrot.lane.b32.xlu0 %v1975_v59, %s5947_s29 }
0x140a   :  { %v2036_v4 = vpop.permute.xlu1 %2035 }
0x141f   :  { %v1896_v60 = vpop.f32.mrf.mxu1 }
0x1420   :  { %v6750_v61 = vadd.f32 %v5010_v62, %v1896_v60 }
0x1422   :  { %v1906_v12 = vrot.slane %v6750_v61, 6 }
0x1424   :  { %v2010_v13 = vadd.f32 %v2007_v7, %v1906_v12 }
0x1426   :  { %v4853_v63 = vmul.f32 -1.442695, %v2010_v13 }
0x1428   :  { %5120 = vpow2.f32 %v4853_v63 }
0x142e   :  { %v5121_v5 = vpop.eup %5120 }
0x142f   :  { %v2014_v41 = vadd.f32 1.0, %v5121_v5 }
0x1431   :  { %5122 = vrcp.f32 %v2014_v41  ;;  %v2026_v1 = vand.u32 2147483648, %v2014_v41  ;;  %v2024_v8 = vand.u32 2147483647, %v2014_v41  ;;  %vm2020_vm1 = vweird.f32 %v2014_v41 }
0x1433   :  { %v2027_v16 = vor.u32 1.1754944e-38, %v2026_v1  ;;  %vm2025_vm3 = vcmp.eq.f32.partialorder %v2024_v8, 8.507059e+37 }
0x1437   :  { %v5123_v10 = vpop.eup %5122 }
0x1438   :  { %v2016_v46 = vmul.f32 %v5123_v10, %v2014_v41  ;;  %vm2021_vm15 = vweird.f32 %v5123_v10 }
0x1439   :  { %vm2022_vm2 = vmor %vm2020_vm1, %vm2021_vm15 }
0x143a   :  { %v2017_v11 = vsub.f32 1.0, %v2016_v46 }
0x143c   :  { %v2018_v2 = vmul.f32 %v5123_v10, %v2017_v11 }
0x143e   :  { %v2019_v15 = vadd.f32 %v5123_v10, %v2018_v2  ;;  %v1905_v2 = vrot.slane %v6750_v61, 4 }
0x1440   :  { %v2023_v17 = vsel %vm2022_vm2, %v5123_v10, %v2019_v15 }
0x1441   :  { %v2028_v18 = vsel %vm2025_vm3, %v2027_v16, %v2023_v17 }
0x1442   :  { %v2038_v19 = vmul.f32 %v2036_v4, %v2028_v18  ;;  %v2045_v43 = vsub.f32 1.0, %v2028_v18  ;;  %v2051_v42 = vmul.f32 0.0, %v2028_v18 }
0x1444   :  { %2040 = vrot.lane.b32.xlu2 %v2038_v19, %s5947_s29 }
0x146a   :  { %v1978_v33 = vpop.permute.xlu0 %1977 }
0x146b   :  { %v1980_v21 = vadd.f32 %v1978_v33, %v6743_v3 }
0x146d   :  { %5124 = vtanh.f32 %v1980_v21 }
0x1473   :  { %v5125_v23 = vpop.eup %5124 }
0x1474   :  { %1984 = vrot.lane.b32.xlu0 %v5125_v23, %s5948_s28 }
0x149e   :  { %v2041_v22 = vpop.permute.xlu2 %2040 }
0x149f   :  { %v2043_v38 = vadd.f32 %v2041_v22, %v1906_v12 }
0x14a1   :  { %5126 = vtanh.f32 %v2043_v38 }
0x14a7   :  { %v5127_v9 = vpop.eup %5126 }
0x14a8   :  { %2047 = vrot.lane.b32.xlu1 %v5127_v9, %s5948_s28 }
0x14e6   :  { %v1985_v14 = vpop.permute.xlu0 %1984 }
0x14e7   :  { %v1987_v34 = vmul.f32 %v1985_v14, %v1982_v25 }
0x14e9   :  { %v6757_v7 = vadd.f32 %v1988_v32, %v1987_v34 }
0x14eb   :  { %2054 = vst [vmem:[#allocation1] ss:$4 sm:$0xff] %v6757_v7 }
0x14f2   :  { %v2055_v35 = vld.sshfl [vmem:[#allocation1] sm:$0xff pattern:$0x73625140] }
0x14f3   :  { %2056 = vrot.lane.b32.xlu2 %v2055_v35, %s5948_s28 }
0x151a   :  { %v2048_v44 = vpop.permute.xlu1 %2047 }
0x151b   :  { %v2050_v62 = vmul.f32 %v2048_v44, %v2045_v43 }
0x151d   :  { %v6761_v47 = vadd.f32 %v2051_v42, %v2050_v62 }
0x151f   :  { %2121 = vst [vmem:[#allocation1] ss:$4 sm:$0xff] %v6761_v47 }
0x1526   :  { %v2122_v48 = vld.sshfl [vmem:[#allocation1] sm:$0xff pattern:$0x73625140] }
0x1527   :  { %2123 = vrot.lane.b32.xlu0 %v2122_v48, %s5948_s28 }
0x154d   :  { %v2057_v49 = vpop.permute.xlu2 %2056 }
0x154e   :  { %4854 = vmatmul.msk.f32.vlgmr.msra.gmra.mxu2 %vm646_vm9, %v2057_v49 }
0x154f   :  { %2474 = vmatpush.msra.mxu2 %v6603_v26 }
0x1551   :  { %2475 = vmatpush.msra.mxu2 %v6605_v36 }
0x1553   :  { %2476 = vmatpush.msra.mxu2 %v6608_v56 }
0x1555   :  { %2477 = vmatpush.msra.mxu2 %v6611_v29 }
0x1599   :  { %v2124_v50 = vpop.permute.xlu0 %2123 }
0x159a   :  { %4856 = vmatmul.msk.f32.vlgmr.msra.gmra.mxu3 %vm646_vm9, %v2124_v50 }
0x159b   :  { %2541 = vmatpush.msra.mxu3 %v6643_v31 }
0x159d   :  { %2542 = vmatpush.msra.mxu3 %v6645_v6 }
0x159f   :  { %2543 = vmatpush.msra.mxu3 %v6648_v45 }
0x15a1   :  { %2544 = vmatpush.msra.mxu3 %v6651_v40 }
0x15d1   :  { %v2077_v51 = vpop.f32.mrf.mxu2 }
0x15d2   :  { %v2100_v53 = vadd.f32 %v2077_v51, %v6719_v24  ;;  %v2080_v54 = vadd.f32 %v2077_v51, %v1831_v28 }
0x15d4   :  { %2102 = vrot.lane.b32.xlu1 %v2100_v53, %s5947_s29  ;;  %v4855_v27 = vmul.f32 -1.442695, %v2080_v54 }
0x15d6   :  { %5128 = vpow2.f32 %v4855_v27 }
0x15dc   :  { %v5129_v58 = vpop.eup %5128 }
0x15dd   :  { %v2084_v30 = vadd.f32 1.0, %v5129_v58 }
0x15df   :  { %5130 = vrcp.f32 %v2084_v30  ;;  %v2096_v63 = vand.u32 2147483648, %v2084_v30  ;;  %vm2090_vm5 = vweird.f32 %v2084_v30  ;;  %v2094_v5 = vand.u32 2147483647, %v2084_v30 }
0x15e1   :  { %v2097_v10 = vor.u32 1.1754944e-38, %v2096_v63  ;;  %vm2095_vm7 = vcmp.eq.f32.partialorder %v2094_v5, 8.507059e+37 }
0x15e5   :  { %v5131_v52 = vpop.eup %5130 }
0x15e6   :  { %v2086_v59 = vmul.f32 %v5131_v52, %v2084_v30  ;;  %vm2091_vm4 = vweird.f32 %v5131_v52 }
0x15e7   :  { %vm2092_vm6 = vmor %vm2090_vm5, %vm2091_vm4 }
0x15e8   :  { %v2087_v60 = vsub.f32 1.0, %v2086_v59 }
0x15ea   :  { %v2088_v12 = vmul.f32 %v5131_v52, %v2087_v60  ;;  %v1832_v60 = vrot.slane %v6743_v3, 4 }
0x15ec   :  { %v2089_v13 = vadd.f32 %v5131_v52, %v2088_v12 }
0x15ee   :  { %v2093_v41 = vsel %vm2092_vm6, %v5131_v52, %v2089_v13 }
0x15ef   :  { %v2098_v11 = vsel %vm2095_vm7, %v2097_v10, %v2093_v41 }
0x15f0   :  { %v2112_v44 = vsub.f32 1.0, %v2098_v11  ;;  %v2118_v49 = vmul.f32 %v2098_v11, %v6757_v7 }
0x161d   :  { %v2144_v55 = vpop.f32.mrf.mxu3 }
0x161e   :  { %v2167_v57 = vadd.f32 %v2144_v55, %v6734_v37  ;;  %v2147_v8 = vadd.f32 %v2144_v55, %v1905_v2 }
0x1620   :  { %2169 = vrot.lane.b32.xlu0 %v2167_v57, %s5947_s29  ;;  %v4857_v15 = vmul.f32 -1.442695, %v2147_v8 }
0x1622   :  { %5132 = vpow2.f32 %v4857_v15 }
0x1628   :  { %v5133_v4 = vpop.eup %5132 }
0x1629   :  { %v2151_v16 = vadd.f32 1.0, %v5133_v4 }
0x162b   :  { %5134 = vrcp.f32 %v2151_v16  ;;  %v2163_v23 = vand.u32 2147483648, %v2151_v16  ;;  %vm2157_vm11 = vweird.f32 %v2151_v16  ;;  %v2161_v22 = vand.u32 2147483647, %v2151_v16 }
0x162d   :  { %v2164_v9 = vor.u32 1.1754944e-38, %v2163_v23  ;;  %vm2162_vm13 = vcmp.eq.f32.partialorder %v2161_v22, 8.507059e+37 }
0x1631   :  { %v5135_v17 = vpop.eup %5134 }
0x1632   :  { %v2153_v18 = vmul.f32 %v5135_v17, %v2151_v16  ;;  %vm2158_vm8 = vweird.f32 %v5135_v17 }
0x1633   :  { %vm2159_vm12 = vmor %vm2157_vm11, %vm2158_vm8 }
0x1634   :  { %v2154_v19 = vsub.f32 1.0, %v2153_v18 }
0x1636   :  { %v2155_v33 = vmul.f32 %v5135_v17, %v2154_v19 }
0x1638   :  { %v2156_v21 = vadd.f32 %v5135_v17, %v2155_v33 }
0x163a   :  { %v2160_v38 = vsel %vm2159_vm12, %v5135_v17, %v2156_v21  ;;  %v1904_v21 = vrot.slane %v6750_v61, 2 }
0x163b   :  { %v2165_v14 = vsel %vm2162_vm13, %v2164_v9, %v2160_v38 }
0x163c   :  { %v2179_v54 = vsub.f32 1.0, %v2165_v14  ;;  %v2185_v55 = vmul.f32 %v2165_v14, %v6761_v47 }
0x1646   :  { %v2103_v46 = vpop.permute.xlu1 %2102 }
0x1647   :  { %v2105_v1 = vmul.f32 %v2103_v46, %v2098_v11 }
0x1649   :  { %2107 = vrot.lane.b32.xlu2 %v2105_v1, %s5947_s29 }
0x1692   :  { %v2170_v25 = vpop.permute.xlu0 %2169 }
0x1693   :  { %v2172_v32 = vmul.f32 %v2170_v25, %v2165_v14 }
0x1695   :  { %2174 = vrot.lane.b32.xlu1 %v2172_v32, %s5947_s29 }
0x16a3   :  { %v2108_v34 = vpop.permute.xlu2 %2107 }
0x16a4   :  { %v2110_v35 = vadd.f32 %v2108_v34, %v1831_v28 }
0x16a6   :  { %5136 = vtanh.f32 %v2110_v35 }
0x16ac   :  { %v5137_v43 = vpop.eup %5136 }
0x16ad   :  { %2114 = vrot.lane.b32.xlu2 %v5137_v43, %s5948_s28 }
0x1707   :  { %v2175_v42 = vpop.permute.xlu1 %2174  ;;  %v2115_v62 = vpop.permute.xlu2 %2114 }
0x1708   :  { %v2177_v48 = vadd.f32 %v2175_v42, %v1905_v2  ;;  %v2117_v50 = vmul.f32 %v2115_v62, %v2112_v44 }
0x170a   :  { %5138 = vtanh.f32 %v2177_v48  ;;  %v6785_v51 = vadd.f32 %v2118_v49, %v2117_v50 }
0x170c   :  { %2188 = vst [vmem:[#allocation1] ss:$4 sm:$0xff] %v6785_v51 }
0x1710   :  { %v5139_v53 = vpop.eup %5138 }
0x1711   :  { %2181 = vrot.lane.b32.xlu0 %v5139_v53, %s5948_s28 }
0x1713   :  { %v2189_v28 = vld.sshfl [vmem:[#allocation1] sm:$0xff pattern:$0x73625140] }
0x1714   :  { %2190 = vrot.lane.b32.xlu1 %v2189_v28, %s5948_s28 }
0x1783   :  { %v2182_v27 = vpop.permute.xlu0 %2181 }
0x1784   :  { %v2184_v57 = vmul.f32 %v2182_v27, %v2179_v54 }
0x1786   :  { %v6791_v58 = vadd.f32 %v2185_v55, %v2184_v57  ;;  %v2191_v7 = vpop.permute.xlu1 %2190 }
0x1787   :  { %4858 = vmatmul.msk.f32.vlgmr.msrb.gmra.mxu2 %vm646_vm9, %v2191_v7 }
0x1788   :  { %2255 = vst [vmem:[#allocation1] ss:$4 sm:$0xff] %v6791_v58  ;;  %2742 = vmatpush.msrb.mxu2 %v6603_v26 }
0x178a   :  { %2743 = vmatpush.msrb.mxu2 %v6605_v36 }
0x178c   :  { %2744 = vmatpush.msrb.mxu2 %v6608_v56 }
0x178e   :  { %2745 = vmatpush.msrb.mxu2 %v6611_v29 }
0x178f   :  { %v2256_v30 = vld.sshfl [vmem:[#allocation1] sm:$0xff pattern:$0x73625140] }
0x1790   :  { %2257 = vrot.lane.b32.xlu2 %v2256_v30, %s5948_s28 }
0x17ea   :  { %v2258_v47 = vpop.permute.xlu2 %2257 }
0x17eb   :  { %4860 = vmatmul.msk.f32.vlgmr.msrb.gmra.mxu3 %vm646_vm9, %v2258_v47 }
0x17ec   :  { %2809 = vmatpush.msrb.mxu3 %v6643_v31 }
0x17ee   :  { %2810 = vmatpush.msrb.mxu3 %v6645_v6 }
0x17f0   :  { %2811 = vmatpush.msrb.mxu3 %v6648_v45 }
0x17f2   :  { %2812 = vmatpush.msrb.mxu3 %v6651_v40 }
0x180a   :  { %v2211_v52 = vpop.f32.mrf.mxu2 }
0x180b   :  { %v2234_v59 = vadd.f32 %v2211_v52, %v6719_v24  ;;  %v2214_v12 = vadd.f32 %v2211_v52, %v1832_v60 }
0x180d   :  { %2236 = vrot.lane.b32.xlu0 %v2234_v59, %s5947_s29  ;;  %v4859_v13 = vmul.f32 -1.442695, %v2214_v12 }
0x180f   :  { %5140 = vpow2.f32 %v4859_v13 }
0x1815   :  { %v5141_v63 = vpop.eup %5140 }
0x1816   :  { %v2218_v5 = vadd.f32 1.0, %v5141_v63 }
0x1818   :  { %5142 = vrcp.f32 %v2218_v5  ;;  %v2230_v15 = vand.u32 2147483648, %v2218_v5  ;;  %vm2224_vm15 = vweird.f32 %v2218_v5  ;;  %v2228_v4 = vand.u32 2147483647, %v2218_v5 }
0x181a   :  { %v2231_v17 = vor.u32 1.1754944e-38, %v2230_v15  ;;  %vm2229_vm2 = vcmp.eq.f32.partialorder %v2228_v4, 8.507059e+37 }
0x181e   :  { %v5143_v41 = vpop.eup %5142 }
0x181f   :  { %v2220_v10 = vmul.f32 %v5143_v41, %v2218_v5  ;;  %vm2225_vm14 = vweird.f32 %v5143_v41 }
0x1820   :  { %vm2226_vm1 = vmor %vm2224_vm15, %vm2225_vm14 }
0x1821   :  { %v2221_v1 = vsub.f32 1.0, %v2220_v10 }
0x1823   :  { %v2222_v2 = vmul.f32 %v5143_v41, %v2221_v1 }
0x1825   :  { %v2223_v8 = vadd.f32 %v5143_v41, %v2222_v2 }
0x1827   :  { %v2227_v16 = vsel %vm2226_vm1, %v5143_v41, %v2223_v8 }
0x1828   :  { %v2232_v19 = vsel %vm2229_vm2, %v2231_v17, %v2227_v16 }
0x1829   :  { %v2246_v7 = vsub.f32 1.0, %v2232_v19  ;;  %v2252_v47 = vmul.f32 %v2232_v19, %v6785_v51 }
0x186e   :  { %v2278_v46 = vpop.f32.mrf.mxu3 }
0x186f   :  { %v2301_v11 = vadd.f32 %v2278_v46, %v6734_v37  ;;  %v2281_v23 = vadd.f32 %v2278_v46, %v1904_v21  ;;  %v6835_v46 = vpop.f32.mrf.mxu0 }
0x1871   :  { %2303 = vrot.lane.b32.xlu2 %v2301_v11, %s5947_s29  ;;  %v4861_v22 = vmul.f32 -1.442695, %v2281_v23 }
0x1873   :  { %5144 = vpow2.f32 %v4861_v22 }
0x1879   :  { %v5145_v38 = vpop.eup %5144 }
0x187a   :  { %v2285_v9 = vadd.f32 1.0, %v5145_v38 }
0x187c   :  { %5146 = vrcp.f32 %v2285_v9  ;;  %v2297_v43 = vand.u32 2147483648, %v2285_v9  ;;  %vm2291_vm4 = vweird.f32 %v2285_v9  ;;  %v2295_v44 = vand.u32 2147483647, %v2285_v9 }
0x187e   :  { %v2298_v62 = vor.u32 1.1754944e-38, %v2297_v43  ;;  %vm2296_vm6 = vcmp.eq.f32.partialorder %v2295_v44, 8.507059e+37 }
0x187f   :  { %v2237_v18 = vpop.permute.xlu0 %2236 }
0x1880   :  { %v2239_v33 = vmul.f32 %v2237_v18, %v2232_v19 }
0x1882   :  { %2241 = vrot.lane.b32.xlu1 %v2239_v33, %s5947_s29  ;;  %v5147_v25 = vpop.eup %5146 }
0x1883   :  { %v2287_v14 = vmul.f32 %v5147_v25, %v2285_v9  ;;  %vm2292_vm3 = vweird.f32 %v5147_v25 }
0x1884   :  { %vm2293_vm5 = vmor %vm2291_vm4, %vm2292_vm3 }
0x1885   :  { %v2288_v32 = vsub.f32 1.0, %v2287_v14 }
0x1887   :  { %v2289_v34 = vmul.f32 %v5147_v25, %v2288_v32 }
0x1889   :  { %v2290_v35 = vadd.f32 %v5147_v25, %v2289_v34 }
0x188b   :  { %v2294_v42 = vsel %vm2293_vm5, %v5147_v25, %v2290_v35 }
0x188c   :  { %v2299_v49 = vsel %vm2296_vm6, %v2298_v62, %v2294_v42 }
0x188d   :  { %v2313_v12 = vsub.f32 1.0, %v2299_v49  ;;  %v2319_v63 = vmul.f32 %v2299_v49, %v6791_v58 }
0x18cb   :  { %v2304_v48 = vpop.permute.xlu2 %2303 }
0x18cc   :  { %v2306_v50 = vmul.f32 %v2304_v48, %v2299_v49 }
0x18ce   :  { %2308 = vrot.lane.b32.xlu0 %v2306_v50, %s5947_s29 }
0x18f4   :  { %v2242_v53 = vpop.permute.xlu1 %2241 }
0x18f5   :  { %v2244_v28 = vadd.f32 %v2242_v53, %v1832_v60 }
0x18f7   :  { %5148 = vtanh.f32 %v2244_v28 }
0x18fd   :  { %v5149_v54 = vpop.eup %5148 }
0x18fe   :  { %2248 = vrot.lane.b32.xlu1 %v5149_v54, %s5948_s28 }
0x1940   :  { %v2309_v27 = vpop.permute.xlu0 %2308 }
0x1941   :  { %v2311_v55 = vadd.f32 %v2309_v27, %v1904_v21 }
0x1943   :  { %5150 = vtanh.f32 %v2311_v55 }
0x1949   :  { %v5151_v57 = vpop.eup %5150 }
0x194a   :  { %2315 = vrot.lane.b32.xlu2 %v5151_v57, %s5948_s28 }
0x1970   :  { %v2249_v30 = vpop.permute.xlu1 %2248 }
0x1971   :  { %v2251_v52 = vmul.f32 %v2249_v30, %v2246_v7 }
0x1973   :  { %v6816_v59 = vadd.f32 %v2252_v47, %v2251_v52 }
0x1975   :  { %2322 = vst [vmem:[#allocation1] ss:$4 sm:$0xff] %v6816_v59 }
0x197c   :  { %v2323_v60 = vld.sshfl [vmem:[#allocation1] sm:$0xff pattern:$0x73625140] }
0x197d   :  { %2324 = vrot.lane.b32.xlu0 %v2323_v60, %s5948_s28 }
0x19a4   :  { %v2316_v13 = vpop.permute.xlu2 %2315 }
0x19a5   :  { %v2318_v5 = vmul.f32 %v2316_v13, %v2313_v12 }
0x19a7   :  { %v6821_v41 = vadd.f32 %v2319_v63, %v2318_v5 }
0x19a9   :  { %2389 = vst [vmem:[#allocation1] ss:$4 sm:$0xff] %v6821_v41 }
0x19b0   :  { %v2390_v10 = vld.sshfl [vmem:[#allocation1] sm:$0xff pattern:$0x73625140] }
0x19b1   :  { %2391 = vrot.lane.b32.xlu1 %v2390_v10, %s5948_s28 }
0x19ef   :  { %v2325_v51 = vpop.permute.xlu0 %2324 }
0x19f0   :  { %4862 = vmatmul.msk.f32.vlgmr.msrb.gmra.mxu0 %vm646_vm9, %v2325_v51 }
0x19f1   :  { %2876 = vmatpush.msrb.mxu0 %v6603_v26 }
0x19f3   :  { %2877 = vmatpush.msrb.mxu0 %v6605_v36 }
0x19f5   :  { %2878 = vmatpush.msrb.mxu0 %v6608_v56  ;;  %v1833_v56 = vrot.slane %v6743_v3, 6 }
0x19f7   :  { %2879 = vmatpush.msrb.mxu0 %v6611_v29 }
0x1a23   :  { %v2392_v58 = vpop.permute.xlu1 %2391 }
0x1a24   :  { %4864 = vmatmul.msk.f32.vlgmr.msrb.gmra.mxu1 %vm646_vm9, %v2392_v58 }
0x1a25   :  { %2943 = vmatpush.msrb.mxu1 %v6643_v31 }
0x1a27   :  { %2944 = vmatpush.msrb.mxu1 %v6645_v6 }
0x1a29   :  { %2945 = vmatpush.msrb.mxu1 %v6648_v45 }
0x1a2b   :  { %2946 = vmatpush.msrb.mxu1 %v6651_v40 }
0x1a6d   :  { %v2345_v26 = vpop.f32.mrf.mxu0 }
0x1a6e   :  { %v2368_v36 = vadd.f32 %v2345_v26, %v6719_v24  ;;  %v2348_v29 = vadd.f32 %v2345_v26, %v1833_v56 }
0x1a70   :  { %2370 = vrot.lane.b32.xlu2 %v2368_v36, %s5947_s29  ;;  %v4863_v11 = vmul.f32 -1.442695, %v2348_v29 }
0x1a72   :  { %5152 = vpow2.f32 %v4863_v11 }
0x1a78   :  { %v5153_v6 = vpop.eup %5152 }
0x1a79   :  { %v2352_v45 = vadd.f32 1.0, %v5153_v6 }
0x1a7b   :  { %5154 = vrcp.f32 %v2352_v45  ;;  %v2364_v16 = vand.u32 2147483648, %v2352_v45  ;;  %vm2358_vm8 = vweird.f32 %v2352_v45  ;;  %v2362_v3 = vand.u32 2147483647, %v2352_v45 }
0x1a7d   :  { %v2365_v18 = vor.u32 1.1754944e-38, %v2364_v16  ;;  %vm2363_vm12 = vcmp.eq.f32.partialorder %v2362_v3, 8.507059e+37 }
0x1a81   :  { %v5155_v40 = vpop.eup %5154 }
0x1a82   :  { %v2354_v2 = vmul.f32 %v5155_v40, %v2352_v45  ;;  %vm2359_vm7 = vweird.f32 %v5155_v40 }
0x1a83   :  { %vm2360_vm11 = vmor %vm2358_vm8, %vm2359_vm7 }
0x1a84   :  { %v2355_v8 = vsub.f32 1.0, %v2354_v2 }
0x1a86   :  { %v2356_v15 = vmul.f32 %v5155_v40, %v2355_v8 }
0x1a88   :  { %v2357_v4 = vadd.f32 %v5155_v40, %v2356_v15 }
0x1a8a   :  { %v2361_v17 = vsel %vm2360_vm11, %v5155_v40, %v2357_v4 }
0x1a8b   :  { %v2366_v33 = vsel %vm2363_vm12, %v2365_v18, %v2361_v17 }
0x1a8c   :  { %v2380_v7 = vsub.f32 1.0, %v2366_v33  ;;  %v2386_v47 = vmul.f32 %v2366_v33, %v6816_v59 }
0x1aa1   :  { %v2412_v1 = vpop.f32.mrf.mxu1 }
0x1aa2   :  { %v2435_v31 = vadd.f32 %v2412_v1, %v6734_v37  ;;  %v2415_v23 = vadd.f32 %v2412_v1, %v6750_v61 }
0x1aa4   :  { %2437 = vrot.lane.b32.xlu1 %v2435_v31, %s5947_s29  ;;  %v4865_v22 = vmul.f32 -1.442695, %v2415_v23 }
0x1aa6   :  { %5156 = vpow2.f32 %v4865_v22 }
0x1aac   :  { %v5157_v38 = vpop.eup %5156 }
0x1aad   :  { %v2419_v9 = vadd.f32 1.0, %v5157_v38 }
0x1aaf   :  { %5158 = vrcp.f32 %v2419_v9  ;;  %v2431_v43 = vand.u32 2147483648, %v2419_v9  ;;  %vm2425_vm14 = vweird.f32 %v2419_v9  ;;  %v2429_v44 = vand.u32 2147483647, %v2419_v9 }
0x1ab1   :  { %v2432_v62 = vor.u32 1.1754944e-38, %v2431_v43  ;;  %vm2430_vm1 = vcmp.eq.f32.partialorder %v2429_v44, 8.507059e+37 }
0x1ab5   :  { %v5159_v25 = vpop.eup %5158 }
0x1ab6   :  { %v2421_v14 = vmul.f32 %v5159_v25, %v2419_v9  ;;  %vm2426_vm13 = vweird.f32 %v5159_v25 }
0x1ab7   :  { %vm2427_vm15 = vmor %vm2425_vm14, %vm2426_vm13 }
0x1ab8   :  { %v2422_v32 = vsub.f32 1.0, %v2421_v14 }
0x1aba   :  { %v2423_v34 = vmul.f32 %v5159_v25, %v2422_v32 }
0x1abc   :  { %v2424_v35 = vadd.f32 %v5159_v25, %v2423_v34 }
0x1abe   :  { %v2428_v42 = vsel %vm2427_vm15, %v5159_v25, %v2424_v35 }
0x1abf   :  { %v2433_v49 = vsel %vm2430_vm1, %v2432_v62, %v2428_v42 }
0x1ac0   :  { %v2447_v13 = vsub.f32 1.0, %v2433_v49 }
0x1aca   :  { %v2371_v19 = vpop.permute.xlu2 %2370 }
0x1acb   :  { %v2373_v21 = vmul.f32 %v2371_v19, %v2366_v33  ;;  %v1903_v19 = vrot.slane %v6747_v0, 6 }
0x1acd   :  { %2375 = vrot.lane.b32.xlu0 %v2373_v21, %s5947_s29 }
0x1b16   :  { %v2438_v48 = vpop.permute.xlu1 %2437 }
0x1b17   :  { %v2440_v50 = vmul.f32 %v2438_v48, %v2433_v49 }
0x1b19   :  { %2442 = vrot.lane.b32.xlu2 %v2440_v50, %s5947_s29 }
0x1b3f   :  { %v2376_v53 = vpop.permute.xlu0 %2375 }
0x1b40   :  { %v2378_v28 = vadd.f32 %v2376_v53, %v1833_v56 }
0x1b42   :  { %5160 = vtanh.f32 %v2378_v28 }
0x1b48   :  { %v5161_v54 = vpop.eup %5160 }
0x1b49   :  { %2382 = vrot.lane.b32.xlu0 %v5161_v54, %s5948_s28 }
0x1b73   :  { %v2443_v27 = vpop.permute.xlu2 %2442 }
0x1b74   :  { %v2445_v55 = vadd.f32 %v2443_v27, %v6750_v61  ;;  %v2453_v61 = vmul.f32 %v2433_v49, %v6821_v41  ;;  %v6864_v41 = vadd.f32 %v6740_v39, %v6835_v46 }
0x1b76   :  { %5162 = vtanh.f32 %v2445_v55 }
0x1b7c   :  { %v5163_v57 = vpop.eup %5162 }
0x1b7d   :  { %2449 = vrot.lane.b32.xlu1 %v5163_v57, %s5948_s28 }
0x1bbb   :  { %v2383_v30 = vpop.permute.xlu0 %2382 }
0x1bbc   :  { %v2385_v52 = vmul.f32 %v2383_v30, %v2380_v7 }
0x1bbe   :  { %v6849_v60 = vadd.f32 %v2386_v47, %v2385_v52 }
0x1bc0   :  { %2456 = vst [vmem:[#allocation1] ss:$4 sm:$0xff] %v6849_v60 }
0x1bc7   :  { %v2457_v12 = vld.sshfl [vmem:[#allocation1] sm:$0xff pattern:$0x73625140] }
0x1bc8   :  { %2458 = vrot.lane.b32.xlu2 %v2457_v12, %s5948_s28 }
0x1bef   :  { %v2450_v63 = vpop.permute.xlu1 %2449 }
0x1bf0   :  { %v2452_v5 = vmul.f32 %v2450_v63, %v2447_v13 }
0x1bf2   :  { %v6854_v10 = vadd.f32 %v2453_v61, %v2452_v5 }
0x1bf4   :  { %2523 = vst [vmem:[#allocation1] ss:$4 sm:$0xff] %v6854_v10 }
0x1bfb   :  { %v2524_v51 = vld.sshfl [vmem:[#allocation1] sm:$0xff pattern:$0x73625140] }
0x1bfc   :  { %2525 = vrot.lane.b32.xlu0 %v2524_v51, %s5948_s28 }
0x1c22   :  { %v2459_v59 = vpop.permute.xlu2 %2458 }
0x1c23   :  { %4866 = vmatmul.msk.f32.vlgmr.msra.gmra.mxu2 %vm646_vm9, %v2459_v59 }
0x1c6e   :  { %v2526_v58 = vpop.permute.xlu0 %2525 }
0x1c6f   :  { %4868 = vmatmul.msk.f32.vlgmr.msra.gmra.mxu3 %vm646_vm9, %v2526_v58 }
0x1ca6   :  { %v2479_v26 = vpop.f32.mrf.mxu2 }
0x1ca7   :  { %v2502_v36 = vadd.f32 %v2479_v26, %v6719_v24  ;;  %v2482_v56 = vadd.f32 %v2479_v26, %v6864_v41 }
0x1ca9   :  { %2504 = vrot.lane.b32.xlu1 %v2502_v36, %s5947_s29  ;;  %v4867_v29 = vmul.f32 -1.442695, %v2482_v56 }
0x1cab   :  { %5164 = vpow2.f32 %v4867_v29 }
0x1cb1   :  { %v5165_v31 = vpop.eup %5164 }
0x1cb2   :  { %v2486_v6 = vadd.f32 1.0, %v5165_v31 }
0x1cb4   :  { %5166 = vrcp.f32 %v2486_v6  ;;  %v2498_v39 = vand.u32 2147483648, %v2486_v6  ;;  %vm2492_vm3 = vweird.f32 %v2486_v6  ;;  %v2496_v46 = vand.u32 2147483647, %v2486_v6 }
0x1cb6   :  { %v2499_v16 = vor.u32 1.1754944e-38, %v2498_v39  ;;  %vm2497_vm5 = vcmp.eq.f32.partialorder %v2496_v46, 8.507059e+37 }
0x1cba   :  { %v5167_v45 = vpop.eup %5166 }
0x1cbb   :  { %v2488_v40 = vmul.f32 %v5167_v45, %v2486_v6  ;;  %vm2493_vm2 = vweird.f32 %v5167_v45 }
0x1cbc   :  { %vm2494_vm4 = vmor %vm2492_vm3, %vm2493_vm2 }
0x1cbd   :  { %v2489_v2 = vsub.f32 1.0, %v2488_v40 }
0x1cbf   :  { %v2490_v8 = vmul.f32 %v5167_v45, %v2489_v2 }
0x1cc1   :  { %v2491_v15 = vadd.f32 %v5167_v45, %v2490_v8 }
0x1cc3   :  { %v2495_v4 = vsel %vm2494_vm4, %v5167_v45, %v2491_v15 }
0x1cc4   :  { %v2500_v17 = vsel %vm2497_vm5, %v2499_v16, %v2495_v4 }
0x1cc5   :  { %v2514_v28 = vsub.f32 1.0, %v2500_v17  ;;  %v2520_v57 = vmul.f32 %v2500_v17, %v6849_v60 }
0x1cf2   :  { %v2546_v11 = vpop.f32.mrf.mxu3 }
0x1cf3   :  { %v2569_v1 = vadd.f32 %v2546_v11, %v6734_v37  ;;  %v2549_v33 = vadd.f32 %v2546_v11, %v1903_v19 }
0x1cf5   :  { %2571 = vrot.lane.b32.xlu0 %v2569_v1, %s5947_s29  ;;  %v4869_v21 = vmul.f32 -1.442695, %v2549_v33 }
0x1cf7   :  { %5168 = vpow2.f32 %v4869_v21 }
0x1cfd   :  { %v5169_v23 = vpop.eup %5168 }
0x1cfe   :  { %v2553_v22 = vadd.f32 1.0, %v5169_v23 }
0x1d00   :  { %5170 = vrcp.f32 %v2553_v22  ;;  %v2565_v34 = vand.u32 2147483648, %v2553_v22  ;;  %vm2559_vm7 = vweird.f32 %v2553_v22  ;;  %v2563_v35 = vand.u32 2147483647, %v2553_v22 }
0x1d02   :  { %v2566_v44 = vor.u32 1.1754944e-38, %v2565_v34  ;;  %vm2564_vm11 = vcmp.eq.f32.partialorder %v2563_v35, 8.507059e+37 }
0x1d06   :  { %v5171_v38 = vpop.eup %5170 }
0x1d07   :  { %v2555_v9 = vmul.f32 %v5171_v38, %v2553_v22  ;;  %vm2560_vm6 = vweird.f32 %v5171_v38 }
0x1d08   :  { %vm2561_vm8 = vmor %vm2559_vm7, %vm2560_vm6 }
0x1d09   :  { %v2556_v25 = vsub.f32 1.0, %v2555_v9 }
0x1d0b   :  { %v2557_v14 = vmul.f32 %v5171_v38, %v2556_v25 }
0x1d0d   :  { %v2558_v32 = vadd.f32 %v5171_v38, %v2557_v14 }
0x1d0f   :  { %v2562_v43 = vsel %vm2561_vm8, %v5171_v38, %v2558_v32 }
0x1d10   :  { %v2567_v62 = vsel %vm2564_vm11, %v2566_v44, %v2562_v43 }
0x1d11   :  { %v2581_v12 = vsub.f32 1.0, %v2567_v62  ;;  %v2587_v63 = vmul.f32 %v2567_v62, %v6854_v10  ;;  %v1834_v10 = vrot.slane %v6864_v41, 2 }
0x1d1b   :  { %v2505_v3 = vpop.permute.xlu1 %2504 }
0x1d1c   :  { %v2507_v18 = vmul.f32 %v2505_v3, %v2500_v17 }
0x1d1e   :  { %2509 = vrot.lane.b32.xlu2 %v2507_v18, %s5947_s29  ;;  %v1902_v18 = vrot.slane %v6747_v0, 4 }
0x1d67   :  { %v2572_v42 = vpop.permute.xlu0 %2571 }
0x1d68   :  { %v2574_v48 = vmul.f32 %v2572_v42, %v2567_v62 }
0x1d6a   :  { %2576 = vrot.lane.b32.xlu1 %v2574_v48, %s5947_s29 }
0x1d78   :  { %v2510_v49 = vpop.permute.xlu2 %2509 }
0x1d79   :  { %v2512_v50 = vadd.f32 %v2510_v49, %v6864_v41 }
0x1d7b   :  { %5172 = vtanh.f32 %v2512_v50 }
0x1d81   :  { %v5173_v53 = vpop.eup %5172 }
0x1d82   :  { %2516 = vrot.lane.b32.xlu2 %v5173_v53, %s5948_s28 }
0x1ddc   :  { %v2577_v54 = vpop.permute.xlu1 %2576  ;;  %v2517_v27 = vpop.permute.xlu2 %2516 }
0x1ddd   :  { %v2579_v55 = vadd.f32 %v2577_v54, %v1903_v19  ;;  %v2519_v7 = vmul.f32 %v2517_v27, %v2514_v28 }
0x1ddf   :  { %5174 = vtanh.f32 %v2579_v55  ;;  %v6875_v30 = vadd.f32 %v2520_v57, %v2519_v7 }
0x1de1   :  { %2590 = vst [vmem:[#allocation1] ss:$4 sm:$0xff] %v6875_v30 }
0x1de5   :  { %v5175_v47 = vpop.eup %5174 }
0x1de6   :  { %2583 = vrot.lane.b32.xlu0 %v5175_v47, %s5948_s28 }
0x1de8   :  { %v2591_v52 = vld.sshfl [vmem:[#allocation1] sm:$0xff pattern:$0x73625140] }
0x1de9   :  { %2592 = vrot.lane.b32.xlu1 %v2591_v52, %s5948_s28 }
0x1e58   :  { %v2584_v13 = vpop.permute.xlu0 %2583 }
0x1e59   :  { %v2586_v61 = vmul.f32 %v2584_v13, %v2581_v12 }
0x1e5b   :  { %v6881_v5 = vadd.f32 %v2587_v63, %v2586_v61  ;;  %v2593_v60 = vpop.permute.xlu1 %2592 }
0x1e5c   :  { %4870 = vmatmul.msk.f32.vlgmr.msra.gmra.mxu0 %vm646_vm9, %v2593_v60 }
0x1e5d   :  { %2657 = vst [vmem:[#allocation1] ss:$4 sm:$0xff] %v6881_v5 }
0x1e64   :  { %v2658_v51 = vld.sshfl [vmem:[#allocation1] sm:$0xff pattern:$0x73625140] }
0x1e65   :  { %2659 = vrot.lane.b32.xlu2 %v2658_v51, %s5948_s28 }
0x1ebf   :  { %v2660_v59 = vpop.permute.xlu2 %2659 }
0x1ec0   :  { %4872 = vmatmul.msk.f32.vlgmr.msra.gmra.mxu1 %vm646_vm9, %v2660_v59 }
0x1ed9   :  { %v2613_v58 = vpop.f32.mrf.mxu0 }
0x1eda   :  { %v2636_v26 = vadd.f32 %v2613_v58, %v6719_v24  ;;  %v2616_v36 = vadd.f32 %v2613_v58, %v1834_v10 }
0x1edc   :  { %2638 = vrot.lane.b32.xlu0 %v2636_v26, %s5947_s29  ;;  %v4871_v56 = vmul.f32 -1.442695, %v2616_v36 }
0x1ede   :  { %5176 = vpow2.f32 %v4871_v56 }
0x1ee4   :  { %v5177_v29 = vpop.eup %5176 }
0x1ee5   :  { %v2620_v11 = vadd.f32 1.0, %v5177_v29 }
0x1ee7   :  { %5178 = vrcp.f32 %v2620_v11  ;;  %v2632_v15 = vand.u32 2147483648, %v2620_v11  ;;  %vm2626_vm13 = vweird.f32 %v2620_v11  ;;  %v2630_v39 = vand.u32 2147483647, %v2620_v11 }
0x1ee9   :  { %v2633_v4 = vor.u32 1.1754944e-38, %v2632_v15  ;;  %vm2631_vm15 = vcmp.eq.f32.partialorder %v2630_v39, 8.507059e+37 }
0x1eed   :  { %v5179_v1 = vpop.eup %5178 }
0x1eee   :  { %v2622_v31 = vmul.f32 %v5179_v1, %v2620_v11  ;;  %vm2627_vm12 = vweird.f32 %v5179_v1 }
0x1eef   :  { %vm2628_vm14 = vmor %vm2626_vm13, %vm2627_vm12 }
0x1ef0   :  { %v2623_v40 = vsub.f32 1.0, %v2622_v31 }
0x1ef2   :  { %v2624_v2 = vmul.f32 %v5179_v1, %v2623_v40 }
0x1ef4   :  { %v2625_v8 = vadd.f32 %v5179_v1, %v2624_v2 }
0x1ef6   :  { %v2629_v46 = vsel %vm2628_vm14, %v5179_v1, %v2625_v8 }
0x1ef7   :  { %v2634_v3 = vsel %vm2631_vm15, %v2633_v4, %v2629_v46 }
0x1ef8   :  { %v2648_v27 = vsub.f32 1.0, %v2634_v3  ;;  %v2654_v57 = vmul.f32 %v2634_v3, %v6875_v30 }
0x1f3d   :  { %v2680_v6 = vpop.f32.mrf.mxu1 }
0x1f3e   :  { %v2703_v45 = vadd.f32 %v2680_v6, %v6734_v37  ;;  %v2683_v19 = vadd.f32 %v2680_v6, %v1902_v18 }
0x1f40   :  { %2705 = vrot.lane.b32.xlu2 %v2703_v45, %s5947_s29  ;;  %v4873_v33 = vmul.f32 -1.442695, %v2683_v19 }
0x1f42   :  { %5180 = vpow2.f32 %v4873_v33 }
0x1f48   :  { %v5181_v21 = vpop.eup %5180 }
0x1f49   :  { %v2687_v23 = vadd.f32 1.0, %v5181_v21 }
0x1f4b   :  { %5182 = vrcp.f32 %v2687_v23  ;;  %v2699_v32 = vand.u32 2147483648, %v2687_v23  ;;  %vm2693_vm2 = vweird.f32 %v2687_v23  ;;  %v2697_v34 = vand.u32 2147483647, %v2687_v23 }
0x1f4d   :  { %v2700_v43 = vor.u32 1.1754944e-38, %v2699_v32  ;;  %vm2698_vm4 = vcmp.eq.f32.partialorder %v2697_v34, 8.507059e+37 }
0x1f4e   :  { %v2639_v16 = vpop.permute.xlu0 %2638 }
0x1f4f   :  { %v2641_v17 = vmul.f32 %v2639_v16, %v2634_v3 }
0x1f51   :  { %2643 = vrot.lane.b32.xlu1 %v2641_v17, %s5947_s29  ;;  %v5183_v22 = vpop.eup %5182  ;;  %v1901_v17 = vrot.slane %v6747_v0, 2 }
0x1f52   :  { %v2689_v38 = vmul.f32 %v5183_v22, %v2687_v23  ;;  %vm2694_vm1 = vweird.f32 %v5183_v22 }
0x1f53   :  { %vm2695_vm3 = vmor %vm2693_vm2, %vm2694_vm1 }
0x1f54   :  { %v2690_v9 = vsub.f32 1.0, %v2689_v38 }
0x1f56   :  { %v2691_v25 = vmul.f32 %v5183_v22, %v2690_v9 }
0x1f58   :  { %v2692_v14 = vadd.f32 %v5183_v22, %v2691_v25 }
0x1f5a   :  { %v2696_v35 = vsel %vm2695_vm3, %v5183_v22, %v2692_v14 }
0x1f5b   :  { %v2701_v42 = vsel %vm2698_vm4, %v2700_v43, %v2696_v35 }
0x1f5c   :  { %v2715_v12 = vsub.f32 1.0, %v2701_v42  ;;  %v2721_v63 = vmul.f32 %v2701_v42, %v6881_v5  ;;  %v1835_v5 = vrot.slane %v6864_v41, 4 }
0x1f9a   :  { %v2706_v44 = vpop.permute.xlu2 %2705 }
0x1f9b   :  { %v2708_v62 = vmul.f32 %v2706_v44, %v2701_v42 }
0x1f9d   :  { %2710 = vrot.lane.b32.xlu0 %v2708_v62, %s5947_s29 }
0x1fc3   :  { %v2644_v48 = vpop.permute.xlu1 %2643 }
0x1fc4   :  { %v2646_v49 = vadd.f32 %v2644_v48, %v1834_v10 }
0x1fc6   :  { %5184 = vtanh.f32 %v2646_v49 }
0x1fcc   :  { %v5185_v50 = vpop.eup %5184 }
0x1fcd   :  { %2650 = vrot.lane.b32.xlu1 %v5185_v50, %s5948_s28 }
0x200f   :  { %v2711_v53 = vpop.permute.xlu0 %2710 }
0x2010   :  { %v2713_v28 = vadd.f32 %v2711_v53, %v1902_v18 }
0x2012   :  { %5186 = vtanh.f32 %v2713_v28 }
0x2018   :  { %v5187_v54 = vpop.eup %5186 }
0x2019   :  { %2717 = vrot.lane.b32.xlu2 %v5187_v54, %s5948_s28 }
0x203f   :  { %v2651_v55 = vpop.permute.xlu1 %2650 }
0x2040   :  { %v2653_v7 = vmul.f32 %v2651_v55, %v2648_v27 }
0x2042   :  { %v6898_v47 = vadd.f32 %v2654_v57, %v2653_v7 }
0x2044   :  { %2724 = vst [vmem:[#allocation1] ss:$4 sm:$0xff] %v6898_v47 }
0x204b   :  { %v2725_v52 = vld.sshfl [vmem:[#allocation1] sm:$0xff pattern:$0x73625140] }
0x204c   :  { %2726 = vrot.lane.b32.xlu0 %v2725_v52, %s5948_s28 }
0x2073   :  { %v2718_v13 = vpop.permute.xlu2 %2717 }
0x2074   :  { %v2720_v61 = vmul.f32 %v2718_v13, %v2715_v12 }
0x2076   :  { %v6903_v60 = vadd.f32 %v2721_v63, %v2720_v61 }
0x2078   :  { %2791 = vst [vmem:[#allocation1] ss:$4 sm:$0xff] %v6903_v60 }
0x207f   :  { %v2792_v51 = vld.sshfl [vmem:[#allocation1] sm:$0xff pattern:$0x73625140] }
0x2080   :  { %2793 = vrot.lane.b32.xlu1 %v2792_v51, %s5948_s28 }
0x20be   :  { %v2727_v30 = vpop.permute.xlu0 %2726 }
0x20bf   :  { %4874 = vmatmul.msk.f32.vlgmr.msrb.gmra.mxu2 %vm646_vm9, %v2727_v30 }
0x20f2   :  { %v2794_v59 = vpop.permute.xlu1 %2793 }
0x20f3   :  { %4876 = vmatmul.msk.f32.vlgmr.msrb.gmra.mxu3 %vm646_vm9, %v2794_v59 }
0x2142   :  { %v2747_v58 = vpop.f32.mrf.mxu2 }
0x2143   :  { %v2770_v26 = vadd.f32 %v2747_v58, %v6719_v24  ;;  %v2750_v10 = vadd.f32 %v2747_v58, %v1835_v5 }
0x2145   :  { %2772 = vrot.lane.b32.xlu2 %v2770_v26, %s5947_s29  ;;  %v4875_v36 = vmul.f32 -1.442695, %v2750_v10 }
0x2147   :  { %5188 = vpow2.f32 %v4875_v36 }
0x214d   :  { %v5189_v11 = vpop.eup %5188 }
0x214e   :  { %v2754_v1 = vadd.f32 1.0, %v5189_v11 }
0x2150   :  { %5190 = vrcp.f32 %v2754_v1  ;;  %v2766_v8 = vand.u32 2147483648, %v2754_v1  ;;  %vm2760_vm6 = vweird.f32 %v2754_v1  ;;  %v2764_v15 = vand.u32 2147483647, %v2754_v1 }
0x2152   :  { %v2767_v46 = vor.u32 1.1754944e-38, %v2766_v8  ;;  %vm2765_vm8 = vcmp.eq.f32.partialorder %v2764_v15, 8.507059e+37 }
0x2156   :  { %v5191_v31 = vpop.eup %5190 }
0x2157   :  { %v2756_v6 = vmul.f32 %v5191_v31, %v2754_v1  ;;  %vm2761_vm5 = vweird.f32 %v5191_v31 }
0x2158   :  { %vm2762_vm7 = vmor %vm2760_vm6, %vm2761_vm5 }
0x2159   :  { %v2757_v45 = vsub.f32 1.0, %v2756_v6 }
0x215b   :  { %v2758_v40 = vmul.f32 %v5191_v31, %v2757_v45 }
0x215d   :  { %v2759_v2 = vadd.f32 %v5191_v31, %v2758_v40 }
0x215f   :  { %v2763_v39 = vsel %vm2762_vm7, %v5191_v31, %v2759_v2 }
0x2160   :  { %v2768_v16 = vsel %vm2765_vm8, %v2767_v46, %v2763_v39 }
0x2161   :  { %v2782_v54 = vsub.f32 1.0, %v2768_v16  ;;  %v2788_v55 = vmul.f32 %v2768_v16, %v6898_v47 }
0x2176   :  { %v2814_v56 = vpop.f32.mrf.mxu3 }
0x2177   :  { %v2837_v29 = vadd.f32 %v2814_v56, %v6734_v37  ;;  %v2817_v18 = vadd.f32 %v2814_v56, %v1901_v17 }
0x2179   :  { %2839 = vrot.lane.b32.xlu1 %v2837_v29, %s5947_s29  ;;  %v4877_v19 = vmul.f32 -1.442695, %v2817_v18 }
0x217b   :  { %5192 = vpow2.f32 %v4877_v19 }
0x2181   :  { %v5193_v33 = vpop.eup %5192 }
0x2182   :  { %v2821_v21 = vadd.f32 1.0, %v5193_v33 }
0x2184   :  { %5194 = vrcp.f32 %v2821_v21  ;;  %v2833_v14 = vand.u32 2147483648, %v2821_v21  ;;  %vm2827_vm12 = vweird.f32 %v2821_v21  ;;  %v2831_v32 = vand.u32 2147483647, %v2821_v21 }
0x2186   :  { %v2834_v35 = vor.u32 1.1754944e-38, %v2833_v14  ;;  %vm2832_vm14 = vcmp.eq.f32.partialorder %v2831_v32, 8.507059e+37 }
0x218a   :  { %v5195_v23 = vpop.eup %5194 }
0x218b   :  { %v2823_v22 = vmul.f32 %v5195_v23, %v2821_v21  ;;  %vm2828_vm11 = vweird.f32 %v5195_v23 }
0x218c   :  { %vm2829_vm13 = vmor %vm2827_vm12, %vm2828_vm11 }
0x218d   :  { %v2824_v38 = vsub.f32 1.0, %v2823_v22 }
0x218f   :  { %v2825_v9 = vmul.f32 %v5195_v23, %v2824_v38 }
0x2191   :  { %v2826_v25 = vadd.f32 %v5195_v23, %v2825_v9 }
0x2193   :  { %v2830_v34 = vsel %vm2829_vm13, %v5195_v23, %v2826_v25 }
0x2194   :  { %v2835_v44 = vsel %vm2832_vm14, %v2834_v35, %v2830_v34 }
0x2195   :  { %v2849_v12 = vsub.f32 1.0, %v2835_v44  ;;  %v2855_v63 = vmul.f32 %v2835_v44, %v6903_v60  ;;  %v1836_v60 = vrot.slane %v6864_v41, 6 }
0x219f   :  { %v2773_v4 = vpop.permute.xlu2 %2772 }
0x21a0   :  { %v2775_v3 = vmul.f32 %v2773_v4, %v2768_v16 }
0x21a2   :  { %2777 = vrot.lane.b32.xlu0 %v2775_v3, %s5947_s29 }
0x21eb   :  { %v2840_v43 = vpop.permute.xlu1 %2839 }
0x21ec   :  { %v2842_v42 = vmul.f32 %v2840_v43, %v2835_v44  ;;  %v3005_v44 = vld [vmem:[%s7425_s9 + $0x38] sm:$0xff] }
0x21ed   :  { %3021 = vmatpush.msra.mxu2 %v3005_v44 }
0x21ee   :  { %2844 = vrot.lane.b32.xlu2 %v2842_v42, %s5947_s29  ;;  %v3004_v42 = vld [vmem:[%s7425_s9 + $0x30] sm:$0xff] }
0x21ef   :  { %3022 = vmatpush.msra.mxu2 %v3004_v42 }
0x2214   :  { %v2778_v62 = vpop.permute.xlu0 %2777 }
0x2215   :  { %v2780_v48 = vadd.f32 %v2778_v62, %v1835_v5  ;;  %v3003_v62 = vld [vmem:[%s7425_s9 + $0x28] sm:$0xff] }
0x2216   :  { %3023 = vmatpush.msra.mxu2 %v3003_v62 }
0x2217   :  { %5196 = vtanh.f32 %v2780_v48  ;;  %v3002_v48 = vld [vmem:[%s7425_s9 + $0x20] sm:$0xff] }
0x2218   :  { %3024 = vmatpush.msra.mxu2 %v3002_v48 }
0x221d   :  { %v5197_v49 = vpop.eup %5196 }
0x221e   :  { %2784 = vrot.lane.b32.xlu0 %v5197_v49, %s5948_s28 }
0x2248   :  { %v2845_v50 = vpop.permute.xlu2 %2844 }
0x2249   :  { %v2847_v53 = vadd.f32 %v2845_v50, %v1901_v17 }
0x224b   :  { %5198 = vtanh.f32 %v2847_v53 }
0x2251   :  { %v5199_v28 = vpop.eup %5198 }
0x2252   :  { %2851 = vrot.lane.b32.xlu1 %v5199_v28, %s5948_s28 }
0x2290   :  { %v2785_v27 = vpop.permute.xlu0 %2784 }
0x2291   :  { %v2787_v57 = vmul.f32 %v2785_v27, %v2782_v54 }
0x2293   :  { %v6920_v7 = vadd.f32 %v2788_v55, %v2787_v57 }
0x2295   :  { %2858 = vst [vmem:[#allocation1] ss:$4 sm:$0xff] %v6920_v7 }
0x229c   :  { %v2859_v52 = vld.sshfl [vmem:[#allocation1] sm:$0xff pattern:$0x73625140] }
0x229d   :  { %2860 = vrot.lane.b32.xlu2 %v2859_v52, %s5948_s28 }
0x22c4   :  { %v2852_v13 = vpop.permute.xlu1 %2851 }
0x22c5   :  { %v2854_v61 = vmul.f32 %v2852_v13, %v2849_v12  ;;  %v3001_v12 = vld [vmem:[%s7425_s9 + $0x18] sm:$0xff]  ;;  %v3000_v13 = vld [vmem:[%s7425_s9 + $0x10] sm:$0xff] }
0x22c6   :  { %3025 = vmatpush.msra.mxu2 %v3001_v12 }
0x22c7   :  { %v6925_v51 = vadd.f32 %v2855_v63, %v2854_v61  ;;  %v2999_v63 = vld [vmem:[%s7425_s9 + $0x8] sm:$0xff] }
0x22c8   :  { %3026 = vmatpush.msra.mxu2 %v3000_v13  ;;  %v3037_v61 = vld [vmem:[#allocation15 + $0x18] sm:$0xff] }
0x22c9   :  { %2925 = vst [vmem:[#allocation1] ss:$4 sm:$0xff] %v6925_v51  ;;  %3057 = vmatpush.msra.mxu3 %v3037_v61 }
0x22ca   :  { %3027 = vmatpush.msra.mxu2 %v2999_v63 }
0x22d0   :  { %v2926_v30 = vld.sshfl [vmem:[#allocation1] sm:$0xff pattern:$0x73625140] }
0x22d1   :  { %2927 = vrot.lane.b32.xlu0 %v2926_v30, %s5948_s28  ;;  %v2998_v30 = vld [vmem:[%s7425_s9] sm:$0xff] }
0x22d2   :  { %3028 = vmatpush.msra.mxu2 %v2998_v30 }
0x22f7   :  { %v2861_v47 = vpop.permute.xlu2 %2860 }
0x22f8   :  { %4878 = vmatmul.msk.f32.vlgmr.msrb.gmra.mxu0 %vm646_vm9, %v2861_v47 }
0x2343   :  { %v2928_v59 = vpop.permute.xlu0 %2927 }
0x2344   :  { %4880 = vmatmul.msk.f32.vlgmr.msrb.gmra.mxu1 %vm646_vm9, %v2928_v59 }
0x2375   :  { %v2881_v58 = vpop.f32.mrf.mxu0 }
0x2376   :  { %v2904_v26 = vadd.f32 %v2881_v58, %v6719_v24  ;;  %v2884_v5 = vadd.f32 %v2881_v58, %v1836_v60 }
0x2378   :  { %2906 = vrot.lane.b32.xlu1 %v2904_v26, %s5947_s29  ;;  %v4879_v10 = vmul.f32 -1.442695, %v2884_v5 }
0x237a   :  { %5200 = vpow2.f32 %v4879_v10  ;;  %v3035_v10 = vld [vmem:[#allocation15 + $0x8] sm:$0xff] }
0x2380   :  { %v5201_v29 = vpop.eup %5200 }
0x2381   :  { %v2888_v11 = vadd.f32 1.0, %v5201_v29  ;;  %v3067_v29 = vld [vmem:[#allocation18 + $0x10] sm:$0xff] }
0x2383   :  { %5202 = vrcp.f32 %v2888_v11  ;;  %v2900_v40 = vand.u32 2147483648, %v2888_v11  ;;  %vm2894_vm1 = vweird.f32 %v2888_v11  ;;  %v2898_v41 = vand.u32 2147483647, %v2888_v11 }
0x2385   :  { %v2901_v8 = vor.u32 1.1754944e-38, %v2900_v40  ;;  %vm2899_vm3 = vcmp.eq.f32.partialorder %v2898_v41, 8.507059e+37  ;;  %v3099_v40 = vld [vmem:[#allocation21 + $0x10] sm:$0xff]  ;;  %v5012_v41 = vld [vmem:[#allocation16] ss:$0 sm:$0xff] }
0x2389   :  { %v5203_v1 = vpop.eup %5202 }
0x238a   :  { %v2890_v31 = vmul.f32 %v5203_v1, %v2888_v11  ;;  %vm2895_vm15 = vweird.f32 %v5203_v1  ;;  %v3066_v11 = vld [vmem:[#allocation18 + $0x8] sm:$0xff] }
0x238b   :  { %vm2896_vm2 = vmor %vm2894_vm1, %vm2895_vm15 }
0x238c   :  { %v2891_v6 = vsub.f32 1.0, %v2890_v31 }
0x238e   :  { %v2892_v45 = vmul.f32 %v5203_v1, %v2891_v6 }
0x2390   :  { %v2893_v24 = vadd.f32 %v5203_v1, %v2892_v45  ;;  %v3065_v45 = vld [vmem:[#allocation18] sm:$0xff] }
0x2392   :  { %v2897_v2 = vsel %vm2896_vm2, %v5203_v1, %v2893_v24  ;;  %v5011_v1 = vld [vmem:[#allocation13] ss:$0 sm:$0xff] }
0x2393   :  { %v3100_v24 = vld [vmem:[#allocation21 + $0x18] sm:$0xff] }
0x2394   :  { %3120 = vmatpush.msra.mxu1 %v3100_v24 }
0x2396   :  { %3121 = vmatpush.msra.mxu1 %v3099_v40 }
0x23c1   :  { %v2948_v36 = vpop.f32.mrf.mxu1 }
0x23c2   :  { %v2971_v56 = vadd.f32 %v2948_v36, %v6734_v37  ;;  %v2902_v37 = vsel %vm2899_vm3, %v2901_v8, %v2897_v2  ;;  %v2951_v46 = vadd.f32 %v2948_v36, %v6747_v0  ;;  %v3034_v36 = vld [vmem:[#allocation15] sm:$0xff] }
0x23c3   :  { %v2916_v49 = vsub.f32 1.0, %v2902_v37  ;;  %v2922_v54 = vmul.f32 %v2902_v37, %v6920_v7 }
0x23c4   :  { %2973 = vrot.lane.b32.xlu0 %v2971_v56, %s5947_s29  ;;  %v4881_v4 = vmul.f32 -1.442695, %v2951_v46  ;;  %v3068_v56 = vld [vmem:[#allocation18 + $0x18] sm:$0xff] }
0x23c5   :  { %3088 = vmatpush.msra.mxu0 %v3068_v56  ;;  %v6959_v46 = vld [vmem:[#allocation25 + $0x10] sm:$0xff] }
0x23c6   :  { %5204 = vpow2.f32 %v4881_v4  ;;  %v5014_v4 = vld [vmem:[#allocation28] ss:$0 sm:$0xff] }
0x23c7   :  { %3089 = vmatpush.msra.mxu0 %v3067_v29  ;;  %v6987_v29 = vld [vmem:[#allocation27] ss:$0 sm:$0xff] }
0x23c9   :  { %3090 = vmatpush.msra.mxu0 %v3066_v11 }
0x23cb   :  { %3091 = vmatpush.msra.mxu0 %v3065_v45 }
0x23cc   :  { %v5205_v16 = vpop.eup %5204 }
0x23cd   :  { %v2955_v3 = vadd.f32 1.0, %v5205_v16  ;;  %v3168_v16 = vld [vmem:[#allocation24 + $0x38] sm:$0xff] }
0x23cf   :  { %5206 = vrcp.f32 %v2955_v3  ;;  %v2967_v23 = vand.u32 2147483648, %v2955_v3  ;;  %vm2961_vm5 = vweird.f32 %v2955_v3  ;;  %v2965_v22 = vand.u32 2147483647, %v2955_v3 }
0x23d1   :  { %v2968_v9 = vor.u32 1.1754944e-38, %v2967_v23  ;;  %vm2966_vm7 = vcmp.eq.f32.partialorder %v2965_v22, 8.507059e+37  ;;  %v3167_v23 = vld [vmem:[#allocation24 + $0x30] sm:$0xff]  ;;  %v3166_v22 = vld [vmem:[#allocation24 + $0x28] sm:$0xff] }
0x23d5   :  { %v5207_v17 = vpop.eup %5206 }
0x23d6   :  { %v2957_v18 = vmul.f32 %v5207_v17, %v2955_v3  ;;  %vm2962_vm4 = vweird.f32 %v5207_v17  ;;  %v6962_v3 = vld [vmem:[#allocation25 + $0x8] sm:$0xff] }
0x23d7   :  { %vm2963_vm6 = vmor %vm2961_vm5, %vm2962_vm4 }
0x23d8   :  { %v2958_v19 = vsub.f32 1.0, %v2957_v18  ;;  %v5013_v18 = vld [vmem:[#allocation19] ss:$0 sm:$0xff] }
0x23da   :  { %v2959_v33 = vmul.f32 %v5207_v17, %v2958_v19 }
0x23dc   :  { %v2960_v21 = vadd.f32 %v5207_v17, %v2959_v33 }
0x23de   :  { %v2964_v38 = vsel %vm2963_vm6, %v5207_v17, %v2960_v21  ;;  %v6967_v17 = vld [vmem:[#allocation25] sm:$0xff] }
0x23df   :  { %v2969_v14 = vsel %vm2966_vm7, %v2968_v9, %v2964_v38  ;;  %v3165_v38 = vld [vmem:[#allocation24 + $0x20] sm:$0xff]  ;;  %v3164_v9 = vld [vmem:[#allocation24 + $0x18] sm:$0xff] }
0x23e0   :  { %v2983_v7 = vsub.f32 1.0, %v2969_v14  ;;  %v2989_v59 = vmul.f32 %v2969_v14, %v6925_v51 }
0x23ea   :  { %v2907_v15 = vpop.permute.xlu1 %2906 }
0x23eb   :  { %v2909_v39 = vmul.f32 %v2907_v15, %v2902_v37  ;;  %v3098_v15 = vld [vmem:[#allocation21 + $0x8] sm:$0xff]  ;;  %v3097_v37 = vld [vmem:[#allocation21] sm:$0xff] }
0x23ec   :  { %3122 = vmatpush.msra.mxu1 %v3098_v15 }
0x23ed   :  { %2911 = vrot.lane.b32.xlu2 %v2909_v39, %s5947_s29  ;;  %v6957_v39 = vld [vmem:[#allocation25 + $0x18] sm:$0xff] }
0x23ee   :  { %3123 = vmatpush.msra.mxu1 %v3097_v37  ;;  %3273 = vmatpush.msrb.mxu0 %v6957_v39 }
0x23f0   :  { %3343 = vmatpush.msrb.mxu1 %v6957_v39  ;;  %3274 = vmatpush.msrb.mxu0 %v6959_v46 }
0x23f2   :  { %3344 = vmatpush.msrb.mxu1 %v6959_v46  ;;  %3275 = vmatpush.msrb.mxu0 %v6962_v3 }
0x23f4   :  { %3345 = vmatpush.msrb.mxu1 %v6962_v3  ;;  %3276 = vmatpush.msrb.mxu0 %v6967_v17 }
0x23f6   :  { %3346 = vmatpush.msrb.mxu1 %v6967_v17 }
0x2436   :  { %v2974_v25 = vpop.permute.xlu0 %2973 }
0x2437   :  { %v2976_v32 = vmul.f32 %v2974_v25, %v2969_v14  ;;  %v3163_v25 = vld [vmem:[#allocation24 + $0x10] sm:$0xff]  ;;  %v3162_v14 = vld [vmem:[#allocation24 + $0x8] sm:$0xff] }
0x2439   :  { %2978 = vrot.lane.b32.xlu1 %v2976_v32, %s5947_s29  ;;  %v3161_v32 = vld [vmem:[#allocation24] sm:$0xff] }
0x2447   :  { %v2912_v34 = vpop.permute.xlu2 %2911 }
0x2448   :  { %v2914_v35 = vadd.f32 %v2912_v34, %v1836_v60  ;;  %v3128_v34 = vld [vmem:[%s7426_s18] sm:$0xff] }
0x2449   :  { %v3130_v42 = vrot.slane %v3128_v34, 1  ;;  %v3131_v62 = vrot.slane %v3128_v34, 2  ;;  %v3132_v48 = vrot.slane %v3128_v34, 3 }
0x244a   :  { %5208 = vtanh.f32 %v2914_v35 }
0x244b   :  { %v3140_v12 = vperm.slane %v3132_v48, 0  ;;  %v7010_v48 = vld [vmem:[#allocation31 + $0x10] sm:$0xff] }
0x2450   :  { %v5209_v43 = vpop.eup %5208 }
0x2451   :  { %2918 = vrot.lane.b32.xlu2 %v5209_v43, %s5948_s28 }
0x2459   :  { %3301 = vrot.lane.b32.xlu2 %v5014_v4, %s5947_s29 }
0x24ab   :  { %v2979_v50 = vpop.permute.xlu1 %2978  ;;  %v2919_v53 = vpop.permute.xlu2 %2918 }
0x24ac   :  { %v2981_v28 = vadd.f32 %v2979_v50, %v6747_v0  ;;  %v2921_v27 = vmul.f32 %v2919_v53, %v2916_v49  ;;  %v3036_v0 = vld [vmem:[#allocation15 + $0x10] sm:$0xff]  ;;  %v5015_v49 = vld [vmem:[#allocation22] ss:$0 sm:$0xff]  ;;  %v3133_v50 = vrot.slane %v3128_v34, 4  ;;  %v3134_v53 = vrot.slane %v3128_v34, 5 }
0x24ad   :  { %3058 = vmatpush.msra.mxu3 %v3036_v0 }
0x24ae   :  { %5210 = vtanh.f32 %v2981_v28  ;;  %v2923_v55 = vadd.f32 %v2922_v54, %v2921_v27  ;;  %v3135_v28 = vrot.slane %v3128_v34, 6  ;;  %v3137_v54 = vperm.slane %v3128_v34, 0 }
0x24af   :  { %3059 = vmatpush.msra.mxu3 %v3035_v10  ;;  %v3138_v27 = vperm.slane %v3130_v42, 0  ;;  %v3141_v63 = vperm.slane %v3133_v50, 0  ;;  %v3142_v61 = vperm.slane %v3134_v53, 0  ;;  %v7004_v42 = vld [vmem:[#allocation31 + $0x18] sm:$0xff]  ;;  %v7014_v50 = vld [vmem:[#allocation31 + $0x8] sm:$0xff]  ;;  %v7019_v53 = vld [vmem:[#allocation30] sm:$0xff] }
0x24b0   :  { %2992 = vst [vmem:[#allocation1] ss:$4 sm:$0xff] %v2923_v55  ;;  %v3139_v55 = vperm.slane %v3131_v62, 0  ;;  %v3143_v0 = vperm.slane %v3135_v28, 0  ;;  %v7006_v62 = vld [vmem:[#allocation30 + $0x10] sm:$0xff]  ;;  %v7021_v28 = vld [vmem:[#allocation31] sm:$0xff] }
0x24b1   :  { %3060 = vmatpush.msra.mxu3 %v3034_v36 }
0x24b3   :  { %3210 = vmatpush.msrb.mxu3 %v3168_v16  ;;  %v6981_v35 = vpop.permute.xlu2 %3301 }
0x24b4   :  { %v5211_v57 = vpop.eup %5210 }
0x24b5   :  { %2985 = vrot.lane.b32.xlu0 %v5211_v57, %s5948_s28  ;;  %3211 = vmatpush.msrb.mxu3 %v3167_v23 }
0x24b7   :  { %v2993_v52 = vld.sshfl [vmem:[#allocation1] sm:$0xff pattern:$0x73625140]  ;;  %3212 = vmatpush.msrb.mxu3 %v3166_v22 }
0x24b8   :  { %2994 = vrot.lane.b32.xlu1 %v2993_v52, %s5948_s28  ;;  %v3136_v52 = vrot.slane %v3128_v34, 7 }
0x24b9   :  { %3213 = vmatpush.msrb.mxu3 %v3165_v38 }
0x24bb   :  { %3214 = vmatpush.msrb.mxu3 %v3164_v9 }
0x24bd   :  { %3215 = vmatpush.msrb.mxu3 %v3163_v25 }
0x24bf   :  { %3216 = vmatpush.msrb.mxu3 %v3162_v14 }
0x24c1   :  { %3217 = vmatpush.msrb.mxu3 %v3161_v32 }
0x2527   :  { %v2986_v47 = vpop.permute.xlu0 %2985 }
0x2528   :  { %v2988_v58 = vmul.f32 %v2986_v47, %v2983_v7 }
0x252a   :  { %v2990_v26 = vadd.f32 %v2989_v59, %v2988_v58  ;;  %v2995_v60 = vpop.permute.xlu1 %2994  ;;  %v3144_v59 = vperm.slane %v3136_v52, 0 }
0x252c   :  { %v2997_v5 = vsel %vm646_vm9, %v2995_v60, %v2990_v26 }
0x252d   :  { %4882 = vmatmul.msk.f32.vlgmr.msra.gmra.mxu2 %vm1801_vm10, %v2997_v5 }
0x25b0   :  { %v3030_v31 = vpop.f32.mrf.mxu2 }
0x25b1   :  { %v3031_v51 = vadd.f32 %v5011_v1, %v3030_v31 }
0x25b3   :  { %v3033_v6 = vmax.f32 %v3031_v51, 0.0 }
0x25b5   :  { %4883 = vmatmul.msk.f32.vlgmr.msra.gmra.mxu3 %vm646_vm9, %v3033_v6 }
0x25b6   :  { %3748 = vmatpush.msra.mxu3 %v7004_v42 }
0x25b8   :  { %3749 = vmatpush.msra.mxu3 %v7010_v48 }
0x25ba   :  { %3750 = vmatpush.msra.mxu3 %v7014_v50 }
0x25bc   :  { %3751 = vmatpush.msra.mxu3 %v7021_v28 }
0x2638   :  { %v3062_v2 = vpop.f32.mrf.mxu3 }
0x2639   :  { %v3063_v8 = vadd.f32 %v5012_v41, %v3062_v2 }
0x263b   :  { %4884 = vmatmul.msk.f32.vlgmr.msra.gmra.mxu0 %vm646_vm9, %v3063_v8 }
0x263c   :  { %3429 = vmatpush.msra.mxu0 %v7004_v42 }
0x263e   :  { %3430 = vmatpush.msra.mxu0 %v7010_v48 }
0x2640   :  { %3431 = vmatpush.msra.mxu0 %v7014_v50 }
0x2642   :  { %3432 = vmatpush.msra.mxu0 %v7021_v28 }
0x2643   :  { %3277 = vmatmul.f32.vlgmr.msrb.gmra.mxu0 %v5946_v20 }
0x2644   :  { %3590 = vmatpush.msrb.mxu0 %v7004_v42 }
0x2646   :  { %3591 = vmatpush.msrb.mxu0 %v7010_v48 }
0x2648   :  { %3592 = vmatpush.msrb.mxu0 %v7014_v50 }
0x264a   :  { %3593 = vmatpush.msrb.mxu0 %v7021_v28 }
0x264b   :  { %3433 = vmatmul.f32.vlgmr.msra.gmra.mxu0 %v5946_v20 }
0x264c   :  { %3815 = vmatpush.msra.mxu0 %v6957_v39 }
0x264e   :  { %3816 = vmatpush.msra.mxu0 %v6959_v46 }
0x2650   :  { %3817 = vmatpush.msra.mxu0 %v6962_v3 }
0x2652   :  { %3818 = vmatpush.msra.mxu0 %v6967_v17 }
0x26b8   :  { %v3093_v19 = vpop.f32.mrf.mxu0 }
0x26b9   :  { %v3094_v33 = vadd.f32 %v5013_v18, %v3093_v19 }
0x26bb   :  { %v3096_v21 = vmax.f32 %v3094_v33, 0.0 }
0x26bd   :  { %4885 = vmatmul.msk.f32.vlgmr.msra.gmra.mxu1 %vm646_vm9, %v3096_v21 }
0x26be   :  { %3499 = vmatpush.msra.mxu1 %v6957_v39 }
0x26c0   :  { %3500 = vmatpush.msra.mxu1 %v6959_v46  ;;  %v3278_v43 = vpop.f32.mrf.mxu0 }
0x26c1   :  { %v3304_v44 = vadd.f32 %v6981_v35, %v3278_v43 }
0x26c2   :  { %3501 = vmatpush.msra.mxu1 %v6962_v3 }
0x26c3   :  { %3306 = vrot.lane.b32.xlu0 %v3304_v44, %s5947_s29  ;;  %v7002_v44 = vld [vmem:[#allocation30 + $0x18] sm:$0xff] }
0x26c4   :  { %3502 = vmatpush.msra.mxu1 %v6967_v17  ;;  %3409 = vmatpush.msrb.mxu2 %v7002_v44 }
0x26c6   :  { %3410 = vmatpush.msrb.mxu2 %v7006_v62 }
0x26c8   :  { %v3434_v52 = vpop.f32.mrf.mxu0 }
0x2735   :  { %v3307_v4 = vpop.permute.xlu0 %3306 }
0x273a   :  { %v3125_v57 = vpop.f32.mrf.mxu1 }
0x273b   :  { %v3126_v13 = vadd.f32 %v5015_v49, %v3125_v57  ;;  %v7012_v49 = vld [vmem:[#allocation30 + $0x8] sm:$0xff] }
0x273c   :  { %3411 = vmatpush.msrb.mxu2 %v7012_v49 }
0x273d   :  { %v3153_v30 = vadd.f32 %v3137_v54, %v3126_v13  ;;  %v3154_v7 = vadd.f32 %v3138_v27, %v3126_v13  ;;  %v3155_v47 = vadd.f32 %v3139_v55, %v3126_v13  ;;  %v3156_v58 = vadd.f32 %v3140_v12, %v3126_v13  ;;  %v5017_v54 = vld [vmem:[#allocation34] ss:$0 sm:$0xff] }
0x273e   :  { %v3157_v26 = vadd.f32 %v3141_v63, %v3126_v13  ;;  %v3158_v60 = vadd.f32 %v3142_v61, %v3126_v13  ;;  %v3159_v5 = vadd.f32 %v3143_v0, %v3126_v13  ;;  %v3160_v10 = vadd.f32 %v3144_v59, %v3126_v13  ;;  %3412 = vmatpush.msrb.mxu2 %v7019_v53  ;;  %v7065_v0 = vld [vmem:[#allocation33] ss:$0 sm:$0xff] }
0x273f   :  { %3181 = vst [vmem:[#allocation1] ss:$4 sm:$0xff] %v3153_v30 }
0x2740   :  { %3183 = vst [vmem:[#allocation1 + $0x1] ss:$4 sm:$0xff] %v3154_v7  ;;  %3565 = vmatpush.msra.mxu2 %v7002_v44 }
0x2741   :  { %3185 = vst [vmem:[#allocation1 + $0x2] ss:$4 sm:$0xff] %v3155_v47 }
0x2742   :  { %3187 = vst [vmem:[#allocation1 + $0x3] ss:$4 sm:$0xff] %v3156_v58  ;;  %3566 = vmatpush.msra.mxu2 %v7006_v62 }
0x2743   :  { %3189 = vst [vmem:[#allocation1 + $0x20] ss:$4 sm:$0xff] %v3157_v26 }
0x2744   :  { %3191 = vst [vmem:[#allocation1 + $0x21] ss:$4 sm:$0xff] %v3158_v60  ;;  %3567 = vmatpush.msra.mxu2 %v7012_v49 }
0x2745   :  { %3193 = vst [vmem:[#allocation1 + $0x22] ss:$4 sm:$0xff] %v3159_v5 }
0x2746   :  { %3195 = vst [vmem:[#allocation1 + $0x23] ss:$4 sm:$0xff] %v3160_v10  ;;  %3568 = vmatpush.msra.mxu2 %v7019_v53 }
0x2749   :  { %v3196_v36 = vld.sshfl [vmem:[#allocation1] sm:$0xff pattern:$0x73625140] }
0x274a   :  { %4886 = vmatmul.msk.f32.vlgmr.msrb.gmra.mxu3 %vm1801_vm10, %v3196_v36 }
0x274b   :  { %3973 = vmatpush.msrb.mxu3 %v6957_v39 }
0x274d   :  { %v3197_v56 = vld.sshfl [vmem:[#allocation1 + $0x20] sm:$0xff pattern:$0x73625140]  ;;  %3974 = vmatpush.msrb.mxu3 %v6959_v46 }
0x274f   :  { %3975 = vmatpush.msrb.mxu3 %v6962_v3 }
0x2751   :  { %3976 = vmatpush.msrb.mxu3 %v6967_v17 }
0x2752   :  { %4887 = vmatmul.msk.f32.gmra.mxu3 %vm1801_vm10, %v3197_v56 }
0x27cd   :  { %v3219_v11 = vpop.f32.mrf.mxu3 }
0x27ce   :  { %v6990_v1 = vadd.f32 %v6987_v29, %v3219_v11 }
0x27d0   :  { %v3281_v31 = vadd.f32 %v3278_v43, %v6990_v1  ;;  %v3227_v63 = vrot.slane %v6990_v1, 2 }
0x27d2   :  { %v4888_v51 = vmul.f32 -1.442695, %v3281_v31 }
0x27d4   :  { %5212 = vpow2.f32 %v4888_v51 }
0x27da   :  { %v5213_v6 = vpop.eup %5212 }
0x27db   :  { %v3285_v45 = vadd.f32 1.0, %v5213_v6 }
0x27dd   :  { %5214 = vrcp.f32 %v3285_v45  ;;  %v3297_v2 = vand.u32 2147483648, %v3285_v45  ;;  %v3295_v15 = vand.u32 2147483647, %v3285_v45  ;;  %vm3291_vm11 = vweird.f32 %v3285_v45 }
0x27df   :  { %v3298_v16 = vor.u32 1.1754944e-38, %v3297_v2  ;;  %vm3296_vm13 = vcmp.eq.f32.partialorder %v3295_v15, 8.507059e+37 }
0x27e3   :  { %v5215_v24 = vpop.eup %5214 }
0x27e4   :  { %v3287_v40 = vmul.f32 %v5215_v24, %v3285_v45  ;;  %vm3292_vm8 = vweird.f32 %v5215_v24 }
0x27e5   :  { %vm3293_vm12 = vmor %vm3291_vm11, %vm3292_vm8 }
0x27e6   :  { %v3288_v41 = vsub.f32 1.0, %v3287_v40 }
0x27e8   :  { %v3289_v8 = vmul.f32 %v5215_v24, %v3288_v41 }
0x27ea   :  { %v3290_v37 = vadd.f32 %v5215_v24, %v3289_v8 }
0x27ec   :  { %v3294_v18 = vsel %vm3293_vm12, %v5215_v24, %v3290_v37 }
0x27ed   :  { %v3299_v19 = vsel %vm3296_vm13, %v3298_v16, %v3294_v18 }
0x27ee   :  { %v3309_v33 = vmul.f32 %v3307_v4, %v3299_v19  ;;  %v3316_v38 = vsub.f32 1.0, %v3299_v19  ;;  %v3322_v25 = vmul.f32 0.0, %v3299_v19 }
0x27f0   :  { %3311 = vrot.lane.b32.xlu1 %v3309_v33, %s5947_s29 }
0x2862   :  { %v3312_v21 = vpop.permute.xlu1 %3311 }
0x2863   :  { %v3314_v23 = vadd.f32 %v3312_v21, %v6990_v1 }
0x2865   :  { %5216 = vtanh.f32 %v3314_v23 }
0x286b   :  { %v5217_v22 = vpop.eup %5216 }
0x286c   :  { %3318 = vrot.lane.b32.xlu2 %v5217_v22, %s5948_s28 }
0x28c6   :  { %v3319_v9 = vpop.permute.xlu2 %3318 }
0x28c7   :  { %v3321_v14 = vmul.f32 %v3319_v9, %v3316_v38 }
0x28c9   :  { %v6996_v32 = vadd.f32 %v3322_v25, %v3321_v14 }
0x28cb   :  { %3325 = vst [vmem:[#allocation1] ss:$4 sm:$0xff] %v6996_v32 }
0x28d2   :  { %v3326_v34 = vld.sshfl [vmem:[#allocation1] sm:$0xff pattern:$0x73625140] }
0x28d3   :  { %3327 = vrot.lane.b32.xlu0 %v3326_v34, %s5948_s28  ;;  %3391 = vst [vmem:[#allocation1] ss:$4 sm:$0xff] %v6996_v32 }
0x28da   :  { %v3392_v43 = vld.sshfl [vmem:[#allocation1] sm:$0xff pattern:$0x73625140] }
0x28db   :  { %3393 = vrot.lane.b32.xlu1 %v3392_v43, %s5948_s28  ;;  %3457 = vrot.lane.b32.xlu0 %v5017_v54, %s5947_s29 }
0x2945   :  { %v3328_v20 = vpop.permute.xlu0 %3327 }
0x2946   :  { %4889 = vmatmul.msk.f32.vlgmr.msrb.gmra.mxu1 %vm646_vm9, %v3328_v20 }
0x2947   :  { %3657 = vmatpush.msrb.mxu1 %v6957_v39 }
0x2949   :  { %3658 = vmatpush.msrb.mxu1 %v6959_v46 }
0x294b   :  { %3659 = vmatpush.msrb.mxu1 %v6962_v3 }
0x294d   :  { %v3394_v27 = vpop.permute.xlu1 %3393  ;;  %3660 = vmatpush.msrb.mxu1 %v6967_v17  ;;  %v7060_v12 = vpop.permute.xlu0 %3457 }
0x294e   :  { %4891 = vmatmul.msk.f32.vlgmr.msrb.gmra.mxu2 %vm646_vm9, %v3394_v27  ;;  %v3460_v13 = vadd.f32 %v7060_v12, %v3434_v52 }
0x294f   :  { %3723 = vmatpush.msrb.mxu2 %v7002_v44 }
0x2951   :  { %3724 = vmatpush.msrb.mxu2 %v7006_v62 }
0x2953   :  { %3725 = vmatpush.msrb.mxu2 %v7012_v49 }
0x2955   :  { %3726 = vmatpush.msrb.mxu2 %v7019_v53 }
0x29c3   :  { %v3348_v55 = vpop.f32.mrf.mxu1 }
0x29c4   :  { %v3371_v57 = vadd.f32 %v3348_v55, %v6981_v35  ;;  %v3351_v61 = vadd.f32 %v3348_v55, %v3227_v63 }
0x29c6   :  { %3373 = vrot.lane.b32.xlu2 %v3371_v57, %s5947_s29  ;;  %v4890_v7 = vmul.f32 -1.442695, %v3351_v61 }
0x29c8   :  { %5218 = vpow2.f32 %v4890_v7 }
0x29ce   :  { %3462 = vrot.lane.b32.xlu2 %v3460_v13, %s5947_s29  ;;  %v5219_v26 = vpop.eup %5218 }
0x29cf   :  { %v3355_v60 = vadd.f32 1.0, %v5219_v26 }
0x29d1   :  { %v3414_v30 = vpop.f32.mrf.mxu2  ;;  %v3367_v40 = vand.u32 2147483648, %v3355_v60  ;;  %vm3361_vm15 = vweird.f32 %v3355_v60  ;;  %v3365_v41 = vand.u32 2147483647, %v3355_v60 }
0x29d2   :  { %v3415_v47 = vadd.f32 %v7065_v0, %v3414_v30 }
0x29d3   :  { %v3368_v15 = vor.u32 1.1754944e-38, %v3367_v40  ;;  %vm3366_vm2 = vcmp.eq.f32.partialorder %v3365_v41, 8.507059e+37  ;;  %v3228_v40 = vrot.slane %v6990_v1, 4 }
0x29d4   :  { %v3437_v59 = vadd.f32 %v3434_v52, %v3415_v47 }
0x29d6   :  { %v4892_v58 = vmul.f32 -1.442695, %v3437_v59 }
0x29d8   :  { %5220 = vpow2.f32 %v4892_v58 }
0x29d9   :  { %5222 = vrcp.f32 %v3355_v60 }
0x29de   :  { %v5221_v5 = vpop.eup %5220 }
0x29df   :  { %v3441_v10 = vadd.f32 1.0, %v5221_v5  ;;  %v5223_v36 = vpop.eup %5222 }
0x29e0   :  { %v3357_v56 = vmul.f32 %v5223_v36, %v3355_v60  ;;  %vm3362_vm14 = vweird.f32 %v5223_v36 }
0x29e1   :  { %5224 = vrcp.f32 %v3441_v10  ;;  %vm3363_vm1 = vmor %vm3361_vm15, %vm3362_vm14  ;;  %v3453_v19 = vand.u32 2147483648, %v3441_v10  ;;  %vm3447_vm4 = vweird.f32 %v3441_v10  ;;  %v3451_v33 = vand.u32 2147483647, %v3441_v10 }
0x29e2   :  { %v3358_v11 = vsub.f32 1.0, %v3357_v56 }
0x29e3   :  { %v3454_v23 = vor.u32 1.1754944e-38, %v3453_v19  ;;  %vm3452_vm6 = vcmp.eq.f32.partialorder %v3451_v33, 8.507059e+37 }
0x29e4   :  { %v3359_v51 = vmul.f32 %v5223_v36, %v3358_v11 }
0x29e6   :  { %v3360_v45 = vadd.f32 %v5223_v36, %v3359_v51 }
0x29e7   :  { %v5225_v31 = vpop.eup %5224 }
0x29e8   :  { %v3443_v6 = vmul.f32 %v5225_v31, %v3441_v10  ;;  %v3364_v2 = vsel %vm3363_vm1, %v5223_v36, %v3360_v45  ;;  %vm3448_vm3 = vweird.f32 %v5225_v31 }
0x29e9   :  { %v3369_v4 = vsel %vm3366_vm2, %v3368_v15, %v3364_v2  ;;  %vm3449_vm5 = vmor %vm3447_vm4, %vm3448_vm3 }
0x29ea   :  { %v3444_v24 = vsub.f32 1.0, %v3443_v6  ;;  %v3389_v30 = vmul.f32 %v3369_v4, %v6996_v32 }
0x29ec   :  { %v3445_v8 = vmul.f32 %v5225_v31, %v3444_v24 }
0x29ee   :  { %v3446_v18 = vadd.f32 %v5225_v31, %v3445_v8 }
0x29f0   :  { %v3450_v21 = vsel %vm3449_vm5, %v5225_v31, %v3446_v18 }
0x29f1   :  { %v3455_v38 = vsel %vm3452_vm6, %v3454_v23, %v3450_v21 }
0x29f2   :  { %v3472_v27 = vsub.f32 1.0, %v3455_v38  ;;  %v3478_v57 = vmul.f32 0.0, %v3455_v38 }
0x2a20   :  { %v3374_v37 = vpop.permute.xlu2 %3373 }
0x2a21   :  { %v3376_v16 = vmul.f32 %v3374_v37, %v3369_v4 }
0x2a23   :  { %3378 = vrot.lane.b32.xlu1 %v3376_v16, %s5947_s29 }
0x2a28   :  { %v3463_v22 = vpop.permute.xlu2 %3462 }
0x2a29   :  { %v3465_v9 = vmul.f32 %v3463_v22, %v3455_v38 }
0x2a2b   :  { %3467 = vrot.lane.b32.xlu0 %v3465_v9, %s5947_s29 }
0x2a95   :  { %v3379_v25 = vpop.permute.xlu1 %3378 }
0x2a96   :  { %v3381_v14 = vadd.f32 %v3379_v25, %v3227_v63  ;;  %v3383_v63 = vsub.f32 1.0, %v3369_v4 }
0x2a98   :  { %5226 = vtanh.f32 %v3381_v14 }
0x2a9d   :  { %v3468_v34 = vpop.permute.xlu0 %3467 }
0x2a9e   :  { %v5227_v43 = vpop.eup %5226  ;;  %v3470_v54 = vadd.f32 %v3468_v34, %v3415_v47 }
0x2a9f   :  { %3385 = vrot.lane.b32.xlu1 %v5227_v43, %s5948_s28 }
0x2aa0   :  { %5228 = vtanh.f32 %v3470_v54 }
0x2aa6   :  { %v5229_v20 = vpop.eup %5228 }
0x2aa7   :  { %3474 = vrot.lane.b32.xlu2 %v5229_v20, %s5948_s28 }
0x2b01   :  { %v3475_v55 = vpop.permute.xlu2 %3474 }
0x2b02   :  { %v3477_v52 = vmul.f32 %v3475_v55, %v3472_v27 }
0x2b04   :  { %v7072_v13 = vadd.f32 %v3478_v57, %v3477_v52 }
0x2b06   :  { %3574 = vrot.lane.b32.xlu1 %v7072_v13, %s5948_s28 }
0x2b11   :  { %v3386_v61 = vpop.permute.xlu1 %3385 }
0x2b12   :  { %v3388_v7 = vmul.f32 %v3386_v61, %v3383_v63 }
0x2b14   :  { %v7077_v47 = vadd.f32 %v3389_v30, %v3388_v7 }
0x2b16   :  { %3481 = vst [vmem:[#allocation1] ss:$4 sm:$0xff] %v7077_v47 }
0x2b1d   :  { %v3482_v59 = vld.sshfl [vmem:[#allocation1] sm:$0xff pattern:$0x73625140] }
0x2b1e   :  { %3483 = vrot.lane.b32.xlu0 %v3482_v59, %s5948_s28  ;;  %3547 = vst [vmem:[#allocation1] ss:$4 sm:$0xff] %v7077_v47 }
0x2b25   :  { %v3548_v58 = vld.sshfl [vmem:[#allocation1] sm:$0xff pattern:$0x73625140] }
0x2b26   :  { %3549 = vrot.lane.b32.xlu2 %v3548_v58, %s5948_s28 }
0x2b78   :  { %v7083_v26 = vpop.permute.xlu1 %3574 }
0x2b79   :  { %4896 = vmatmul.msk.f32.vlgmr.msrb.gmra.mxu0 %vm646_vm9, %v7083_v26 }
0x2b7a   :  { %4039 = vmatpush.msrb.mxu0 %v7002_v44 }
0x2b7c   :  { %4040 = vmatpush.msrb.mxu0 %v7006_v62 }
0x2b7e   :  { %4041 = vmatpush.msrb.mxu0 %v7012_v49 }
0x2b80   :  { %v3550_v32 = vpop.permute.xlu2 %3549  ;;  %4042 = vmatpush.msrb.mxu0 %v7019_v53 }
0x2b81   :  { %4895 = vmatmul.msk.f32.vlgmr.msra.gmra.mxu2 %vm646_vm9, %v3550_v32 }
0x2b82   :  { %3906 = vmatpush.msra.mxu2 %v7004_v42 }
0x2b84   :  { %3907 = vmatpush.msra.mxu2 %v7010_v48 }
0x2b86   :  { %3908 = vmatpush.msra.mxu2 %v7014_v50 }
0x2b88   :  { %3909 = vmatpush.msra.mxu2 %v7021_v28 }
0x2b90   :  { %v3484_v60 = vpop.permute.xlu0 %3483 }
0x2b91   :  { %4893 = vmatmul.msk.f32.vlgmr.msra.gmra.mxu1 %vm646_vm9, %v3484_v60 }
0x2b92   :  { %3881 = vmatpush.msra.mxu1 %v7002_v44 }
0x2b94   :  { %3882 = vmatpush.msra.mxu1 %v7006_v62 }
0x2b96   :  { %3883 = vmatpush.msra.mxu1 %v7012_v49 }
0x2b98   :  { %3884 = vmatpush.msra.mxu1 %v7019_v53 }
0x2bf6   :  { %v3595_v5 = vpop.f32.mrf.mxu0 }
0x2bf7   :  { %v3618_v10 = vadd.f32 %v3595_v5, %v7060_v12 }
0x2bf9   :  { %3620 = vrot.lane.b32.xlu1 %v3618_v10, %s5947_s29 }
0x2c04   :  { %v3570_v11 = vpop.f32.mrf.mxu2 }
0x2c05   :  { %v3571_v31 = vadd.f32 %v7065_v0, %v3570_v11 }
0x2c07   :  { %v3598_v51 = vadd.f32 %v3595_v5, %v3571_v31 }
0x2c09   :  { %v4897_v6 = vmul.f32 -1.442695, %v3598_v51 }
0x2c0b   :  { %5230 = vpow2.f32 %v4897_v6 }
0x2c0e   :  { %v3504_v36 = vpop.f32.mrf.mxu1 }
0x2c0f   :  { %v3527_v56 = vadd.f32 %v3504_v36, %v6981_v35  ;;  %v3507_v41 = vadd.f32 %v3504_v36, %v3228_v40 }
0x2c11   :  { %3529 = vrot.lane.b32.xlu0 %v3527_v56, %s5947_s29  ;;  %v5231_v45 = vpop.eup %5230  ;;  %v4894_v8 = vmul.f32 -1.442695, %v3507_v41 }
0x2c12   :  { %v3602_v24 = vadd.f32 1.0, %v5231_v45 }
0x2c14   :  { %5232 = vrcp.f32 %v3602_v24  ;;  %v3614_v33 = vand.u32 2147483648, %v3602_v24  ;;  %vm3608_vm8 = vweird.f32 %v3602_v24  ;;  %v3612_v21 = vand.u32 2147483647, %v3602_v24 }
0x2c15   :  { %5234 = vpow2.f32 %v4894_v8 }
0x2c16   :  { %v3615_v22 = vor.u32 1.1754944e-38, %v3614_v33  ;;  %vm3613_vm12 = vcmp.eq.f32.partialorder %v3612_v21, 8.507059e+37 }
0x2c1a   :  { %v5233_v2 = vpop.eup %5232 }
0x2c1b   :  { %v3604_v15 = vmul.f32 %v5233_v2, %v3602_v24  ;;  %v5235_v4 = vpop.eup %5234  ;;  %vm3609_vm7 = vweird.f32 %v5233_v2 }
0x2c1c   :  { %v3511_v18 = vadd.f32 1.0, %v5235_v4  ;;  %vm3610_vm11 = vmor %vm3608_vm8, %vm3609_vm7 }
0x2c1d   :  { %v3605_v37 = vsub.f32 1.0, %v3604_v15  ;;  %v7141_v15 = vpop.f32.mrf.mxu3 }
0x2c1e   :  { %5236 = vrcp.f32 %v3511_v18  ;;  %v3523_v27 = vand.u32 2147483648, %v3511_v18  ;;  %vm3517_vm14 = vweird.f32 %v3511_v18  ;;  %v3521_v55 = vand.u32 2147483647, %v3511_v18 }
0x2c1f   :  { %v3606_v16 = vmul.f32 %v5233_v2, %v3605_v37 }
0x2c20   :  { %v3524_v52 = vor.u32 1.1754944e-38, %v3523_v27  ;;  %vm3522_vm1 = vcmp.eq.f32.partialorder %v3521_v55, 8.507059e+37 }
0x2c21   :  { %v3607_v19 = vadd.f32 %v5233_v2, %v3606_v16 }
0x2c23   :  { %v3611_v23 = vsel %vm3610_vm11, %v5233_v2, %v3607_v19 }
0x2c24   :  { %v3616_v9 = vsel %vm3613_vm12, %v3615_v22, %v3611_v23  ;;  %v5237_v14 = vpop.eup %5236 }
0x2c25   :  { %v3513_v34 = vmul.f32 %v5237_v14, %v3511_v18  ;;  %vm3518_vm13 = vweird.f32 %v5237_v14  ;;  %v3630_v10 = vsub.f32 1.0, %v3616_v9  ;;  %v3636_v56 = vmul.f32 %v3616_v9, %v7072_v13 }
0x2c26   :  { %vm3519_vm15 = vmor %vm3517_vm14, %vm3518_vm13 }
0x2c27   :  { %v3514_v43 = vsub.f32 1.0, %v3513_v34 }
0x2c29   :  { %v3515_v54 = vmul.f32 %v5237_v14, %v3514_v43 }
0x2c2b   :  { %v3516_v20 = vadd.f32 %v5237_v14, %v3515_v54 }
0x2c2d   :  { %v3520_v57 = vsel %vm3519_vm15, %v5237_v14, %v3516_v20 }
0x2c2e   :  { %v3525_v61 = vsel %vm3522_vm1, %v3524_v52, %v3520_v57 }
0x2c2f   :  { %v3539_v6 = vsub.f32 1.0, %v3525_v61  ;;  %v3545_v45 = vmul.f32 %v3525_v61, %v7077_v47 }
0x2c6b   :  { %v3621_v38 = vpop.permute.xlu1 %3620 }
0x2c6c   :  { %v3623_v25 = vmul.f32 %v3621_v38, %v3616_v9  ;;  %v3229_v9 = vrot.slane %v6990_v1, 6 }
0x2c6e   :  { %3625 = vrot.lane.b32.xlu0 %v3623_v25, %s5947_s29 }
0x2c83   :  { %v3530_v63 = vpop.permute.xlu0 %3529 }
0x2c84   :  { %v3532_v30 = vmul.f32 %v3530_v63, %v3525_v61 }
0x2c86   :  { %3534 = vrot.lane.b32.xlu2 %v3532_v30, %s5947_s29 }
0x2ce0   :  { %v3535_v7 = vpop.permute.xlu2 %3534  ;;  %v3626_v59 = vpop.permute.xlu0 %3625 }
0x2ce1   :  { %v3537_v58 = vadd.f32 %v3535_v7, %v3228_v40  ;;  %v3628_v32 = vadd.f32 %v3626_v59, %v3571_v31 }
0x2ce3   :  { %5238 = vtanh.f32 %v3537_v58 }
0x2ce4   :  { %5240 = vtanh.f32 %v3628_v32 }
0x2ce9   :  { %v5239_v60 = vpop.eup %5238 }
0x2cea   :  { %v5241_v5 = vpop.eup %5240  ;;  %3541 = vrot.lane.b32.xlu1 %v5239_v60, %s5948_s28 }
0x2ceb   :  { %3632 = vrot.lane.b32.xlu2 %v5241_v5, %s5948_s28 }
0x2d45   :  { %v3633_v36 = vpop.permute.xlu2 %3632 }
0x2d46   :  { %v3635_v11 = vmul.f32 %v3633_v36, %v3630_v10 }
0x2d48   :  { %v7112_v51 = vadd.f32 %v3636_v56, %v3635_v11 }
0x2d4a   :  { %3732 = vrot.lane.b32.xlu1 %v7112_v51, %s5948_s28 }
0x2d5c   :  { %v3542_v31 = vpop.permute.xlu1 %3541 }
0x2d5d   :  { %v3544_v24 = vmul.f32 %v3542_v31, %v3539_v6 }
0x2d5f   :  { %v7117_v40 = vadd.f32 %v3545_v45, %v3544_v24 }
0x2d61   :  { %3639 = vst [vmem:[#allocation1] ss:$4 sm:$0xff] %v7117_v40 }
0x2d68   :  { %v3640_v41 = vld.sshfl [vmem:[#allocation1] sm:$0xff pattern:$0x73625140] }
0x2d69   :  { %3641 = vrot.lane.b32.xlu0 %v3640_v41, %s5948_s28  ;;  %3705 = vst [vmem:[#allocation1] ss:$4 sm:$0xff] %v7117_v40 }
0x2d70   :  { %v3706_v13 = vld.sshfl [vmem:[#allocation1] sm:$0xff pattern:$0x73625140] }
0x2d71   :  { %3707 = vrot.lane.b32.xlu2 %v3706_v13, %s5948_s28 }
0x2dbc   :  { %v7123_v2 = vpop.permute.xlu1 %3732 }
0x2dbd   :  { %4901 = vmatmul.msk.f32.vlgmr.msra.gmra.mxu3 %vm646_vm9, %v7123_v2 }
0x2dbe   :  { %4197 = vmatpush.msra.mxu3 %v7002_v44 }
0x2dc0   :  { %4198 = vmatpush.msra.mxu3 %v7006_v62 }
0x2dc2   :  { %4199 = vmatpush.msra.mxu3 %v7012_v49 }
0x2dc4   :  { %4200 = vmatpush.msra.mxu3 %v7019_v53 }
0x2dcb   :  { %v3708_v47 = vpop.permute.xlu2 %3707 }
0x2dcc   :  { %4900 = vmatmul.msk.f32.vlgmr.msrb.gmra.mxu2 %vm646_vm9, %v3708_v47 }
0x2dcd   :  { %4131 = vmatpush.msrb.mxu2 %v6957_v39 }
0x2dcf   :  { %4132 = vmatpush.msrb.mxu2 %v6959_v46 }
0x2dd1   :  { %4133 = vmatpush.msrb.mxu2 %v6962_v3 }
0x2dd3   :  { %4134 = vmatpush.msrb.mxu2 %v6967_v17 }
0x2ddb   :  { %v3642_v8 = vpop.permute.xlu0 %3641 }
0x2ddc   :  { %4898 = vmatmul.msk.f32.vlgmr.msrb.gmra.mxu1 %vm646_vm9, %v3642_v8 }
0x2ddd   :  { %4064 = vmatpush.msrb.mxu1 %v7004_v42 }
0x2ddf   :  { %4065 = vmatpush.msrb.mxu1 %v7010_v48 }
0x2de1   :  { %4066 = vmatpush.msrb.mxu1 %v7014_v50 }
0x2de3   :  { %4067 = vmatpush.msrb.mxu1 %v7021_v28 }
0x2e40   :  { %v3753_v37 = vpop.f32.mrf.mxu3 }
0x2e41   :  { %v3776_v4 = vadd.f32 %v3753_v37, %v7060_v12 }
0x2e43   :  { %3778 = vrot.lane.b32.xlu1 %v3776_v4, %s5947_s29 }
0x2e4f   :  { %v3728_v19 = vpop.f32.mrf.mxu2 }
0x2e50   :  { %v3729_v33 = vadd.f32 %v7065_v0, %v3728_v19 }
0x2e52   :  { %v3756_v21 = vadd.f32 %v3753_v37, %v3729_v33 }
0x2e54   :  { %v4902_v23 = vmul.f32 -1.442695, %v3756_v21 }
0x2e56   :  { %5242 = vpow2.f32 %v4902_v23 }
0x2e59   :  { %v3662_v16 = vpop.f32.mrf.mxu1 }
0x2e5a   :  { %v3685_v18 = vadd.f32 %v3662_v16, %v6981_v35  ;;  %v3665_v25 = vadd.f32 %v3662_v16, %v3229_v9 }
0x2e5c   :  { %3687 = vrot.lane.b32.xlu0 %v3685_v18, %s5947_s29  ;;  %v5243_v22 = vpop.eup %5242  ;;  %v4899_v34 = vmul.f32 -1.442695, %v3665_v25 }
0x2e5d   :  { %v3760_v38 = vadd.f32 1.0, %v5243_v22 }
0x2e5f   :  { %5244 = vrcp.f32 %v3760_v38  ;;  %v3772_v52 = vand.u32 2147483648, %v3760_v38  ;;  %vm3766_vm3 = vweird.f32 %v3760_v38  ;;  %v3770_v63 = vand.u32 2147483647, %v3760_v38 }
0x2e60   :  { %5246 = vpow2.f32 %v4899_v34 }
0x2e61   :  { %v3773_v30 = vor.u32 1.1754944e-38, %v3772_v52  ;;  %vm3771_vm5 = vcmp.eq.f32.partialorder %v3770_v63, 8.507059e+37  ;;  %v7190_v63 = vadd.f32 %v6987_v29, %v7141_v15 }
0x2e65   :  { %v5245_v14 = vpop.eup %5244 }
0x2e66   :  { %v3762_v43 = vmul.f32 %v5245_v14, %v3760_v38  ;;  %v5247_v27 = vpop.eup %5246  ;;  %vm3767_vm2 = vweird.f32 %v5245_v14 }
0x2e67   :  { %v3669_v55 = vadd.f32 1.0, %v5247_v27  ;;  %vm3768_vm4 = vmor %vm3766_vm3, %vm3767_vm2 }
0x2e68   :  { %v3763_v54 = vsub.f32 1.0, %v3762_v43 }
0x2e69   :  { %5248 = vrcp.f32 %v3669_v55  ;;  %v3681_v36 = vand.u32 2147483648, %v3669_v55  ;;  %vm3675_vm7 = vweird.f32 %v3669_v55  ;;  %v3679_v56 = vand.u32 2147483647, %v3669_v55 }
0x2e6a   :  { %v3764_v20 = vmul.f32 %v5245_v14, %v3763_v54 }
0x2e6b   :  { %v3682_v6 = vor.u32 1.1754944e-38, %v3681_v36  ;;  %vm3680_vm11 = vcmp.eq.f32.partialorder %v3679_v56, 8.507059e+37 }
0x2e6c   :  { %v3765_v57 = vadd.f32 %v5245_v14, %v3764_v20 }
0x2e6e   :  { %v3769_v61 = vsel %vm3768_vm4, %v5245_v14, %v3765_v57 }
0x2e6f   :  { %v3774_v7 = vsel %vm3771_vm5, %v3773_v30, %v3769_v61  ;;  %v5249_v58 = vpop.eup %5248 }
0x2e70   :  { %v3671_v32 = vmul.f32 %v5249_v58, %v3669_v55  ;;  %vm3676_vm6 = vweird.f32 %v5249_v58  ;;  %v3788_v16 = vsub.f32 1.0, %v3774_v7  ;;  %v3794_v19 = vmul.f32 %v3774_v7, %v7112_v51 }
0x2e71   :  { %vm3677_vm8 = vmor %vm3675_vm7, %vm3676_vm6 }
0x2e72   :  { %v3672_v60 = vsub.f32 1.0, %v3671_v32 }
0x2e74   :  { %v3673_v5 = vmul.f32 %v5249_v58, %v3672_v60 }
0x2e76   :  { %v3674_v10 = vadd.f32 %v5249_v58, %v3673_v5 }
0x2e78   :  { %v3678_v11 = vsel %vm3677_vm8, %v5249_v58, %v3674_v10 }
0x2e79   :  { %v3683_v45 = vsel %vm3680_vm11, %v3682_v6, %v3678_v11 }
0x2e7a   :  { %v3703_v38 = vmul.f32 %v3683_v45, %v7117_v40 }
0x2eb5   :  { %v3779_v1 = vpop.permute.xlu1 %3778 }
0x2eb6   :  { %v3781_v59 = vmul.f32 %v3779_v1, %v3774_v7 }
0x2eb8   :  { %3783 = vrot.lane.b32.xlu0 %v3781_v59, %s5947_s29 }
0x2ece   :  { %v3688_v31 = vpop.permute.xlu0 %3687 }
0x2ecf   :  { %v3690_v24 = vmul.f32 %v3688_v31, %v3683_v45 }
0x2ed1   :  { %3692 = vrot.lane.b32.xlu2 %v3690_v24, %s5947_s29 }
0x2f2a   :  { %v3784_v41 = vpop.permute.xlu0 %3783 }
0x2f2b   :  { %v3786_v13 = vadd.f32 %v3784_v41, %v3729_v33  ;;  %v3693_v47 = vpop.permute.xlu2 %3692  ;;  %v3697_v33 = vsub.f32 1.0, %v3683_v45 }
0x2f2c   :  { %v3695_v8 = vadd.f32 %v3693_v47, %v3229_v9 }
0x2f2d   :  { %5250 = vtanh.f32 %v3786_v13 }
0x2f2e   :  { %5252 = vtanh.f32 %v3695_v8 }
0x2f33   :  { %v5251_v37 = vpop.eup %5250 }
0x2f34   :  { %v5253_v4 = vpop.eup %5252  ;;  %3790 = vrot.lane.b32.xlu2 %v5251_v37, %s5948_s28 }
0x2f35   :  { %3699 = vrot.lane.b32.xlu1 %v5253_v4, %s5948_s28 }
0x2f8e   :  { %v3791_v18 = vpop.permute.xlu2 %3790 }
0x2f8f   :  { %v3793_v21 = vmul.f32 %v3791_v18, %v3788_v16 }
0x2f91   :  { %v7154_v23 = vadd.f32 %v3794_v19, %v3793_v21 }
0x2f93   :  { %3890 = vrot.lane.b32.xlu1 %v7154_v23, %s5948_s28 }
0x2fa7   :  { %v3700_v22 = vpop.permute.xlu1 %3699 }
0x2fa8   :  { %v3702_v9 = vmul.f32 %v3700_v22, %v3697_v33 }
0x2faa   :  { %v7159_v25 = vadd.f32 %v3703_v38, %v3702_v9 }
0x2fac   :  { %3797 = vst [vmem:[#allocation1] ss:$4 sm:$0xff] %v7159_v25 }
0x2fb3   :  { %v3798_v14 = vld.sshfl [vmem:[#allocation1] sm:$0xff pattern:$0x73625140] }
0x2fb4   :  { %3799 = vrot.lane.b32.xlu0 %v3798_v14, %s5948_s28  ;;  %3863 = vst [vmem:[#allocation1] ss:$4 sm:$0xff] %v7159_v25 }
0x2fbb   :  { %v3864_v51 = vld.sshfl [vmem:[#allocation1] sm:$0xff pattern:$0x73625140] }
0x2fbc   :  { %3865 = vrot.lane.b32.xlu2 %v3864_v51, %s5948_s28 }
0x3005   :  { %v7165_v34 = vpop.permute.xlu1 %3890 }
0x3006   :  { %4906 = vmatmul.msk.f32.vlgmr.msra.gmra.mxu2 %vm646_vm9, %v7165_v34 }
0x3007   :  { %4355 = vmatpush.msra.mxu2 %v7002_v44 }
0x3009   :  { %4356 = vmatpush.msra.mxu2 %v7006_v62 }
0x300b   :  { %4357 = vmatpush.msra.mxu2 %v7012_v49 }
0x300d   :  { %4358 = vmatpush.msra.mxu2 %v7019_v53 }
0x3016   :  { %v3866_v40 = vpop.permute.xlu2 %3865 }
0x3017   :  { %4905 = vmatmul.msk.f32.vlgmr.msra.gmra.mxu1 %vm646_vm9, %v3866_v40 }
0x3018   :  { %4289 = vmatpush.msra.mxu1 %v6957_v39 }
0x301a   :  { %4290 = vmatpush.msra.mxu1 %v6959_v46 }
0x301c   :  { %4291 = vmatpush.msra.mxu1 %v6962_v3 }
0x301e   :  { %4292 = vmatpush.msra.mxu1 %v6967_v17 }
0x3026   :  { %v3800_v43 = vpop.permute.xlu0 %3799 }
0x3027   :  { %4903 = vmatmul.msk.f32.vlgmr.msra.gmra.mxu0 %vm646_vm9, %v3800_v43 }
0x3028   :  { %4222 = vmatpush.msra.mxu0 %v7004_v42 }
0x302a   :  { %4223 = vmatpush.msra.mxu0 %v7010_v48 }
0x302c   :  { %4224 = vmatpush.msra.mxu0 %v7014_v50 }
0x302e   :  { %4225 = vmatpush.msra.mxu0 %v7021_v28 }
0x3089   :  { %v3911_v54 = vpop.f32.mrf.mxu2 }
0x308a   :  { %v3934_v39 = vadd.f32 %v3911_v54, %v7060_v12 }
0x308c   :  { %3936 = vrot.lane.b32.xlu1 %v3934_v39, %s5947_s29 }
0x3094   :  { %v3886_v17 = vpop.f32.mrf.mxu1 }
0x3095   :  { %v3887_v20 = vadd.f32 %v7065_v0, %v3886_v17 }
0x3097   :  { %v3914_v27 = vadd.f32 %v3911_v54, %v3887_v20 }
0x3099   :  { %v4907_v55 = vmul.f32 -1.442695, %v3914_v27 }
0x309b   :  { %5254 = vpow2.f32 %v4907_v55 }
0x30a1   :  { %v5255_v57 = vpop.eup %5254 }
0x30a2   :  { %v3918_v52 = vadd.f32 1.0, %v5255_v57 }
0x30a4   :  { %v3820_v46 = vpop.f32.mrf.mxu0  ;;  %5256 = vrcp.f32 %v3918_v52  ;;  %v3930_v5 = vand.u32 2147483648, %v3918_v52  ;;  %vm3924_vm13 = vweird.f32 %v3918_v52  ;;  %v3928_v36 = vand.u32 2147483647, %v3918_v52 }
0x30a5   :  { %v3843_v3 = vadd.f32 %v3820_v46, %v6981_v35  ;;  %v3823_v30 = vadd.f32 %v3820_v46, %v7190_v63 }
0x30a6   :  { %v3931_v11 = vor.u32 1.1754944e-38, %v3930_v5  ;;  %vm3929_vm15 = vcmp.eq.f32.partialorder %v3928_v36, 8.507059e+37 }
0x30a7   :  { %3845 = vrot.lane.b32.xlu0 %v3843_v3, %s5947_s29  ;;  %v4904_v7 = vmul.f32 -1.442695, %v3823_v30 }
0x30a9   :  { %5258 = vpow2.f32 %v4904_v7 }
0x30aa   :  { %v5257_v61 = vpop.eup %5256 }
0x30ab   :  { %v3920_v1 = vmul.f32 %v5257_v61, %v3918_v52  ;;  %vm3925_vm12 = vweird.f32 %v5257_v61 }
0x30ac   :  { %vm3926_vm14 = vmor %vm3924_vm13, %vm3925_vm12 }
0x30ad   :  { %v3921_v59 = vsub.f32 1.0, %v3920_v1 }
0x30af   :  { %v3922_v58 = vmul.f32 %v5257_v61, %v3921_v59  ;;  %v5259_v32 = vpop.eup %5258 }
0x30b0   :  { %v3827_v10 = vadd.f32 1.0, %v5259_v32  ;;  %v3230_v32 = vrot.slane %v7190_v63, 2 }
0x30b1   :  { %v3923_v60 = vadd.f32 %v5257_v61, %v3922_v58 }
0x30b2   :  { %5260 = vrcp.f32 %v3827_v10  ;;  %v3839_v47 = vand.u32 2147483648, %v3827_v10  ;;  %vm3833_vm2 = vweird.f32 %v3827_v10  ;;  %v3837_v8 = vand.u32 2147483647, %v3827_v10 }
0x30b3   :  { %v3927_v56 = vsel %vm3926_vm14, %v5257_v61, %v3923_v60 }
0x30b4   :  { %v3932_v15 = vsel %vm3929_vm15, %v3931_v11, %v3927_v56  ;;  %v3840_v4 = vor.u32 1.1754944e-38, %v3839_v47  ;;  %vm3838_vm4 = vcmp.eq.f32.partialorder %v3837_v8, 8.507059e+37 }
0x30b5   :  { %v3946_v51 = vsub.f32 1.0, %v3932_v15  ;;  %v3952_v43 = vmul.f32 %v3932_v15, %v7154_v23 }
0x30b8   :  { %v5261_v31 = vpop.eup %5260 }
0x30b9   :  { %v3829_v45 = vmul.f32 %v5261_v31, %v3827_v10  ;;  %vm3834_vm1 = vweird.f32 %v5261_v31 }
0x30ba   :  { %vm3835_vm3 = vmor %vm3833_vm2, %vm3834_vm1 }
0x30bb   :  { %v3830_v24 = vsub.f32 1.0, %v3829_v45 }
0x30bd   :  { %v3831_v41 = vmul.f32 %v5261_v31, %v3830_v24 }
0x30bf   :  { %v3832_v13 = vadd.f32 %v5261_v31, %v3831_v41 }
0x30c1   :  { %v3836_v37 = vsel %vm3835_vm3, %v5261_v31, %v3832_v13 }
0x30c2   :  { %v3841_v18 = vsel %vm3838_vm4, %v3840_v4, %v3836_v37 }
0x30c3   :  { %v3855_v46 = vsub.f32 1.0, %v3841_v18  ;;  %v3861_v17 = vmul.f32 %v3841_v18, %v7159_v25 }
0x30fe   :  { %v3937_v29 = vpop.permute.xlu1 %3936 }
0x30ff   :  { %v3939_v6 = vmul.f32 %v3937_v29, %v3932_v15 }
0x3101   :  { %3941 = vrot.lane.b32.xlu0 %v3939_v6, %s5947_s29 }
0x3119   :  { %v3846_v16 = vpop.permute.xlu0 %3845 }
0x311a   :  { %v3848_v19 = vmul.f32 %v3846_v16, %v3841_v18 }
0x311c   :  { %3850 = vrot.lane.b32.xlu2 %v3848_v19, %s5947_s29 }
0x3173   :  { %v3942_v21 = vpop.permute.xlu0 %3941 }
0x3174   :  { %v3944_v33 = vadd.f32 %v3942_v21, %v3887_v20 }
0x3176   :  { %5262 = vtanh.f32 %v3944_v33  ;;  %v3851_v22 = vpop.permute.xlu2 %3850 }
0x3177   :  { %v3853_v38 = vadd.f32 %v3851_v22, %v7190_v63 }
0x3179   :  { %5264 = vtanh.f32 %v3853_v38 }
0x317c   :  { %v5263_v9 = vpop.eup %5262 }
0x317d   :  { %3948 = vrot.lane.b32.xlu2 %v5263_v9, %s5948_s28 }
0x317f   :  { %v5265_v14 = vpop.eup %5264 }
0x3180   :  { %3857 = vrot.lane.b32.xlu1 %v5265_v14, %s5948_s28 }
0x31d7   :  { %v3949_v40 = vpop.permute.xlu2 %3948 }
0x31d8   :  { %v3951_v54 = vmul.f32 %v3949_v40, %v3946_v51 }
0x31da   :  { %v7199_v39 = vadd.f32 %v3952_v43, %v3951_v54 }
0x31dc   :  { %4048 = vrot.lane.b32.xlu1 %v7199_v39, %s5948_s28 }
0x31f2   :  { %v3858_v3 = vpop.permute.xlu1 %3857 }
0x31f3   :  { %v3860_v20 = vmul.f32 %v3858_v3, %v3855_v46 }
0x31f5   :  { %v7204_v27 = vadd.f32 %v3861_v17, %v3860_v20 }
0x31f7   :  { %3955 = vst [vmem:[#allocation1] ss:$4 sm:$0xff] %v7204_v27 }
0x31fe   :  { %v3956_v55 = vld.sshfl [vmem:[#allocation1] sm:$0xff pattern:$0x73625140] }
0x31ff   :  { %3957 = vrot.lane.b32.xlu0 %v3956_v55, %s5948_s28  ;;  %4021 = vst [vmem:[#allocation1] ss:$4 sm:$0xff] %v7204_v27 }
0x3206   :  { %v4022_v23 = vld.sshfl [vmem:[#allocation1] sm:$0xff pattern:$0x73625140] }
0x3207   :  { %4023 = vrot.lane.b32.xlu2 %v4022_v23, %s5948_s28 }
0x324e   :  { %v7210_v57 = vpop.permute.xlu1 %4048 }
0x324f   :  { %4911 = vmatmul.msk.f32.vlgmr.msrb.gmra.mxu1 %vm646_vm9, %v7210_v57 }
0x3250   :  { %4472 = vmatpush.msrb.mxu1 %v7004_v42 }
0x3252   :  { %4473 = vmatpush.msrb.mxu1 %v7010_v48 }
0x3254   :  { %4474 = vmatpush.msrb.mxu1 %v7014_v50 }
0x3256   :  { %4475 = vmatpush.msrb.mxu1 %v7021_v28 }
0x3261   :  { %v4024_v25 = vpop.permute.xlu2 %4023 }
0x3262   :  { %4910 = vmatmul.msk.f32.vlgmr.msrb.gmra.mxu0 %vm646_vm9, %v4024_v25 }
0x3263   :  { %4447 = vmatpush.msrb.mxu0 %v7002_v44 }
0x3265   :  { %4448 = vmatpush.msrb.mxu0 %v7006_v62 }
0x3267   :  { %4449 = vmatpush.msrb.mxu0 %v7012_v49 }
0x3269   :  { %4450 = vmatpush.msrb.mxu0 %v7019_v53 }
0x3271   :  { %v3958_v52 = vpop.permute.xlu0 %3957 }
0x3272   :  { %4908 = vmatmul.msk.f32.vlgmr.msrb.gmra.mxu3 %vm646_vm9, %v3958_v52 }
0x3273   :  { %4380 = vmatpush.msrb.mxu3 %v7004_v42 }
0x3275   :  { %4381 = vmatpush.msrb.mxu3 %v7010_v48 }
0x3277   :  { %4382 = vmatpush.msrb.mxu3 %v7014_v50 }
0x3279   :  { %4383 = vmatpush.msrb.mxu3 %v7021_v28 }
0x32cc   :  { %v4069_v61 = vpop.f32.mrf.mxu1 }
0x32cd   :  { %v4092_v44 = vadd.f32 %v4069_v61, %v7060_v12 }
0x32cf   :  { %4094 = vrot.lane.b32.xlu1 %v4092_v44, %s5947_s29 }
0x32df   :  { %v4044_v53 = vpop.f32.mrf.mxu0 }
0x32e0   :  { %v4045_v30 = vadd.f32 %v7065_v0, %v4044_v53 }
0x32e2   :  { %v4072_v42 = vadd.f32 %v4069_v61, %v4045_v30 }
0x32e4   :  { %v4912_v1 = vmul.f32 -1.442695, %v4072_v42 }
0x32e6   :  { %5266 = vpow2.f32 %v4912_v1 }
0x32ec   :  { %v5267_v48 = vpop.eup %5266 }
0x32ed   :  { %v4076_v50 = vadd.f32 1.0, %v5267_v48 }
0x32ef   :  { %5268 = vrcp.f32 %v4076_v50  ;;  %v4088_v10 = vand.u32 2147483648, %v4076_v50  ;;  %vm4082_vm6 = vweird.f32 %v4076_v50  ;;  %v4086_v36 = vand.u32 2147483647, %v4076_v50 }
0x32f1   :  { %v4089_v29 = vor.u32 1.1754944e-38, %v4088_v10  ;;  %vm4087_vm8 = vcmp.eq.f32.partialorder %v4086_v36, 8.507059e+37 }
0x32f5   :  { %v3978_v62 = vpop.f32.mrf.mxu3  ;;  %v5269_v28 = vpop.eup %5268 }
0x32f6   :  { %v4001_v49 = vadd.f32 %v3978_v62, %v6981_v35  ;;  %v4078_v7 = vmul.f32 %v5269_v28, %v4076_v50  ;;  %v3981_v60 = vadd.f32 %v3978_v62, %v3230_v32  ;;  %vm4083_vm5 = vweird.f32 %v5269_v28 }
0x32f7   :  { %vm4084_vm7 = vmor %vm4082_vm6, %vm4083_vm5 }
0x32f8   :  { %4003 = vrot.lane.b32.xlu0 %v4001_v49, %s5947_s29  ;;  %v4079_v59 = vsub.f32 1.0, %v4078_v7  ;;  %v4909_v56 = vmul.f32 -1.442695, %v3981_v60 }
0x32fa   :  { %v4080_v58 = vmul.f32 %v5269_v28, %v4079_v59  ;;  %5270 = vpow2.f32 %v4909_v56 }
0x32fc   :  { %v4081_v5 = vadd.f32 %v5269_v28, %v4080_v58 }
0x32fe   :  { %v4085_v11 = vsel %vm4084_vm7, %v5269_v28, %v4081_v5 }
0x32ff   :  { %v4090_v6 = vsel %vm4087_vm8, %v4089_v29, %v4085_v11 }
0x3300   :  { %v5271_v45 = vpop.eup %5270  ;;  %v4104_v54 = vsub.f32 1.0, %v4090_v6  ;;  %v4110_v3 = vmul.f32 %v4090_v6, %v7199_v39 }
0x3301   :  { %v3985_v24 = vadd.f32 1.0, %v5271_v45  ;;  %v3231_v45 = vrot.slane %v7190_v63, 4 }
0x3303   :  { %5272 = vrcp.f32 %v3985_v24  ;;  %v3997_v4 = vand.u32 2147483648, %v3985_v24  ;;  %vm3991_vm12 = vweird.f32 %v3985_v24  ;;  %v3995_v16 = vand.u32 2147483647, %v3985_v24 }
0x3305   :  { %v3998_v19 = vor.u32 1.1754944e-38, %v3997_v4  ;;  %vm3996_vm14 = vcmp.eq.f32.partialorder %v3995_v16, 8.507059e+37 }
0x3309   :  { %v5273_v41 = vpop.eup %5272 }
0x330a   :  { %v3987_v13 = vmul.f32 %v5273_v41, %v3985_v24  ;;  %vm3992_vm11 = vweird.f32 %v5273_v41 }
0x330b   :  { %vm3993_vm13 = vmor %vm3991_vm12, %vm3992_vm11 }
0x330c   :  { %v3988_v47 = vsub.f32 1.0, %v3987_v13 }
0x330e   :  { %v3989_v8 = vmul.f32 %v5273_v41, %v3988_v47 }
0x3310   :  { %v3990_v37 = vadd.f32 %v5273_v41, %v3989_v8 }
0x3312   :  { %v3994_v18 = vsel %vm3993_vm13, %v5273_v41, %v3990_v37 }
0x3313   :  { %v3999_v33 = vsel %vm3996_vm14, %v3998_v19, %v3994_v18 }
0x3314   :  { %v4013_v55 = vsub.f32 1.0, %v3999_v33  ;;  %v4019_v25 = vmul.f32 %v3999_v33, %v7204_v27 }
0x3341   :  { %v4095_v15 = vpop.permute.xlu1 %4094 }
0x3342   :  { %v4097_v31 = vmul.f32 %v4095_v15, %v4090_v6 }
0x3344   :  { %4099 = vrot.lane.b32.xlu0 %v4097_v31, %s5947_s29 }
0x336a   :  { %v4004_v21 = vpop.permute.xlu0 %4003 }
0x336b   :  { %v4006_v22 = vmul.f32 %v4004_v21, %v3999_v33 }
0x336d   :  { %4008 = vrot.lane.b32.xlu2 %v4006_v22, %s5947_s29 }
0x33b6   :  { %v4100_v38 = vpop.permute.xlu0 %4099 }
0x33b7   :  { %v4102_v9 = vadd.f32 %v4100_v38, %v4045_v30 }
0x33b9   :  { %5274 = vtanh.f32 %v4102_v9 }
0x33bf   :  { %v5275_v14 = vpop.eup %5274 }
0x33c0   :  { %4106 = vrot.lane.b32.xlu2 %v5275_v14, %s5948_s28 }
0x33c7   :  { %v4009_v51 = vpop.permute.xlu2 %4008 }
0x33c8   :  { %v4011_v40 = vadd.f32 %v4009_v51, %v3230_v32 }
0x33ca   :  { %5276 = vtanh.f32 %v4011_v40 }
0x33d0   :  { %v5277_v43 = vpop.eup %5276 }
0x33d1   :  { %4015 = vrot.lane.b32.xlu1 %v5277_v43, %s5948_s28 }
0x341a   :  { %v4107_v46 = vpop.permute.xlu2 %4106 }
0x341b   :  { %v4109_v17 = vmul.f32 %v4107_v46, %v4104_v54 }
0x341d   :  { %v7239_v20 = vadd.f32 %v4110_v3, %v4109_v17 }
0x341f   :  { %4206 = vrot.lane.b32.xlu1 %v7239_v20, %s5948_s28 }
0x3443   :  { %v4016_v23 = vpop.permute.xlu1 %4015 }
0x3444   :  { %v4018_v52 = vmul.f32 %v4016_v23, %v4013_v55 }
0x3446   :  { %v7244_v61 = vadd.f32 %v4019_v25, %v4018_v52 }
0x3448   :  { %4113 = vst [vmem:[#allocation1] ss:$4 sm:$0xff] %v7244_v61 }
0x344f   :  { %v4114_v44 = vld.sshfl [vmem:[#allocation1] sm:$0xff pattern:$0x73625140] }
0x3450   :  { %4115 = vrot.lane.b32.xlu0 %v4114_v44, %s5948_s28  ;;  %4179 = vst [vmem:[#allocation1] ss:$4 sm:$0xff] %v7244_v61 }
0x3457   :  { %v4180_v39 = vld.sshfl [vmem:[#allocation1] sm:$0xff pattern:$0x73625140] }
0x3458   :  { %4181 = vrot.lane.b32.xlu2 %v4180_v39, %s5948_s28 }
0x3491   :  { %v7250_v62 = vpop.permute.xlu1 %4206 }
0x3492   :  { %4916 = vmatmul.msk.f32.vlgmr.msra.gmra.mxu0 %vm646_vm9, %v7250_v62 }
0x34b2   :  { %v4182_v49 = vpop.permute.xlu2 %4181 }
0x34b3   :  { %4915 = vmatmul.msk.f32.vlgmr.msra.gmra.mxu3 %vm646_vm9, %v4182_v49 }
0x34c2   :  { %v4116_v27 = vpop.permute.xlu0 %4115 }
0x34c3   :  { %4913 = vmatmul.msk.f32.vlgmr.msrb.gmra.mxu2 %vm646_vm9, %v4116_v27 }
0x350f   :  { %v4227_v53 = vpop.f32.mrf.mxu0 }
0x3510   :  { %v4250_v30 = vadd.f32 %v4227_v53, %v7060_v12 }
0x3512   :  { %4252 = vrot.lane.b32.xlu1 %v4250_v30, %s5947_s29 }
0x3536   :  { %v4202_v48 = vpop.f32.mrf.mxu3 }
0x3537   :  { %v4203_v50 = vadd.f32 %v7065_v0, %v4202_v48  ;;  %v7293_v48 = vld [vmem:[%s6132_s8] sm:$0xff] }
0x3539   :  { %v4230_v28 = vadd.f32 %v4227_v53, %v4203_v50 }
0x353b   :  { %v4917_v7 = vmul.f32 -1.442695, %v4230_v28 }
0x353d   :  { %5278 = vpow2.f32 %v4917_v7 }
0x3543   :  { %v5279_v59 = vpop.eup %5278 }
0x3544   :  { %v4234_v58 = vadd.f32 1.0, %v5279_v59 }
0x3546   :  { %v4136_v42 = vpop.f32.mrf.mxu2  ;;  %5280 = vrcp.f32 %v4234_v58  ;;  %v4246_v56 = vand.u32 2147483648, %v4234_v58  ;;  %vm4240_vm1 = vweird.f32 %v4234_v58  ;;  %v4244_v11 = vand.u32 2147483647, %v4234_v58 }
0x3547   :  { %v4159_v1 = vadd.f32 %v4136_v42, %v6981_v35  ;;  %v4139_v24 = vadd.f32 %v4136_v42, %v3231_v45  ;;  %v7279_v42 = vld [vmem:[%s6132_s8 + $0x18] sm:$0xff] }
0x3548   :  { %v4247_v15 = vor.u32 1.1754944e-38, %v4246_v56  ;;  %vm4245_vm3 = vcmp.eq.f32.partialorder %v4244_v11, 8.507059e+37  ;;  %4556 = vmatpush.msra.mxu3 %v7279_v42  ;;  %4536 = vmatpush.msrb.mxu2 %v7279_v42 }
0x3549   :  { %4161 = vrot.lane.b32.xlu0 %v4159_v1, %s5947_s29  ;;  %v4914_v41 = vmul.f32 -1.442695, %v4139_v24  ;;  %v7282_v1 = vld [vmem:[%s6132_s8 + $0x10] sm:$0xff]  ;;  %4576 = vmatpush.msra.mxu0 %v7279_v42 }
0x354a   :  { %4557 = vmatpush.msra.mxu3 %v7282_v1  ;;  %4537 = vmatpush.msrb.mxu2 %v7282_v1 }
0x354b   :  { %5282 = vpow2.f32 %v4914_v41  ;;  %4577 = vmatpush.msra.mxu0 %v7282_v1 }
0x354c   :  { %v5281_v32 = vpop.eup %5280 }
0x354d   :  { %v4236_v60 = vmul.f32 %v5281_v32, %v4234_v58  ;;  %vm4241_vm15 = vweird.f32 %v5281_v32 }
0x354e   :  { %vm4242_vm2 = vmor %vm4240_vm1, %vm4241_vm15 }
0x354f   :  { %v4237_v5 = vsub.f32 1.0, %v4236_v60 }
0x3551   :  { %v4238_v10 = vmul.f32 %v5281_v32, %v4237_v5  ;;  %v5283_v13 = vpop.eup %5282 }
0x3552   :  { %v4143_v47 = vadd.f32 1.0, %v5283_v13 }
0x3553   :  { %v4239_v36 = vadd.f32 %v5281_v32, %v4238_v10 }
0x3554   :  { %5284 = vrcp.f32 %v4143_v47  ;;  %v4155_v19 = vand.u32 2147483648, %v4143_v47  ;;  %vm4149_vm5 = vweird.f32 %v4143_v47  ;;  %v4153_v21 = vand.u32 2147483647, %v4143_v47 }
0x3555   :  { %v4243_v29 = vsel %vm4242_vm2, %v5281_v32, %v4239_v36 }
0x3556   :  { %v4248_v6 = vsel %vm4245_vm3, %v4247_v15, %v4243_v29  ;;  %v4156_v22 = vor.u32 1.1754944e-38, %v4155_v19  ;;  %vm4154_vm7 = vcmp.eq.f32.partialorder %v4153_v21, 8.507059e+37 }
0x3557   :  { %v4262_v17 = vsub.f32 1.0, %v4248_v6  ;;  %v4268_v23 = vmul.f32 %v4248_v6, %v7239_v20 }
0x355a   :  { %v5285_v8 = vpop.eup %5284 }
0x355b   :  { %v4145_v37 = vmul.f32 %v5285_v8, %v4143_v47  ;;  %vm4150_vm4 = vweird.f32 %v5285_v8 }
0x355c   :  { %vm4151_vm6 = vmor %vm4149_vm5, %vm4150_vm4 }
0x355d   :  { %v4146_v4 = vsub.f32 1.0, %v4145_v37 }
0x355f   :  { %v4147_v16 = vmul.f32 %v5285_v8, %v4146_v4 }
0x3561   :  { %v4148_v18 = vadd.f32 %v5285_v8, %v4147_v16 }
0x3563   :  { %v4152_v33 = vsel %vm4151_vm6, %v5285_v8, %v4148_v18  ;;  %v3232_v8 = vrot.slane %v7190_v63, 6 }
0x3564   :  { %v4157_v9 = vsel %vm4154_vm7, %v4156_v22, %v4152_v33  ;;  %vm4719_vm7 = vcmask 392192  }
0x3565   :  { %v4171_v44 = vsub.f32 1.0, %v4157_v9  ;;  %v4177_v49 = vmul.f32 %v4157_v9, %v7244_v61  ;;  %v7287_v61 = vld [vmem:[%s6132_s8 + $0x8] sm:$0xff]  ;;  %s5949_s8 = smov 16  }
0x3566   :  { %4558 = vmatpush.msra.mxu3 %v7287_v61  ;;  %4538 = vmatpush.msrb.mxu2 %v7287_v61 }
0x3567   :  { %4578 = vmatpush.msra.mxu0 %v7287_v61 }
0x3568   :  { %4559 = vmatpush.msra.mxu3 %v7293_v48  ;;  %4539 = vmatpush.msrb.mxu2 %v7293_v48 }
0x3569   :  { %4579 = vmatpush.msra.mxu0 %v7293_v48 }
0x3584   :  { %v4253_v0 = vpop.permute.xlu1 %4252 }
0x3585   :  { %v4255_v31 = vmul.f32 %v4253_v0, %v4248_v6 }
0x3587   :  { %4257 = vrot.lane.b32.xlu0 %v4255_v31, %s5947_s29 }
0x35bb   :  { %v4162_v38 = vpop.permute.xlu0 %4161 }
0x35bc   :  { %v4164_v14 = vmul.f32 %v4162_v38, %v4157_v9 }
0x35be   :  { %4166 = vrot.lane.b32.xlu2 %v4164_v14, %s5947_s29 }
0x35f9   :  { %v4258_v51 = vpop.permute.xlu0 %4257 }
0x35fa   :  { %v4260_v40 = vadd.f32 %v4258_v51, %v4203_v50 }
0x35fc   :  { %5286 = vtanh.f32 %v4260_v40 }
0x3602   :  { %v5287_v43 = vpop.eup %5286 }
0x3603   :  { %4264 = vrot.lane.b32.xlu2 %v5287_v43, %s5948_s28 }
0x3618   :  { %v4167_v54 = vpop.permute.xlu2 %4166 }
0x3619   :  { %v4169_v46 = vadd.f32 %v4167_v54, %v3231_v45 }
0x361b   :  { %5288 = vtanh.f32 %v4169_v46 }
0x3621   :  { %v5289_v3 = vpop.eup %5288 }
0x3622   :  { %4173 = vrot.lane.b32.xlu1 %v5289_v3, %s5948_s28 }
0x365d   :  { %v4265_v55 = vpop.permute.xlu2 %4264 }
0x365e   :  { %v4267_v25 = vmul.f32 %v4265_v55, %v4262_v17 }
0x3660   :  { %v7267_v52 = vadd.f32 %v4268_v23, %v4267_v25 }
0x3662   :  { %4364 = vrot.lane.b32.xlu0 %v7267_v52, %s5948_s28 }
0x3694   :  { %v4174_v39 = vpop.permute.xlu1 %4173 }
0x3695   :  { %v4176_v27 = vmul.f32 %v4174_v39, %v4171_v44 }
0x3697   :  { %v7272_v53 = vadd.f32 %v4177_v49, %v4176_v27 }
0x3699   :  { %4271 = vst [vmem:[#allocation1] ss:$4 sm:$0xff] %v7272_v53 }
0x36a0   :  { %v4272_v30 = vld.sshfl [vmem:[#allocation1] sm:$0xff pattern:$0x73625140] }
0x36a1   :  { %4273 = vrot.lane.b32.xlu1 %v4272_v30, %s5948_s28  ;;  %4337 = vst [vmem:[#allocation1] ss:$4 sm:$0xff] %v7272_v53 }
0x36a8   :  { %v4338_v20 = vld.sshfl [vmem:[#allocation1] sm:$0xff pattern:$0x73625140] }
0x36a9   :  { %4339 = vrot.lane.b32.xlu2 %v4338_v20, %s5948_s28 }
0x36d4   :  { %v4365_v50 = vpop.permute.xlu0 %4364 }
0x36d5   :  { %4921 = vmatmul.msk.f32.vlgmr.msrb.gmra.mxu3 %vm646_vm9, %v4365_v50 }
0x36d6   :  { %4636 = vmatpush.msrb.mxu3 %v7279_v42 }
0x36d8   :  { %4637 = vmatpush.msrb.mxu3 %v7282_v1 }
0x36da   :  { %4638 = vmatpush.msrb.mxu3 %v7287_v61 }
0x36dc   :  { %4639 = vmatpush.msrb.mxu3 %v7293_v48 }
0x36dd   :  { %4927 = vmatmul.msk.f32.vlgmr.msra.gmra.mxu3 %vm646_vm9, %v7123_v2 }
0x36e5   :  { %4931 = vmatmul.msk.f32.vlgmr.msrb.gmra.mxu3 %vm646_vm9, %v4365_v50 }
0x3703   :  { %v4340_v28 = vpop.permute.xlu2 %4339 }
0x3704   :  { %4920 = vmatmul.msk.f32.vlgmr.msra.gmra.mxu2 %vm646_vm9, %v4340_v28 }
0x3705   :  { %4616 = vmatpush.msra.mxu2 %v7279_v42 }
0x3707   :  { %4617 = vmatpush.msra.mxu2 %v7282_v1 }
0x3709   :  { %4618 = vmatpush.msra.mxu2 %v7287_v61 }
0x370b   :  { %4619 = vmatpush.msra.mxu2 %v7293_v48 }
0x370c   :  { %4926 = vmatmul.msk.f32.vlgmr.msrb.gmra.mxu2 %vm646_vm9, %v7083_v26 }
0x3713   :  { %v4274_v7 = vpop.permute.xlu1 %4273 }
0x3714   :  { %4918 = vmatmul.msk.f32.vlgmr.msra.gmra.mxu1 %vm646_vm9, %v4274_v7  ;;  %4930 = vmatmul.msk.f32.vlgmr.msra.gmra.mxu2 %vm646_vm9, %v7250_v62  ;;  %v7328_v62 = vld [vmem:[#allocation33] ss:$0 sm:$0xff] }
0x3715   :  { %4596 = vmatpush.msra.mxu1 %v7279_v42 }
0x3717   :  { %4597 = vmatpush.msra.mxu1 %v7282_v1 }
0x3719   :  { %4598 = vmatpush.msra.mxu1 %v7287_v61 }
0x371b   :  { %4599 = vmatpush.msra.mxu1 %v7293_v48 }
0x3758   :  { %v4385_v2 = vpop.f32.mrf.mxu3 }
0x3759   :  { %v4408_v59 = vadd.f32 %v4385_v2, %v7060_v12 }
0x375b   :  { %4410 = vrot.lane.b32.xlu0 %v4408_v59, %s5947_s29 }
0x3787   :  { %v4360_v32 = vpop.f32.mrf.mxu2 }
0x3788   :  { %v4361_v60 = vadd.f32 %v7328_v62, %v4360_v32 }
0x378a   :  { %v4388_v5 = vadd.f32 %v4385_v2, %v4361_v60 }
0x378c   :  { %v4922_v10 = vmul.f32 -1.442695, %v4388_v5 }
0x378e   :  { %5290 = vpow2.f32 %v4922_v10 }
0x3791   :  { %v4294_v26 = vpop.f32.mrf.mxu1 }
0x3792   :  { %v4317_v58 = vadd.f32 %v4294_v26, %v6981_v35  ;;  %v4297_v37 = vadd.f32 %v4294_v26, %v3232_v8 }
0x3794   :  { %4319 = vrot.lane.b32.xlu1 %v4317_v58, %s5947_s29  ;;  %v5291_v36 = vpop.eup %5290  ;;  %v4919_v4 = vmul.f32 -1.442695, %v4297_v37 }
0x3795   :  { %v4392_v56 = vadd.f32 1.0, %v5291_v36 }
0x3797   :  { %5292 = vrcp.f32 %v4392_v56  ;;  %v4404_v35 = vand.u32 2147483648, %v4392_v56  ;;  %vm4398_vm11 = vweird.f32 %v4392_v56  ;;  %v4402_v31 = vand.u32 2147483647, %v4392_v56 }
0x3798   :  { %5294 = vpow2.f32 %v4919_v4 }
0x3799   :  { %v4405_v24 = vor.u32 1.1754944e-38, %v4404_v35  ;;  %vm4403_vm13 = vcmp.eq.f32.partialorder %v4402_v31, 8.507059e+37 }
0x379d   :  { %v5293_v11 = vpop.eup %5292 }
0x379e   :  { %v4394_v29 = vmul.f32 %v5293_v11, %v4392_v56  ;;  %vm4399_vm8 = vweird.f32 %v5293_v11  ;;  %v5295_v16 = vpop.eup %5294 }
0x379f   :  { %vm4400_vm12 = vmor %vm4398_vm11, %vm4399_vm8  ;;  %v4301_v18 = vadd.f32 1.0, %v5295_v16  ;;  %vm4722_vm8 = vcmask 654336   ;;  %vm4724_vm11 = vcmask 785408  }
0x37a0   :  { %v4395_v15 = vsub.f32 1.0, %v4394_v29 }
0x37a1   :  { %5296 = vrcp.f32 %v4301_v18  ;;  %v4313_v9 = vand.u32 2147483648, %v4301_v18  ;;  %vm4307_vm15 = vweird.f32 %v4301_v18  ;;  %v4311_v14 = vand.u32 2147483647, %v4301_v18 }
0x37a2   :  { %v4396_v0 = vmul.f32 %v5293_v11, %v4395_v15 }
0x37a3   :  { %v4314_v40 = vor.u32 1.1754944e-38, %v4313_v9  ;;  %vm4312_vm2 = vcmp.eq.f32.partialorder %v4311_v14, 8.507059e+37 }
0x37a4   :  { %v4397_v6 = vadd.f32 %v5293_v11, %v4396_v0 }
0x37a6   :  { %v4401_v45 = vsel %vm4400_vm12, %v5293_v11, %v4397_v6  ;;  %v5019_v6 = vld [vmem:[#allocation36] ss:$0 sm:$0xff]  ;;  %vm4726_vm12 = vcmask 916480  }
0x37a7   :  { %v4406_v13 = vsel %vm4403_vm13, %v4405_v24, %v4401_v45  ;;  %v5297_v19 = vpop.eup %5296 }
0x37a8   :  { %v4303_v21 = vmul.f32 %v5297_v19, %v4301_v18  ;;  %vm4308_vm14 = vweird.f32 %v5297_v19  ;;  %v4420_v44 = vsub.f32 1.0, %v4406_v13  ;;  %v4426_v49 = vmul.f32 %v4406_v13, %v7267_v52 }
0x37a9   :  { %vm4309_vm1 = vmor %vm4307_vm15, %vm4308_vm14 }
0x37aa   :  { %v4304_v33 = vsub.f32 1.0, %v4303_v21  ;;  %v4541_v21 = vpop.f32.mrf.mxu2 }
0x37ac   :  { %v4305_v22 = vmul.f32 %v5297_v19, %v4304_v33 }
0x37ae   :  { %v4306_v38 = vadd.f32 %v5297_v19, %v4305_v22 }
0x37b0   :  { %v4310_v51 = vsel %vm4309_vm1, %v5297_v19, %v4306_v38 }
0x37b1   :  { %v4315_v43 = vsel %vm4312_vm2, %v4314_v40, %v4310_v51 }
0x37b2   :  { %v4329_v20 = vsub.f32 1.0, %v4315_v43  ;;  %v4335_v28 = vmul.f32 %v4315_v43, %v7272_v53  ;;  %v4621_v33 = vpop.f32.mrf.mxu2 }
0x37cd   :  { %v4411_v41 = vpop.permute.xlu0 %4410 }
0x37ce   :  { %v4413_v47 = vmul.f32 %v4411_v41, %v4406_v13 }
0x37d0   :  { %4415 = vrot.lane.b32.xlu2 %v4413_v47, %s5947_s29  ;;  %v4561_v47 = vpop.f32.mrf.mxu3 }
0x3806   :  { %v4320_v63 = vpop.permute.xlu1 %4319 }
0x3807   :  { %v4322_v54 = vmul.f32 %v4320_v63, %v4315_v43  ;;  %v4728_v43 = vld [vmem:[#allocation36] sm:$0x1] }
0x3809   :  { %4324 = vrot.lane.b32.xlu0 %v4322_v54, %s5947_s29 }
0x382a   :  { %v4416_v46 = vpop.permute.xlu2 %4415 }
0x382b   :  { %v4418_v3 = vadd.f32 %v4416_v46, %v4361_v60 }
0x382d   :  { %5298 = vtanh.f32 %v4418_v3 }
0x3833   :  { %v5299_v17 = vpop.eup %5298 }
0x3834   :  { %4422 = vrot.lane.b32.xlu1 %v5299_v17, %s5948_s28 }
0x387b   :  { %v4325_v55 = vpop.permute.xlu0 %4324 }
0x387c   :  { %v4327_v23 = vadd.f32 %v4325_v55, %v3232_v8  ;;  %v4641_v8 = vpop.f32.mrf.mxu3 }
0x387e   :  { %5300 = vtanh.f32 %v4327_v23 }
0x3884   :  { %v5301_v25 = vpop.eup %5300 }
0x3885   :  { %4331 = vrot.lane.b32.xlu2 %v5301_v25, %s5948_s28 }
0x38a6   :  { %v4423_v39 = vpop.permute.xlu1 %4422 }
0x38a7   :  { %v4425_v27 = vmul.f32 %v4423_v39, %v4420_v44 }
0x38a9   :  { %v7337_v30 = vadd.f32 %v4426_v49, %v4425_v27 }
0x38ab   :  { %4456 = vrot.lane.b32.xlu0 %v7337_v30, %s5948_s28 }
0x38df   :  { %v4332_v50 = vpop.permute.xlu2 %4331 }
0x38e0   :  { %v4334_v7 = vmul.f32 %v4332_v50, %v4329_v20 }
0x38e2   :  { %v4336_v2 = vadd.f32 %v4335_v28, %v4334_v7 }
0x38e4   :  { %4429 = vst [vmem:[#allocation1] ss:$4 sm:$0xff] %v4336_v2 }
0x38eb   :  { %v4430_v59 = vld.sshfl [vmem:[#allocation1] sm:$0xff pattern:$0x73625140] }
0x38ec   :  { %4431 = vrot.lane.b32.xlu1 %v4430_v59, %s5948_s28 }
0x391d   :  { %v4457_v26 = vpop.permute.xlu0 %4456 }
0x391e   :  { %4924 = vmatmul.msk.f32.vlgmr.msrb.gmra.mxu1 %vm646_vm9, %v4457_v26 }
0x391f   :  { %4681 = vmatpush.msrb.mxu1 %v7279_v42 }
0x3921   :  { %4682 = vmatpush.msrb.mxu1 %v7282_v1 }
0x3923   :  { %4683 = vmatpush.msrb.mxu1 %v7287_v61 }
0x3925   :  { %4684 = vmatpush.msrb.mxu1 %v7293_v48 }
0x3926   :  { %4929 = vmatmul.msk.f32.vlgmr.msra.gmra.mxu1 %vm646_vm9, %v7210_v57 }
0x395e   :  { %v4432_v52 = vpop.permute.xlu1 %4431 }
0x395f   :  { %4923 = vmatmul.msk.f32.vlgmr.msrb.gmra.mxu0 %vm646_vm9, %v4432_v52 }
0x3960   :  { %4656 = vmatpush.msrb.mxu0 %v7279_v42 }
0x3962   :  { %4657 = vmatpush.msrb.mxu0 %v7282_v1 }
0x3964   :  { %4658 = vmatpush.msrb.mxu0 %v7287_v61 }
0x3966   :  { %4659 = vmatpush.msrb.mxu0 %v7293_v48 }
0x3967   :  { %4928 = vmatmul.msk.f32.vlgmr.msra.gmra.mxu0 %vm646_vm9, %v7165_v34 }
0x396f   :  { %4932 = vmatmul.msk.f32.vlgmr.msrb.gmra.mxu0 %vm646_vm9, %v4457_v26 }
0x399b   :  { %v4477_v53 = vpop.f32.mrf.mxu1 }
0x399c   :  { %v4500_v58 = vadd.f32 %v4477_v53, %v7060_v12 }
0x399e   :  { %4502 = vrot.lane.b32.xlu2 %v4500_v58, %s5947_s29 }
0x39a3   :  { %v4601_v35 = vpop.f32.mrf.mxu1 }
0x39dc   :  { %v4452_v57 = vpop.f32.mrf.mxu0 }
0x39dd   :  { %v4453_v32 = vadd.f32 %v7328_v62, %v4452_v57 }
0x39df   :  { %v4480_v42 = vadd.f32 %v4477_v53, %v4453_v32 }
0x39e1   :  { %v4925_v60 = vmul.f32 -1.442695, %v4480_v42 }
0x39e3   :  { %5302 = vpow2.f32 %v4925_v60 }
0x39e4   :  { %v4581_v31 = vpop.f32.mrf.mxu0 }
0x39e9   :  { %v5303_v1 = vpop.eup %5302 }
0x39ea   :  { %v4484_v61 = vadd.f32 1.0, %v5303_v1 }
0x39ec   :  { %5304 = vrcp.f32 %v4484_v61  ;;  %v4496_v34 = vand.u32 2147483648, %v4484_v61  ;;  %v4494_v56 = vand.u32 2147483647, %v4484_v61  ;;  %vm4490_vm4 = vweird.f32 %v4484_v61  ;;  %v4661_v45 = vpop.f32.mrf.mxu0 }
0x39ee   :  { %v4497_v12 = vor.u32 1.1754944e-38, %v4496_v34  ;;  %vm4495_vm6 = vcmp.eq.f32.partialorder %v4494_v56, 8.507059e+37 }
0x39f2   :  { %v5305_v48 = vpop.eup %5304 }
0x39f3   :  { %v4486_v5 = vmul.f32 %v5305_v48, %v4484_v61  ;;  %vm4491_vm3 = vweird.f32 %v5305_v48 }
0x39f4   :  { %vm4492_vm5 = vmor %vm4490_vm4, %vm4491_vm3 }
0x39f5   :  { %v4487_v10 = vsub.f32 1.0, %v4486_v5 }
0x39f7   :  { %v4488_v36 = vmul.f32 %v5305_v48, %v4487_v10 }
0x39f8   :  { %v4503_v15 = vpop.permute.xlu2 %4502 }
0x39f9   :  { %v4489_v11 = vadd.f32 %v5305_v48, %v4488_v36 }
0x39fb   :  { %v4493_v29 = vsel %vm4492_vm5, %v5305_v48, %v4489_v11 }
0x39fc   :  { %v4498_v62 = vsel %vm4495_vm6, %v4497_v12, %v4493_v29 }
0x39fd   :  { %v4505_v0 = vmul.f32 %v4503_v15, %v4498_v62  ;;  %v4512_v37 = vsub.f32 1.0, %v4498_v62  ;;  %v4518_v16 = vmul.f32 %v4498_v62, %v7337_v30 }
0x39ff   :  { %4507 = vrot.lane.b32.xlu0 %v4505_v0, %s5947_s29 }
0x3a07   :  { %4731 = vrot.lane.b32.xlu0 %v5019_v6, %s5949_s8 }
0x3a0f   :  { %4737 = vrot.lane.b32.xlu0 %v5019_v6, %s5950_s13 }
0x3a17   :  { %4698 = vrot.lane.b32.xlu0 %v4601_v35, %s5950_s13 }
0x3a1f   :  { %4746 = vrot.lane.b32.xlu0 %v5019_v6, %s5948_s28 }
0x3a27   :  { %4710 = vrot.lane.b32.xlu0 %v4661_v45, %s5948_s28 }
0x3a71   :  { %v4508_v24 = vpop.permute.xlu0 %4507 }
0x3a72   :  { %v4510_v41 = vadd.f32 %v4508_v24, %v4453_v32 }
0x3a74   :  { %5306 = vtanh.f32 %v4510_v41 }
0x3a79   :  { %v4732_v9 = vpop.permute.xlu0 %4731 }
0x3a7a   :  { %v5307_v13 = vpop.eup %5306  ;;  %v4752_v46 = vsel %vm526_vm0, %v4728_v43, %v4732_v9 }
0x3a7b   :  { %4514 = vrot.lane.b32.xlu1 %v5307_v13, %s5948_s28 }
0x3a81   :  { %v4738_v40 = vpop.permute.xlu0 %4737 }
0x3a83   :  { %4734 = vrot.lane.b32.xlu1 %v5019_v6, %s5951_s6 }
0x3a89   :  { %v4699_v3 = vpop.permute.xlu0 %4698 }
0x3a8b   :  { %4694 = vrot.lane.b32.xlu1 %v4581_v31, %s5951_s6 }
0x3a91   :  { %v4747_v49 = vpop.permute.xlu0 %4746 }
0x3a93   :  { %4743 = vrot.lane.b32.xlu1 %v5019_v6, %s5952_s22 }
0x3a99   :  { %v4711_v52 = vpop.permute.xlu0 %4710 }
0x3a9b   :  { %4706 = vrot.lane.b32.xlu1 %v4641_v8, %s5952_s22 }
0x3aed   :  { %v4515_v4 = vpop.permute.xlu1 %4514 }
0x3aee   :  { %v4517_v18 = vmul.f32 %v4515_v4, %v4512_v37 }
0x3af0   :  { %v4519_v19 = vadd.f32 %v4518_v16, %v4517_v18 }
0x3af2   :  { %4665 = vrot.lane.b32.xlu2 %v4519_v19, %s5948_s28 }
0x3af5   :  { %v4735_v14 = vpop.permute.xlu1 %4734 }
0x3af6   :  { %v4753_v17 = vsel %vm646_vm9, %v4752_v46, %v4735_v14 }
0x3af7   :  { %v4754_v23 = vsel %vm4719_vm7, %v4753_v17, %v4738_v40 }
0x3afa   :  { %4690 = vrot.lane.b32.xlu2 %v4561_v47, %s5949_s8 }
0x3afd   :  { %v4695_v63 = vpop.permute.xlu1 %4694 }
0x3b02   :  { %4740 = vrot.lane.b32.xlu2 %v5019_v6, %s5947_s29 }
0x3b05   :  { %v4744_v55 = vpop.permute.xlu1 %4743 }
0x3b0a   :  { %4702 = vrot.lane.b32.xlu2 %v4621_v33, %s5947_s29 }
0x3b0d   :  { %v4707_v20 = vpop.permute.xlu1 %4706 }
0x3b12   :  { %4749 = vrot.lane.b32.xlu2 %v5019_v6, %s5953_s12 }
0x3b4c   :  { %v4666_v22 = vpop.permute.xlu2 %4665 }
0x3b4d   :  { %4933 = vmatmul.msk.f32.vlgmr.msrb.gmra.mxu1 %vm646_vm9, %v4666_v22 }
0x3b54   :  { %v4691_v51 = vpop.permute.xlu2 %4690 }
0x3b55   :  { %v4717_v44 = vsel %vm526_vm0, %v4541_v21, %v4691_v51 }
0x3b56   :  { %v4718_v27 = vsel %vm646_vm9, %v4717_v44, %v4695_v63 }
0x3b57   :  { %v4720_v50 = vsel %vm4719_vm7, %v4718_v27, %v4699_v3 }
0x3b5c   :  { %v4741_v54 = vpop.permute.xlu2 %4740 }
0x3b5d   :  { %v4755_v39 = vsel %vm1801_vm10, %v4754_v23, %v4741_v54 }
0x3b5e   :  { %v4756_v30 = vsel %vm4722_vm8, %v4755_v39, %v4744_v55 }
0x3b5f   :  { %v4757_v2 = vsel %vm4724_vm11, %v4756_v30, %v4747_v49 }
0x3b64   :  { %v4703_v25 = vpop.permute.xlu2 %4702 }
0x3b65   :  { %v4721_v28 = vsel %vm1801_vm10, %v4720_v50, %v4703_v25 }
0x3b66   :  { %v4723_v59 = vsel %vm4722_vm8, %v4721_v28, %v4707_v20 }
0x3b67   :  { %v4725_v57 = vsel %vm4724_vm11, %v4723_v59, %v4711_v52 }
0x3b6c   :  { %v4750_v7 = vpop.permute.xlu2 %4749 }
0x3b6d   :  { %v4758_v26 = vsel %vm4726_vm12, %v4757_v2, %v4750_v7 }
0x3b6e   :  { %v4759_v53 = vperm.slane %v4758_v26, 0 }
0x3bca   :  { %v4686_v38 = vpop.f32.mrf.mxu1 }
0x3bcb   :  { %4714 = vrot.lane.b32.xlu1 %v4686_v38, %s5953_s12 }
0x3c3d   :  { %v4715_v58 = vpop.permute.xlu1 %4714 }
0x3c3e   :  { %v4727_v32 = vsel %vm4726_vm12, %v4725_v57, %v4715_v58 }
0x3c3f   :  { %v4760_v42 = vadd.f32 %v4759_v53, %v4727_v32 }
0x3c41   :  { %4761 = vst [vmem:[%s6142_s5] sm:$0x3] %v4760_v42 }
0x3c42   :  { %4766 = vsyncpa [#allocation3], 1 }
0x3c43   :  { %4767 = vsyncpa [#allocation5], 1 }
0x3c44   :  { %4768 = vsyncpa [#allocation8], 1 }
0x3c45   :  { %4769 = vsyncpa [#allocation11], 1 }
0x3c46   :  { %4770 = vsyncpa [#allocation14], 1 }
0x3c47   :  { %4771 = vsyncpa [#allocation17], 1 }
0x3c48   :  { %4772 = vsyncpa [#allocation20], 1 }
0x3c49   :  { %4773 = vsyncpa [#allocation23], 1 }
0x3c4a   :  { %4774 = vsyncpa [#allocation26], 1 }
0x3c4b   :  { %4775 = vsyncpa [#allocation29], 1 }
0x3c4c   :  { %4776 = vsyncpa [#allocation32], 1 }
0x3c4d   :  { %4777 = vsyncpa [#allocation35], 1 }

</bundles_post_ra>
